<compile_context>
chip_gen: v6e
topology: v6e:2x2x1
jax: 0.10.0
libtpu: 0.0.40
codegen_flags: <defaults>
</compile_context>

<pallas_src>
import functools

import jax
import jax.numpy as jnp
from jax.experimental import pallas as pl
from jax.experimental.pallas import tpu as pltpu

VMEM_SPEC = pl.BlockSpec(memory_space=pltpu.MemorySpace.VMEM)


# ----------------------------- Pallas kernels ------------------------------ #

def _feature_kernel(xa_ref, xb_ref, xc_ref, pmat_ref,
                    w1_ref, w2_ref, w3_ref,
                    g1_ref, be1_ref, g2_ref, be2_ref, g3_ref, be3_ref,
                    feat_ref, *, n, eps, chunk=512):
    """Fused conv1/bn1/relu -> conv2/bn2/relu -> conv3/bn3/relu -> avg_pool.

    All tensors are channel-major: x* are (3, M) with pixels on lanes, weights are
    (Cout, Cin), bn params are (C, 1) columns.  Output feat is (128, n).
    """
    w1, w2, w3 = w1_ref[...], w2_ref[...], w3_ref[...]
    g1, be1 = g1_ref[...], be1_ref[...]
    g2, be2 = g2_ref[...], be2_ref[...]
    g3, be3 = g3_ref[...], be3_ref[...]

    def finalize(s, sq, m):
        mean = s * (1.0 / m)
        var = sq * (1.0 / m) - mean * mean        # one-pass biased variance
        return mean, jax.lax.rsqrt(var + eps)

    def bn_relu(y, mean, inv, g, b):
        return jnp.maximum((y - mean) * (inv * g) + b, 0.0)

    def chunked_stats(src_ref, cout, fn):
        """Sum / sum-of-squares of fn(src chunk) over lane chunks (keeps vreg use small)."""
        m = src_ref.shape[1]
        s = jnp.zeros((cout, 1), jnp.float32)
        sq = jnp.zeros((cout, 1), jnp.float32)
        for c0 in range(0, m, chunk):
            c1 = min(c0 + chunk, m)
            y = fn(src_ref[:, c0:c1])
            s = s + jnp.sum(y, axis=1, keepdims=True)
            sq = sq + jnp.sum(y * y, axis=1, keepdims=True)
        return finalize(s, sq, m)

    # ---- stage 1: BN1 stats over the full 56x56 grid (stride-4 view). ----
    mean1, inv1 = chunked_stats(
        xa_ref, w1.shape[0],
        lambda xk: jnp.dot(w1, xk, preferred_element_type=jnp.float32))

    # ---- stage 2: BN2 stats over the 28x28 grid (stride-8 view). ----
    def stage2_chunk(xk):
        a1 = bn_relu(jnp.dot(w1, xk, preferred_element_type=jnp.float32),
                     mean1, inv1, g1, be1)
        return jnp.dot(w2, a1, preferred_element_type=jnp.float32)

    mean2, inv2 = chunked_stats(xb_ref, w2.shape[0], stage2_chunk)

    # ---- carried path: 14x14 grid (stride-16 view) through all three stages. ----
    xc = xc_ref[...]
    a1c = bn_relu(jnp.dot(w1, xc, preferred_element_type=jnp.float32),
                  mean1, inv1, g1, be1)                          # (32, n*196)
    a2c = bn_relu(jnp.dot(w2, a1c, preferred_element_type=jnp.float32),
                  mean2, inv2, g2, be2)                          # (64, n*196)
    y3 = jnp.dot(w3, a2c, preferred_element_type=jnp.float32)    # (128, n*196)
    mc = y3.shape[1]
    mean3, inv3 = finalize(jnp.sum(y3, axis=1, keepdims=True),
                           jnp.sum(y3 * y3, axis=1, keepdims=True), mc)
    a3 = bn_relu(y3, mean3, inv3, g3, be3)

    # ---- avg_pool2d(14) == per-example spatial mean, done as a lane-dense matmul. ----
    feat_ref[...] = jnp.dot(a3, pmat_ref[...],
                            preferred_element_type=jnp.float32).astype(feat_ref.dtype)


def _head_kernel(z1_ref, f_ref, a1_ref, a2_ref, b1_ref, w2_ref, b2_ref,
                 out_ref, p_acc, *, bs):
    """Pairwise classifier head, fc_c1 contraction tiled over the grid.

    out[i] = sum_j fc_c2(relu(fc_c1(cat(z1_i, f_j))))
           = sum_j fc_c2(relu(z1_i @ A1 + f_j @ A2 + b1))
    """
    k = pl.program_id(0)

    @pl.when(k == 0)
    def _():
        p_acc[...] = jnp.zeros_like(p_acc)

    # Accumulate z1 @ A1 over the streamed hidden-dim contraction.
    p_acc[...] += jnp.dot(z1_ref[...], a1_ref[...],
                          preferred_element_type=jnp.float32)

    @pl.when(k == pl.num_programs(0) - 1)
    def _():
        p = p_acc[...] + b1_ref[...]                               # (bs, 1024)
        q = jnp.dot(f_ref[...], a2_ref[...],
                    preferred_element_type=jnp.float32)            # (bs, 1024)
        # hh row (i*bs + j) == relu(p_i + q_j)
        hh = jnp.concatenate([p[i:i + 1, :] + q for i in range(bs)], axis=0)
        hh = jnp.maximum(hh, 0.0)                                  # (bs*bs, 1024)
        o = jnp.dot(hh, w2_ref[...],
                    preferred_element_type=jnp.float32) + b2_ref[...]
        # sum over j (second pair index)
        rows = [jnp.sum(o[i * bs:(i + 1) * bs, :], axis=0, keepdims=True)
                for i in range(bs)]
        out_ref[...] = jnp.concatenate(rows, axis=0).astype(out_ref.dtype)


# ------------------------------ Wrappers ----------------------------------- #

def _channels_major_subsample(z2_nchw, stride):
    """Strided 1x1-conv input view, channel-major: (N,C,H,W) -> (C, N*(H/s)*(W/s))."""
    xs = z2_nchw[:, :, ::stride, ::stride]
    c = xs.shape[1]
    return jnp.transpose(xs, (1, 0, 2, 3)).reshape(c, -1)


def fdc6_forward(params, z1, z2, eps=1e-5):
    n = z2.shape[0]
    hidden = z1.shape[1]

    # Layout plumbing: three strided channel-major views of the input.
    xa = _channels_major_subsample(z2, 4)     # 56x56 grid  -> stage-1 BN stats
    xb = _channels_major_subsample(z2, 8)     # 28x28 grid  -> stage-2 BN stats
    xc = _channels_major_subsample(z2, 16)    # 14x14 grid  -> carried values

    hw = xc.shape[1] // n                     # pixels per example on the 14x14 grid
    pmat = jnp.repeat(jnp.eye(n, dtype=jnp.float32), hw, axis=0) / float(hw)

    w1 = params["conv1_w"].reshape(params["conv1_w"].shape[0], -1)   # (32, 3)
    w2 = params["conv2_w"].reshape(params["conv2_w"].shape[0], -1)   # (64, 32)
    w3 = params["conv3_w"].reshape(params["conv3_w"].shape[0], -1)   # (128, 64)
    col = lambda v: v.reshape(-1, 1)

    feat_cn = pl.pallas_call(
        functools.partial(_feature_kernel, n=n, eps=eps),
        out_shape=jax.ShapeDtypeStruct((w3.shape[0], n), jnp.float32),
        in_specs=[VMEM_SPEC] * 13,
        out_specs=VMEM_SPEC,
    )(xa, xb, xc, pmat, w1, w2, w3,
      col(params["bn1_gamma"]), col(params["bn1_beta"]),
      col(params["bn2_gamma"]), col(params["bn2_beta"]),
      col(params["bn3_gamma"]), col(params["bn3_beta"]))
    feat = feat_cn.T                                                 # (N, 128)

    # fc_c1 split: cat(z1_i, f_j) @ W.T == z1_i @ A1 + f_j @ A2
    a1 = params["fc_c1_w"][:, :hidden].T                             # (hidden, 1024)
    a2 = params["fc_c1_w"][:, hidden:].T                             # (128, 1024)
    fb1 = params["fc_c1_b"].reshape(1, -1)                           # (1, 1024)
    w2t = params["fc_c2_w"].T                                        # (1024, cat_num)
    fb2 = params["fc_c2_b"].reshape(1, -1)                           # (1, cat_num)
    h1 = a1.shape[1]
    cat = w2t.shape[1]
    fdim = a2.shape[0]

    tk = 256 if hidden % 256 == 0 else hidden
    grid = (hidden // tk,)

    out = pl.pallas_call(
        functools.partial(_head_kernel, bs=n),
        out_shape=jax.ShapeDtypeStruct((n, cat), jnp.float32),
        grid=grid,
        in_specs=[
            pl.BlockSpec((n, tk), lambda k: (0, k)),     # z1 (streamed over K)
            pl.BlockSpec((n, fdim), lambda k: (0, 0)),   # pooled features
            pl.BlockSpec((tk, h1), lambda k: (k, 0)),    # A1 (streamed over K)
            pl.BlockSpec((fdim, h1), lambda k: (0, 0)),  # A2
            pl.BlockSpec((1, h1), lambda k: (0, 0)),     # fc_c1 bias
            pl.BlockSpec((h1, cat), lambda k: (0, 0)),   # fc_c2 weight (transposed)
            pl.BlockSpec((1, cat), lambda k: (0, 0)),    # fc_c2 bias
        ],
        out_specs=pl.BlockSpec((n, cat), lambda k: (0, 0)),
        scratch_shapes=[pltpu.VMEM((n, h1), jnp.float32)],
        compiler_params=pltpu.CompilerParams(dimension_semantics=("arbitrary",)),
    )(z1, feat, a1, a2, fb1, w2t, fb2)
    return out


# ------------------------------ Parameters --------------------------------- #

def init_params(key, hidden_dim=2048, cat_num=65):
    """Deterministic init matching the PyTorch module's shapes / default scales."""
    ks = jax.random.split(key, 7)

    def u(k, shape, fan_in):
        b = 1.0 / (fan_in ** 0.5)
        return jax.random.uniform(k, shape, jnp.float32, -b, b)

    return {
        "conv1_w": u(ks[0], (32, 3, 1, 1), 3),          # Conv2d(3, 32, 1, stride=4, bias=False)
        "conv2_w": u(ks[1], (64, 32, 1, 1), 32),        # Conv2d(32, 64, 1, stride=2, bias=False)
        "conv3_w": u(ks[2], (128, 64, 1, 1), 64),       # Conv2d(64, 128, 1, stride=2, bias=False)
        "bn1_gamma": jnp.ones((32,), jnp.float32),  "bn1_beta": jnp.zeros((32,), jnp.float32),
        "bn2_gamma": jnp.ones((64,), jnp.float32),  "bn2_beta": jnp.zeros((64,), jnp.float32),
        "bn3_gamma": jnp.ones((128,), jnp.float32), "bn3_beta": jnp.zeros((128,), jnp.float32),
        "fc_c1_w": u(ks[3], (1024, hidden_dim + 128), hidden_dim + 128),
        "fc_c1_b": u(ks[4], (1024,), hidden_dim + 128),
        "fc_c2_w": u(ks[5], (cat_num, 1024), 1024),
        "fc_c2_b": u(ks[6], (cat_num,), 1024),
    }


# --------------------------- Pure-JAX reference ----------------------------- #

def _reference_forward(params, z1, z2, eps=1e-5):
    hp = jax.lax.Precision.HIGHEST

    def conv1x1(x, w, stride):
        xs = x[:, :, ::stride, ::stride]
        return jnp.einsum("oc,nchw->nohw", w, xs, precision=hp)

    def bn_relu(x, g, b):
        mean = jnp.mean(x, axis=(0, 2, 3), keepdims=True)
        var = jnp.mean((x - mean) ** 2, axis=(0, 2, 3), keepdims=True)
        xn = (x - mean) / jnp.sqrt(var + eps)
        return jnp.maximum(xn * g.reshape(1, -1, 1, 1) + b.reshape(1, -1, 1, 1), 0.0)

    x = bn_relu(conv1x1(z2, params["conv1_w"].reshape(32, 3), 4),
                params["bn1_gamma"], params["bn1_beta"])
    x = bn_relu(conv1x1(x, params["conv2_w"].reshape(64, 32), 2),
                params["bn2_gamma"], params["bn2_beta"])
    x = bn_relu(conv1x1(x, params["conv3_w"].reshape(128, 64), 2),
                params["bn3_gamma"], params["bn3_beta"])
    f = jnp.mean(x, axis=(2, 3))                                   # avg_pool2d(14)

    bs = z1.shape[0]
    z1r = jnp.repeat(z1[:, None, :], bs, axis=1)
    z2r = jnp.repeat(f[None, :, :], bs, axis=0)
    hh = jnp.concatenate([z1r, z2r], axis=2).reshape(bs * bs, -1)
    hh = jnp.maximum(jnp.dot(hh, params["fc_c1_w"].T, precision=hp) + params["fc_c1_b"], 0.0)
    out = jnp.dot(hh, params["fc_c2_w"].T, precision=hp) + params["fc_c2_b"]
    return jnp.sum(out.reshape(bs, bs, -1), axis=1)


# --------------------------------- Main ------------------------------------ #

if __name__ == "__main__":
    key = jax.random.PRNGKey(0)
    pkey, k1, k2 = jax.random.split(key, 3)

    HIDDEN, CAT, BS = 2048, 65, 2
    params = init_params(pkey, HIDDEN, CAT)

    # Shapes implied by the module: avg_pool2d(14) after total stride 16 -> 224x224 input.
    z1 = jax.random.normal(k1, (BS, HIDDEN), jnp.float32)
    z2 = jax.random.normal(k2, (BS, 3, 224, 224), jnp.float32)

    out = jax.jit(fdc6_forward)(params, z1, z2)
    jax.block_until_ready(out)

    assert out.shape == (BS, CAT)
    assert bool(jnp.all(jnp.isfinite(out)))

    ref = _reference_forward(params, z1, z2)
    rel_err = float(jnp.max(jnp.abs(out - ref)) / (jnp.max(jnp.abs(ref)) + 1e-6))
    assert rel_err < 5e-2, f"mismatch vs pure-JAX reference: rel_err={rel_err:.4f}"

    print("KERNEL_OK")
</pallas_src>

<mosaic_0001>
module attributes {stable_mosaic.version = 11 : i64} {
  func.func @_feature_kernel(%arg0: memref<3x6272xf32, #tpu.memory_space<vmem>>, %arg1: memref<3x1568xf32, #tpu.memory_space<vmem>>, %arg2: memref<3x392xf32, #tpu.memory_space<vmem>>, %arg3: memref<392x2xf32, #tpu.memory_space<vmem>>, %arg4: memref<32x3xf32, #tpu.memory_space<vmem>>, %arg5: memref<64x32xf32, #tpu.memory_space<vmem>>, %arg6: memref<128x64xf32, #tpu.memory_space<vmem>>, %arg7: memref<32x1xf32, #tpu.memory_space<vmem>>, %arg8: memref<32x1xf32, #tpu.memory_space<vmem>>, %arg9: memref<64x1xf32, #tpu.memory_space<vmem>>, %arg10: memref<64x1xf32, #tpu.memory_space<vmem>>, %arg11: memref<128x1xf32, #tpu.memory_space<vmem>>, %arg12: memref<128x1xf32, #tpu.memory_space<vmem>>, %arg13: memref<128x2xf32, #tpu.memory_space<vmem>>) attributes {dimension_semantics = [], scalar_prefetch = 0 : i64, scratch_operands = 0 : i64, tpu.core_type = #tpu.core_type<tc>} {
    %c0 = arith.constant 0 : index
    %c0_0 = arith.constant 0 : index
    %0 = vector.load %arg4[%c0, %c0_0] : memref<32x3xf32, #tpu.memory_space<vmem>>, vector<32x3xf32>
    %c0_1 = arith.constant 0 : index
    %c0_2 = arith.constant 0 : index
    %1 = vector.load %arg5[%c0_1, %c0_2] : memref<64x32xf32, #tpu.memory_space<vmem>>, vector<64x32xf32>
    %c0_3 = arith.constant 0 : index
    %c0_4 = arith.constant 0 : index
    %2 = vector.load %arg6[%c0_3, %c0_4] : memref<128x64xf32, #tpu.memory_space<vmem>>, vector<128x64xf32>
    %c0_5 = arith.constant 0 : index
    %c0_6 = arith.constant 0 : index
    %3 = vector.load %arg7[%c0_5, %c0_6] : memref<32x1xf32, #tpu.memory_space<vmem>>, vector<32x1xf32>
    %c0_7 = arith.constant 0 : index
    %c0_8 = arith.constant 0 : index
    %4 = vector.load %arg8[%c0_7, %c0_8] : memref<32x1xf32, #tpu.memory_space<vmem>>, vector<32x1xf32>
    %c0_9 = arith.constant 0 : index
    %c0_10 = arith.constant 0 : index
    %5 = vector.load %arg9[%c0_9, %c0_10] : memref<64x1xf32, #tpu.memory_space<vmem>>, vector<64x1xf32>
    %c0_11 = arith.constant 0 : index
    %c0_12 = arith.constant 0 : index
    %6 = vector.load %arg10[%c0_11, %c0_12] : memref<64x1xf32, #tpu.memory_space<vmem>>, vector<64x1xf32>
    %c0_13 = arith.constant 0 : index
    %c0_14 = arith.constant 0 : index
    %7 = vector.load %arg11[%c0_13, %c0_14] : memref<128x1xf32, #tpu.memory_space<vmem>>, vector<128x1xf32>
    %c0_15 = arith.constant 0 : index
    %c0_16 = arith.constant 0 : index
    %8 = vector.load %arg12[%c0_15, %c0_16] : memref<128x1xf32, #tpu.memory_space<vmem>>, vector<128x1xf32>
    %cst = arith.constant 0.000000e+00 : f32
    %9 = vector.broadcast %cst : f32 to vector<32x1xf32>
    %cst_17 = arith.constant 0.000000e+00 : f32
    %10 = vector.broadcast %cst_17 : f32 to vector<32x1xf32>
    %c0_18 = arith.constant 0 : index
    %c0_19 = arith.constant 0 : index
    %11 = vector.load %arg0[%c0_18, %c0_19] : memref<3x6272xf32, #tpu.memory_space<vmem>>, vector<3x512xf32>
    %cst_20 = arith.constant dense<0.000000e+00> : vector<32x512xf32>
    %12 = tpu.matmul %0, %11, %cst_20 {dimension_numbers = #tpu.dot_dimension_numbers<[1], [0], [0], [1], [0, 0, 1, 1], [], []>} : vector<32x3xf32>, vector<3x512xf32>, vector<32x512xf32> -> vector<32x512xf32>
    %cst_21 = arith.constant dense<0.000000e+00> : vector<32xf32>
    %13 = vector.multi_reduction <add>, %12, %cst_21 [1] : vector<32x512xf32> to vector<32xf32>
    %14 = vector.shape_cast %13 : vector<32xf32> to vector<32x1xf32>
    %15 = arith.addf %9, %14 : vector<32x1xf32>
    %16 = arith.mulf %12, %12 : vector<32x512xf32>
    %cst_22 = arith.constant dense<0.000000e+00> : vector<32xf32>
    %17 = vector.multi_reduction <add>, %16, %cst_22 [1] : vector<32x512xf32> to vector<32xf32>
    %18 = vector.shape_cast %17 : vector<32xf32> to vector<32x1xf32>
    %19 = arith.addf %10, %18 : vector<32x1xf32>
    %c0_23 = arith.constant 0 : index
    %c512 = arith.constant 512 : index
    %20 = vector.load %arg0[%c0_23, %c512] : memref<3x6272xf32, #tpu.memory_space<vmem>>, vector<3x512xf32>
    %cst_24 = arith.constant dense<0.000000e+00> : vector<32x512xf32>
    %21 = tpu.matmul %0, %20, %cst_24 {dimension_numbers = #tpu.dot_dimension_numbers<[1], [0], [0], [1], [0, 0, 1, 1], [], []>} : vector<32x3xf32>, vector<3x512xf32>, vector<32x512xf32> -> vector<32x512xf32>
    %cst_25 = arith.constant dense<0.000000e+00> : vector<32xf32>
    %22 = vector.multi_reduction <add>, %21, %cst_25 [1] : vector<32x512xf32> to vector<32xf32>
    %23 = vector.shape_cast %22 : vector<32xf32> to vector<32x1xf32>
    %24 = arith.addf %15, %23 : vector<32x1xf32>
    %25 = arith.mulf %21, %21 : vector<32x512xf32>
    %cst_26 = arith.constant dense<0.000000e+00> : vector<32xf32>
    %26 = vector.multi_reduction <add>, %25, %cst_26 [1] : vector<32x512xf32> to vector<32xf32>
    %27 = vector.shape_cast %26 : vector<32xf32> to vector<32x1xf32>
    %28 = arith.addf %19, %27 : vector<32x1xf32>
    %c0_27 = arith.constant 0 : index
    %c1024 = arith.constant 1024 : index
    %29 = vector.load %arg0[%c0_27, %c1024] : memref<3x6272xf32, #tpu.memory_space<vmem>>, vector<3x512xf32>
    %cst_28 = arith.constant dense<0.000000e+00> : vector<32x512xf32>
    %30 = tpu.matmul %0, %29, %cst_28 {dimension_numbers = #tpu.dot_dimension_numbers<[1], [0], [0], [1], [0, 0, 1, 1], [], []>} : vector<32x3xf32>, vector<3x512xf32>, vector<32x512xf32> -> vector<32x512xf32>
    %cst_29 = arith.constant dense<0.000000e+00> : vector<32xf32>
    %31 = vector.multi_reduction <add>, %30, %cst_29 [1] : vector<32x512xf32> to vector<32xf32>
    %32 = vector.shape_cast %31 : vector<32xf32> to vector<32x1xf32>
    %33 = arith.addf %24, %32 : vector<32x1xf32>
    %34 = arith.mulf %30, %30 : vector<32x512xf32>
    %cst_30 = arith.constant dense<0.000000e+00> : vector<32xf32>
    %35 = vector.multi_reduction <add>, %34, %cst_30 [1] : vector<32x512xf32> to vector<32xf32>
    %36 = vector.shape_cast %35 : vector<32xf32> to vector<32x1xf32>
    %37 = arith.addf %28, %36 : vector<32x1xf32>
    %c0_31 = arith.constant 0 : index
    %c1536 = arith.constant 1536 : index
    %38 = vector.load %arg0[%c0_31, %c1536] : memref<3x6272xf32, #tpu.memory_space<vmem>>, vector<3x512xf32>
    %cst_32 = arith.constant dense<0.000000e+00> : vector<32x512xf32>
    %39 = tpu.matmul %0, %38, %cst_32 {dimension_numbers = #tpu.dot_dimension_numbers<[1], [0], [0], [1], [0, 0, 1, 1], [], []>} : vector<32x3xf32>, vector<3x512xf32>, vector<32x512xf32> -> vector<32x512xf32>
    %cst_33 = arith.constant dense<0.000000e+00> : vector<32xf32>
    %40 = vector.multi_reduction <add>, %39, %cst_33 [1] : vector<32x512xf32> to vector<32xf32>
    %41 = vector.shape_cast %40 : vector<32xf32> to vector<32x1xf32>
    %42 = arith.addf %33, %41 : vector<32x1xf32>
    %43 = arith.mulf %39, %39 : vector<32x512xf32>
    %cst_34 = arith.constant dense<0.000000e+00> : vector<32xf32>
    %44 = vector.multi_reduction <add>, %43, %cst_34 [1] : vector<32x512xf32> to vector<32xf32>
    %45 = vector.shape_cast %44 : vector<32xf32> to vector<32x1xf32>
    %46 = arith.addf %37, %45 : vector<32x1xf32>
    %c0_35 = arith.constant 0 : index
    %c2048 = arith.constant 2048 : index
    %47 = vector.load %arg0[%c0_35, %c2048] : memref<3x6272xf32, #tpu.memory_space<vmem>>, vector<3x512xf32>
    %cst_36 = arith.constant dense<0.000000e+00> : vector<32x512xf32>
    %48 = tpu.matmul %0, %47, %cst_36 {dimension_numbers = #tpu.dot_dimension_numbers<[1], [0], [0], [1], [0, 0, 1, 1], [], []>} : vector<32x3xf32>, vector<3x512xf32>, vector<32x512xf32> -> vector<32x512xf32>
    %cst_37 = arith.constant dense<0.000000e+00> : vector<32xf32>
    %49 = vector.multi_reduction <add>, %48, %cst_37 [1] : vector<32x512xf32> to vector<32xf32>
    %50 = vector.shape_cast %49 : vector<32xf32> to vector<32x1xf32>
    %51 = arith.addf %42, %50 : vector<32x1xf32>
    %52 = arith.mulf %48, %48 : vector<32x512xf32>
    %cst_38 = arith.constant dense<0.000000e+00> : vector<32xf32>
    %53 = vector.multi_reduction <add>, %52, %cst_38 [1] : vector<32x512xf32> to vector<32xf32>
    %54 = vector.shape_cast %53 : vector<32xf32> to vector<32x1xf32>
    %55 = arith.addf %46, %54 : vector<32x1xf32>
    %c0_39 = arith.constant 0 : index
    %c2560 = arith.constant 2560 : index
    %56 = vector.load %arg0[%c0_39, %c2560] : memref<3x6272xf32, #tpu.memory_space<vmem>>, vector<3x512xf32>
    %cst_40 = arith.constant dense<0.000000e+00> : vector<32x512xf32>
    %57 = tpu.matmul %0, %56, %cst_40 {dimension_numbers = #tpu.dot_dimension_numbers<[1], [0], [0], [1], [0, 0, 1, 1], [], []>} : vector<32x3xf32>, vector<3x512xf32>, vector<32x512xf32> -> vector<32x512xf32>
    %cst_41 = arith.constant dense<0.000000e+00> : vector<32xf32>
    %58 = vector.multi_reduction <add>, %57, %cst_41 [1] : vector<32x512xf32> to vector<32xf32>
    %59 = vector.shape_cast %58 : vector<32xf32> to vector<32x1xf32>
    %60 = arith.addf %51, %59 : vector<32x1xf32>
    %61 = arith.mulf %57, %57 : vector<32x512xf32>
    %cst_42 = arith.constant dense<0.000000e+00> : vector<32xf32>
    %62 = vector.multi_reduction <add>, %61, %cst_42 [1] : vector<32x512xf32> to vector<32xf32>
    %63 = vector.shape_cast %62 : vector<32xf32> to vector<32x1xf32>
    %64 = arith.addf %55, %63 : vector<32x1xf32>
    %c0_43 = arith.constant 0 : index
    %c3072 = arith.constant 3072 : index
    %65 = vector.load %arg0[%c0_43, %c3072] : memref<3x6272xf32, #tpu.memory_space<vmem>>, vector<3x512xf32>
    %cst_44 = arith.constant dense<0.000000e+00> : vector<32x512xf32>
    %66 = tpu.matmul %0, %65, %cst_44 {dimension_numbers = #tpu.dot_dimension_numbers<[1], [0], [0], [1], [0, 0, 1, 1], [], []>} : vector<32x3xf32>, vector<3x512xf32>, vector<32x512xf32> -> vector<32x512xf32>
    %cst_45 = arith.constant dense<0.000000e+00> : vector<32xf32>
    %67 = vector.multi_reduction <add>, %66, %cst_45 [1] : vector<32x512xf32> to vector<32xf32>
    %68 = vector.shape_cast %67 : vector<32xf32> to vector<32x1xf32>
    %69 = arith.addf %60, %68 : vector<32x1xf32>
    %70 = arith.mulf %66, %66 : vector<32x512xf32>
    %cst_46 = arith.constant dense<0.000000e+00> : vector<32xf32>
    %71 = vector.multi_reduction <add>, %70, %cst_46 [1] : vector<32x512xf32> to vector<32xf32>
    %72 = vector.shape_cast %71 : vector<32xf32> to vector<32x1xf32>
    %73 = arith.addf %64, %72 : vector<32x1xf32>
    %c0_47 = arith.constant 0 : index
    %c3584 = arith.constant 3584 : index
    %74 = vector.load %arg0[%c0_47, %c3584] : memref<3x6272xf32, #tpu.memory_space<vmem>>, vector<3x512xf32>
    %cst_48 = arith.constant dense<0.000000e+00> : vector<32x512xf32>
    %75 = tpu.matmul %0, %74, %cst_48 {dimension_numbers = #tpu.dot_dimension_numbers<[1], [0], [0], [1], [0, 0, 1, 1], [], []>} : vector<32x3xf32>, vector<3x512xf32>, vector<32x512xf32> -> vector<32x512xf32>
    %cst_49 = arith.constant dense<0.000000e+00> : vector<32xf32>
    %76 = vector.multi_reduction <add>, %75, %cst_49 [1] : vector<32x512xf32> to vector<32xf32>
    %77 = vector.shape_cast %76 : vector<32xf32> to vector<32x1xf32>
    %78 = arith.addf %69, %77 : vector<32x1xf32>
    %79 = arith.mulf %75, %75 : vector<32x512xf32>
    %cst_50 = arith.constant dense<0.000000e+00> : vector<32xf32>
    %80 = vector.multi_reduction <add>, %79, %cst_50 [1] : vector<32x512xf32> to vector<32xf32>
    %81 = vector.shape_cast %80 : vector<32xf32> to vector<32x1xf32>
    %82 = arith.addf %73, %81 : vector<32x1xf32>
    %c0_51 = arith.constant 0 : index
    %c4096 = arith.constant 4096 : index
    %83 = vector.load %arg0[%c0_51, %c4096] : memref<3x6272xf32, #tpu.memory_space<vmem>>, vector<3x512xf32>
    %cst_52 = arith.constant dense<0.000000e+00> : vector<32x512xf32>
    %84 = tpu.matmul %0, %83, %cst_52 {dimension_numbers = #tpu.dot_dimension_numbers<[1], [0], [0], [1], [0, 0, 1, 1], [], []>} : vector<32x3xf32>, vector<3x512xf32>, vector<32x512xf32> -> vector<32x512xf32>
    %cst_53 = arith.constant dense<0.000000e+00> : vector<32xf32>
    %85 = vector.multi_reduction <add>, %84, %cst_53 [1] : vector<32x512xf32> to vector<32xf32>
    %86 = vector.shape_cast %85 : vector<32xf32> to vector<32x1xf32>
    %87 = arith.addf %78, %86 : vector<32x1xf32>
    %88 = arith.mulf %84, %84 : vector<32x512xf32>
    %cst_54 = arith.constant dense<0.000000e+00> : vector<32xf32>
    %89 = vector.multi_reduction <add>, %88, %cst_54 [1] : vector<32x512xf32> to vector<32xf32>
    %90 = vector.shape_cast %89 : vector<32xf32> to vector<32x1xf32>
    %91 = arith.addf %82, %90 : vector<32x1xf32>
    %c0_55 = arith.constant 0 : index
    %c4608 = arith.constant 4608 : index
    %92 = vector.load %arg0[%c0_55, %c4608] : memref<3x6272xf32, #tpu.memory_space<vmem>>, vector<3x512xf32>
    %cst_56 = arith.constant dense<0.000000e+00> : vector<32x512xf32>
    %93 = tpu.matmul %0, %92, %cst_56 {dimension_numbers = #tpu.dot_dimension_numbers<[1], [0], [0], [1], [0, 0, 1, 1], [], []>} : vector<32x3xf32>, vector<3x512xf32>, vector<32x512xf32> -> vector<32x512xf32>
    %cst_57 = arith.constant dense<0.000000e+00> : vector<32xf32>
    %94 = vector.multi_reduction <add>, %93, %cst_57 [1] : vector<32x512xf32> to vector<32xf32>
    %95 = vector.shape_cast %94 : vector<32xf32> to vector<32x1xf32>
    %96 = arith.addf %87, %95 : vector<32x1xf32>
    %97 = arith.mulf %93, %93 : vector<32x512xf32>
    %cst_58 = arith.constant dense<0.000000e+00> : vector<32xf32>
    %98 = vector.multi_reduction <add>, %97, %cst_58 [1] : vector<32x512xf32> to vector<32xf32>
    %99 = vector.shape_cast %98 : vector<32xf32> to vector<32x1xf32>
    %100 = arith.addf %91, %99 : vector<32x1xf32>
    %c0_59 = arith.constant 0 : index
    %c5120 = arith.constant 5120 : index
    %101 = vector.load %arg0[%c0_59, %c5120] : memref<3x6272xf32, #tpu.memory_space<vmem>>, vector<3x512xf32>
    %cst_60 = arith.constant dense<0.000000e+00> : vector<32x512xf32>
    %102 = tpu.matmul %0, %101, %cst_60 {dimension_numbers = #tpu.dot_dimension_numbers<[1], [0], [0], [1], [0, 0, 1, 1], [], []>} : vector<32x3xf32>, vector<3x512xf32>, vector<32x512xf32> -> vector<32x512xf32>
    %cst_61 = arith.constant dense<0.000000e+00> : vector<32xf32>
    %103 = vector.multi_reduction <add>, %102, %cst_61 [1] : vector<32x512xf32> to vector<32xf32>
    %104 = vector.shape_cast %103 : vector<32xf32> to vector<32x1xf32>
    %105 = arith.addf %96, %104 : vector<32x1xf32>
    %106 = arith.mulf %102, %102 : vector<32x512xf32>
    %cst_62 = arith.constant dense<0.000000e+00> : vector<32xf32>
    %107 = vector.multi_reduction <add>, %106, %cst_62 [1] : vector<32x512xf32> to vector<32xf32>
    %108 = vector.shape_cast %107 : vector<32xf32> to vector<32x1xf32>
    %109 = arith.addf %100, %108 : vector<32x1xf32>
    %c0_63 = arith.constant 0 : index
    %c5632 = arith.constant 5632 : index
    %110 = vector.load %arg0[%c0_63, %c5632] : memref<3x6272xf32, #tpu.memory_space<vmem>>, vector<3x512xf32>
    %cst_64 = arith.constant dense<0.000000e+00> : vector<32x512xf32>
    %111 = tpu.matmul %0, %110, %cst_64 {dimension_numbers = #tpu.dot_dimension_numbers<[1], [0], [0], [1], [0, 0, 1, 1], [], []>} : vector<32x3xf32>, vector<3x512xf32>, vector<32x512xf32> -> vector<32x512xf32>
    %cst_65 = arith.constant dense<0.000000e+00> : vector<32xf32>
    %112 = vector.multi_reduction <add>, %111, %cst_65 [1] : vector<32x512xf32> to vector<32xf32>
    %113 = vector.shape_cast %112 : vector<32xf32> to vector<32x1xf32>
    %114 = arith.addf %105, %113 : vector<32x1xf32>
    %115 = arith.mulf %111, %111 : vector<32x512xf32>
    %cst_66 = arith.constant dense<0.000000e+00> : vector<32xf32>
    %116 = vector.multi_reduction <add>, %115, %cst_66 [1] : vector<32x512xf32> to vector<32xf32>
    %117 = vector.shape_cast %116 : vector<32xf32> to vector<32x1xf32>
    %118 = arith.addf %109, %117 : vector<32x1xf32>
    %c0_67 = arith.constant 0 : index
    %c6144 = arith.constant 6144 : index
    %119 = vector.load %arg0[%c0_67, %c6144] : memref<3x6272xf32, #tpu.memory_space<vmem>>, vector<3x128xf32>
    %cst_68 = arith.constant dense<0.000000e+00> : vector<32x128xf32>
    %120 = tpu.matmul %0, %119, %cst_68 {dimension_numbers = #tpu.dot_dimension_numbers<[1], [0], [0], [1], [0, 0, 1, 1], [], []>} : vector<32x3xf32>, vector<3x128xf32>, vector<32x128xf32> -> vector<32x128xf32>
    %cst_69 = arith.constant dense<0.000000e+00> : vector<32xf32>
    %121 = vector.multi_reduction <add>, %120, %cst_69 [1] : vector<32x128xf32> to vector<32xf32>
    %122 = vector.shape_cast %121 : vector<32xf32> to vector<32x1xf32>
    %123 = arith.addf %114, %122 : vector<32x1xf32>
    %124 = arith.mulf %120, %120 : vector<32x128xf32>
    %cst_70 = arith.constant dense<0.000000e+00> : vector<32xf32>
    %125 = vector.multi_reduction <add>, %124, %cst_70 [1] : vector<32x128xf32> to vector<32xf32>
    %126 = vector.shape_cast %125 : vector<32xf32> to vector<32x1xf32>
    %127 = arith.addf %118, %126 : vector<32x1xf32>
    %cst_71 = arith.constant 1.59438772E-4 : f32
    %128 = vector.broadcast %cst_71 : f32 to vector<32x1xf32>
    %129 = arith.mulf %123, %128 : vector<32x1xf32>
    %cst_72 = arith.constant 1.59438772E-4 : f32
    %130 = vector.broadcast %cst_72 : f32 to vector<32x1xf32>
    %131 = arith.mulf %127, %130 : vector<32x1xf32>
    %132 = arith.mulf %129, %129 : vector<32x1xf32>
    %133 = arith.subf %131, %132 : vector<32x1xf32>
    %cst_73 = arith.constant 9.99999974E-6 : f32
    %134 = vector.broadcast %cst_73 : f32 to vector<32x1xf32>
    %135 = arith.addf %133, %134 : vector<32x1xf32>
    %136 = math.rsqrt %135 : vector<32x1xf32>
    %cst_74 = arith.constant 0.000000e+00 : f32
    %137 = vector.broadcast %cst_74 : f32 to vector<64x1xf32>
    %cst_75 = arith.constant 0.000000e+00 : f32
    %138 = vector.broadcast %cst_75 : f32 to vector<64x1xf32>
    %c0_76 = arith.constant 0 : index
    %c0_77 = arith.constant 0 : index
    %139 = vector.load %arg1[%c0_76, %c0_77] : memref<3x1568xf32, #tpu.memory_space<vmem>>, vector<3x512xf32>
    %cst_78 = arith.constant dense<0.000000e+00> : vector<32x512xf32>
    %140 = tpu.matmul %0, %139, %cst_78 {dimension_numbers = #tpu.dot_dimension_numbers<[1], [0], [0], [1], [0, 0, 1, 1], [], []>} : vector<32x3xf32>, vector<3x512xf32>, vector<32x512xf32> -> vector<32x512xf32>
    %141 = vector.broadcast %129 : vector<32x1xf32> to vector<32x512xf32>
    %142 = arith.subf %140, %141 : vector<32x512xf32>
    %143 = arith.mulf %136, %3 : vector<32x1xf32>
    %144 = vector.broadcast %143 : vector<32x1xf32> to vector<32x512xf32>
    %145 = arith.mulf %142, %144 : vector<32x512xf32>
    %146 = vector.broadcast %4 : vector<32x1xf32> to vector<32x512xf32>
    %147 = arith.addf %145, %146 : vector<32x512xf32>
    %cst_79 = arith.constant 0.000000e+00 : f32
    %148 = vector.broadcast %cst_79 : f32 to vector<32x512xf32>
    %149 = arith.maximumf %147, %148 : vector<32x512xf32>
    %cst_80 = arith.constant dense<0.000000e+00> : vector<64x512xf32>
    %150 = tpu.matmul %1, %149, %cst_80 {dimension_numbers = #tpu.dot_dimension_numbers<[1], [0], [0], [1], [0, 0, 1, 1], [], []>} : vector<64x32xf32>, vector<32x512xf32>, vector<64x512xf32> -> vector<64x512xf32>
    %cst_81 = arith.constant dense<0.000000e+00> : vector<64xf32>
    %151 = vector.multi_reduction <add>, %150, %cst_81 [1] : vector<64x512xf32> to vector<64xf32>
    %152 = vector.shape_cast %151 : vector<64xf32> to vector<64x1xf32>
    %153 = arith.addf %137, %152 : vector<64x1xf32>
    %154 = arith.mulf %150, %150 : vector<64x512xf32>
    %cst_82 = arith.constant dense<0.000000e+00> : vector<64xf32>
    %155 = vector.multi_reduction <add>, %154, %cst_82 [1] : vector<64x512xf32> to vector<64xf32>
    %156 = vector.shape_cast %155 : vector<64xf32> to vector<64x1xf32>
    %157 = arith.addf %138, %156 : vector<64x1xf32>
    %c0_83 = arith.constant 0 : index
    %c512_84 = arith.constant 512 : index
    %158 = vector.load %arg1[%c0_83, %c512_84] : memref<3x1568xf32, #tpu.memory_space<vmem>>, vector<3x512xf32>
    %cst_85 = arith.constant dense<0.000000e+00> : vector<32x512xf32>
    %159 = tpu.matmul %0, %158, %cst_85 {dimension_numbers = #tpu.dot_dimension_numbers<[1], [0], [0], [1], [0, 0, 1, 1], [], []>} : vector<32x3xf32>, vector<3x512xf32>, vector<32x512xf32> -> vector<32x512xf32>
    %160 = vector.broadcast %129 : vector<32x1xf32> to vector<32x512xf32>
    %161 = arith.subf %159, %160 : vector<32x512xf32>
    %162 = arith.mulf %136, %3 : vector<32x1xf32>
    %163 = vector.broadcast %162 : vector<32x1xf32> to vector<32x512xf32>
    %164 = arith.mulf %161, %163 : vector<32x512xf32>
    %165 = vector.broadcast %4 : vector<32x1xf32> to vector<32x512xf32>
    %166 = arith.addf %164, %165 : vector<32x512xf32>
    %cst_86 = arith.constant 0.000000e+00 : f32
    %167 = vector.broadcast %cst_86 : f32 to vector<32x512xf32>
    %168 = arith.maximumf %166, %167 : vector<32x512xf32>
    %cst_87 = arith.constant dense<0.000000e+00> : vector<64x512xf32>
    %169 = tpu.matmul %1, %168, %cst_87 {dimension_numbers = #tpu.dot_dimension_numbers<[1], [0], [0], [1], [0, 0, 1, 1], [], []>} : vector<64x32xf32>, vector<32x512xf32>, vector<64x512xf32> -> vector<64x512xf32>
    %cst_88 = arith.constant dense<0.000000e+00> : vector<64xf32>
    %170 = vector.multi_reduction <add>, %169, %cst_88 [1] : vector<64x512xf32> to vector<64xf32>
    %171 = vector.shape_cast %170 : vector<64xf32> to vector<64x1xf32>
    %172 = arith.addf %153, %171 : vector<64x1xf32>
    %173 = arith.mulf %169, %169 : vector<64x512xf32>
    %cst_89 = arith.constant dense<0.000000e+00> : vector<64xf32>
    %174 = vector.multi_reduction <add>, %173, %cst_89 [1] : vector<64x512xf32> to vector<64xf32>
    %175 = vector.shape_cast %174 : vector<64xf32> to vector<64x1xf32>
    %176 = arith.addf %157, %175 : vector<64x1xf32>
    %c0_90 = arith.constant 0 : index
    %c1024_91 = arith.constant 1024 : index
    %177 = vector.load %arg1[%c0_90, %c1024_91] : memref<3x1568xf32, #tpu.memory_space<vmem>>, vector<3x512xf32>
    %cst_92 = arith.constant dense<0.000000e+00> : vector<32x512xf32>
    %178 = tpu.matmul %0, %177, %cst_92 {dimension_numbers = #tpu.dot_dimension_numbers<[1], [0], [0], [1], [0, 0, 1, 1], [], []>} : vector<32x3xf32>, vector<3x512xf32>, vector<32x512xf32> -> vector<32x512xf32>
    %179 = vector.broadcast %129 : vector<32x1xf32> to vector<32x512xf32>
    %180 = arith.subf %178, %179 : vector<32x512xf32>
    %181 = arith.mulf %136, %3 : vector<32x1xf32>
    %182 = vector.broadcast %181 : vector<32x1xf32> to vector<32x512xf32>
    %183 = arith.mulf %180, %182 : vector<32x512xf32>
    %184 = vector.broadcast %4 : vector<32x1xf32> to vector<32x512xf32>
    %185 = arith.addf %183, %184 : vector<32x512xf32>
    %cst_93 = arith.constant 0.000000e+00 : f32
    %186 = vector.broadcast %cst_93 : f32 to vector<32x512xf32>
    %187 = arith.maximumf %185, %186 : vector<32x512xf32>
    %cst_94 = arith.constant dense<0.000000e+00> : vector<64x512xf32>
    %188 = tpu.matmul %1, %187, %cst_94 {dimension_numbers = #tpu.dot_dimension_numbers<[1], [0], [0], [1], [0, 0, 1, 1], [], []>} : vector<64x32xf32>, vector<32x512xf32>, vector<64x512xf32> -> vector<64x512xf32>
    %cst_95 = arith.constant dense<0.000000e+00> : vector<64xf32>
    %189 = vector.multi_reduction <add>, %188, %cst_95 [1] : vector<64x512xf32> to vector<64xf32>
    %190 = vector.shape_cast %189 : vector<64xf32> to vector<64x1xf32>
    %191 = arith.addf %172, %190 : vector<64x1xf32>
    %192 = arith.mulf %188, %188 : vector<64x512xf32>
    %cst_96 = arith.constant dense<0.000000e+00> : vector<64xf32>
    %193 = vector.multi_reduction <add>, %192, %cst_96 [1] : vector<64x512xf32> to vector<64xf32>
    %194 = vector.shape_cast %193 : vector<64xf32> to vector<64x1xf32>
    %195 = arith.addf %176, %194 : vector<64x1xf32>
    %c0_97 = arith.constant 0 : index
    %c1536_98 = arith.constant 1536 : index
    %196 = vector.load %arg1[%c0_97, %c1536_98] : memref<3x1568xf32, #tpu.memory_space<vmem>>, vector<3x32xf32>
    %cst_99 = arith.constant dense<0.000000e+00> : vector<32x32xf32>
    %197 = tpu.matmul %0, %196, %cst_99 {dimension_numbers = #tpu.dot_dimension_numbers<[1], [0], [0], [1], [0, 0, 1, 1], [], []>} : vector<32x3xf32>, vector<3x32xf32>, vector<32x32xf32> -> vector<32x32xf32>
    %198 = vector.broadcast %129 : vector<32x1xf32> to vector<32x32xf32>
    %199 = arith.subf %197, %198 : vector<32x32xf32>
    %200 = arith.mulf %136, %3 : vector<32x1xf32>
    %201 = vector.broadcast %200 : vector<32x1xf32> to vector<32x32xf32>
    %202 = arith.mulf %199, %201 : vector<32x32xf32>
    %203 = vector.broadcast %4 : vector<32x1xf32> to vector<32x32xf32>
    %204 = arith.addf %202, %203 : vector<32x32xf32>
    %cst_100 = arith.constant 0.000000e+00 : f32
    %205 = vector.broadcast %cst_100 : f32 to vector<32x32xf32>
    %206 = arith.maximumf %204, %205 : vector<32x32xf32>
    %cst_101 = arith.constant dense<0.000000e+00> : vector<64x32xf32>
    %207 = tpu.matmul %1, %206, %cst_101 {dimension_numbers = #tpu.dot_dimension_numbers<[1], [0], [0], [1], [0, 0, 1, 1], [], []>} : vector<64x32xf32>, vector<32x32xf32>, vector<64x32xf32> -> vector<64x32xf32>
    %cst_102 = arith.constant dense<0.000000e+00> : vector<64xf32>
    %208 = vector.multi_reduction <add>, %207, %cst_102 [1] : vector<64x32xf32> to vector<64xf32>
    %209 = vector.shape_cast %208 : vector<64xf32> to vector<64x1xf32>
    %210 = arith.addf %191, %209 : vector<64x1xf32>
    %211 = arith.mulf %207, %207 : vector<64x32xf32>
    %cst_103 = arith.constant dense<0.000000e+00> : vector<64xf32>
    %212 = vector.multi_reduction <add>, %211, %cst_103 [1] : vector<64x32xf32> to vector<64xf32>
    %213 = vector.shape_cast %212 : vector<64xf32> to vector<64x1xf32>
    %214 = arith.addf %195, %213 : vector<64x1xf32>
    %cst_104 = arith.constant 6.37755089E-4 : f32
    %215 = vector.broadcast %cst_104 : f32 to vector<64x1xf32>
    %216 = arith.mulf %210, %215 : vector<64x1xf32>
    %cst_105 = arith.constant 6.37755089E-4 : f32
    %217 = vector.broadcast %cst_105 : f32 to vector<64x1xf32>
    %218 = arith.mulf %214, %217 : vector<64x1xf32>
    %219 = arith.mulf %216, %216 : vector<64x1xf32>
    %220 = arith.subf %218, %219 : vector<64x1xf32>
    %cst_106 = arith.constant 9.99999974E-6 : f32
    %221 = vector.broadcast %cst_106 : f32 to vector<64x1xf32>
    %222 = arith.addf %220, %221 : vector<64x1xf32>
    %223 = math.rsqrt %222 : vector<64x1xf32>
    %c0_107 = arith.constant 0 : index
    %c0_108 = arith.constant 0 : index
    %224 = vector.load %arg2[%c0_107, %c0_108] : memref<3x392xf32, #tpu.memory_space<vmem>>, vector<3x392xf32>
    %cst_109 = arith.constant dense<0.000000e+00> : vector<32x392xf32>
    %225 = tpu.matmul %0, %224, %cst_109 {dimension_numbers = #tpu.dot_dimension_numbers<[1], [0], [0], [1], [0, 0, 1, 1], [], []>} : vector<32x3xf32>, vector<3x392xf32>, vector<32x392xf32> -> vector<32x392xf32>
    %226 = vector.broadcast %129 : vector<32x1xf32> to vector<32x392xf32>
    %227 = arith.subf %225, %226 : vector<32x392xf32>
    %228 = arith.mulf %136, %3 : vector<32x1xf32>
    %229 = vector.broadcast %228 : vector<32x1xf32> to vector<32x392xf32>
    %230 = arith.mulf %227, %229 : vector<32x392xf32>
    %231 = vector.broadcast %4 : vector<32x1xf32> to vector<32x392xf32>
    %232 = arith.addf %230, %231 : vector<32x392xf32>
    %cst_110 = arith.constant 0.000000e+00 : f32
    %233 = vector.broadcast %cst_110 : f32 to vector<32x392xf32>
    %234 = arith.maximumf %232, %233 : vector<32x392xf32>
    %cst_111 = arith.constant dense<0.000000e+00> : vector<64x392xf32>
    %235 = tpu.matmul %1, %234, %cst_111 {dimension_numbers = #tpu.dot_dimension_numbers<[1], [0], [0], [1], [0, 0, 1, 1], [], []>} : vector<64x32xf32>, vector<32x392xf32>, vector<64x392xf32> -> vector<64x392xf32>
    %236 = vector.broadcast %216 : vector<64x1xf32> to vector<64x392xf32>
    %237 = arith.subf %235, %236 : vector<64x392xf32>
    %238 = arith.mulf %223, %5 : vector<64x1xf32>
    %239 = vector.broadcast %238 : vector<64x1xf32> to vector<64x392xf32>
    %240 = arith.mulf %237, %239 : vector<64x392xf32>
    %241 = vector.broadcast %6 : vector<64x1xf32> to vector<64x392xf32>
    %242 = arith.addf %240, %241 : vector<64x392xf32>
    %cst_112 = arith.constant 0.000000e+00 : f32
    %243 = vector.broadcast %cst_112 : f32 to vector<64x392xf32>
    %244 = arith.maximumf %242, %243 : vector<64x392xf32>
    %cst_113 = arith.constant dense<0.000000e+00> : vector<128x392xf32>
    %245 = tpu.matmul %2, %244, %cst_113 {dimension_numbers = #tpu.dot_dimension_numbers<[1], [0], [0], [1], [0, 0, 1, 1], [], []>} : vector<128x64xf32>, vector<64x392xf32>, vector<128x392xf32> -> vector<128x392xf32>
    %cst_114 = arith.constant dense<0.000000e+00> : vector<128xf32>
    %246 = vector.multi_reduction <add>, %245, %cst_114 [1] : vector<128x392xf32> to vector<128xf32>
    %247 = vector.shape_cast %246 : vector<128xf32> to vector<128x1xf32>
    %248 = arith.mulf %245, %245 : vector<128x392xf32>
    %cst_115 = arith.constant dense<0.000000e+00> : vector<128xf32>
    %249 = vector.multi_reduction <add>, %248, %cst_115 [1] : vector<128x392xf32> to vector<128xf32>
    %250 = vector.shape_cast %249 : vector<128xf32> to vector<128x1xf32>
    %cst_116 = arith.constant 0.00255102036 : f32
    %251 = vector.broadcast %cst_116 : f32 to vector<128x1xf32>
    %252 = arith.mulf %247, %251 : vector<128x1xf32>
    %cst_117 = arith.constant 0.00255102036 : f32
    %253 = vector.broadcast %cst_117 : f32 to vector<128x1xf32>
    %254 = arith.mulf %250, %253 : vector<128x1xf32>
    %255 = arith.mulf %252, %252 : vector<128x1xf32>
    %256 = arith.subf %254, %255 : vector<128x1xf32>
    %cst_118 = arith.constant 9.99999974E-6 : f32
    %257 = vector.broadcast %cst_118 : f32 to vector<128x1xf32>
    %258 = arith.addf %256, %257 : vector<128x1xf32>
    %259 = math.rsqrt %258 : vector<128x1xf32>
    %260 = vector.broadcast %252 : vector<128x1xf32> to vector<128x392xf32>
    %261 = arith.subf %245, %260 : vector<128x392xf32>
    %262 = arith.mulf %259, %7 : vector<128x1xf32>
    %263 = vector.broadcast %262 : vector<128x1xf32> to vector<128x392xf32>
    %264 = arith.mulf %261, %263 : vector<128x392xf32>
    %265 = vector.broadcast %8 : vector<128x1xf32> to vector<128x392xf32>
    %266 = arith.addf %264, %265 : vector<128x392xf32>
    %cst_119 = arith.constant 0.000000e+00 : f32
    %267 = vector.broadcast %cst_119 : f32 to vector<128x392xf32>
    %268 = arith.maximumf %266, %267 : vector<128x392xf32>
    %c0_120 = arith.constant 0 : index
    %c0_121 = arith.constant 0 : index
    %269 = vector.load %arg3[%c0_120, %c0_121] : memref<392x2xf32, #tpu.memory_space<vmem>>, vector<392x2xf32>
    %cst_122 = arith.constant dense<0.000000e+00> : vector<128x2xf32>
    %270 = tpu.matmul %268, %269, %cst_122 {dimension_numbers = #tpu.dot_dimension_numbers<[1], [0], [0], [1], [0, 0, 1, 1], [], []>} : vector<128x392xf32>, vector<392x2xf32>, vector<128x2xf32> -> vector<128x2xf32>
    %c0_123 = arith.constant 0 : index
    %c0_124 = arith.constant 0 : index
    %271 = vector.load %arg13[%c0_123, %c0_124] : memref<128x2xf32, #tpu.memory_space<vmem>>, vector<128x2xf32>
    tpu.vector_store %arg13[%c0_123, %c0_124], %270 {strides = array<i32>} : memref<128x2xf32, #tpu.memory_space<vmem>>, vector<128x2xf32>,
    return
  }
}

module attributes {stable_mosaic.version = 11 : i64} {
  func.func @_head_kernel(%arg0: i32, %arg1: memref<2x256xf32, #tpu.memory_space<vmem>>, %arg2: memref<2x128xf32, #tpu.memory_space<vmem>>, %arg3: memref<256x1024xf32, #tpu.memory_space<vmem>>, %arg4: memref<128x1024xf32, #tpu.memory_space<vmem>>, %arg5: memref<1x1024xf32, #tpu.memory_space<vmem>>, %arg6: memref<1024x65xf32, #tpu.memory_space<vmem>>, %arg7: memref<1x65xf32, #tpu.memory_space<vmem>>, %arg8: memref<2x65xf32, #tpu.memory_space<vmem>>, %arg9: memref<2x1024xf32, #tpu.memory_space<vmem>>) attributes {dimension_semantics = [#tpu.dimension_semantics<arbitrary>], iteration_bounds = array<i64: 8>, scalar_prefetch = 0 : i64, scratch_operands = 1 : i64, tpu.core_type = #tpu.core_type<tc>, window_params = [{transform_indices = @transform_0, window_bounds = array<i64: 2, 256>}, {pipeline_mode = #tpu.pipeline_mode<synchronous>, transform_indices = @transform_1, window_bounds = array<i64: 2, 128>}, {transform_indices = @transform_2, window_bounds = array<i64: 256, 1024>}, {pipeline_mode = #tpu.pipeline_mode<synchronous>, transform_indices = @transform_3, window_bounds = array<i64: 128, 1024>}, {pipeline_mode = #tpu.pipeline_mode<synchronous>, transform_indices = @transform_4, window_bounds = array<i64: 1, 1024>}, {pipeline_mode = #tpu.pipeline_mode<synchronous>, transform_indices = @transform_5, window_bounds = array<i64: 1024, 65>}, {pipeline_mode = #tpu.pipeline_mode<synchronous>, transform_indices = @transform_6, window_bounds = array<i64: 1, 65>}, {pipeline_mode = #tpu.pipeline_mode<synchronous>, transform_indices = @transform_7, window_bounds = array<i64: 2, 65>}]} {
    %c0_i32 = arith.constant 0 : i32
    %0 = arith.cmpi eq, %arg0, %c0_i32 : i32
    %1 = arith.extui %0 : i1 to i32
    %c0_i32_0 = arith.constant 0 : i32
    %2 = arith.cmpi ne, %1, %c0_i32_0 : i32
    scf.if %2 {
      %cst_9 = arith.constant 0.000000e+00 : f32
      %12 = vector.broadcast %cst_9 : f32 to vector<2x1024xf32>
      %c0_10 = arith.constant 0 : index
      %c0_11 = arith.constant 0 : index
      %13 = vector.load %arg9[%c0_10, %c0_11] : memref<2x1024xf32, #tpu.memory_space<vmem>>, vector<2x1024xf32>
      tpu.vector_store %arg9[%c0_10, %c0_11], %12 {strides = array<i32>} : memref<2x1024xf32, #tpu.memory_space<vmem>>, vector<2x1024xf32>,
    } else {
    }
    %c0 = arith.constant 0 : index
    %c0_1 = arith.constant 0 : index
    %3 = vector.load %arg9[%c0, %c0_1] : memref<2x1024xf32, #tpu.memory_space<vmem>>, vector<2x1024xf32>
    %c0_2 = arith.constant 0 : index
    %c0_3 = arith.constant 0 : index
    %4 = vector.load %arg1[%c0_2, %c0_3] : memref<2x256xf32, #tpu.memory_space<vmem>>, vector<2x256xf32>
    %c0_4 = arith.constant 0 : index
    %c0_5 = arith.constant 0 : index
    %5 = vector.load %arg3[%c0_4, %c0_5] : memref<256x1024xf32, #tpu.memory_space<vmem>>, vector<256x1024xf32>
    %cst = arith.constant dense<0.000000e+00> : vector<2x1024xf32>
    %6 = tpu.matmul %4, %5, %cst {dimension_numbers = #tpu.dot_dimension_numbers<[1], [0], [0], [1], [0, 0, 1, 1], [], []>} : vector<2x256xf32>, vector<256x1024xf32>, vector<2x1024xf32> -> vector<2x1024xf32>
    %7 = arith.addf %3, %6 : vector<2x1024xf32>
    %c0_6 = arith.constant 0 : index
    %c0_7 = arith.constant 0 : index
    %8 = vector.load %arg9[%c0_6, %c0_7] : memref<2x1024xf32, #tpu.memory_space<vmem>>, vector<2x1024xf32>
    tpu.vector_store %arg9[%c0_6, %c0_7], %7 {strides = array<i32>} : memref<2x1024xf32, #tpu.memory_space<vmem>>, vector<2x1024xf32>,
    %c7_i32 = arith.constant 7 : i32
    %9 = arith.cmpi eq, %arg0, %c7_i32 : i32
    %10 = arith.extui %9 : i1 to i32
    %c0_i32_8 = arith.constant 0 : i32
    %11 = arith.cmpi ne, %10, %c0_i32_8 : i32
    scf.if %11 {
      %c0_9 = arith.constant 0 : index
      %c0_10 = arith.constant 0 : index
      %12 = vector.load %arg9[%c0_9, %c0_10] : memref<2x1024xf32, #tpu.memory_space<vmem>>, vector<2x1024xf32>
      %c0_11 = arith.constant 0 : index
      %c0_12 = arith.constant 0 : index
      %13 = vector.load %arg5[%c0_11, %c0_12] : memref<1x1024xf32, #tpu.memory_space<vmem>>, vector<1x1024xf32>
      %14 = vector.broadcast %13 : vector<1x1024xf32> to vector<2x1024xf32>
      %15 = arith.addf %12, %14 : vector<2x1024xf32>
      %c0_13 = arith.constant 0 : index
      %c0_14 = arith.constant 0 : index
      %16 = vector.load %arg2[%c0_13, %c0_14] : memref<2x128xf32, #tpu.memory_space<vmem>>, vector<2x128xf32>
      %c0_15 = arith.constant 0 : index
      %c0_16 = arith.constant 0 : index
      %17 = vector.load %arg4[%c0_15, %c0_16] : memref<128x1024xf32, #tpu.memory_space<vmem>>, vector<128x1024xf32>
      %cst_17 = arith.constant dense<0.000000e+00> : vector<2x1024xf32>
      %18 = tpu.matmul %16, %17, %cst_17 {dimension_numbers = #tpu.dot_dimension_numbers<[1], [0], [0], [1], [0, 0, 1, 1], [], []>} : vector<2x128xf32>, vector<128x1024xf32>, vector<2x1024xf32> -> vector<2x1024xf32>
      %19 = vector.extract_strided_slice %15 {offsets = [0, 0], sizes = [1, 1024], strides = [1, 1]} : vector<2x1024xf32> to vector<1x1024xf32>
      %20 = vector.broadcast %19 : vector<1x1024xf32> to vector<2x1024xf32>
      %21 = arith.addf %20, %18 : vector<2x1024xf32>
      %22 = vector.extract_strided_slice %15 {offsets = [1, 0], sizes = [1, 1024], strides = [1, 1]} : vector<2x1024xf32> to vector<1x1024xf32>
      %23 = vector.broadcast %22 : vector<1x1024xf32> to vector<2x1024xf32>
      %24 = arith.addf %23, %18 : vector<2x1024xf32>
      %25 = tpu.concatenate %21, %24 in 0 : vector<2x1024xf32>, vector<2x1024xf32> -> vector<4x1024xf32>
      %cst_18 = arith.constant 0.000000e+00 : f32
      %26 = vector.broadcast %cst_18 : f32 to vector<4x1024xf32>
      %27 = arith.maximumf %25, %26 : vector<4x1024xf32>
      %c0_19 = arith.constant 0 : index
      %c0_20 = arith.constant 0 : index
      %28 = vector.load %arg6[%c0_19, %c0_20] : memref<1024x65xf32, #tpu.memory_space<vmem>>, vector<1024x65xf32>
      %cst_21 = arith.constant dense<0.000000e+00> : vector<4x65xf32>
      %29 = tpu.matmul %27, %28, %cst_21 {dimension_numbers = #tpu.dot_dimension_numbers<[1], [0], [0], [1], [0, 0, 1, 1], [], []>} : vector<4x1024xf32>, vector<1024x65xf32>, vector<4x65xf32> -> vector<4x65xf32>
      %c0_22 = arith.constant 0 : index
      %c0_23 = arith.constant 0 : index
      %30 = vector.load %arg7[%c0_22, %c0_23] : memref<1x65xf32, #tpu.memory_space<vmem>>, vector<1x65xf32>
      %31 = vector.broadcast %30 : vector<1x65xf32> to vector<4x65xf32>
      %32 = arith.addf %29, %31 : vector<4x65xf32>
      %33 = vector.extract_strided_slice %32 {offsets = [0, 0], sizes = [2, 65], strides = [1, 1]} : vector<4x65xf32> to vector<2x65xf32>
      %cst_24 = arith.constant dense<0.000000e+00> : vector<65xf32>
      %34 = vector.multi_reduction <add>, %33, %cst_24 [0] : vector<2x65xf32> to vector<65xf32>
      %35 = vector.shape_cast %34 : vector<65xf32> to vector<1x65xf32>
      %36 = vector.extract_strided_slice %32 {offsets = [2, 0], sizes = [2, 65], strides = [1, 1]} : vector<4x65xf32> to vector<2x65xf32>
      %cst_25 = arith.constant dense<0.000000e+00> : vector<65xf32>
      %37 = vector.multi_reduction <add>, %36, %cst_25 [0] : vector<2x65xf32> to vector<65xf32>
      %38 = vector.shape_cast %37 : vector<65xf32> to vector<1x65xf32>
      %39 = tpu.concatenate %35, %38 in 0 : vector<1x65xf32>, vector<1x65xf32> -> vector<2x65xf32>
      %c0_26 = arith.constant 0 : index
      %c0_27 = arith.constant 0 : index
      %40 = vector.load %arg8[%c0_26, %c0_27] : memref<2x65xf32, #tpu.memory_space<vmem>>, vector<2x65xf32>
      tpu.vector_store %arg8[%c0_26, %c0_27], %39 {strides = array<i32>} : memref<2x65xf32, #tpu.memory_space<vmem>>, vector<2x65xf32>,
    } else {
    }
    return
  }
  func.func @transform_0(%arg0: i32) -> (i32, i32) {
    %c0_i32 = arith.constant 0 : i32
    %c0_i32_0 = arith.constant 0 : i32
    return %c0_i32, %arg0 : i32, i32
  }
  func.func @transform_1(%arg0: i32) -> (i32, i32) {
    %c0_i32 = arith.constant 0 : i32
    %c0_i32_0 = arith.constant 0 : i32
    %c0_i32_1 = arith.constant 0 : i32
    return %c0_i32, %c0_i32_0 : i32, i32
  }
  func.func @transform_2(%arg0: i32) -> (i32, i32) {
    %c0_i32 = arith.constant 0 : i32
    %c0_i32_0 = arith.constant 0 : i32
    return %arg0, %c0_i32 : i32, i32
  }
  func.func @transform_3(%arg0: i32) -> (i32, i32) {
    %c0_i32 = arith.constant 0 : i32
    %c0_i32_0 = arith.constant 0 : i32
    %c0_i32_1 = arith.constant 0 : i32
    return %c0_i32, %c0_i32_0 : i32, i32
  }
  func.func @transform_4(%arg0: i32) -> (i32, i32) {
    %c0_i32 = arith.constant 0 : i32
    %c0_i32_0 = arith.constant 0 : i32
    %c0_i32_1 = arith.constant 0 : i32
    return %c0_i32, %c0_i32_0 : i32, i32
  }
  func.func @transform_5(%arg0: i32) -> (i32, i32) {
    %c0_i32 = arith.constant 0 : i32
    %c0_i32_0 = arith.constant 0 : i32
    %c0_i32_1 = arith.constant 0 : i32
    return %c0_i32, %c0_i32_0 : i32, i32
  }
  func.func @transform_6(%arg0: i32) -> (i32, i32) {
    %c0_i32 = arith.constant 0 : i32
    %c0_i32_0 = arith.constant 0 : i32
    %c0_i32_1 = arith.constant 0 : i32
    return %c0_i32, %c0_i32_0 : i32, i32
  }
  func.func @transform_7(%arg0: i32) -> (i32, i32) {
    %c0_i32 = arith.constant 0 : i32
    %c0_i32_0 = arith.constant 0 : i32
    %c0_i32_1 = arith.constant 0 : i32
    return %c0_i32, %c0_i32_0 : i32, i32
  }
}

</mosaic_0001>

<bundles_post_ra>
// kernel: fdc6_forward.3
= control target key start
LH: loop header
LB: loop body
LE: loop exit
PB: predicated region body
PF: predicated region fallthrough
CT: control target
= control target key end

     0   :  { %12 = vsyncpa [#allocation4], 0  ;;  %s2344_s24 = smov 0   ;;  %s3549_s0 = inlined_call_operand.vmem [shape: f32[2,2048], index: 0, kind: input, shape index: {}]   ;;  %s3550_s1 = inlined_call_operand.vmem [shape: f32[2,128], index: 1, kind: input, shape index: {}]   ;;  %s3551_s2 = inlined_call_operand.vmem [shape: f32[2048,1024], index: 2, kind: input, shape index: {}]   ;;  %s3552_s3 = inlined_call_operand.vmem [shape: f32[128,1024], index: 3, kind: input, shape index: {}]   ;;  %s3553_s4 = inlined_call_operand.vmem [shape: f32[1,1024], index: 4, kind: input, shape index: {}]   ;;  %s3554_s5 = inlined_call_operand.vmem [shape: f32[1024,65], index: 5, kind: input, shape index: {}]   ;;  %s3555_s6 = inlined_call_operand.vmem [shape: f32[1,65], index: 6, kind: input, shape index: {}]   ;;  %s3556_s7 = inlined_call_operand.hbm [shape: f32[2,65], index: 7, kind: output, shape index: {}]  }
   0x1 LB: > { %s2350_s25 = sadd.s32 4294967295, %s2298_s24   ;;  %p2091_p0 = scmp.ge.s32.totalorder %s2298_s24, 1  ;;  %s2298_s24 = sphi %s2344_s24, %s18_s24  }
   0x2   : > { %p246_p1 = scmp.lt.s32.totalorder %s2298_s24, 9 }
   0x4   : > { %p247_p2 = pnand %p2091_p0, %p246_p1 }
   0x5   : > { %s2092_s26 = sshll.u32 (!%p247_p2), %s2350_s25, 1  ;;  %s2094_s27 = sshll.u32 (!%p247_p2), %s2350_s25, 5 }
   0x6   : > { %250 = sbr.rel (%p247_p2) target bundleno = 861 (0x35d), region = 48  ;;  %p280_p3 = scmp.lt.s32.totalorder (!%p247_p2), %s2092_s26, 15 }
   0x7   : > { %p286_p4 = scmp.lt.s32.totalorder (!%p247_p2), %s2094_s27, 255  ;;  %p2097_p5 = scmp.ne.s32.totalorder (!%p247_p2), %s2350_s25, 0 }
   0xb   : > { %s3558_s26 = smov (!%p280_p3, %s2092_s26), 15  ;;  %s3560_s27 = smov (!%p286_p4, %s2094_s27), 255 }
   0xc   : > { %s2093_s28 = sshll.u32 %s3558_s26, 1  ;;  %s2105_s9 = sshll.u32 %s3560_s27, 6 }
   0xd   : > { %s2359_s8 = scalar_lea.vmem %s3549_s0, %s2093_s28  ;;  %s2364_s12 = scalar_lea.vmem %s3551_s2, %s2105_s9 }
   0xe   : > { %295 = sbr.rel (%p2097_p5) target bundleno = 21 (0x15), region = 52 }
  0x13   : > { %v2300_v0 = vmov 0.0  }
  0x14   : > { %296 = vst [vmem:[#allocation2] sm:$0xff] %v2300_v0  ;;  %297 = vst [vmem:[#allocation2 + $0x8] sm:$0xff] %v2300_v0 }
  0x15 PF: > { %v422_v1 = vld [vmem:[%s2364_s12 + $0x3c8] sm:$0xff]  ;;  %v424_v2 = vld [vmem:[%s2364_s12 + $0x3d8] sm:$0xff]  ;;  %v421_v3 = vld [vmem:[%s2364_s12 + $0x3c0] sm:$0xff]  ;;  %p2099_p6 = scmp.ne.s32.totalorder %s2350_s25, 7 }
  0x16   : > { %568 = vmatprep.subr.mxu0 %v422_v1  ;;  %639 = vmatprep.subr.mxu1 %v424_v2  ;;  %v423_v4 = vld [vmem:[%s2364_s12 + $0x3d0] sm:$0xff]  ;;  %v414_v5 = vld [vmem:[%s2364_s12 + $0x388] sm:$0xff]  ;;  %v416_v6 = vld [vmem:[%s2364_s12 + $0x398] sm:$0xff] }
  0x17   : > { %569 = vmatpush1.msra.mxu0 %v421_v3  ;;  %640 = vmatpush1.msra.mxu1 %v423_v4  ;;  %v413_v7 = vld [vmem:[%s2364_s12 + $0x380] sm:$0xff]  ;;  %v415_v8 = vld [vmem:[%s2364_s12 + $0x390] sm:$0xff]  ;;  %v406_v9 = vld [vmem:[%s2364_s12 + $0x348] sm:$0xff] }
  0x18   : > { %570 = vmatprep.subr.mxu0 %v414_v5  ;;  %641 = vmatprep.subr.mxu1 %v416_v6  ;;  %v408_v10 = vld [vmem:[%s2364_s12 + $0x358] sm:$0xff]  ;;  %v405_v11 = vld [vmem:[%s2364_s12 + $0x340] sm:$0xff]  ;;  %v407_v12 = vld [vmem:[%s2364_s12 + $0x350] sm:$0xff] }
  0x19   : > { %571 = vmatpush1.msra.mxu0 %v413_v7  ;;  %642 = vmatpush1.msra.mxu1 %v415_v8  ;;  %v398_v13 = vld [vmem:[%s2364_s12 + $0x308] sm:$0xff]  ;;  %v400_v14 = vld [vmem:[%s2364_s12 + $0x318] sm:$0xff]  ;;  %v397_v15 = vld [vmem:[%s2364_s12 + $0x300] sm:$0xff] }
  0x1a   : > { %572 = vmatprep.subr.mxu0 %v406_v9  ;;  %643 = vmatprep.subr.mxu1 %v408_v10  ;;  %v399_v16 = vld [vmem:[%s2364_s12 + $0x310] sm:$0xff]  ;;  %v390_v17 = vld [vmem:[%s2364_s12 + $0x2c8] sm:$0xff]  ;;  %v392_v18 = vld [vmem:[%s2364_s12 + $0x2d8] sm:$0xff] }
  0x1b   : > { %573 = vmatpush1.msra.mxu0 %v405_v11  ;;  %644 = vmatpush1.msra.mxu1 %v407_v12  ;;  %v389_v19 = vld [vmem:[%s2364_s12 + $0x2c0] sm:$0xff]  ;;  %v391_v20 = vld [vmem:[%s2364_s12 + $0x2d0] sm:$0xff]  ;;  %v382_v21 = vld [vmem:[%s2364_s12 + $0x288] sm:$0xff] }
  0x1c   : > { %574 = vmatprep.subr.mxu0 %v398_v13  ;;  %645 = vmatprep.subr.mxu1 %v400_v14  ;;  %v384_v22 = vld [vmem:[%s2364_s12 + $0x298] sm:$0xff]  ;;  %v381_v23 = vld [vmem:[%s2364_s12 + $0x280] sm:$0xff]  ;;  %v383_v24 = vld [vmem:[%s2364_s12 + $0x290] sm:$0xff] }
  0x1d   : > { %575 = vmatpush1.msra.mxu0 %v397_v15  ;;  %646 = vmatpush1.msra.mxu1 %v399_v16  ;;  %v374_v25 = vld [vmem:[%s2364_s12 + $0x248] sm:$0xff]  ;;  %v376_v26 = vld [vmem:[%s2364_s12 + $0x258] sm:$0xff]  ;;  %v373_v27 = vld [vmem:[%s2364_s12 + $0x240] sm:$0xff] }
  0x1e   : > { %576 = vmatprep.subr.mxu0 %v390_v17  ;;  %647 = vmatprep.subr.mxu1 %v392_v18  ;;  %v375_v28 = vld [vmem:[%s2364_s12 + $0x250] sm:$0xff]  ;;  %v366_v29 = vld [vmem:[%s2364_s12 + $0x208] sm:$0xff]  ;;  %v368_v30 = vld [vmem:[%s2364_s12 + $0x218] sm:$0xff] }
  0x1f   : > { %577 = vmatpush1.msra.mxu0 %v389_v19  ;;  %648 = vmatpush1.msra.mxu1 %v391_v20  ;;  %v365_v31 = vld [vmem:[%s2364_s12 + $0x200] sm:$0xff]  ;;  %v367_v32 = vld [vmem:[%s2364_s12 + $0x210] sm:$0xff]  ;;  %v358_v33 = vld [vmem:[%s2364_s12 + $0x1c8] sm:$0xff] }
  0x20   : > { %578 = vmatprep.subr.mxu0 %v382_v21  ;;  %649 = vmatprep.subr.mxu1 %v384_v22  ;;  %v360_v34 = vld [vmem:[%s2364_s12 + $0x1d8] sm:$0xff]  ;;  %v357_v35 = vld [vmem:[%s2364_s12 + $0x1c0] sm:$0xff]  ;;  %v359_v36 = vld [vmem:[%s2364_s12 + $0x1d0] sm:$0xff] }
  0x21   : > { %579 = vmatpush1.msra.mxu0 %v381_v23  ;;  %650 = vmatpush1.msra.mxu1 %v383_v24  ;;  %v350_v37 = vld [vmem:[%s2364_s12 + $0x188] sm:$0xff]  ;;  %v352_v38 = vld [vmem:[%s2364_s12 + $0x198] sm:$0xff]  ;;  %v349_v39 = vld [vmem:[%s2364_s12 + $0x180] sm:$0xff] }
  0x22   : > { %580 = vmatprep.subr.mxu0 %v374_v25  ;;  %651 = vmatprep.subr.mxu1 %v376_v26  ;;  %v351_v40 = vld [vmem:[%s2364_s12 + $0x190] sm:$0xff]  ;;  %v342_v41 = vld [vmem:[%s2364_s12 + $0x148] sm:$0xff]  ;;  %v344_v42 = vld [vmem:[%s2364_s12 + $0x158] sm:$0xff] }
  0x23   : > { %581 = vmatpush1.msra.mxu0 %v373_v27  ;;  %652 = vmatpush1.msra.mxu1 %v375_v28  ;;  %v341_v43 = vld [vmem:[%s2364_s12 + $0x140] sm:$0xff]  ;;  %v343_v44 = vld [vmem:[%s2364_s12 + $0x150] sm:$0xff]  ;;  %v334_v45 = vld [vmem:[%s2364_s12 + $0x108] sm:$0xff] }
  0x24   : > { %582 = vmatprep.subr.mxu0 %v366_v29  ;;  %653 = vmatprep.subr.mxu1 %v368_v30  ;;  %v336_v46 = vld [vmem:[%s2364_s12 + $0x118] sm:$0xff]  ;;  %v333_v47 = vld [vmem:[%s2364_s12 + $0x100] sm:$0xff]  ;;  %v335_v48 = vld [vmem:[%s2364_s12 + $0x110] sm:$0xff] }
  0x25   : > { %583 = vmatpush1.msra.mxu0 %v365_v31  ;;  %654 = vmatpush1.msra.mxu1 %v367_v32  ;;  %v326_v49 = vld [vmem:[%s2364_s12 + $0xc8] sm:$0xff]  ;;  %v328_v50 = vld [vmem:[%s2364_s12 + $0xd8] sm:$0xff]  ;;  %v325_v51 = vld [vmem:[%s2364_s12 + $0xc0] sm:$0xff] }
  0x26   : > { %584 = vmatprep.subr.mxu0 %v358_v33  ;;  %655 = vmatprep.subr.mxu1 %v360_v34  ;;  %v327_v52 = vld [vmem:[%s2364_s12 + $0xd0] sm:$0xff]  ;;  %v318_v53 = vld [vmem:[%s2364_s12 + $0x88] sm:$0xff]  ;;  %v320_v54 = vld [vmem:[%s2364_s12 + $0x98] sm:$0xff] }
  0x27   : > { %585 = vmatpush1.msra.mxu0 %v357_v35  ;;  %656 = vmatpush1.msra.mxu1 %v359_v36  ;;  %v317_v55 = vld [vmem:[%s2364_s12 + $0x80] sm:$0xff]  ;;  %v319_v56 = vld [vmem:[%s2364_s12 + $0x90] sm:$0xff]  ;;  %v310_v57 = vld [vmem:[%s2364_s12 + $0x48] sm:$0xff] }
  0x28   : > { %586 = vmatprep.subr.mxu0 %v350_v37  ;;  %657 = vmatprep.subr.mxu1 %v352_v38  ;;  %v312_v58 = vld [vmem:[%s2364_s12 + $0x58] sm:$0xff]  ;;  %v309_v59 = vld [vmem:[%s2364_s12 + $0x40] sm:$0xff]  ;;  %v311_v60 = vld [vmem:[%s2364_s12 + $0x50] sm:$0xff] }
  0x29   : > { %587 = vmatpush1.msra.mxu0 %v349_v39  ;;  %658 = vmatpush1.msra.mxu1 %v351_v40  ;;  %v302_v61 = vld [vmem:[%s2364_s12 + $0x8] sm:$0xff]  ;;  %v304_v62 = vld [vmem:[%s2364_s12 + $0x18] sm:$0xff]  ;;  %v301_v63 = vld [vmem:[%s2364_s12] sm:$0xff] }
  0x2a   : > { %588 = vmatprep.subr.mxu0 %v342_v41  ;;  %659 = vmatprep.subr.mxu1 %v344_v42  ;;  %v303_v0 = vld [vmem:[%s2364_s12 + $0x10] sm:$0xff]  ;;  %v550_v1 = vld [vmem:[%s2364_s12 + $0x7c8] sm:$0xff]  ;;  %v552_v2 = vld [vmem:[%s2364_s12 + $0x7d8] sm:$0xff] }
  0x2b   : > { %589 = vmatpush1.msra.mxu0 %v341_v43  ;;  %660 = vmatpush1.msra.mxu1 %v343_v44  ;;  %v549_v3 = vld [vmem:[%s2364_s12 + $0x7c0] sm:$0xff]  ;;  %v551_v4 = vld [vmem:[%s2364_s12 + $0x7d0] sm:$0xff]  ;;  %v542_v5 = vld [vmem:[%s2364_s12 + $0x788] sm:$0xff] }
  0x2c   : > { %590 = vmatprep.subr.mxu0 %v334_v45  ;;  %661 = vmatprep.subr.mxu1 %v336_v46  ;;  %v544_v6 = vld [vmem:[%s2364_s12 + $0x798] sm:$0xff]  ;;  %v541_v7 = vld [vmem:[%s2364_s12 + $0x780] sm:$0xff]  ;;  %v543_v8 = vld [vmem:[%s2364_s12 + $0x790] sm:$0xff] }
  0x2d   : > { %591 = vmatpush1.msra.mxu0 %v333_v47  ;;  %662 = vmatpush1.msra.mxu1 %v335_v48  ;;  %v534_v9 = vld [vmem:[%s2364_s12 + $0x748] sm:$0xff]  ;;  %v536_v10 = vld [vmem:[%s2364_s12 + $0x758] sm:$0xff]  ;;  %v533_v11 = vld [vmem:[%s2364_s12 + $0x740] sm:$0xff] }
  0x2e   : > { %592 = vmatprep.subr.mxu0 %v326_v49  ;;  %663 = vmatprep.subr.mxu1 %v328_v50  ;;  %v535_v12 = vld [vmem:[%s2364_s12 + $0x750] sm:$0xff]  ;;  %v526_v13 = vld [vmem:[%s2364_s12 + $0x708] sm:$0xff]  ;;  %v528_v14 = vld [vmem:[%s2364_s12 + $0x718] sm:$0xff] }
  0x2f   : > { %593 = vmatpush1.msra.mxu0 %v325_v51  ;;  %664 = vmatpush1.msra.mxu1 %v327_v52  ;;  %v525_v15 = vld [vmem:[%s2364_s12 + $0x700] sm:$0xff]  ;;  %v527_v16 = vld [vmem:[%s2364_s12 + $0x710] sm:$0xff]  ;;  %v518_v17 = vld [vmem:[%s2364_s12 + $0x6c8] sm:$0xff] }
  0x30   : > { %594 = vmatprep.subr.mxu0 %v318_v53  ;;  %665 = vmatprep.subr.mxu1 %v320_v54  ;;  %v520_v18 = vld [vmem:[%s2364_s12 + $0x6d8] sm:$0xff]  ;;  %v517_v19 = vld [vmem:[%s2364_s12 + $0x6c0] sm:$0xff]  ;;  %v519_v20 = vld [vmem:[%s2364_s12 + $0x6d0] sm:$0xff] }
  0x31   : > { %595 = vmatpush1.msra.mxu0 %v317_v55  ;;  %666 = vmatpush1.msra.mxu1 %v319_v56  ;;  %v510_v21 = vld [vmem:[%s2364_s12 + $0x688] sm:$0xff]  ;;  %v512_v22 = vld [vmem:[%s2364_s12 + $0x698] sm:$0xff]  ;;  %v509_v23 = vld [vmem:[%s2364_s12 + $0x680] sm:$0xff] }
  0x32   : > { %596 = vmatprep.subr.mxu0 %v310_v57  ;;  %667 = vmatprep.subr.mxu1 %v312_v58  ;;  %v511_v24 = vld [vmem:[%s2364_s12 + $0x690] sm:$0xff]  ;;  %v502_v25 = vld [vmem:[%s2364_s12 + $0x648] sm:$0xff]  ;;  %v504_v26 = vld [vmem:[%s2364_s12 + $0x658] sm:$0xff] }
  0x33   : > { %597 = vmatpush1.msra.mxu0 %v309_v59  ;;  %668 = vmatpush1.msra.mxu1 %v311_v60  ;;  %v501_v27 = vld [vmem:[%s2364_s12 + $0x640] sm:$0xff]  ;;  %v503_v28 = vld [vmem:[%s2364_s12 + $0x650] sm:$0xff]  ;;  %v494_v29 = vld [vmem:[%s2364_s12 + $0x608] sm:$0xff] }
  0x34   : > { %598 = vmatprep.subr.mxu0 %v302_v61  ;;  %669 = vmatprep.subr.mxu1 %v304_v62  ;;  %v496_v30 = vld [vmem:[%s2364_s12 + $0x618] sm:$0xff]  ;;  %v493_v31 = vld [vmem:[%s2364_s12 + $0x600] sm:$0xff]  ;;  %v495_v32 = vld [vmem:[%s2364_s12 + $0x610] sm:$0xff] }
  0x35   : > { %599 = vmatpush1.msra.mxu0 %v301_v63  ;;  %670 = vmatpush1.msra.mxu1 %v303_v0  ;;  %v486_v33 = vld [vmem:[%s2364_s12 + $0x5c8] sm:$0xff]  ;;  %v488_v34 = vld [vmem:[%s2364_s12 + $0x5d8] sm:$0xff]  ;;  %v485_v35 = vld [vmem:[%s2364_s12 + $0x5c0] sm:$0xff] }
  0x36   : > { %600 = vmatprep.subr.mxu0 %v550_v1  ;;  %671 = vmatprep.subr.mxu1 %v552_v2  ;;  %v487_v36 = vld [vmem:[%s2364_s12 + $0x5d0] sm:$0xff]  ;;  %v478_v37 = vld [vmem:[%s2364_s12 + $0x588] sm:$0xff]  ;;  %v480_v38 = vld [vmem:[%s2364_s12 + $0x598] sm:$0xff] }
  0x37   : > { %601 = vmatpush2.msra.mxu0 %v549_v3  ;;  %672 = vmatpush2.msra.mxu1 %v551_v4  ;;  %v477_v39 = vld [vmem:[%s2364_s12 + $0x580] sm:$0xff]  ;;  %v479_v40 = vld [vmem:[%s2364_s12 + $0x590] sm:$0xff]  ;;  %v470_v41 = vld [vmem:[%s2364_s12 + $0x548] sm:$0xff] }
  0x38   : > { %602 = vmatprep.subr.mxu0 %v542_v5  ;;  %673 = vmatprep.subr.mxu1 %v544_v6  ;;  %v472_v42 = vld [vmem:[%s2364_s12 + $0x558] sm:$0xff]  ;;  %v469_v43 = vld [vmem:[%s2364_s12 + $0x540] sm:$0xff]  ;;  %v471_v44 = vld [vmem:[%s2364_s12 + $0x550] sm:$0xff] }
  0x39   : > { %603 = vmatpush2.msra.mxu0 %v541_v7  ;;  %674 = vmatpush2.msra.mxu1 %v543_v8  ;;  %v462_v45 = vld [vmem:[%s2364_s12 + $0x508] sm:$0xff]  ;;  %v464_v46 = vld [vmem:[%s2364_s12 + $0x518] sm:$0xff]  ;;  %v461_v47 = vld [vmem:[%s2364_s12 + $0x500] sm:$0xff] }
  0x3a   : > { %604 = vmatprep.subr.mxu0 %v534_v9  ;;  %675 = vmatprep.subr.mxu1 %v536_v10  ;;  %v463_v48 = vld [vmem:[%s2364_s12 + $0x510] sm:$0xff]  ;;  %v454_v49 = vld [vmem:[%s2364_s12 + $0x4c8] sm:$0xff]  ;;  %v456_v50 = vld [vmem:[%s2364_s12 + $0x4d8] sm:$0xff] }
  0x3b   : > { %605 = vmatpush2.msra.mxu0 %v533_v11  ;;  %676 = vmatpush2.msra.mxu1 %v535_v12  ;;  %v453_v51 = vld [vmem:[%s2364_s12 + $0x4c0] sm:$0xff]  ;;  %v455_v52 = vld [vmem:[%s2364_s12 + $0x4d0] sm:$0xff]  ;;  %v446_v53 = vld [vmem:[%s2364_s12 + $0x488] sm:$0xff] }
  0x3c   : > { %606 = vmatprep.subr.mxu0 %v526_v13  ;;  %677 = vmatprep.subr.mxu1 %v528_v14  ;;  %v448_v54 = vld [vmem:[%s2364_s12 + $0x498] sm:$0xff]  ;;  %v445_v55 = vld [vmem:[%s2364_s12 + $0x480] sm:$0xff]  ;;  %v447_v56 = vld [vmem:[%s2364_s12 + $0x490] sm:$0xff] }
  0x3d   : > { %607 = vmatpush2.msra.mxu0 %v525_v15  ;;  %678 = vmatpush2.msra.mxu1 %v527_v16  ;;  %v2488_v57 = vld.sshfl [vmem:[%s2359_s8] sm:$0x33 pattern:$0x76325410]  ;;  %v438_v58 = vld [vmem:[%s2364_s12 + $0x448] sm:$0xff]  ;;  %v440_v59 = vld [vmem:[%s2364_s12 + $0x458] sm:$0xff] }
  0x3e   : > { %608 = vmatprep.subr.mxu0 %v518_v17  ;;  %679 = vmatprep.subr.mxu1 %v520_v18  ;;  %v437_v60 = vld [vmem:[%s2364_s12 + $0x440] sm:$0xff]  ;;  %v439_v61 = vld [vmem:[%s2364_s12 + $0x450] sm:$0xff]  ;;  %v430_v62 = vld [vmem:[%s2364_s12 + $0x408] sm:$0xff]  ;;  %v2498_v0 = vcombine.high %v2488_v57, %v2488_v57 }
  0x3f   : > { %609 = vmatpush2.msra.mxu0 %v517_v19  ;;  %680 = vmatpush2.msra.mxu1 %v519_v20  ;;  %v432_v63 = vld [vmem:[%s2364_s12 + $0x418] sm:$0xff]  ;;  %v429_v1 = vld [vmem:[%s2364_s12 + $0x400] sm:$0xff]  ;;  %v431_v2 = vld [vmem:[%s2364_s12 + $0x410] sm:$0xff] }
  0x40   : > { %610 = vmatprep.subr.mxu0 %v510_v21  ;;  %681 = vmatprep.subr.mxu1 %v512_v22  ;;  %v426_v3 = vld [vmem:[%s2364_s12 + $0x3e8] sm:$0xff]  ;;  %v428_v4 = vld [vmem:[%s2364_s12 + $0x3f8] sm:$0xff]  ;;  %v425_v5 = vld [vmem:[%s2364_s12 + $0x3e0] sm:$0xff] }
  0x41   : > { %611 = vmatpush2.msra.mxu0 %v509_v23  ;;  %682 = vmatpush2.msra.mxu1 %v511_v24  ;;  %v427_v6 = vld [vmem:[%s2364_s12 + $0x3f0] sm:$0xff]  ;;  %v418_v7 = vld [vmem:[%s2364_s12 + $0x3a8] sm:$0xff]  ;;  %v420_v8 = vld [vmem:[%s2364_s12 + $0x3b8] sm:$0xff] }
  0x42   : > { %612 = vmatprep.subr.mxu0 %v502_v25  ;;  %683 = vmatprep.subr.mxu1 %v504_v26  ;;  %v417_v9 = vld [vmem:[%s2364_s12 + $0x3a0] sm:$0xff]  ;;  %v419_v10 = vld [vmem:[%s2364_s12 + $0x3b0] sm:$0xff]  ;;  %v410_v11 = vld [vmem:[%s2364_s12 + $0x368] sm:$0xff] }
  0x43   : > { %613 = vmatpush2.msra.mxu0 %v501_v27  ;;  %684 = vmatpush2.msra.mxu1 %v503_v28  ;;  %v412_v12 = vld [vmem:[%s2364_s12 + $0x378] sm:$0xff]  ;;  %v409_v13 = vld [vmem:[%s2364_s12 + $0x360] sm:$0xff]  ;;  %v411_v14 = vld [vmem:[%s2364_s12 + $0x370] sm:$0xff] }
  0x44   : > { %614 = vmatprep.subr.mxu0 %v494_v29  ;;  %685 = vmatprep.subr.mxu1 %v496_v30  ;;  %v402_v15 = vld [vmem:[%s2364_s12 + $0x328] sm:$0xff]  ;;  %v404_v16 = vld [vmem:[%s2364_s12 + $0x338] sm:$0xff]  ;;  %v401_v17 = vld [vmem:[%s2364_s12 + $0x320] sm:$0xff] }
  0x45   : > { %615 = vmatpush2.msra.mxu0 %v493_v31  ;;  %686 = vmatpush2.msra.mxu1 %v495_v32  ;;  %v403_v18 = vld [vmem:[%s2364_s12 + $0x330] sm:$0xff]  ;;  %v394_v19 = vld [vmem:[%s2364_s12 + $0x2e8] sm:$0xff]  ;;  %v396_v20 = vld [vmem:[%s2364_s12 + $0x2f8] sm:$0xff] }
  0x46   : > { %616 = vmatprep.subr.mxu0 %v486_v33  ;;  %687 = vmatprep.subr.mxu1 %v488_v34  ;;  %v393_v21 = vld [vmem:[%s2364_s12 + $0x2e0] sm:$0xff]  ;;  %v395_v22 = vld [vmem:[%s2364_s12 + $0x2f0] sm:$0xff]  ;;  %v386_v23 = vld [vmem:[%s2364_s12 + $0x2a8] sm:$0xff] }
  0x47   : > { %617 = vmatpush2.msra.mxu0 %v485_v35  ;;  %688 = vmatpush2.msra.mxu1 %v487_v36  ;;  %v388_v24 = vld [vmem:[%s2364_s12 + $0x2b8] sm:$0xff]  ;;  %v385_v25 = vld [vmem:[%s2364_s12 + $0x2a0] sm:$0xff]  ;;  %v387_v26 = vld [vmem:[%s2364_s12 + $0x2b0] sm:$0xff] }
  0x48   : > { %618 = vmatprep.subr.mxu0 %v478_v37  ;;  %689 = vmatprep.subr.mxu1 %v480_v38  ;;  %v378_v27 = vld [vmem:[%s2364_s12 + $0x268] sm:$0xff]  ;;  %v380_v28 = vld [vmem:[%s2364_s12 + $0x278] sm:$0xff]  ;;  %v377_v29 = vld [vmem:[%s2364_s12 + $0x260] sm:$0xff] }
  0x49   : > { %619 = vmatpush2.msra.mxu0 %v477_v39  ;;  %690 = vmatpush2.msra.mxu1 %v479_v40  ;;  %v379_v30 = vld [vmem:[%s2364_s12 + $0x270] sm:$0xff]  ;;  %v370_v31 = vld [vmem:[%s2364_s12 + $0x228] sm:$0xff]  ;;  %v372_v32 = vld [vmem:[%s2364_s12 + $0x238] sm:$0xff] }
  0x4a   : > { %620 = vmatprep.subr.mxu0 %v470_v41  ;;  %691 = vmatprep.subr.mxu1 %v472_v42  ;;  %v369_v33 = vld [vmem:[%s2364_s12 + $0x220] sm:$0xff]  ;;  %v371_v34 = vld [vmem:[%s2364_s12 + $0x230] sm:$0xff]  ;;  %v362_v35 = vld [vmem:[%s2364_s12 + $0x1e8] sm:$0xff] }
  0x4b   : > { %621 = vmatpush2.msra.mxu0 %v469_v43  ;;  %692 = vmatpush2.msra.mxu1 %v471_v44  ;;  %v364_v36 = vld [vmem:[%s2364_s12 + $0x1f8] sm:$0xff]  ;;  %v361_v37 = vld [vmem:[%s2364_s12 + $0x1e0] sm:$0xff]  ;;  %v363_v38 = vld [vmem:[%s2364_s12 + $0x1f0] sm:$0xff] }
  0x4c   : > { %622 = vmatprep.subr.mxu0 %v462_v45  ;;  %693 = vmatprep.subr.mxu1 %v464_v46  ;;  %v354_v39 = vld [vmem:[%s2364_s12 + $0x1a8] sm:$0xff]  ;;  %v356_v40 = vld [vmem:[%s2364_s12 + $0x1b8] sm:$0xff]  ;;  %v353_v41 = vld [vmem:[%s2364_s12 + $0x1a0] sm:$0xff] }
  0x4d   : > { %623 = vmatpush2.msra.mxu0 %v461_v47  ;;  %694 = vmatpush2.msra.mxu1 %v463_v48  ;;  %v355_v42 = vld [vmem:[%s2364_s12 + $0x1b0] sm:$0xff]  ;;  %v346_v43 = vld [vmem:[%s2364_s12 + $0x168] sm:$0xff]  ;;  %v348_v44 = vld [vmem:[%s2364_s12 + $0x178] sm:$0xff] }
  0x4e   : > { %624 = vmatprep.subr.mxu0 %v454_v49  ;;  %695 = vmatprep.subr.mxu1 %v456_v50  ;;  %v345_v45 = vld [vmem:[%s2364_s12 + $0x160] sm:$0xff]  ;;  %v347_v46 = vld [vmem:[%s2364_s12 + $0x170] sm:$0xff]  ;;  %v338_v47 = vld [vmem:[%s2364_s12 + $0x128] sm:$0xff] }
  0x4f   : > { %625 = vmatpush2.msra.mxu0 %v453_v51  ;;  %696 = vmatpush2.msra.mxu1 %v455_v52  ;;  %v340_v48 = vld [vmem:[%s2364_s12 + $0x138] sm:$0xff]  ;;  %v337_v49 = vld [vmem:[%s2364_s12 + $0x120] sm:$0xff]  ;;  %v339_v50 = vld [vmem:[%s2364_s12 + $0x130] sm:$0xff] }
  0x50   : > { %626 = vmatprep.subr.mxu0 %v446_v53  ;;  %697 = vmatprep.subr.mxu1 %v448_v54  ;;  %v330_v51 = vld [vmem:[%s2364_s12 + $0xe8] sm:$0xff]  ;;  %v332_v52 = vld [vmem:[%s2364_s12 + $0xf8] sm:$0xff]  ;;  %v329_v53 = vld [vmem:[%s2364_s12 + $0xe0] sm:$0xff] }
  0x51   : > { %627 = vmatpush2.msra.mxu0 %v445_v55  ;;  %698 = vmatpush2.msra.mxu1 %v447_v56  ;;  %v331_v54 = vld [vmem:[%s2364_s12 + $0xf0] sm:$0xff]  ;;  %v322_v55 = vld [vmem:[%s2364_s12 + $0xa8] sm:$0xff]  ;;  %v324_v56 = vld [vmem:[%s2364_s12 + $0xb8] sm:$0xff] }
  0x52   : > { %628 = vmatprep.subr.mxu0 %v438_v58  ;;  %699 = vmatprep.subr.mxu1 %v440_v59  ;;  %v321_v58 = vld [vmem:[%s2364_s12 + $0xa0] sm:$0xff]  ;;  %v323_v59 = vld [vmem:[%s2364_s12 + $0xb0] sm:$0xff] }
  0x53   : > { %629 = vmatpush2.msra.mxu0 %v437_v60  ;;  %700 = vmatpush2.msra.mxu1 %v439_v61  ;;  %v314_v60 = vld [vmem:[%s2364_s12 + $0x68] sm:$0xff]  ;;  %v316_v61 = vld [vmem:[%s2364_s12 + $0x78] sm:$0xff] }
  0x54   : > { %630 = vmatprep.subr.mxu0 %v430_v62  ;;  %701 = vmatprep.subr.mxu1 %v432_v63  ;;  %v313_v62 = vld [vmem:[%s2364_s12 + $0x60] sm:$0xff]  ;;  %v315_v63 = vld [vmem:[%s2364_s12 + $0x70] sm:$0xff] }
  0x55   : > { %631 = vmatpush2.msra.mxu0 %v429_v1  ;;  %632 = vmatprep.mubr.f32.mxu0 %v2498_v0  ;;  %v306_v1 = vld [vmem:[%s2364_s12 + $0x28] sm:$0xff] }
  0x56   : > { %702 = vmatpush2.msra.mxu1 %v431_v2  ;;  %703 = vmatprep.mubr.f32.mxu1 %v2498_v0  ;;  %v308_v2 = vld [vmem:[%s2364_s12 + $0x38] sm:$0xff] }
  0x57   : > { %633 = vmatmul.mubr.f32.vlgmr.msra.gmra.mxu0 %v2488_v57  ;;  %704 = vmatmul.mubr.f32.vlgmr.msra.gmra.mxu1 %v2488_v57 }
  0x58   : > { %710 = vmatprep.subr.mxu0 %v426_v3  ;;  %781 = vmatprep.subr.mxu1 %v428_v4  ;;  %v305_v3 = vld [vmem:[%s2364_s12 + $0x20] sm:$0xff]  ;;  %v307_v4 = vld [vmem:[%s2364_s12 + $0x30] sm:$0xff] }
  0x59   : > { %711 = vmatpush1.msra.mxu0 %v425_v5  ;;  %782 = vmatpush1.msra.mxu1 %v427_v6  ;;  %v554_v5 = vld [vmem:[%s2364_s12 + $0x7e8] sm:$0xff]  ;;  %v556_v6 = vld [vmem:[%s2364_s12 + $0x7f8] sm:$0xff] }
  0x5a   : > { %712 = vmatprep.subr.mxu0 %v418_v7  ;;  %783 = vmatprep.subr.mxu1 %v420_v8  ;;  %v553_v7 = vld [vmem:[%s2364_s12 + $0x7e0] sm:$0xff]  ;;  %v555_v8 = vld [vmem:[%s2364_s12 + $0x7f0] sm:$0xff] }
  0x5b   : > { %713 = vmatpush1.msra.mxu0 %v417_v9  ;;  %784 = vmatpush1.msra.mxu1 %v419_v10  ;;  %v546_v9 = vld [vmem:[%s2364_s12 + $0x7a8] sm:$0xff]  ;;  %v548_v10 = vld [vmem:[%s2364_s12 + $0x7b8] sm:$0xff] }
  0x5c   : > { %714 = vmatprep.subr.mxu0 %v410_v11  ;;  %785 = vmatprep.subr.mxu1 %v412_v12  ;;  %v545_v11 = vld [vmem:[%s2364_s12 + $0x7a0] sm:$0xff]  ;;  %v547_v12 = vld [vmem:[%s2364_s12 + $0x7b0] sm:$0xff] }
  0x5d   : > { %715 = vmatpush1.msra.mxu0 %v409_v13  ;;  %786 = vmatpush1.msra.mxu1 %v411_v14  ;;  %v538_v13 = vld [vmem:[%s2364_s12 + $0x768] sm:$0xff]  ;;  %v540_v14 = vld [vmem:[%s2364_s12 + $0x778] sm:$0xff] }
  0x5e   : > { %716 = vmatprep.subr.mxu0 %v402_v15  ;;  %787 = vmatprep.subr.mxu1 %v404_v16  ;;  %v537_v15 = vld [vmem:[%s2364_s12 + $0x760] sm:$0xff]  ;;  %v539_v16 = vld [vmem:[%s2364_s12 + $0x770] sm:$0xff] }
  0x5f   : > { %717 = vmatpush1.msra.mxu0 %v401_v17  ;;  %788 = vmatpush1.msra.mxu1 %v403_v18  ;;  %v530_v17 = vld [vmem:[%s2364_s12 + $0x728] sm:$0xff]  ;;  %v532_v18 = vld [vmem:[%s2364_s12 + $0x738] sm:$0xff] }
  0x60   : > { %718 = vmatprep.subr.mxu0 %v394_v19  ;;  %789 = vmatprep.subr.mxu1 %v396_v20  ;;  %v529_v19 = vld [vmem:[%s2364_s12 + $0x720] sm:$0xff]  ;;  %v531_v20 = vld [vmem:[%s2364_s12 + $0x730] sm:$0xff] }
  0x61   : > { %719 = vmatpush1.msra.mxu0 %v393_v21  ;;  %790 = vmatpush1.msra.mxu1 %v395_v22  ;;  %v522_v21 = vld [vmem:[%s2364_s12 + $0x6e8] sm:$0xff]  ;;  %v524_v22 = vld [vmem:[%s2364_s12 + $0x6f8] sm:$0xff] }
  0x62   : > { %720 = vmatprep.subr.mxu0 %v386_v23  ;;  %791 = vmatprep.subr.mxu1 %v388_v24  ;;  %v521_v23 = vld [vmem:[%s2364_s12 + $0x6e0] sm:$0xff]  ;;  %v523_v24 = vld [vmem:[%s2364_s12 + $0x6f0] sm:$0xff] }
  0x63   : > { %721 = vmatpush1.msra.mxu0 %v385_v25  ;;  %792 = vmatpush1.msra.mxu1 %v387_v26  ;;  %v514_v25 = vld [vmem:[%s2364_s12 + $0x6a8] sm:$0xff]  ;;  %v516_v26 = vld [vmem:[%s2364_s12 + $0x6b8] sm:$0xff] }
  0x64   : > { %722 = vmatprep.subr.mxu0 %v378_v27  ;;  %793 = vmatprep.subr.mxu1 %v380_v28  ;;  %v513_v27 = vld [vmem:[%s2364_s12 + $0x6a0] sm:$0xff]  ;;  %v515_v28 = vld [vmem:[%s2364_s12 + $0x6b0] sm:$0xff] }
  0x65   : > { %723 = vmatpush1.msra.mxu0 %v377_v29  ;;  %794 = vmatpush1.msra.mxu1 %v379_v30  ;;  %v506_v29 = vld [vmem:[%s2364_s12 + $0x668] sm:$0xff]  ;;  %v508_v30 = vld [vmem:[%s2364_s12 + $0x678] sm:$0xff] }
  0x66   : > { %724 = vmatprep.subr.mxu0 %v370_v31  ;;  %795 = vmatprep.subr.mxu1 %v372_v32  ;;  %v505_v31 = vld [vmem:[%s2364_s12 + $0x660] sm:$0xff]  ;;  %v507_v32 = vld [vmem:[%s2364_s12 + $0x670] sm:$0xff] }
  0x67   : > { %725 = vmatpush1.msra.mxu0 %v369_v33  ;;  %796 = vmatpush1.msra.mxu1 %v371_v34  ;;  %v498_v33 = vld [vmem:[%s2364_s12 + $0x628] sm:$0xff]  ;;  %v500_v34 = vld [vmem:[%s2364_s12 + $0x638] sm:$0xff] }
  0x68   : > { %726 = vmatprep.subr.mxu0 %v362_v35  ;;  %797 = vmatprep.subr.mxu1 %v364_v36  ;;  %v497_v35 = vld [vmem:[%s2364_s12 + $0x620] sm:$0xff]  ;;  %v499_v36 = vld [vmem:[%s2364_s12 + $0x630] sm:$0xff] }
  0x69   : > { %727 = vmatpush1.msra.mxu0 %v361_v37  ;;  %798 = vmatpush1.msra.mxu1 %v363_v38  ;;  %v490_v37 = vld [vmem:[%s2364_s12 + $0x5e8] sm:$0xff]  ;;  %v492_v38 = vld [vmem:[%s2364_s12 + $0x5f8] sm:$0xff] }
  0x6a   : > { %728 = vmatprep.subr.mxu0 %v354_v39  ;;  %799 = vmatprep.subr.mxu1 %v356_v40  ;;  %v489_v39 = vld [vmem:[%s2364_s12 + $0x5e0] sm:$0xff]  ;;  %v491_v40 = vld [vmem:[%s2364_s12 + $0x5f0] sm:$0xff] }
  0x6b   : > { %729 = vmatpush1.msra.mxu0 %v353_v41  ;;  %800 = vmatpush1.msra.mxu1 %v355_v42  ;;  %v482_v41 = vld [vmem:[%s2364_s12 + $0x5a8] sm:$0xff]  ;;  %v484_v42 = vld [vmem:[%s2364_s12 + $0x5b8] sm:$0xff] }
  0x6c   : > { %730 = vmatprep.subr.mxu0 %v346_v43  ;;  %801 = vmatprep.subr.mxu1 %v348_v44  ;;  %v481_v43 = vld [vmem:[%s2364_s12 + $0x5a0] sm:$0xff]  ;;  %v483_v44 = vld [vmem:[%s2364_s12 + $0x5b0] sm:$0xff] }
  0x6d   : > { %731 = vmatpush1.msra.mxu0 %v345_v45  ;;  %802 = vmatpush1.msra.mxu1 %v347_v46  ;;  %v474_v45 = vld [vmem:[%s2364_s12 + $0x568] sm:$0xff]  ;;  %v476_v46 = vld [vmem:[%s2364_s12 + $0x578] sm:$0xff] }
  0x6e   : > { %732 = vmatprep.subr.mxu0 %v338_v47  ;;  %803 = vmatprep.subr.mxu1 %v340_v48  ;;  %v473_v47 = vld [vmem:[%s2364_s12 + $0x560] sm:$0xff]  ;;  %v475_v48 = vld [vmem:[%s2364_s12 + $0x570] sm:$0xff] }
  0x6f   : > { %733 = vmatpush1.msra.mxu0 %v337_v49  ;;  %804 = vmatpush1.msra.mxu1 %v339_v50  ;;  %v466_v49 = vld [vmem:[%s2364_s12 + $0x528] sm:$0xff]  ;;  %v468_v50 = vld [vmem:[%s2364_s12 + $0x538] sm:$0xff] }
  0x70   : > { %734 = vmatprep.subr.mxu0 %v330_v51  ;;  %805 = vmatprep.subr.mxu1 %v332_v52  ;;  %v465_v51 = vld [vmem:[%s2364_s12 + $0x520] sm:$0xff]  ;;  %v467_v52 = vld [vmem:[%s2364_s12 + $0x530] sm:$0xff] }
  0x71   : > { %735 = vmatpush1.msra.mxu0 %v329_v53  ;;  %806 = vmatpush1.msra.mxu1 %v331_v54  ;;  %v458_v53 = vld [vmem:[%s2364_s12 + $0x4e8] sm:$0xff]  ;;  %v460_v54 = vld [vmem:[%s2364_s12 + $0x4f8] sm:$0xff] }
  0x72   : > { %736 = vmatprep.subr.mxu0 %v322_v55  ;;  %807 = vmatprep.subr.mxu1 %v324_v56  ;;  %v457_v55 = vld [vmem:[%s2364_s12 + $0x4e0] sm:$0xff]  ;;  %v459_v56 = vld [vmem:[%s2364_s12 + $0x4f0] sm:$0xff] }
  0x73   : > { %737 = vmatpush1.msra.mxu0 %v321_v58  ;;  %808 = vmatpush1.msra.mxu1 %v323_v59  ;;  %v450_v58 = vld [vmem:[%s2364_s12 + $0x4a8] sm:$0xff]  ;;  %v452_v59 = vld [vmem:[%s2364_s12 + $0x4b8] sm:$0xff] }
  0x74   : > { %738 = vmatprep.subr.mxu0 %v314_v60  ;;  %809 = vmatprep.subr.mxu1 %v316_v61  ;;  %v449_v60 = vld [vmem:[%s2364_s12 + $0x4a0] sm:$0xff]  ;;  %v451_v61 = vld [vmem:[%s2364_s12 + $0x4b0] sm:$0xff] }
  0x75   : > { %739 = vmatpush1.msra.mxu0 %v313_v62  ;;  %810 = vmatpush1.msra.mxu1 %v315_v63  ;;  %v442_v62 = vld [vmem:[%s2364_s12 + $0x468] sm:$0xff]  ;;  %v444_v63 = vld [vmem:[%s2364_s12 + $0x478] sm:$0xff] }
  0x76   : > { %740 = vmatprep.subr.mxu0 %v306_v1  ;;  %811 = vmatprep.subr.mxu1 %v308_v2  ;;  %v441_v1 = vld [vmem:[%s2364_s12 + $0x460] sm:$0xff]  ;;  %v443_v2 = vld [vmem:[%s2364_s12 + $0x470] sm:$0xff] }
  0x77   : > { %741 = vmatpush1.msra.mxu0 %v305_v3  ;;  %812 = vmatpush1.msra.mxu1 %v307_v4  ;;  %v434_v3 = vld [vmem:[%s2364_s12 + $0x428] sm:$0xff]  ;;  %v436_v4 = vld [vmem:[%s2364_s12 + $0x438] sm:$0xff] }
  0x78   : > { %742 = vmatprep.subr.mxu0 %v554_v5  ;;  %813 = vmatprep.subr.mxu1 %v556_v6  ;;  %v433_v5 = vld [vmem:[%s2364_s12 + $0x420] sm:$0xff]  ;;  %v435_v6 = vld [vmem:[%s2364_s12 + $0x430] sm:$0xff] }
  0x79   : > { %743 = vmatpush2.msra.mxu0 %v553_v7  ;;  %814 = vmatpush2.msra.mxu1 %v555_v8  ;;  %v2301_v7 = vmov 1983009808  }
  0x7a   : > { %744 = vmatprep.subr.mxu0 %v546_v9  ;;  %815 = vmatprep.subr.mxu1 %v548_v10  ;;  %v863_v8 = vunpack.c.l.s4 %v2301_v7  ;;  %v865_v9 = vlaneseq }
  0x7b   : > { %745 = vmatpush2.msra.mxu0 %v545_v11  ;;  %816 = vmatpush2.msra.mxu1 %v547_v12 }
  0x7c   : > { %746 = vmatprep.subr.mxu0 %v538_v13  ;;  %817 = vmatprep.subr.mxu1 %v540_v14  ;;  %v864_v10 = vunpack.c.0.s8 %v863_v8  ;;  %v2638_v11 = vshrl.u32 %v865_v9, 7 }
  0x7d   : > { %747 = vmatpush2.msra.mxu0 %v537_v15  ;;  %818 = vmatpush2.msra.mxu1 %v539_v16 }
  0x7e   : > { %748 = vmatprep.subr.mxu0 %v530_v17  ;;  %819 = vmatprep.subr.mxu1 %v532_v18  ;;  %v2641_v14 = vsub.s32 %v864_v10, %v2638_v11 }
  0x7f   : > { %749 = vmatpush2.msra.mxu0 %v529_v19  ;;  %820 = vmatpush2.msra.mxu1 %v531_v20 }
  0x80   : > { %750 = vmatprep.subr.mxu0 %v522_v21  ;;  %821 = vmatprep.subr.mxu1 %v524_v22 }
  0x81   : > { %751 = vmatpush2.msra.mxu0 %v521_v23  ;;  %822 = vmatpush2.msra.mxu1 %v523_v24 }
  0x82   : > { %752 = vmatprep.subr.mxu0 %v514_v25  ;;  %823 = vmatprep.subr.mxu1 %v516_v26 }
  0x83   : > { %753 = vmatpush2.msra.mxu0 %v513_v27  ;;  %824 = vmatpush2.msra.mxu1 %v515_v28 }
  0x84   : > { %754 = vmatprep.subr.mxu0 %v506_v29  ;;  %825 = vmatprep.subr.mxu1 %v508_v30  ;;  %v299_v30 = vld [vmem:[#allocation2 + $0x8] sm:$0xff] }
  0x85   : > { %755 = vmatpush2.msra.mxu0 %v505_v31  ;;  %826 = vmatpush2.msra.mxu1 %v507_v32 }
  0x86   : > { %756 = vmatprep.subr.mxu0 %v498_v33  ;;  %827 = vmatprep.subr.mxu1 %v500_v34 }
  0x87   : > { %757 = vmatpush2.msra.mxu0 %v497_v35  ;;  %828 = vmatpush2.msra.mxu1 %v499_v36 }
  0x88   : > { %758 = vmatprep.subr.mxu0 %v490_v37  ;;  %829 = vmatprep.subr.mxu1 %v492_v38 }
  0x89   : > { %759 = vmatpush2.msra.mxu0 %v489_v39  ;;  %830 = vmatpush2.msra.mxu1 %v491_v40 }
  0x8a   : > { %760 = vmatprep.subr.mxu0 %v482_v41  ;;  %831 = vmatprep.subr.mxu1 %v484_v42 }
  0x8b   : > { %761 = vmatpush2.msra.mxu0 %v481_v43  ;;  %832 = vmatpush2.msra.mxu1 %v483_v44 }
  0x8c   : > { %762 = vmatprep.subr.mxu0 %v474_v45  ;;  %833 = vmatprep.subr.mxu1 %v476_v46 }
  0x8d   : > { %763 = vmatpush2.msra.mxu0 %v473_v47  ;;  %834 = vmatpush2.msra.mxu1 %v475_v48 }
  0x8e   : > { %764 = vmatprep.subr.mxu0 %v466_v49  ;;  %835 = vmatprep.subr.mxu1 %v468_v50 }
  0x8f   : > { %765 = vmatpush2.msra.mxu0 %v465_v51  ;;  %836 = vmatpush2.msra.mxu1 %v467_v52 }
  0x90   : > { %766 = vmatprep.subr.mxu0 %v458_v53  ;;  %837 = vmatprep.subr.mxu1 %v460_v54 }
  0x91   : > { %767 = vmatpush2.msra.mxu0 %v457_v55  ;;  %838 = vmatpush2.msra.mxu1 %v459_v56 }
  0x92   : > { %768 = vmatprep.subr.mxu0 %v450_v58  ;;  %839 = vmatprep.subr.mxu1 %v452_v59 }
  0x93   : > { %769 = vmatpush2.msra.mxu0 %v449_v60  ;;  %840 = vmatpush2.msra.mxu1 %v451_v61 }
  0x94   : > { %770 = vmatprep.subr.mxu0 %v442_v62  ;;  %841 = vmatprep.subr.mxu1 %v444_v63 }
  0x95   : > { %771 = vmatpush2.msra.mxu0 %v441_v1  ;;  %842 = vmatpush2.msra.mxu1 %v443_v2 }
  0x96   : > { %772 = vmatprep.subr.mxu0 %v434_v3  ;;  %843 = vmatprep.subr.mxu1 %v436_v4 }
  0x97   : > { %773 = vmatpush2.msra.mxu0 %v433_v5  ;;  %774 = vmatprep.mubr.f32.mxu0 %v2498_v0 }
  0x98   : > { %844 = vmatpush2.msra.mxu1 %v435_v6  ;;  %845 = vmatprep.mubr.f32.mxu1 %v2498_v0 }
  0x99   : > { %775 = vmatmul.mubr.f32.vlgmr.msra.gmra.mxu0 %v2488_v57  ;;  %846 = vmatmul.mubr.f32.vlgmr.msra.gmra.mxu1 %v2488_v57  ;;  %v298_v57 = vld [vmem:[#allocation2] sm:$0xff] }
 0x117   : > { %v634_v12 = vpop.f32.mrf.mxu0  ;;  %v705_v13 = vpop.f32.mrf.mxu1 }
 0x119   : > { %v636_v15 = vpop.f32.mrf.mxu0  ;;  %v707_v16 = vpop.f32.mrf.mxu1 }
 0x11a   : > { %v860_v17 = vcombine.low %v634_v12, %v636_v15  ;;  %v861_v18 = vcombine.low %v705_v13, %v707_v16 }
 0x11c   : > { %v868_v0 = vrot.slane %v860_v17, %v2641_v14  ;;  %v875_v19 = vrot.slane %v861_v18, %v2641_v14 }
 0x11e   : > { %v876_v20 = vcombine.low %v868_v0, %v875_v19 }
 0x120   : > { %v896_v21 = vadd.f32 %v876_v20, %v298_v57 }
 0x122   : > { %898 = vst [vmem:[#allocation2] sm:$0xff] %v896_v21 }
 0x159   : > { %v776_v22 = vpop.f32.mrf.mxu0  ;;  %v847_v23 = vpop.f32.mrf.mxu1 }
 0x15b   : > { %v778_v24 = vpop.f32.mrf.mxu0  ;;  %v849_v25 = vpop.f32.mrf.mxu1 }
 0x15c   : > { %v877_v26 = vcombine.low %v776_v22, %v778_v24  ;;  %v878_v27 = vcombine.low %v847_v23, %v849_v25 }
 0x15e   : > { %v885_v28 = vrot.slane %v877_v26, %v2641_v14  ;;  %v892_v29 = vrot.slane %v878_v27, %v2641_v14 }
 0x160   : > { %v893_v31 = vcombine.low %v885_v28, %v892_v29  ;;  %903 = sbr.rel (%p2099_p6) target bundleno = 846 (0x34e), region = 56 }
 0x162   : > { %v897_v32 = vadd.f32 %v893_v31, %v299_v30 }
 0x164   : > { %899 = vst [vmem:[#allocation2 + $0x8] sm:$0xff] %v897_v32 }
 0x165   : > { %v1100_v33 = vld [vmem:[%s3552_s3 + $0x3c8] sm:$0xff]  ;;  %v1102_v34 = vld [vmem:[%s3552_s3 + $0x3d8] sm:$0xff]  ;;  %v1099_v35 = vld [vmem:[%s3552_s3 + $0x3c0] sm:$0xff]  ;;  %vm1577_vm0 = vcmask 1041408   ;;  %vm2009_vm1 = vcmask 525312   ;;  %vm2027_vm2 = vcmask 1040384  }
 0x166   : > { %1107 = vmatprep.subr.mxu0 %v1100_v33  ;;  %1178 = vmatprep.subr.mxu1 %v1102_v34  ;;  %v1101_v36 = vld [vmem:[%s3552_s3 + $0x3d0] sm:$0xff]  ;;  %v1092_v37 = vld [vmem:[%s3552_s3 + $0x388] sm:$0xff]  ;;  %v1094_v38 = vld [vmem:[%s3552_s3 + $0x398] sm:$0xff] }
 0x167   : > { %1108 = vmatpush1.msra.mxu0 %v1099_v35  ;;  %1179 = vmatpush1.msra.mxu1 %v1101_v36  ;;  %v1091_v39 = vld [vmem:[%s3552_s3 + $0x380] sm:$0xff]  ;;  %v1093_v40 = vld [vmem:[%s3552_s3 + $0x390] sm:$0xff]  ;;  %v1084_v41 = vld [vmem:[%s3552_s3 + $0x348] sm:$0xff]  ;;  %v2302_v36 = vmov 0.0  }
 0x168   : > { %1109 = vmatprep.subr.mxu0 %v1092_v37  ;;  %1180 = vmatprep.subr.mxu1 %v1094_v38  ;;  %v1086_v42 = vld [vmem:[%s3552_s3 + $0x358] sm:$0xff]  ;;  %v1083_v43 = vld [vmem:[%s3552_s3 + $0x340] sm:$0xff]  ;;  %v1085_v44 = vld [vmem:[%s3552_s3 + $0x350] sm:$0xff] }
 0x169   : > { %1110 = vmatpush1.msra.mxu0 %v1091_v39  ;;  %1181 = vmatpush1.msra.mxu1 %v1093_v40  ;;  %v1076_v45 = vld [vmem:[%s3552_s3 + $0x308] sm:$0xff]  ;;  %v1078_v46 = vld [vmem:[%s3552_s3 + $0x318] sm:$0xff]  ;;  %v1075_v47 = vld [vmem:[%s3552_s3 + $0x300] sm:$0xff] }
 0x16a   : > { %1111 = vmatprep.subr.mxu0 %v1084_v41  ;;  %1182 = vmatprep.subr.mxu1 %v1086_v42  ;;  %v1077_v48 = vld [vmem:[%s3552_s3 + $0x310] sm:$0xff]  ;;  %v1068_v49 = vld [vmem:[%s3552_s3 + $0x2c8] sm:$0xff]  ;;  %v1070_v50 = vld [vmem:[%s3552_s3 + $0x2d8] sm:$0xff] }
 0x16b   : > { %1112 = vmatpush1.msra.mxu0 %v1083_v43  ;;  %1183 = vmatpush1.msra.mxu1 %v1085_v44  ;;  %v1067_v51 = vld [vmem:[%s3552_s3 + $0x2c0] sm:$0xff]  ;;  %v1069_v52 = vld [vmem:[%s3552_s3 + $0x2d0] sm:$0xff]  ;;  %v1060_v53 = vld [vmem:[%s3552_s3 + $0x288] sm:$0xff] }
 0x16c   : > { %1113 = vmatprep.subr.mxu0 %v1076_v45  ;;  %1184 = vmatprep.subr.mxu1 %v1078_v46  ;;  %v1062_v54 = vld [vmem:[%s3552_s3 + $0x298] sm:$0xff]  ;;  %v1059_v55 = vld [vmem:[%s3552_s3 + $0x280] sm:$0xff]  ;;  %v1061_v56 = vld [vmem:[%s3552_s3 + $0x290] sm:$0xff] }
 0x16d   : > { %1114 = vmatpush1.msra.mxu0 %v1075_v47  ;;  %1185 = vmatpush1.msra.mxu1 %v1077_v48  ;;  %v1052_v58 = vld [vmem:[%s3552_s3 + $0x248] sm:$0xff]  ;;  %v1054_v59 = vld [vmem:[%s3552_s3 + $0x258] sm:$0xff]  ;;  %v1051_v60 = vld [vmem:[%s3552_s3 + $0x240] sm:$0xff] }
 0x16e   : > { %1115 = vmatprep.subr.mxu0 %v1068_v49  ;;  %1186 = vmatprep.subr.mxu1 %v1070_v50  ;;  %v1053_v61 = vld [vmem:[%s3552_s3 + $0x250] sm:$0xff]  ;;  %v1044_v62 = vld [vmem:[%s3552_s3 + $0x208] sm:$0xff]  ;;  %v1046_v63 = vld [vmem:[%s3552_s3 + $0x218] sm:$0xff] }
 0x16f   : > { %1116 = vmatpush1.msra.mxu0 %v1067_v51  ;;  %1187 = vmatpush1.msra.mxu1 %v1069_v52  ;;  %v1043_v1 = vld [vmem:[%s3552_s3 + $0x200] sm:$0xff]  ;;  %v1045_v2 = vld [vmem:[%s3552_s3 + $0x210] sm:$0xff]  ;;  %v1036_v3 = vld [vmem:[%s3552_s3 + $0x1c8] sm:$0xff] }
 0x170   : > { %1117 = vmatprep.subr.mxu0 %v1060_v53  ;;  %1188 = vmatprep.subr.mxu1 %v1062_v54  ;;  %v1038_v4 = vld [vmem:[%s3552_s3 + $0x1d8] sm:$0xff]  ;;  %v1035_v5 = vld [vmem:[%s3552_s3 + $0x1c0] sm:$0xff]  ;;  %v1037_v6 = vld [vmem:[%s3552_s3 + $0x1d0] sm:$0xff] }
 0x171   : > { %1118 = vmatpush1.msra.mxu0 %v1059_v55  ;;  %1189 = vmatpush1.msra.mxu1 %v1061_v56  ;;  %v1028_v7 = vld [vmem:[%s3552_s3 + $0x188] sm:$0xff]  ;;  %v1030_v8 = vld [vmem:[%s3552_s3 + $0x198] sm:$0xff]  ;;  %v1027_v9 = vld [vmem:[%s3552_s3 + $0x180] sm:$0xff] }
 0x172   : > { %1119 = vmatprep.subr.mxu0 %v1052_v58  ;;  %1190 = vmatprep.subr.mxu1 %v1054_v59  ;;  %v1029_v10 = vld [vmem:[%s3552_s3 + $0x190] sm:$0xff]  ;;  %v1020_v12 = vld [vmem:[%s3552_s3 + $0x148] sm:$0xff]  ;;  %v1022_v13 = vld [vmem:[%s3552_s3 + $0x158] sm:$0xff] }
 0x173   : > { %1120 = vmatpush1.msra.mxu0 %v1051_v60  ;;  %1191 = vmatpush1.msra.mxu1 %v1053_v61  ;;  %v1019_v15 = vld [vmem:[%s3552_s3 + $0x140] sm:$0xff]  ;;  %v1021_v16 = vld [vmem:[%s3552_s3 + $0x150] sm:$0xff]  ;;  %v1012_v17 = vld [vmem:[%s3552_s3 + $0x108] sm:$0xff] }
 0x174   : > { %1121 = vmatprep.subr.mxu0 %v1044_v62  ;;  %1192 = vmatprep.subr.mxu1 %v1046_v63  ;;  %v1014_v18 = vld [vmem:[%s3552_s3 + $0x118] sm:$0xff]  ;;  %v1011_v0 = vld [vmem:[%s3552_s3 + $0x100] sm:$0xff]  ;;  %v1013_v19 = vld [vmem:[%s3552_s3 + $0x110] sm:$0xff] }
 0x175   : > { %1122 = vmatpush1.msra.mxu0 %v1043_v1  ;;  %1193 = vmatpush1.msra.mxu1 %v1045_v2  ;;  %v1004_v57 = vld [vmem:[%s3552_s3 + $0xc8] sm:$0xff]  ;;  %v1006_v20 = vld [vmem:[%s3552_s3 + $0xd8] sm:$0xff]  ;;  %v1003_v21 = vld [vmem:[%s3552_s3 + $0xc0] sm:$0xff] }
 0x176   : > { %1123 = vmatprep.subr.mxu0 %v1036_v3  ;;  %1194 = vmatprep.subr.mxu1 %v1038_v4  ;;  %v1005_v22 = vld [vmem:[%s3552_s3 + $0xd0] sm:$0xff]  ;;  %v996_v23 = vld [vmem:[%s3552_s3 + $0x88] sm:$0xff]  ;;  %v998_v24 = vld [vmem:[%s3552_s3 + $0x98] sm:$0xff] }
 0x177   : > { %1124 = vmatpush1.msra.mxu0 %v1035_v5  ;;  %1195 = vmatpush1.msra.mxu1 %v1037_v6  ;;  %v995_v25 = vld [vmem:[%s3552_s3 + $0x80] sm:$0xff]  ;;  %v997_v26 = vld [vmem:[%s3552_s3 + $0x90] sm:$0xff]  ;;  %v988_v27 = vld [vmem:[%s3552_s3 + $0x48] sm:$0xff] }
 0x178   : > { %1125 = vmatprep.subr.mxu0 %v1028_v7  ;;  %1196 = vmatprep.subr.mxu1 %v1030_v8  ;;  %v990_v28 = vld [vmem:[%s3552_s3 + $0x58] sm:$0xff]  ;;  %v987_v29 = vld [vmem:[%s3552_s3 + $0x40] sm:$0xff]  ;;  %v989_v30 = vld [vmem:[%s3552_s3 + $0x50] sm:$0xff] }
 0x179   : > { %1126 = vmatpush1.msra.mxu0 %v1027_v9  ;;  %1197 = vmatpush1.msra.mxu1 %v1029_v10  ;;  %v980_v31 = vld [vmem:[%s3552_s3 + $0x8] sm:$0xff]  ;;  %v982_v32 = vld [vmem:[%s3552_s3 + $0x18] sm:$0xff]  ;;  %v979_v33 = vld [vmem:[%s3552_s3] sm:$0xff] }
 0x17a   : > { %1127 = vmatprep.subr.mxu0 %v1020_v12  ;;  %1198 = vmatprep.subr.mxu1 %v1022_v13  ;;  %v981_v34 = vld [vmem:[%s3552_s3 + $0x10] sm:$0xff]  ;;  %v2843_v35 = vld [vmem:[%s3550_s1] sm:$0x3]  ;;  %v1104_v37 = vld [vmem:[%s3552_s3 + $0x3e8] sm:$0xff] }
 0x17b   : > { %1128 = vmatpush1.msra.mxu0 %v1019_v15  ;;  %1199 = vmatpush1.msra.mxu1 %v1021_v16  ;;  %v1106_v38 = vld [vmem:[%s3552_s3 + $0x3f8] sm:$0xff]  ;;  %v1103_v39 = vld [vmem:[%s3552_s3 + $0x3e0] sm:$0xff]  ;;  %v1105_v40 = vld [vmem:[%s3552_s3 + $0x3f0] sm:$0xff] }
 0x17c   : > { %1129 = vmatprep.subr.mxu0 %v1012_v17  ;;  %1200 = vmatprep.subr.mxu1 %v1014_v18  ;;  %v1096_v41 = vld [vmem:[%s3552_s3 + $0x3a8] sm:$0xff]  ;;  %v1098_v42 = vld [vmem:[%s3552_s3 + $0x3b8] sm:$0xff]  ;;  %v1095_v43 = vld [vmem:[%s3552_s3 + $0x3a0] sm:$0xff] }
 0x17d   : > { %1130 = vmatpush1.msra.mxu0 %v1011_v0  ;;  %1201 = vmatpush1.msra.mxu1 %v1013_v19  ;;  %v1097_v44 = vld [vmem:[%s3552_s3 + $0x3b0] sm:$0xff]  ;;  %v1088_v45 = vld [vmem:[%s3552_s3 + $0x368] sm:$0xff]  ;;  %v1090_v46 = vld [vmem:[%s3552_s3 + $0x378] sm:$0xff] }
 0x17e   : > { %1131 = vmatprep.subr.mxu0 %v1004_v57  ;;  %1202 = vmatprep.subr.mxu1 %v1006_v20  ;;  %v1087_v47 = vld [vmem:[%s3552_s3 + $0x360] sm:$0xff]  ;;  %v1089_v48 = vld [vmem:[%s3552_s3 + $0x370] sm:$0xff]  ;;  %v1080_v49 = vld [vmem:[%s3552_s3 + $0x328] sm:$0xff] }
 0x17f   : > { %1132 = vmatpush1.msra.mxu0 %v1003_v21  ;;  %1203 = vmatpush1.msra.mxu1 %v1005_v22  ;;  %v1082_v50 = vld [vmem:[%s3552_s3 + $0x338] sm:$0xff]  ;;  %v1079_v51 = vld [vmem:[%s3552_s3 + $0x320] sm:$0xff]  ;;  %v1081_v52 = vld [vmem:[%s3552_s3 + $0x330] sm:$0xff] }
 0x180   : > { %1133 = vmatprep.subr.mxu0 %v996_v23  ;;  %1204 = vmatprep.subr.mxu1 %v998_v24  ;;  %v1072_v53 = vld [vmem:[%s3552_s3 + $0x2e8] sm:$0xff]  ;;  %v1074_v54 = vld [vmem:[%s3552_s3 + $0x2f8] sm:$0xff]  ;;  %v1071_v55 = vld [vmem:[%s3552_s3 + $0x2e0] sm:$0xff] }
 0x181   : > { %1134 = vmatpush1.msra.mxu0 %v995_v25  ;;  %1205 = vmatpush1.msra.mxu1 %v997_v26  ;;  %v1073_v56 = vld [vmem:[%s3552_s3 + $0x2f0] sm:$0xff]  ;;  %v1064_v58 = vld [vmem:[%s3552_s3 + $0x2a8] sm:$0xff]  ;;  %v1066_v59 = vld [vmem:[%s3552_s3 + $0x2b8] sm:$0xff] }
 0x182   : > { %1135 = vmatprep.subr.mxu0 %v988_v27  ;;  %1206 = vmatprep.subr.mxu1 %v990_v28  ;;  %v1063_v60 = vld [vmem:[%s3552_s3 + $0x2a0] sm:$0xff]  ;;  %v1065_v61 = vld [vmem:[%s3552_s3 + $0x2b0] sm:$0xff]  ;;  %v1056_v62 = vld [vmem:[%s3552_s3 + $0x268] sm:$0xff] }
 0x183   : > { %1136 = vmatpush1.msra.mxu0 %v987_v29  ;;  %1207 = vmatpush1.msra.mxu1 %v989_v30  ;;  %v1058_v63 = vld [vmem:[%s3552_s3 + $0x278] sm:$0xff]  ;;  %v1055_v1 = vld [vmem:[%s3552_s3 + $0x260] sm:$0xff]  ;;  %v1057_v2 = vld [vmem:[%s3552_s3 + $0x270] sm:$0xff] }
 0x184   : > { %1137 = vmatprep.subr.mxu0 %v980_v31  ;;  %1208 = vmatprep.subr.mxu1 %v982_v32  ;;  %v1048_v3 = vld [vmem:[%s3552_s3 + $0x228] sm:$0xff]  ;;  %v1050_v4 = vld [vmem:[%s3552_s3 + $0x238] sm:$0xff]  ;;  %v1047_v5 = vld [vmem:[%s3552_s3 + $0x220] sm:$0xff] }
 0x185   : > { %1138 = vmatpush1.msra.mxu0 %v979_v33  ;;  %1171 = vmatprep.mubr.f32.mxu0 %v2302_v36  ;;  %v1049_v6 = vld [vmem:[%s3552_s3 + $0x230] sm:$0xff]  ;;  %v1040_v7 = vld [vmem:[%s3552_s3 + $0x1e8] sm:$0xff]  ;;  %v1042_v8 = vld [vmem:[%s3552_s3 + $0x1f8] sm:$0xff] }
 0x186   : > { %1209 = vmatpush1.msra.mxu1 %v981_v34  ;;  %1242 = vmatprep.mubr.f32.mxu1 %v2302_v36  ;;  %v1039_v9 = vld [vmem:[%s3552_s3 + $0x1e0] sm:$0xff]  ;;  %v1041_v10 = vld [vmem:[%s3552_s3 + $0x1f0] sm:$0xff]  ;;  %v1032_v12 = vld [vmem:[%s3552_s3 + $0x1a8] sm:$0xff] }
 0x187   : > { %1172 = vmatmul.mubr.f32.vlgmr.msra.gmra.mxu0 %v2843_v35  ;;  %1243 = vmatmul.mubr.f32.vlgmr.msra.gmra.mxu1 %v2843_v35  ;;  %v1034_v13 = vld [vmem:[%s3552_s3 + $0x1b8] sm:$0xff]  ;;  %v1031_v15 = vld [vmem:[%s3552_s3 + $0x1a0] sm:$0xff]  ;;  %v1033_v16 = vld [vmem:[%s3552_s3 + $0x1b0] sm:$0xff] }
 0x188   : > { %1249 = vmatprep.subr.mxu0 %v1104_v37  ;;  %1320 = vmatprep.subr.mxu1 %v1106_v38  ;;  %v1024_v17 = vld [vmem:[%s3552_s3 + $0x168] sm:$0xff]  ;;  %v1026_v18 = vld [vmem:[%s3552_s3 + $0x178] sm:$0xff]  ;;  %v1023_v0 = vld [vmem:[%s3552_s3 + $0x160] sm:$0xff] }
 0x189   : > { %1250 = vmatpush1.msra.mxu0 %v1103_v39  ;;  %1321 = vmatpush1.msra.mxu1 %v1105_v40  ;;  %v1025_v19 = vld [vmem:[%s3552_s3 + $0x170] sm:$0xff]  ;;  %v1016_v57 = vld [vmem:[%s3552_s3 + $0x128] sm:$0xff]  ;;  %v1018_v20 = vld [vmem:[%s3552_s3 + $0x138] sm:$0xff] }
 0x18a   : > { %1251 = vmatprep.subr.mxu0 %v1096_v41  ;;  %1322 = vmatprep.subr.mxu1 %v1098_v42  ;;  %v1015_v21 = vld [vmem:[%s3552_s3 + $0x120] sm:$0xff]  ;;  %v1017_v22 = vld [vmem:[%s3552_s3 + $0x130] sm:$0xff]  ;;  %v1008_v23 = vld [vmem:[%s3552_s3 + $0xe8] sm:$0xff] }
 0x18b   : > { %1252 = vmatpush1.msra.mxu0 %v1095_v43  ;;  %1323 = vmatpush1.msra.mxu1 %v1097_v44  ;;  %v1010_v24 = vld [vmem:[%s3552_s3 + $0xf8] sm:$0xff]  ;;  %v1007_v25 = vld [vmem:[%s3552_s3 + $0xe0] sm:$0xff]  ;;  %v1009_v26 = vld [vmem:[%s3552_s3 + $0xf0] sm:$0xff] }
 0x18c   : > { %1253 = vmatprep.subr.mxu0 %v1088_v45  ;;  %1324 = vmatprep.subr.mxu1 %v1090_v46  ;;  %v1000_v27 = vld [vmem:[%s3552_s3 + $0xa8] sm:$0xff]  ;;  %v1002_v28 = vld [vmem:[%s3552_s3 + $0xb8] sm:$0xff]  ;;  %v999_v29 = vld [vmem:[%s3552_s3 + $0xa0] sm:$0xff] }
 0x18d   : > { %1254 = vmatpush1.msra.mxu0 %v1087_v47  ;;  %1325 = vmatpush1.msra.mxu1 %v1089_v48  ;;  %v1001_v30 = vld [vmem:[%s3552_s3 + $0xb0] sm:$0xff]  ;;  %v992_v31 = vld [vmem:[%s3552_s3 + $0x68] sm:$0xff]  ;;  %v994_v32 = vld [vmem:[%s3552_s3 + $0x78] sm:$0xff] }
 0x18e   : > { %1255 = vmatprep.subr.mxu0 %v1080_v49  ;;  %1326 = vmatprep.subr.mxu1 %v1082_v50  ;;  %v991_v33 = vld [vmem:[%s3552_s3 + $0x60] sm:$0xff]  ;;  %v993_v34 = vld [vmem:[%s3552_s3 + $0x70] sm:$0xff]  ;;  %v984_v37 = vld [vmem:[%s3552_s3 + $0x28] sm:$0xff] }
 0x18f   : > { %1256 = vmatpush1.msra.mxu0 %v1079_v51  ;;  %1327 = vmatpush1.msra.mxu1 %v1081_v52  ;;  %v986_v38 = vld [vmem:[%s3552_s3 + $0x38] sm:$0xff]  ;;  %v983_v39 = vld [vmem:[%s3552_s3 + $0x20] sm:$0xff]  ;;  %v985_v40 = vld [vmem:[%s3552_s3 + $0x30] sm:$0xff] }
 0x190   : > { %1257 = vmatprep.subr.mxu0 %v1072_v53  ;;  %1328 = vmatprep.subr.mxu1 %v1074_v54  ;;  %v1625_v41 = vld [vmem:[%s3554_s5 + $0xf8] sm:$0xff]  ;;  %v1624_v45 = vld [vmem:[%s3554_s5 + $0xf0] sm:$0xff]  ;;  %v1655_v48 = vld [vmem:[%s3554_s5 + $0x1e8] sm:$0xff] }
 0x191   : > { %1258 = vmatpush1.msra.mxu0 %v1071_v55  ;;  %1329 = vmatpush1.msra.mxu1 %v1073_v56  ;;  %v1657_v42 = vld [vmem:[%s3554_s5 + $0x1f8] sm:$0xff]  ;;  %v1608_v46 = vld [vmem:[%s3554_s5 + $0x70] sm:$0xff]  ;;  %v1607_v49 = vld [vmem:[%s3554_s5 + $0x68] sm:$0xff] }
 0x192   : > { %1259 = vmatprep.subr.mxu0 %v1064_v58  ;;  %1330 = vmatprep.subr.mxu1 %v1066_v59  ;;  %v1609_v43 = vld [vmem:[%s3554_s5 + $0x78] sm:$0xff]  ;;  %v1640_v47 = vld [vmem:[%s3554_s5 + $0x170] sm:$0xff]  ;;  %v1639_v50 = vld [vmem:[%s3554_s5 + $0x168] sm:$0xff] }
 0x193   : > { %1260 = vmatpush1.msra.mxu0 %v1063_v60  ;;  %1331 = vmatpush1.msra.mxu1 %v1065_v61  ;;  %v1641_v44 = vld [vmem:[%s3554_s5 + $0x178] sm:$0xff]  ;;  %v1622_v51 = vld [vmem:[%s3554_s5 + $0xe0] sm:$0xff]  ;;  %v1620_v60 = vld [vmem:[%s3554_s5 + $0xd0] sm:$0xff] }
 0x194   : > { %1261 = vmatprep.subr.mxu0 %v1056_v62  ;;  %1332 = vmatprep.subr.mxu1 %v1058_v63  ;;  %v1654_v52 = vld [vmem:[%s3554_s5 + $0x1e0] sm:$0xff]  ;;  %v1621_v55 = vld [vmem:[%s3554_s5 + $0xd8] sm:$0xff]  ;;  %v1652_v61 = vld [vmem:[%s3554_s5 + $0x1d0] sm:$0xff] }
 0x195   : > { %1262 = vmatpush1.msra.mxu0 %v1055_v1  ;;  %1333 = vmatpush1.msra.mxu1 %v1057_v2  ;;  %v1606_v53 = vld [vmem:[%s3554_s5 + $0x60] sm:$0xff]  ;;  %v1653_v56 = vld [vmem:[%s3554_s5 + $0x1d8] sm:$0xff]  ;;  %v1604_v62 = vld [vmem:[%s3554_s5 + $0x50] sm:$0xff] }
 0x196   : > { %1263 = vmatprep.subr.mxu0 %v1048_v3  ;;  %1334 = vmatprep.subr.mxu1 %v1050_v4  ;;  %v1638_v54 = vld [vmem:[%s3554_s5 + $0x160] sm:$0xff]  ;;  %v1605_v58 = vld [vmem:[%s3554_s5 + $0x58] sm:$0xff]  ;;  %v1636_v63 = vld [vmem:[%s3554_s5 + $0x150] sm:$0xff] }
 0x197   : > { %1264 = vmatpush1.msra.mxu0 %v1047_v5  ;;  %1335 = vmatpush1.msra.mxu1 %v1049_v6  ;;  %v1637_v59 = vld [vmem:[%s3554_s5 + $0x158] sm:$0xff]  ;;  %v1619_v1 = vld [vmem:[%s3554_s5 + $0xc8] sm:$0xff]  ;;  %v1618_v5 = vld [vmem:[%s3554_s5 + $0xc0] sm:$0xff] }
 0x198   : > { %1265 = vmatprep.subr.mxu0 %v1040_v7  ;;  %1336 = vmatprep.subr.mxu1 %v1042_v8  ;;  %v1651_v2 = vld [vmem:[%s3554_s5 + $0x1c8] sm:$0xff]  ;;  %v1650_v6 = vld [vmem:[%s3554_s5 + $0x1c0] sm:$0xff] }
 0x199   : > { %1266 = vmatpush1.msra.mxu0 %v1039_v9  ;;  %1337 = vmatpush1.msra.mxu1 %v1041_v10  ;;  %v1603_v3 = vld [vmem:[%s3554_s5 + $0x48] sm:$0xff]  ;;  %v1602_v7 = vld [vmem:[%s3554_s5 + $0x40] sm:$0xff]  ;;  %v1617_v9 = vld [vmem:[%s3554_s5 + $0xb8] sm:$0xff] }
 0x19a   : > { %1267 = vmatprep.subr.mxu0 %v1032_v12  ;;  %1338 = vmatprep.subr.mxu1 %v1034_v13  ;;  %v1635_v4 = vld [vmem:[%s3554_s5 + $0x148] sm:$0xff]  ;;  %v1634_v8 = vld [vmem:[%s3554_s5 + $0x140] sm:$0xff]  ;;  %v1649_v10 = vld [vmem:[%s3554_s5 + $0x1b8] sm:$0xff] }
 0x19b   : > { %1268 = vmatpush1.msra.mxu0 %v1031_v15  ;;  %1339 = vmatpush1.msra.mxu1 %v1033_v16  ;;  %v1601_v12 = vld [vmem:[%s3554_s5 + $0x38] sm:$0xff]  ;;  %v1616_v15 = vld [vmem:[%s3554_s5 + $0xb0] sm:$0xff] }
 0x19c   : > { %1269 = vmatprep.subr.mxu0 %v1024_v17  ;;  %1340 = vmatprep.subr.mxu1 %v1026_v18  ;;  %v1633_v13 = vld [vmem:[%s3554_s5 + $0x138] sm:$0xff]  ;;  %v1648_v16 = vld [vmem:[%s3554_s5 + $0x1b0] sm:$0xff] }
 0x19d   : > { %1270 = vmatpush1.msra.mxu0 %v1023_v0  ;;  %1341 = vmatpush1.msra.mxu1 %v1025_v19  ;;  %v1600_v17 = vld [vmem:[%s3554_s5 + $0x30] sm:$0xff]  ;;  %v1615_v0 = vld [vmem:[%s3554_s5 + $0xa8] sm:$0xff] }
 0x19e   : > { %1271 = vmatprep.subr.mxu0 %v1016_v57  ;;  %1342 = vmatprep.subr.mxu1 %v1018_v20  ;;  %v1632_v18 = vld [vmem:[%s3554_s5 + $0x130] sm:$0xff]  ;;  %v1647_v19 = vld [vmem:[%s3554_s5 + $0x1a8] sm:$0xff] }
 0x19f   : > { %1272 = vmatpush1.msra.mxu0 %v1015_v21  ;;  %1343 = vmatpush1.msra.mxu1 %v1017_v22  ;;  %v1599_v57 = vld [vmem:[%s3554_s5 + $0x28] sm:$0xff]  ;;  %v1614_v21 = vld [vmem:[%s3554_s5 + $0xa0] sm:$0xff] }
 0x1a0   : > { %1273 = vmatprep.subr.mxu0 %v1008_v23  ;;  %1344 = vmatprep.subr.mxu1 %v1010_v24  ;;  %v1631_v20 = vld [vmem:[%s3554_s5 + $0x128] sm:$0xff]  ;;  %v1646_v22 = vld [vmem:[%s3554_s5 + $0x1a0] sm:$0xff] }
 0x1a1   : > { %1274 = vmatpush1.msra.mxu0 %v1007_v25  ;;  %1345 = vmatpush1.msra.mxu1 %v1009_v26  ;;  %v1598_v23 = vld [vmem:[%s3554_s5 + $0x20] sm:$0xff]  ;;  %v1613_v25 = vld [vmem:[%s3554_s5 + $0x98] sm:$0xff] }
 0x1a2   : > { %1275 = vmatprep.subr.mxu0 %v1000_v27  ;;  %1346 = vmatprep.subr.mxu1 %v1002_v28  ;;  %v1630_v24 = vld [vmem:[%s3554_s5 + $0x120] sm:$0xff]  ;;  %v1645_v26 = vld [vmem:[%s3554_s5 + $0x198] sm:$0xff] }
 0x1a3   : > { %1276 = vmatpush1.msra.mxu0 %v999_v29  ;;  %1347 = vmatpush1.msra.mxu1 %v1001_v30  ;;  %v1597_v27 = vld [vmem:[%s3554_s5 + $0x18] sm:$0xff]  ;;  %v1612_v29 = vld [vmem:[%s3554_s5 + $0x90] sm:$0xff] }
 0x1a4   : > { %1277 = vmatprep.subr.mxu0 %v992_v31  ;;  %1348 = vmatprep.subr.mxu1 %v994_v32  ;;  %v1629_v28 = vld [vmem:[%s3554_s5 + $0x118] sm:$0xff]  ;;  %v1644_v30 = vld [vmem:[%s3554_s5 + $0x190] sm:$0xff] }
 0x1a5   : > { %1278 = vmatpush1.msra.mxu0 %v991_v33  ;;  %1349 = vmatpush1.msra.mxu1 %v993_v34  ;;  %v1596_v31 = vld [vmem:[%s3554_s5 + $0x10] sm:$0xff]  ;;  %v1611_v33 = vld [vmem:[%s3554_s5 + $0x88] sm:$0xff] }
 0x1a6   : > { %1279 = vmatprep.subr.mxu0 %v984_v37  ;;  %1350 = vmatprep.subr.mxu1 %v986_v38  ;;  %v1628_v32 = vld [vmem:[%s3554_s5 + $0x110] sm:$0xff]  ;;  %v1643_v34 = vld [vmem:[%s3554_s5 + $0x188] sm:$0xff] }
 0x1a7   : > { %1280 = vmatpush1.msra.mxu0 %v983_v39  ;;  %1313 = vmatprep.mubr.f32.mxu0 %v2302_v36  ;;  %v1595_v37 = vld [vmem:[%s3554_s5 + $0x8] sm:$0xff]  ;;  %v1610_v39 = vld [vmem:[%s3554_s5 + $0x80] sm:$0xff] }
 0x1a8   : > { %1351 = vmatpush1.msra.mxu1 %v985_v40  ;;  %1384 = vmatprep.mubr.f32.mxu1 %v2302_v36  ;;  %v1656_v36 = vld [vmem:[%s3554_s5 + $0x1f0] sm:$0xff]  ;;  %v1627_v38 = vld [vmem:[%s3554_s5 + $0x108] sm:$0xff]  ;;  %v1642_v40 = vld [vmem:[%s3554_s5 + $0x180] sm:$0xff] }
 0x1a9   : > { %1314 = vmatmul.mubr.f32.vlgmr.msra.gmra.mxu0 %v2843_v35  ;;  %1385 = vmatmul.mubr.f32.vlgmr.msra.gmra.mxu1 %v2843_v35  ;;  %v1623_v35 = vld [vmem:[%s3554_s5 + $0xe8] sm:$0xff] }
 0x1aa   : > { %2106 = vmatprep.subr.mxu0 %v1625_v41  ;;  %2141 = vmatprep.subr.mxu1 %v1657_v42  ;;  %v1594_v41 = vld [vmem:[%s3554_s5] sm:$0xff] }
 0x1ab   : > { %2107 = vmatpush3.msra.mxu0 %v1609_v43  ;;  %2142 = vmatpush3.msra.mxu1 %v1641_v44  ;;  %v1626_v42 = vld [vmem:[%s3554_s5 + $0x100] sm:$0xff]  ;;  %v1689_v43 = vld [vmem:[%s3554_s5 + $0x2f8] sm:$0xff] }
 0x1ac   : > { %2108 = vmatprep.subr.mxu0 %v1624_v45  ;;  %2143 = vmatprep.subr.mxu1 %v1656_v36  ;;  %v1721_v44 = vld [vmem:[%s3554_s5 + $0x3f8] sm:$0xff]  ;;  %v3244_v45 = vsub.s32 0, %v2638_v11  ;;  %v3247_v36 = vsub.s32 1, %v2638_v11 }
 0x1ad   : > { %2109 = vmatpush3.msra.mxu0 %v1608_v46  ;;  %2144 = vmatpush3.msra.mxu1 %v1640_v47  ;;  %v3250_v46 = vsub.s32 2, %v2638_v11  ;;  %v3253_v47 = vsub.s32 3, %v2638_v11 }
 0x1ae   : > { %2110 = vmatprep.subr.mxu0 %v1623_v35  ;;  %2145 = vmatprep.subr.mxu1 %v1655_v48  ;;  %v3258_v35 = vld [vmem:[%s3553_s4] sm:$0xff] }
 0x1af   : > { %2111 = vmatpush3.msra.mxu0 %v1607_v49  ;;  %2146 = vmatpush3.msra.mxu1 %v1639_v50  ;;  %v911_v48 = vrot.slane %v3258_v35, %v3244_v45  ;;  %v915_v49 = vrot.slane %v3258_v35, %v3247_v36  ;;  %v919_v50 = vrot.slane %v3258_v35, %v3250_v46 }
 0x1b0   : > { %2112 = vmatprep.subr.mxu0 %v1622_v51  ;;  %2147 = vmatprep.subr.mxu1 %v1654_v52  ;;  %v923_v51 = vrot.slane %v3258_v35, %v3253_v47 }
 0x1b1   : > { %2113 = vmatpush3.msra.mxu0 %v1606_v53  ;;  %2148 = vmatpush3.msra.mxu1 %v1638_v54  ;;  %v940_v52 = vcombine.low %v911_v48, %v915_v49  ;;  %v1673_v48 = vld [vmem:[%s3554_s5 + $0x278] sm:$0xff] }
 0x1b2   : > { %2114 = vmatprep.subr.mxu0 %v1621_v55  ;;  %2149 = vmatprep.subr.mxu1 %v1653_v56  ;;  %v941_v53 = vcombine.low %v919_v50, %v923_v51  ;;  %v1705_v50 = vld [vmem:[%s3554_s5 + $0x378] sm:$0xff] }
 0x1b3   : > { %2115 = vmatpush3.msra.mxu0 %v1605_v58  ;;  %2150 = vmatpush3.msra.mxu1 %v1637_v59  ;;  %v948_v54 = vrot.slane %v940_v52, %v2641_v14  ;;  %v904_v58 = vld [vmem:[#allocation2] sm:$0xff] }
 0x1b4   : > { %2116 = vmatprep.subr.mxu0 %v1620_v60  ;;  %2151 = vmatprep.subr.mxu1 %v1652_v61  ;;  %v955_v55 = vrot.slane %v941_v53, %v2641_v14  ;;  %v3271_v60 = vsub.s32 5, %v2638_v11  ;;  %v3274_v61 = vsub.s32 4, %v2638_v11  ;;  %v1720_v53 = vld [vmem:[%s3554_s5 + $0x3f0] sm:$0xff] }
 0x1b5   : > { %2117 = vmatpush3.msra.mxu0 %v1604_v62  ;;  %2152 = vmatpush3.msra.mxu1 %v1636_v63  ;;  %v3277_v62 = vsub.s32 6, %v2638_v11  ;;  %v3280_v63 = vsub.s32 7, %v2638_v11 }
 0x1b6   : > { %2118 = vmatprep.subr.mxu0 %v1619_v1  ;;  %2153 = vmatprep.subr.mxu1 %v1651_v2  ;;  %v956_v56 = vcombine.low %v948_v54, %v955_v55  ;;  %v1672_v54 = vld [vmem:[%s3554_s5 + $0x270] sm:$0xff] }
 0x1b7   : > { %2119 = vmatpush3.msra.mxu0 %v1603_v3  ;;  %2154 = vmatpush3.msra.mxu1 %v1635_v4  ;;  %v1704_v55 = vld [vmem:[%s3554_s5 + $0x370] sm:$0xff] }
 0x1b8   : > { %2120 = vmatprep.subr.mxu0 %v1618_v5  ;;  %2155 = vmatprep.subr.mxu1 %v1650_v6  ;;  %v976_v59 = vadd.f32 %v956_v56, %v904_v58  ;;  %v1687_v56 = vld [vmem:[%s3554_s5 + $0x2e8] sm:$0xff] }
 0x1b9   : > { %2121 = vmatpush3.msra.mxu0 %v1602_v7  ;;  %2156 = vmatpush3.msra.mxu1 %v1634_v8  ;;  %v1719_v58 = vld [vmem:[%s3554_s5 + $0x3e8] sm:$0xff] }
 0x1ba   : > { %2122 = vmatprep.subr.mxu0 %v1617_v9  ;;  %2157 = vmatprep.subr.mxu1 %v1649_v10  ;;  %v1476_v1 = vrot.slane %v976_v59, %v3247_v36  ;;  %v1484_v2 = vrot.slane %v976_v59, %v3271_v60  ;;  %v1396_v3 = vrot.slane %v976_v59, %v3244_v45 }
 0x1bb   : > { %2123 = vmatpush3.msra.mxu0 %v1601_v12  ;;  %2158 = vmatpush3.msra.mxu1 %v1633_v13  ;;  %v1404_v4 = vrot.slane %v976_v59, %v3274_v61  ;;  %v1480_v5 = vrot.slane %v976_v59, %v3253_v47  ;;  %v1408_v6 = vrot.slane %v976_v59, %v3277_v62 }
 0x1bc   : > { %2124 = vmatprep.subr.mxu0 %v1616_v15  ;;  %2159 = vmatprep.subr.mxu1 %v1648_v16  ;;  %v1488_v7 = vrot.slane %v976_v59, %v3280_v63  ;;  %v1516_v8 = vrot.slane %v1476_v1, %v3247_v36  ;;  %v1524_v9 = vrot.slane %v1484_v2, %v3247_v36  ;;  %v1703_v1 = vld [vmem:[%s3554_s5 + $0x368] sm:$0xff]  ;;  %v1686_v2 = vld [vmem:[%s3554_s5 + $0x2e0] sm:$0xff] }
 0x1bd   : > { %2125 = vmatpush3.msra.mxu0 %v1600_v17  ;;  %2160 = vmatpush3.msra.mxu1 %v1632_v18  ;;  %v1400_v11 = vrot.slane %v976_v59, %v3250_v46  ;;  %v1436_v10 = vrot.slane %v1396_v3, %v3244_v45  ;;  %v1444_v12 = vrot.slane %v1404_v4, %v3244_v45  ;;  %v1671_v59 = vld [vmem:[%s3554_s5 + $0x268] sm:$0xff] }
 0x1be   : > { %2126 = vmatprep.subr.mxu0 %v1615_v0  ;;  %2161 = vmatprep.subr.mxu1 %v1647_v19  ;;  %v1520_v13 = vrot.slane %v1480_v5, %v3247_v36  ;;  %v1448_v17 = vrot.slane %v1408_v6, %v3244_v45  ;;  %v1528_v18 = vrot.slane %v1488_v7, %v3247_v36  ;;  %v1718_v5 = vld [vmem:[%s3554_s5 + $0x3e0] sm:$0xff] }
 0x1bf   : > { %2127 = vmatpush3.msra.mxu0 %v1599_v57  ;;  %2162 = vmatpush3.msra.mxu1 %v1631_v20  ;;  %v1440_v57 = vrot.slane %v1400_v11, %v3244_v45  ;;  %v1670_v6 = vld [vmem:[%s3554_s5 + $0x260] sm:$0xff]  ;;  %v1701_v11 = vld [vmem:[%s3554_s5 + $0x358] sm:$0xff] }
 0x1c0   : > { %2128 = vmatprep.subr.mxu0 %v1614_v21  ;;  %2163 = vmatprep.subr.mxu1 %v1646_v22  ;;  %v1702_v7 = vld [vmem:[%s3554_s5 + $0x360] sm:$0xff] }
 0x1c1   : > { %2129 = vmatpush3.msra.mxu0 %v1598_v23  ;;  %2164 = vmatpush3.msra.mxu1 %v1630_v24 }
 0x1c2   : > { %2130 = vmatprep.subr.mxu0 %v1613_v25  ;;  %2165 = vmatprep.subr.mxu1 %v1645_v26 }
 0x1c3   : > { %2131 = vmatpush3.msra.mxu0 %v1597_v27  ;;  %2166 = vmatpush3.msra.mxu1 %v1629_v28 }
 0x1c4   : > { %2132 = vmatprep.subr.mxu0 %v1612_v29  ;;  %2167 = vmatprep.subr.mxu1 %v1644_v30 }
 0x1c5   : > { %2133 = vmatpush3.msra.mxu0 %v1596_v31  ;;  %2168 = vmatpush3.msra.mxu1 %v1628_v32  ;;  %v927_v32 = vrot.slane %v3258_v35, %v3274_v61 }
 0x1c6   : > { %2134 = vmatprep.subr.mxu0 %v1611_v33  ;;  %2169 = vmatprep.subr.mxu1 %v1643_v34  ;;  %v931_v33 = vrot.slane %v3258_v35, %v3271_v60 }
 0x1c7   : > { %2135 = vmatpush3.msra.mxu0 %v1595_v37  ;;  %2170 = vmatpush3.msra.mxu1 %v1627_v38  ;;  %v935_v38 = vrot.slane %v3258_v35, %v3277_v62 }
 0x1c8   : > { %2136 = vmatprep.subr.mxu0 %v1610_v39  ;;  %2171 = vmatprep.subr.mxu1 %v1642_v40  ;;  %v939_v39 = vrot.slane %v3258_v35, %v3280_v63  ;;  %v1688_v35 = vld [vmem:[%s3554_s5 + $0x2f0] sm:$0xff]  ;;  %v957_v51 = vcombine.low %v927_v32, %v931_v33 }
 0x1c9   : > { %2137 = vmatpush3.msra.mxu0 %v1594_v41  ;;  %2172 = vmatpush3.msra.mxu1 %v1626_v42 }
 0x1ca   : > { %2176 = vmatprep.subr.mxu0 %v1689_v43  ;;  %2211 = vmatprep.subr.mxu1 %v1721_v44  ;;  %v958_v52 = vcombine.low %v935_v38, %v939_v39  ;;  %v965_v3 = vrot.slane %v957_v51, %v2641_v14  ;;  %v1711_v38 = vld [vmem:[%s3554_s5 + $0x3a8] sm:$0xff] }
 0x1cc   : > { %v972_v4 = vrot.slane %v958_v52, %v2641_v14  ;;  %v1685_v14 = vld [vmem:[%s3554_s5 + $0x2d8] sm:$0xff] }
 0x247   : > { %v1173_v15 = vpop.f32.mrf.mxu0  ;;  %v1244_v16 = vpop.f32.mrf.mxu1 }
 0x248   : > { %v1545_v0 = vadd.f32 %v1516_v8, %v1173_v15  ;;  %v1547_v19 = vadd.f32 %v1524_v9, %v1244_v16  ;;  %v1465_v20 = vadd.f32 %v1436_v10, %v1173_v15  ;;  %v1467_v24 = vadd.f32 %v1444_v12, %v1244_v16  ;;  %v1717_v8 = vld [vmem:[%s3554_s5 + $0x3d8] sm:$0xff]  ;;  %v1684_v10 = vld [vmem:[%s3554_s5 + $0x2d0] sm:$0xff]  ;;  %v905_v16 = vld [vmem:[#allocation2 + $0x8] sm:$0xff] }
 0x249   : > { %v1175_v21 = vpop.f32.mrf.mxu0  ;;  %v1246_v22 = vpop.f32.mrf.mxu1  ;;  %v1669_v9 = vld [vmem:[%s3554_s5 + $0x258] sm:$0xff]  ;;  %v973_v12 = vcombine.low %v965_v3, %v972_v4  ;;  %v1668_v15 = vld [vmem:[%s3554_s5 + $0x250] sm:$0xff] }
 0x24a   : > { %v1561_v23 = vrot.slane %v1545_v0, 6  ;;  %v1563_v25 = vrot.slane %v1547_v19, 6  ;;  %v1546_v26 = vadd.f32 %v1520_v13, %v1175_v21  ;;  %v1468_v27 = vadd.f32 %v1448_v17, %v1246_v22  ;;  %v1716_v13 = vld [vmem:[%s3554_s5 + $0x3d0] sm:$0xff]  ;;  %v1715_v0 = vld [vmem:[%s3554_s5 + $0x3c8] sm:$0xff] }
 0x24b   : > { %v1548_v28 = vadd.f32 %v1528_v18, %v1246_v22  ;;  %v1466_v29 = vadd.f32 %v1440_v57, %v1175_v21  ;;  %v1700_v17 = vld [vmem:[%s3554_s5 + $0x350] sm:$0xff]  ;;  %v1683_v18 = vld [vmem:[%s3554_s5 + $0x2c8] sm:$0xff]  ;;  %v3393_v21 = vadd.f32 %v973_v12, %v905_v16  ;;  %v1714_v22 = vld [vmem:[%s3554_s5 + $0x3c0] sm:$0xff] }
 0x24c   : > { %v1562_v30 = vrot.slane %v1546_v26, 6  ;;  %v1578_v31 = vsel %vm1577_vm0, %v1465_v20, %v1561_v23  ;;  %v1580_v37 = vsel %vm1577_vm0, %v1467_v24, %v1563_v25  ;;  %v1667_v19 = vld [vmem:[%s3554_s5 + $0x248] sm:$0xff]  ;;  %v1682_v20 = vld [vmem:[%s3554_s5 + $0x2c0] sm:$0xff]  ;;  %v1681_v25 = vld [vmem:[%s3554_s5 + $0x2b8] sm:$0xff] }
 0x24d   : > { %v1564_v34 = vrot.slane %v1548_v28, 6  ;;  %v1586_v43 = vmax.f32 %v1578_v31, 0.0  ;;  %v1588_v49 = vmax.f32 %v1580_v37, 0.0  ;;  %v1699_v57 = vld [vmem:[%s3554_s5 + $0x348] sm:$0xff]  ;;  %v1666_v23 = vld [vmem:[%s3554_s5 + $0x240] sm:$0xff]  ;;  %v1713_v26 = vld [vmem:[%s3554_s5 + $0x3b8] sm:$0xff]  ;;  %v1492_v32 = vrot.slane %v3393_v21, %v3247_v36 }
 0x24e   : > { %v1579_v40 = vsel %vm1577_vm0, %v1466_v29, %v1562_v30  ;;  %v1698_v24 = vld [vmem:[%s3554_s5 + $0x340] sm:$0xff]  ;;  %v1697_v28 = vld [vmem:[%s3554_s5 + $0x338] sm:$0xff]  ;;  %v1680_v29 = vld [vmem:[%s3554_s5 + $0x2b0] sm:$0xff]  ;;  %v1500_v33 = vrot.slane %v3393_v21, %v3271_v60  ;;  %v1420_v39 = vrot.slane %v3393_v21, %v3274_v61 }
 0x24f   : > { %v1587_v41 = vmax.f32 %v1579_v40, 0.0  ;;  %v1581_v42 = vsel %vm1577_vm0, %v1468_v27, %v1564_v34  ;;  %v1665_v27 = vld [vmem:[%s3554_s5 + $0x238] sm:$0xff]  ;;  %v1712_v30 = vld [vmem:[%s3554_s5 + $0x3b0] sm:$0xff]  ;;  %v1679_v37 = vld [vmem:[%s3554_s5 + $0x2a8] sm:$0xff]  ;;  %v1496_v40 = vrot.slane %v3393_v21, %v3253_v47  ;;  %v1532_v47 = vrot.slane %v1492_v32, %v3247_v36 }
 0x250   : > { %v1589_v44 = vmax.f32 %v1581_v42, 0.0  ;;  %v1664_v31 = vld [vmem:[%s3554_s5 + $0x230] sm:$0xff]  ;;  %v1663_v60 = vld [vmem:[%s3554_s5 + $0x228] sm:$0xff]  ;;  %v1678_v61 = vld [vmem:[%s3554_s5 + $0x2a0] sm:$0xff]  ;;  %v1460_v51 = vrot.slane %v1420_v39, %v3244_v45 }
 0x251   : > { %1793 = vmatprep.mubr.f32.mxu0 %v1587_v41  ;;  %v1696_v34 = vld [vmem:[%s3554_s5 + $0x330] sm:$0xff]  ;;  %v1412_v41 = vrot.slane %v3393_v21, %v3244_v45  ;;  %v1695_v42 = vld [vmem:[%s3554_s5 + $0x328] sm:$0xff]  ;;  %v1536_v52 = vrot.slane %v1496_v40, %v3247_v36  ;;  %v2100_v39 = vld [vmem:[%s3555_s6] ss:$0 sm:$0xff] }
 0x252   : > { %1863 = vmatprep.mubr.f32.mxu1 %v1589_v44  ;;  %1794 = vmatmul.mubr.f32.vlgmr.msra.gmra.mxu0 %v1586_v43  ;;  %v1504_v43 = vrot.slane %v3393_v21, %v3280_v63  ;;  %v1540_v44 = vrot.slane %v1500_v33, %v3247_v36  ;;  %v1424_v63 = vrot.slane %v3393_v21, %v3277_v62  ;;  %v1676_v4 = vld [vmem:[%s3554_s5 + $0x290] sm:$0xff] }
 0x253   : > { %1864 = vmatmul.mubr.f32.vlgmr.msra.gmra.mxu1 %v1588_v49  ;;  %2177 = vmatpush3.msra.mxu0 %v1673_v48  ;;  %v1710_v48 = vld [vmem:[%s3554_s5 + $0x3a0] sm:$0xff]  ;;  %v1416_v49 = vrot.slane %v3393_v21, %v3250_v46  ;;  %v1677_v46 = vld [vmem:[%s3554_s5 + $0x298] sm:$0xff]  ;;  %v1452_v62 = vrot.slane %v1412_v41, %v3244_v45 }
 0x254   : > { %2212 = vmatpush3.msra.mxu1 %v1705_v50  ;;  %2178 = vmatprep.subr.mxu0 %v1688_v35  ;;  %v1662_v50 = vld [vmem:[%s3554_s5 + $0x220] sm:$0xff] }
 0x255   : > { %2213 = vmatprep.subr.mxu1 %v1720_v53  ;;  %2179 = vmatpush3.msra.mxu0 %v1672_v54  ;;  %v1694_v35 = vld [vmem:[%s3554_s5 + $0x320] sm:$0xff]  ;;  %v1709_v53 = vld [vmem:[%s3554_s5 + $0x398] sm:$0xff]  ;;  %v1456_v3 = vrot.slane %v1416_v49, %v3244_v45 }
 0x256   : > { %2214 = vmatpush3.msra.mxu1 %v1704_v55  ;;  %2180 = vmatprep.subr.mxu0 %v1687_v56  ;;  %v1544_v56 = vrot.slane %v1504_v43, %v3247_v36  ;;  %v1708_v36 = vld [vmem:[%s3554_s5 + $0x390] sm:$0xff] }
 0x257   : > { %2215 = vmatprep.subr.mxu1 %v1719_v58  ;;  %2181 = vmatpush3.msra.mxu0 %v1671_v59  ;;  %v1661_v58 = vld [vmem:[%s3554_s5 + $0x218] sm:$0xff] }
 0x258   : > { %2216 = vmatpush3.msra.mxu1 %v1703_v1  ;;  %2182 = vmatprep.subr.mxu0 %v1686_v2  ;;  %v1693_v59 = vld [vmem:[%s3554_s5 + $0x318] sm:$0xff] }
 0x259   : > { %2217 = vmatprep.subr.mxu1 %v1718_v5  ;;  %2183 = vmatpush3.msra.mxu0 %v1670_v6 }
 0x25a   : > { %2218 = vmatpush3.msra.mxu1 %v1702_v7  ;;  %2184 = vmatprep.subr.mxu0 %v1685_v14  ;;  %v1464_v7 = vrot.slane %v1424_v63, %v3244_v45  ;;  %v1660_v14 = vld [vmem:[%s3554_s5 + $0x210] sm:$0xff]  ;;  %v1675_v45 = vld [vmem:[%s3554_s5 + $0x288] sm:$0xff] }
 0x25b   : > { %2219 = vmatprep.subr.mxu1 %v1717_v8  ;;  %2185 = vmatpush3.msra.mxu0 %v1669_v9  ;;  %v1692_v8 = vld [vmem:[%s3554_s5 + $0x310] sm:$0xff] }
 0x25c   : > { %2220 = vmatpush3.msra.mxu1 %v1701_v11  ;;  %2186 = vmatprep.subr.mxu0 %v1684_v10 }
 0x25d   : > { %2221 = vmatprep.subr.mxu1 %v1716_v13  ;;  %2187 = vmatpush3.msra.mxu0 %v1668_v15  ;;  %v1707_v13 = vld [vmem:[%s3554_s5 + $0x388] sm:$0xff] }
 0x25e   : > { %2222 = vmatpush3.msra.mxu1 %v1700_v17  ;;  %2188 = vmatprep.subr.mxu0 %v1683_v18  ;;  %v1659_v17 = vld [vmem:[%s3554_s5 + $0x208] sm:$0xff] }
 0x25f   : > { %2223 = vmatprep.subr.mxu1 %v1715_v0  ;;  %2189 = vmatpush3.msra.mxu0 %v1667_v19  ;;  %v1691_v18 = vld [vmem:[%s3554_s5 + $0x308] sm:$0xff] }
 0x260   : > { %2224 = vmatpush3.msra.mxu1 %v1699_v57  ;;  %2190 = vmatprep.subr.mxu0 %v1682_v20  ;;  %v1674_v57 = vld [vmem:[%s3554_s5 + $0x280] sm:$0xff] }
 0x261   : > { %2225 = vmatprep.subr.mxu1 %v1714_v22  ;;  %2191 = vmatpush3.msra.mxu0 %v1666_v23  ;;  %v1706_v20 = vld [vmem:[%s3554_s5 + $0x380] sm:$0xff] }
 0x262   : > { %2226 = vmatpush3.msra.mxu1 %v1698_v24  ;;  %2192 = vmatprep.subr.mxu0 %v1681_v25  ;;  %v1658_v24 = vld [vmem:[%s3554_s5 + $0x200] sm:$0xff] }
 0x263   : > { %2227 = vmatprep.subr.mxu1 %v1713_v26  ;;  %2193 = vmatpush3.msra.mxu0 %v1665_v27  ;;  %v1690_v25 = vld [vmem:[%s3554_s5 + $0x300] sm:$0xff] }
 0x264   : > { %2228 = vmatpush3.msra.mxu1 %v1697_v28  ;;  %2194 = vmatprep.subr.mxu0 %v1680_v29 }
 0x265   : > { %2229 = vmatprep.subr.mxu1 %v1712_v30  ;;  %2195 = vmatpush3.msra.mxu0 %v1664_v31 }
 0x266   : > { %2230 = vmatpush3.msra.mxu1 %v1696_v34  ;;  %2196 = vmatprep.subr.mxu0 %v1679_v37 }
 0x267   : > { %2231 = vmatprep.subr.mxu1 %v1711_v38  ;;  %2197 = vmatpush3.msra.mxu0 %v1663_v60 }
 0x268   : > { %2232 = vmatpush3.msra.mxu1 %v1695_v42  ;;  %2198 = vmatprep.subr.mxu0 %v1678_v61 }
 0x269   : > { %v1315_v54 = vpop.f32.mrf.mxu0  ;;  %v1386_v55 = vpop.f32.mrf.mxu1  ;;  %2233 = vmatprep.subr.mxu1 %v1710_v48  ;;  %2199 = vmatpush3.msra.mxu0 %v1662_v50 }
 0x26a   : > { %v1549_v1 = vadd.f32 %v1532_v47, %v1315_v54  ;;  %v1551_v2 = vadd.f32 %v1540_v44, %v1386_v55  ;;  %2234 = vmatpush3.msra.mxu1 %v1694_v35  ;;  %2200 = vmatprep.subr.mxu0 %v1677_v46  ;;  %v1471_v11 = vadd.f32 %v1460_v51, %v1386_v55 }
 0x26b   : > { %v1317_v5 = vpop.f32.mrf.mxu0  ;;  %v1388_v6 = vpop.f32.mrf.mxu1  ;;  %2235 = vmatprep.subr.mxu1 %v1709_v53  ;;  %2201 = vmatpush3.msra.mxu0 %v1661_v58  ;;  %v1469_v15 = vadd.f32 %v1452_v62, %v1315_v54 }
 0x26c   : > { %v1565_v9 = vrot.slane %v1549_v1, 6  ;;  %v1567_v10 = vrot.slane %v1551_v2, 6  ;;  %v1550_v12 = vadd.f32 %v1536_v52, %v1317_v5  ;;  %2236 = vmatpush3.msra.mxu1 %v1693_v59  ;;  %v1552_v16 = vadd.f32 %v1544_v56, %v1388_v6  ;;  %2202 = vmatprep.subr.mxu0 %v1676_v4 }
 0x26d   : > { %2237 = vmatprep.subr.mxu1 %v1708_v36  ;;  %v1470_v0 = vadd.f32 %v1456_v3, %v1317_v5  ;;  %2203 = vmatpush3.msra.mxu0 %v1660_v14  ;;  %v1472_v22 = vadd.f32 %v1464_v7, %v1388_v6 }
 0x26e   : > { %v1566_v19 = vrot.slane %v1550_v12, 6  ;;  %2238 = vmatpush3.msra.mxu1 %v1692_v8  ;;  %v1582_v21 = vsel %vm1577_vm0, %v1469_v15, %v1565_v9  ;;  %v1568_v23 = vrot.slane %v1552_v16, 6  ;;  %2204 = vmatprep.subr.mxu0 %v1675_v45  ;;  %v1584_v26 = vsel %vm1577_vm0, %v1471_v11, %v1567_v10 }
 0x26f   : > { %2239 = vmatprep.subr.mxu1 %v1707_v13  ;;  %2205 = vmatpush3.msra.mxu0 %v1659_v17  ;;  %v1590_v30 = vmax.f32 %v1582_v21, 0.0  ;;  %v1592_v32 = vmax.f32 %v1584_v26, 0.0 }
 0x270   : > { %2240 = vmatpush3.msra.mxu1 %v1691_v18  ;;  %v1583_v27 = vsel %vm1577_vm0, %v1470_v0, %v1566_v19  ;;  %2206 = vmatprep.subr.mxu0 %v1674_v57  ;;  %v1585_v29 = vsel %vm1577_vm0, %v1472_v22, %v1568_v23 }
 0x271   : > { %2241 = vmatprep.subr.mxu1 %v1706_v20  ;;  %v1591_v28 = vmax.f32 %v1583_v27, 0.0  ;;  %2207 = vmatpush3.msra.mxu0 %v1658_v24  ;;  %v1593_v31 = vmax.f32 %v1585_v29, 0.0 }
 0x272   : > { %2242 = vmatpush3.msra.mxu1 %v1690_v25 }
 0x273   : > { %1933 = vmatprep.mubr.f32.mxu0 %v1591_v28  ;;  %2003 = vmatprep.mubr.f32.mxu1 %v1593_v31 }
 0x274   : > { %1934 = vmatmul.mubr.f32.vlgmr.msra.gmra.mxu0 %v1590_v30  ;;  %2004 = vmatmul.mubr.f32.vlgmr.msra.gmra.mxu1 %v1592_v32 }
 0x312   : > { %v2138_v33 = vpop.f32.mrf.mxu0 }
 0x313   : > { %v2173_v37 = vpop.f32.mrf.mxu1 }
 0x314   : > { %v2139_v34 = vpop.f32.mrf.mxu0 }
 0x315   : > { %v2140_v38 = vadd.f32 %v2139_v34, %v2138_v33  ;;  %v2174_v60 = vpop.f32.mrf.mxu1 }
 0x316   : > { %v2175_v42 = vadd.f32 %v2174_v60, %v2173_v37 }
 0x317   : > { %v1796_v40 = vadd.f32 %v2140_v38, %v2100_v39 }
 0x319   : > { %v1866_v47 = vadd.f32 %v2175_v42, %v1796_v40 }
 0x334   : > { %v2208_v41 = vpop.f32.mrf.mxu0  ;;  %v2243_v61 = vpop.f32.mrf.mxu1 }
 0x336   : > { %v2209_v43 = vpop.f32.mrf.mxu0  ;;  %v2244_v48 = vpop.f32.mrf.mxu1 }
 0x337   : > { %v2210_v44 = vadd.f32 %v2209_v43, %v2208_v41  ;;  %v2245_v50 = vadd.f32 %v2244_v48, %v2243_v61 }
 0x339   : > { %v1936_v49 = vadd.f32 %v2210_v44, %v1866_v47 }
 0x33b   : > { %v2006_v63 = vadd.f32 %v2245_v50, %v1936_v49 }
 0x33d   : > { %v2010_v35 = vsel %vm2009_vm1, %v2006_v63, 0.0  ;;  %v2018_v51 = vrot.slane %v2006_v63, 2 }
 0x33e   : > { %v2011_v52 = vrot.slane %v2010_v35, 4 }
 0x33f   : > { %v2020_v46 = vsel %vm2009_vm1, %v2018_v51, 0.0 }
 0x340   : > { %v2012_v53 = vadd.f32 %v2011_v52, %v2010_v35  ;;  %v2021_v54 = vrot.slane %v2020_v46, 4 }
 0x342   : > { %v2013_v62 = vrot.slane %v2012_v53, 2  ;;  %v2022_v55 = vadd.f32 %v2021_v54, %v2020_v46 }
 0x344   : > { %v2014_v56 = vadd.f32 %v2013_v62, %v2012_v53  ;;  %v2023_v58 = vrot.slane %v2022_v55, 2 }
 0x346   : > { %v2015_v59 = vrot.slane %v2014_v56, 1  ;;  %v2024_v1 = vadd.f32 %v2023_v58, %v2022_v55 }
 0x348   : > { %v2025_v2 = vrot.slane %v2024_v1, 1  ;;  %v2016_v3 = vadd.f32 %v2015_v59, %v2014_v56 }
 0x34a   : > { %v2026_v4 = vadd.f32 %v2025_v2, %v2024_v1 }
 0x34c   : > { %v2028_v36 = vsel %vm2027_vm2, %v2016_v3, %v2026_v4 }
 0x34d   : > { %2029 = vst.msk [vmem:[#allocation3] sm:$0x3] %vm2009_vm1, %v2028_v36 }
 0x34e PF: > { %p2250_p7 = scmp.eq.s32.totalorder %s2350_s25, 7  ;;  %s2303_s29 = smov [#allocation3]  }
 0x34f   : > { %s2037_s30 = sshll.u32 %s2303_s29, 4  ;;  %s2038_s30 = int_to_ptr.vmem [resolvable:$true] %s2037_s30 }
 0x350   : > { %s2264_s8 = scalar_lea.vmem %s2038_s30, 32  ;;  %p2271_p11 = scmp.lt.s32.totalorder %s2038_s30, %s2038_s30 }
 0x351   : > { %p2265_p8 = scmp.ne.s32.totalorder %s2038_s30, %s2264_s8  ;;  %p2272_p12 = scmp.lt.s32.totalorder %s2264_s8, %s2264_s8 }
 0x353   : > { %p2266_p9 = pnand %p2265_p8, %p2250_p7  ;;  %p2273_p13 = por %p2272_p12, %p2271_p11 }
 0x355   : > { %p2267_p10 = pneg %p2266_p9 }
 0x357   : > { %p2274_p0 = pnand %p2273_p13, %p2267_p10 }
 0x359   : > { %2277 = shalt.err (!%p2274_p0)
}
 0x35a   : > { %2247 = dma.vmem_to_hbm [thread:$0]  (%p2250_p7), %s2038_s30, 32, %s3556_s7, [#allocation4]  }
 0x35b   : > { %2293 = dma.done.wait (%p2250_p7), [#allocation4], 32  }
 0x35c   : > { %2295 = vsyncadd (%p2250_p7), [#allocation4], 4294967264 }
 0x35d PF: > { %s18_s24 = sadd.s32 1, %s2298_s24  }
 0x35e   : > { %p15_p1 = scmp.ge.s32.totalorder %s18_s24, 10  }
 0x360   :  { %17 = sbr.rel (!%p15_p1) target bundleno = 1 (0x1), region = 86 }
 0x365   :  { %2050 = vsyncpa [#allocation4], 1 }
 0x366   :  { %2052 = vsyncpa [#allocation4 + $0x1], 1 }

// kernel: fdc6_forward.2
= control target key start
LH: loop header
LB: loop body
LE: loop exit
PB: predicated region body
PF: predicated region fallthrough
CT: control target
= control target key end

     0   :  { %vm147_vm0 = vcmask 1042432   ;;  %v11811_v1 = vmov 0.0   ;;  %vm134_vm1 = vcmask 23552   ;;  %vm3655_vm2 = vcmask 261120   ;;  %s11797_s0 = inlined_call_operand.vmem [shape: f32[3,6272], index: 0, kind: input, shape index: {}]   ;;  %s11798_s4 = inlined_call_operand.vmem [shape: f32[32,3], index: 4, kind: input, shape index: {}]   ;;  %s11799_s1 = inlined_call_operand.vmem [shape: f32[3,1568], index: 1, kind: input, shape index: {}]   ;;  %s11800_s7 = inlined_call_operand.vmem [shape: f32[32,1], index: 7, kind: input, shape index: {}]   ;;  %s11801_s8 = inlined_call_operand.vmem [shape: f32[32,1], index: 8, kind: input, shape index: {}]   ;;  %s11802_s5 = inlined_call_operand.vmem [shape: f32[64,32], index: 5, kind: input, shape index: {}]   ;;  %s11803_s2 = inlined_call_operand.vmem [shape: f32[3,392], index: 2, kind: input, shape index: {}]   ;;  %s11804_s10 = inlined_call_operand.vmem [shape: f32[64,1], index: 10, kind: input, shape index: {}]   ;;  %s11805_s9 = inlined_call_operand.vmem [shape: f32[64,1], index: 9, kind: input, shape index: {}]   ;;  %s11806_s6 = inlined_call_operand.vmem [shape: f32[128,64], index: 6, kind: input, shape index: {}]   ;;  %s11807_s12 = inlined_call_operand.vmem [shape: f32[128,1], index: 12, kind: input, shape index: {}]   ;;  %s11808_s3 = inlined_call_operand.vmem [shape: f32[392,2], index: 3, kind: input, shape index: {}]   ;;  %s11809_s11 = inlined_call_operand.vmem [shape: f32[128,1], index: 11, kind: input, shape index: {}]   ;;  %s11810_s13 = inlined_call_operand.vmem [shape: f32[128,2], index: 13, kind: output, shape index: {}]  }
   0x1   :  { %v128_v0 = vld [vmem:[%s11797_s0] sm:$0x77]  ;;  %232 = vmatprep.mubr.f32.mxu1 %v11811_v1  ;;  %220 = vmatprep.mubr.f32.mxu0 %v11811_v1  ;;  %v129_v3 = vld [vmem:[%s11797_s0 + $0x8] sm:$0x77]  ;;  %v8499_v4 = vld [vmem:[%s11798_s4 + $0x10] sm:$0xff]  ;;  %vm6282_vm3 = vcmask 523264  }
   0x2   :  { %v132_v2 = vcombine.high %v128_v0, %v128_v0  ;;  %v8504_v5 = vld [vmem:[%s11798_s4] sm:$0xff]  ;;  %v398_v6 = vld [vmem:[%s11797_s0 + $0x10] sm:$0x77]  ;;  %v133_v7 = vcombine.high %v129_v3, %v129_v3  ;;  %v399_v9 = vld [vmem:[%s11797_s0 + $0x18] sm:$0x77]  ;;  %vm6655_vm4 = vcmask 64512  }
   0x3   :  { %v402_v8 = vcombine.high %v398_v6, %v398_v6  ;;  %v654_v10 = vld [vmem:[%s11797_s0 + $0x20] sm:$0x77]  ;;  %v8527_v11 = vld [vmem:[%s11798_s4 + $0x18] sm:$0xff]  ;;  %v8533_v12 = vld [vmem:[%s11798_s4 + $0x8] sm:$0xff]  ;;  %v403_v13 = vcombine.high %v399_v9, %v399_v9  ;;  %vm7825_vm5 = vcmask 15360  }
   0x4   :  { %8306 = vmatprep.subr.msk.mxu1 %vm147_vm0, %v132_v2  ;;  %7846 = vmatprep.subr.msk.mxu0 %vm147_vm0, %v132_v2  ;;  %v658_v14 = vcombine.high %v654_v10, %v654_v10  ;;  %v655_v15 = vld [vmem:[%s11797_s0 + $0x28] sm:$0x77]  ;;  %v910_v16 = vld [vmem:[%s11797_s0 + $0x30] sm:$0x77]  ;;  %v911_v19 = vld [vmem:[%s11797_s0 + $0x38] sm:$0x77] }
   0x5   :  { %8307 = vmatpush1.msk.msra.mxu1 %vm147_vm0, %v128_v0  ;;  %7847 = vmatpush1.msk.msra.mxu0 %vm147_vm0, %v128_v0  ;;  %v659_v17 = vcombine.high %v655_v15, %v655_v15  ;;  %v914_v18 = vcombine.high %v910_v16, %v910_v16  ;;  %v1166_v20 = vld [vmem:[%s11797_s0 + $0x40] sm:$0x77]  ;;  %v915_v21 = vcombine.high %v911_v19, %v911_v19  ;;  %v1167_v23 = vld [vmem:[%s11797_s0 + $0x48] sm:$0x77]  ;;  %v1422_v24 = vld [vmem:[%s11797_s0 + $0x50] sm:$0x77] }
   0x6   :  { %7850 = vmatmul.mubr.msk.f32.vlgmr.msra.gmra.mxu1 %vm134_vm1, %v8499_v4  ;;  %7848 = vmatmul.mubr.msk.f32.vlgmr.msra.gmra.mxu0 %vm134_vm1, %v8504_v5  ;;  %v1170_v22 = vcombine.high %v1166_v20, %v1166_v20  ;;  %v1171_v25 = vcombine.high %v1167_v23, %v1167_v23  ;;  %v1426_v26 = vcombine.high %v1422_v24, %v1422_v24  ;;  %v1423_v27 = vld [vmem:[%s11797_s0 + $0x58] sm:$0x77]  ;;  %v1678_v28 = vld [vmem:[%s11797_s0 + $0x60] sm:$0x77]  ;;  %v1679_v31 = vld [vmem:[%s11797_s0 + $0x68] sm:$0x77] }
   0x7   :  { %238 = vmatprep.mubr.f32.mxu1 %v11811_v1  ;;  %226 = vmatprep.mubr.f32.mxu0 %v11811_v1  ;;  %v1427_v29 = vcombine.high %v1423_v27, %v1423_v27  ;;  %v1682_v30 = vcombine.high %v1678_v28, %v1678_v28  ;;  %v1934_v32 = vld [vmem:[%s11797_s0 + $0x70] sm:$0x77]  ;;  %v1683_v33 = vcombine.high %v1679_v31, %v1679_v31  ;;  %v1935_v35 = vld [vmem:[%s11797_s0 + $0x78] sm:$0x77]  ;;  %v2190_v36 = vld [vmem:[%s11797_s0 + $0x80] sm:$0x77] }
   0x8   :  { %7852 = vmatprep.subr.msk.mxu1 %vm147_vm0, %v133_v7  ;;  %7858 = vmatprep.subr.msk.mxu0 %vm147_vm0, %v402_v8  ;;  %v1938_v34 = vcombine.high %v1934_v32, %v1934_v32  ;;  %v1939_v37 = vcombine.high %v1935_v35, %v1935_v35  ;;  %v2194_v38 = vcombine.high %v2190_v36, %v2190_v36  ;;  %v2191_v39 = vld [vmem:[%s11797_s0 + $0x88] sm:$0x77]  ;;  %v2446_v40 = vld [vmem:[%s11797_s0 + $0x90] sm:$0x77]  ;;  %v2447_v43 = vld [vmem:[%s11797_s0 + $0x98] sm:$0x77] }
   0x9   :  { %7853 = vmatpush1.msk.msra.mxu1 %vm147_vm0, %v129_v3  ;;  %7859 = vmatpush1.msk.msra.mxu0 %vm147_vm0, %v398_v6  ;;  %v2195_v41 = vcombine.high %v2191_v39, %v2191_v39  ;;  %v2450_v42 = vcombine.high %v2446_v40, %v2446_v40  ;;  %v2702_v44 = vld [vmem:[%s11797_s0 + $0xa0] sm:$0x77]  ;;  %v2451_v45 = vcombine.high %v2447_v43, %v2447_v43  ;;  %v2703_v47 = vld [vmem:[%s11797_s0 + $0xa8] sm:$0x77]  ;;  %v2958_v48 = vld [vmem:[%s11797_s0 + $0xb0] sm:$0x77] }
   0xa   :  { %7851 = vmatmul.mubr.msk.f32.gmra.mxu1 %vm134_vm1, %v8527_v11  ;;  %7849 = vmatmul.mubr.msk.f32.gmra.mxu0 %vm134_vm1, %v8533_v12  ;;  %v2706_v46 = vcombine.high %v2702_v44, %v2702_v44  ;;  %v2707_v49 = vcombine.high %v2703_v47, %v2703_v47  ;;  %v2962_v50 = vcombine.high %v2958_v48, %v2958_v48  ;;  %v2959_v51 = vld [vmem:[%s11797_s0 + $0xb8] sm:$0x77]  ;;  %v3214_v53 = vld [vmem:[%s11797_s0 + $0xc0] sm:$0x7] }
   0xb   :  { %309 = vmatprep.mubr.f32.mxu1 %v11811_v1  ;;  %476 = vmatprep.mubr.f32.mxu0 %v11811_v1  ;;  %v2963_v52 = vcombine.high %v2959_v51, %v2959_v51 }
   0xc   :  { %7864 = vmatprep.subr.msk.mxu1 %vm147_vm0, %v403_v13  ;;  %7870 = vmatprep.subr.msk.mxu0 %vm147_vm0, %v658_v14 }
   0xe   :  { %7854 = vmatmul.mubr.msk.f32.vlgmr.msra.gmra.mxu1 %vm134_vm1, %v8504_v5  ;;  %7860 = vmatmul.mubr.msk.f32.vlgmr.msra.gmra.mxu0 %vm134_vm1, %v8504_v5 }
   0xf   :  { %315 = vmatprep.mubr.f32.mxu1 %v11811_v1  ;;  %482 = vmatprep.mubr.f32.mxu0 %v11811_v1 }
  0x10   :  { %7865 = vmatpush1.msk.msra.mxu1 %vm147_vm0, %v399_v9  ;;  %7871 = vmatpush1.msk.msra.mxu0 %vm147_vm0, %v654_v10 }
  0x11   :  { %7876 = vmatprep.subr.msk.mxu1 %vm147_vm0, %v659_v17  ;;  %7882 = vmatprep.subr.msk.mxu0 %vm147_vm0, %v914_v18 }
  0x12   :  { %7855 = vmatmul.mubr.msk.f32.gmra.mxu1 %vm134_vm1, %v8533_v12  ;;  %7861 = vmatmul.mubr.msk.f32.gmra.mxu0 %vm134_vm1, %v8533_v12 }
  0x13   :  { %321 = vmatprep.mubr.f32.mxu1 %v11811_v1  ;;  %488 = vmatprep.mubr.f32.mxu0 %v11811_v1 }
  0x16   :  { %7856 = vmatmul.mubr.msk.f32.gmra.mxu1 %vm134_vm1, %v8499_v4  ;;  %7862 = vmatmul.mubr.msk.f32.gmra.mxu0 %vm134_vm1, %v8499_v4 }
  0x17   :  { %327 = vmatprep.mubr.f32.mxu1 %v11811_v1  ;;  %494 = vmatprep.mubr.f32.mxu0 %v11811_v1 }
  0x1a   :  { %7857 = vmatmul.mubr.msk.f32.gmra.mxu1 %vm134_vm1, %v8527_v11  ;;  %7863 = vmatmul.mubr.msk.f32.gmra.mxu0 %vm134_vm1, %v8527_v11 }
  0x1b   :  { %565 = vmatprep.mubr.f32.mxu1 %v11811_v1  ;;  %732 = vmatprep.mubr.f32.mxu0 %v11811_v1 }
  0x1e   :  { %7866 = vmatmul.mubr.msk.f32.vlgmr.msra.gmra.mxu1 %vm134_vm1, %v8504_v5  ;;  %7872 = vmatmul.mubr.msk.f32.vlgmr.msra.gmra.mxu0 %vm134_vm1, %v8504_v5 }
  0x1f   :  { %571 = vmatprep.mubr.f32.mxu1 %v11811_v1  ;;  %738 = vmatprep.mubr.f32.mxu0 %v11811_v1 }
  0x20   :  { %7877 = vmatpush1.msk.msra.mxu1 %vm147_vm0, %v655_v15  ;;  %7883 = vmatpush1.msk.msra.mxu0 %vm147_vm0, %v910_v16 }
  0x21   :  { %7888 = vmatprep.subr.msk.mxu1 %vm147_vm0, %v915_v21  ;;  %7894 = vmatprep.subr.msk.mxu0 %vm147_vm0, %v1170_v22 }
  0x22   :  { %7867 = vmatmul.mubr.msk.f32.gmra.mxu1 %vm134_vm1, %v8533_v12  ;;  %7873 = vmatmul.mubr.msk.f32.gmra.mxu0 %vm134_vm1, %v8533_v12 }
  0x23   :  { %577 = vmatprep.mubr.f32.mxu1 %v11811_v1  ;;  %744 = vmatprep.mubr.f32.mxu0 %v11811_v1 }
  0x26   :  { %7868 = vmatmul.mubr.msk.f32.gmra.mxu1 %vm134_vm1, %v8499_v4  ;;  %7874 = vmatmul.mubr.msk.f32.gmra.mxu0 %vm134_vm1, %v8499_v4 }
  0x27   :  { %583 = vmatprep.mubr.f32.mxu1 %v11811_v1  ;;  %750 = vmatprep.mubr.f32.mxu0 %v11811_v1 }
  0x2a   :  { %7869 = vmatmul.mubr.msk.f32.gmra.mxu1 %vm134_vm1, %v8527_v11  ;;  %7875 = vmatmul.mubr.msk.f32.gmra.mxu0 %vm134_vm1, %v8527_v11 }
  0x2b   :  { %821 = vmatprep.mubr.f32.mxu1 %v11811_v1  ;;  %988 = vmatprep.mubr.f32.mxu0 %v11811_v1 }
  0x2e   :  { %7878 = vmatmul.mubr.msk.f32.vlgmr.msra.gmra.mxu1 %vm134_vm1, %v8504_v5  ;;  %7884 = vmatmul.mubr.msk.f32.vlgmr.msra.gmra.mxu0 %vm134_vm1, %v8504_v5 }
  0x2f   :  { %827 = vmatprep.mubr.f32.mxu1 %v11811_v1  ;;  %994 = vmatprep.mubr.f32.mxu0 %v11811_v1 }
  0x30   :  { %7889 = vmatpush1.msk.msra.mxu1 %vm147_vm0, %v911_v19  ;;  %7895 = vmatpush1.msk.msra.mxu0 %vm147_vm0, %v1166_v20 }
  0x31   :  { %7900 = vmatprep.subr.msk.mxu1 %vm147_vm0, %v1171_v25  ;;  %7906 = vmatprep.subr.msk.mxu0 %vm147_vm0, %v1426_v26 }
  0x32   :  { %7879 = vmatmul.mubr.msk.f32.gmra.mxu1 %vm134_vm1, %v8533_v12  ;;  %7885 = vmatmul.mubr.msk.f32.gmra.mxu0 %vm134_vm1, %v8533_v12 }
  0x33   :  { %833 = vmatprep.mubr.f32.mxu1 %v11811_v1  ;;  %1000 = vmatprep.mubr.f32.mxu0 %v11811_v1 }
  0x36   :  { %7880 = vmatmul.mubr.msk.f32.gmra.mxu1 %vm134_vm1, %v8499_v4  ;;  %7886 = vmatmul.mubr.msk.f32.gmra.mxu0 %vm134_vm1, %v8499_v4 }
  0x37   :  { %839 = vmatprep.mubr.f32.mxu1 %v11811_v1  ;;  %1006 = vmatprep.mubr.f32.mxu0 %v11811_v1 }
  0x3a   :  { %7881 = vmatmul.mubr.msk.f32.gmra.mxu1 %vm134_vm1, %v8527_v11  ;;  %7887 = vmatmul.mubr.msk.f32.gmra.mxu0 %vm134_vm1, %v8527_v11 }
  0x3b   :  { %1077 = vmatprep.mubr.f32.mxu1 %v11811_v1  ;;  %1244 = vmatprep.mubr.f32.mxu0 %v11811_v1 }
  0x3e   :  { %7890 = vmatmul.mubr.msk.f32.vlgmr.msra.gmra.mxu1 %vm134_vm1, %v8504_v5  ;;  %7896 = vmatmul.mubr.msk.f32.vlgmr.msra.gmra.mxu0 %vm134_vm1, %v8504_v5 }
  0x3f   :  { %1083 = vmatprep.mubr.f32.mxu1 %v11811_v1  ;;  %1250 = vmatprep.mubr.f32.mxu0 %v11811_v1 }
  0x40   :  { %7901 = vmatpush1.msk.msra.mxu1 %vm147_vm0, %v1167_v23  ;;  %7907 = vmatpush1.msk.msra.mxu0 %vm147_vm0, %v1422_v24 }
  0x41   :  { %7912 = vmatprep.subr.msk.mxu1 %vm147_vm0, %v1427_v29  ;;  %7918 = vmatprep.subr.msk.mxu0 %vm147_vm0, %v1682_v30 }
  0x42   :  { %7891 = vmatmul.mubr.msk.f32.gmra.mxu1 %vm134_vm1, %v8533_v12  ;;  %7897 = vmatmul.mubr.msk.f32.gmra.mxu0 %vm134_vm1, %v8533_v12 }
  0x43   :  { %1089 = vmatprep.mubr.f32.mxu1 %v11811_v1  ;;  %1256 = vmatprep.mubr.f32.mxu0 %v11811_v1 }
  0x46   :  { %7892 = vmatmul.mubr.msk.f32.gmra.mxu1 %vm134_vm1, %v8499_v4  ;;  %7898 = vmatmul.mubr.msk.f32.gmra.mxu0 %vm134_vm1, %v8499_v4 }
  0x47   :  { %1095 = vmatprep.mubr.f32.mxu1 %v11811_v1  ;;  %1262 = vmatprep.mubr.f32.mxu0 %v11811_v1 }
  0x4a   :  { %7893 = vmatmul.mubr.msk.f32.gmra.mxu1 %vm134_vm1, %v8527_v11  ;;  %7899 = vmatmul.mubr.msk.f32.gmra.mxu0 %vm134_vm1, %v8527_v11 }
  0x4b   :  { %1333 = vmatprep.mubr.f32.mxu1 %v11811_v1  ;;  %1500 = vmatprep.mubr.f32.mxu0 %v11811_v1 }
  0x4e   :  { %7902 = vmatmul.mubr.msk.f32.vlgmr.msra.gmra.mxu1 %vm134_vm1, %v8504_v5  ;;  %7908 = vmatmul.mubr.msk.f32.vlgmr.msra.gmra.mxu0 %vm134_vm1, %v8504_v5 }
  0x4f   :  { %1339 = vmatprep.mubr.f32.mxu1 %v11811_v1  ;;  %1506 = vmatprep.mubr.f32.mxu0 %v11811_v1 }
  0x50   :  { %7913 = vmatpush1.msk.msra.mxu1 %vm147_vm0, %v1423_v27  ;;  %7919 = vmatpush1.msk.msra.mxu0 %vm147_vm0, %v1678_v28  ;;  %v3355_v27 = vld [vmem:[%s11799_s1] sm:$0x77]  ;;  %v3356_v28 = vld [vmem:[%s11799_s1 + $0x8] sm:$0x77] }
  0x51   :  { %7924 = vmatprep.subr.msk.mxu1 %vm147_vm0, %v1683_v33  ;;  %7930 = vmatprep.subr.msk.mxu0 %vm147_vm0, %v1938_v34  ;;  %v3359_v33 = vcombine.high %v3355_v27, %v3355_v27  ;;  %v3360_v34 = vcombine.high %v3356_v28, %v3356_v28 }
  0x52   :  { %7903 = vmatmul.mubr.msk.f32.gmra.mxu1 %vm134_vm1, %v8533_v12  ;;  %7909 = vmatmul.mubr.msk.f32.gmra.mxu0 %vm134_vm1, %v8533_v12 }
  0x53   :  { %1345 = vmatprep.mubr.f32.mxu1 %v11811_v1  ;;  %1512 = vmatprep.mubr.f32.mxu0 %v11811_v1 }
  0x56   :  { %7904 = vmatmul.mubr.msk.f32.gmra.mxu1 %vm134_vm1, %v8499_v4  ;;  %7910 = vmatmul.mubr.msk.f32.gmra.mxu0 %vm134_vm1, %v8499_v4 }
  0x57   :  { %1351 = vmatprep.mubr.f32.mxu1 %v11811_v1  ;;  %1518 = vmatprep.mubr.f32.mxu0 %v11811_v1 }
  0x5a   :  { %7905 = vmatmul.mubr.msk.f32.gmra.mxu1 %vm134_vm1, %v8527_v11  ;;  %7911 = vmatmul.mubr.msk.f32.gmra.mxu0 %vm134_vm1, %v8527_v11 }
  0x5b   :  { %1589 = vmatprep.mubr.f32.mxu1 %v11811_v1  ;;  %1756 = vmatprep.mubr.f32.mxu0 %v11811_v1 }
  0x5e   :  { %7914 = vmatmul.mubr.msk.f32.vlgmr.msra.gmra.mxu1 %vm134_vm1, %v8504_v5  ;;  %7920 = vmatmul.mubr.msk.f32.vlgmr.msra.gmra.mxu0 %vm134_vm1, %v8504_v5 }
  0x5f   :  { %1595 = vmatprep.mubr.f32.mxu1 %v11811_v1  ;;  %1762 = vmatprep.mubr.f32.mxu0 %v11811_v1 }
  0x60   :  { %7925 = vmatpush1.msk.msra.mxu1 %vm147_vm0, %v1679_v31  ;;  %7931 = vmatpush1.msk.msra.mxu0 %vm147_vm0, %v1934_v32 }
  0x61   :  { %7936 = vmatprep.subr.msk.mxu1 %vm147_vm0, %v1939_v37  ;;  %7942 = vmatprep.subr.msk.mxu0 %vm147_vm0, %v2194_v38 }
  0x62   :  { %7915 = vmatmul.mubr.msk.f32.gmra.mxu1 %vm134_vm1, %v8533_v12  ;;  %7921 = vmatmul.mubr.msk.f32.gmra.mxu0 %vm134_vm1, %v8533_v12 }
  0x63   :  { %1601 = vmatprep.mubr.f32.mxu1 %v11811_v1  ;;  %1768 = vmatprep.mubr.f32.mxu0 %v11811_v1 }
  0x66   :  { %7916 = vmatmul.mubr.msk.f32.gmra.mxu1 %vm134_vm1, %v8499_v4  ;;  %7922 = vmatmul.mubr.msk.f32.gmra.mxu0 %vm134_vm1, %v8499_v4 }
  0x67   :  { %1607 = vmatprep.mubr.f32.mxu1 %v11811_v1  ;;  %1774 = vmatprep.mubr.f32.mxu0 %v11811_v1 }
  0x6a   :  { %7917 = vmatmul.mubr.msk.f32.gmra.mxu1 %vm134_vm1, %v8527_v11  ;;  %7923 = vmatmul.mubr.msk.f32.gmra.mxu0 %vm134_vm1, %v8527_v11 }
  0x6b   :  { %1845 = vmatprep.mubr.f32.mxu1 %v11811_v1  ;;  %2012 = vmatprep.mubr.f32.mxu0 %v11811_v1 }
  0x6e   :  { %7926 = vmatmul.mubr.msk.f32.vlgmr.msra.gmra.mxu1 %vm134_vm1, %v8504_v5  ;;  %7932 = vmatmul.mubr.msk.f32.vlgmr.msra.gmra.mxu0 %vm134_vm1, %v8504_v5 }
  0x6f   :  { %1851 = vmatprep.mubr.f32.mxu1 %v11811_v1  ;;  %2018 = vmatprep.mubr.f32.mxu0 %v11811_v1 }
  0x70   :  { %7937 = vmatpush1.msk.msra.mxu1 %vm147_vm0, %v1935_v35  ;;  %7943 = vmatpush1.msk.msra.mxu0 %vm147_vm0, %v2190_v36 }
  0x71   :  { %7948 = vmatprep.subr.msk.mxu1 %vm147_vm0, %v2195_v41  ;;  %7954 = vmatprep.subr.msk.mxu0 %vm147_vm0, %v2450_v42 }
  0x72   :  { %7927 = vmatmul.mubr.msk.f32.gmra.mxu1 %vm134_vm1, %v8533_v12  ;;  %7933 = vmatmul.mubr.msk.f32.gmra.mxu0 %vm134_vm1, %v8533_v12 }
  0x73   :  { %1857 = vmatprep.mubr.f32.mxu1 %v11811_v1  ;;  %2024 = vmatprep.mubr.f32.mxu0 %v11811_v1 }
  0x76   :  { %7928 = vmatmul.mubr.msk.f32.gmra.mxu1 %vm134_vm1, %v8499_v4  ;;  %7934 = vmatmul.mubr.msk.f32.gmra.mxu0 %vm134_vm1, %v8499_v4 }
  0x77   :  { %1863 = vmatprep.mubr.f32.mxu1 %v11811_v1  ;;  %2030 = vmatprep.mubr.f32.mxu0 %v11811_v1 }
  0x7a   :  { %7929 = vmatmul.mubr.msk.f32.gmra.mxu1 %vm134_vm1, %v8527_v11  ;;  %7935 = vmatmul.mubr.msk.f32.gmra.mxu0 %vm134_vm1, %v8527_v11 }
  0x7b   :  { %2101 = vmatprep.mubr.f32.mxu1 %v11811_v1  ;;  %2268 = vmatprep.mubr.f32.mxu0 %v11811_v1 }
  0x7e   :  { %7938 = vmatmul.mubr.msk.f32.vlgmr.msra.gmra.mxu1 %vm134_vm1, %v8504_v5  ;;  %7944 = vmatmul.mubr.msk.f32.vlgmr.msra.gmra.mxu0 %vm134_vm1, %v8504_v5 }
  0x7f   :  { %2107 = vmatprep.mubr.f32.mxu1 %v11811_v1  ;;  %2274 = vmatprep.mubr.f32.mxu0 %v11811_v1 }
  0x80   :  { %7949 = vmatpush1.msk.msra.mxu1 %vm147_vm0, %v2191_v39  ;;  %7955 = vmatpush1.msk.msra.mxu0 %vm147_vm0, %v2446_v40 }
  0x81   :  { %7960 = vmatprep.subr.msk.mxu1 %vm147_vm0, %v2451_v45  ;;  %7966 = vmatprep.subr.msk.mxu0 %vm147_vm0, %v2706_v46 }
  0x82   :  { %7939 = vmatmul.mubr.msk.f32.gmra.mxu1 %vm134_vm1, %v8533_v12  ;;  %7945 = vmatmul.mubr.msk.f32.gmra.mxu0 %vm134_vm1, %v8533_v12 }
  0x83   :  { %2113 = vmatprep.mubr.f32.mxu1 %v11811_v1  ;;  %2280 = vmatprep.mubr.f32.mxu0 %v11811_v1 }
  0x86   :  { %7940 = vmatmul.mubr.msk.f32.gmra.mxu1 %vm134_vm1, %v8499_v4  ;;  %7946 = vmatmul.mubr.msk.f32.gmra.mxu0 %vm134_vm1, %v8499_v4 }
  0x87   :  { %2119 = vmatprep.mubr.f32.mxu1 %v11811_v1  ;;  %2286 = vmatprep.mubr.f32.mxu0 %v11811_v1 }
  0x8a   :  { %7941 = vmatmul.mubr.msk.f32.gmra.mxu1 %vm134_vm1, %v8527_v11  ;;  %7947 = vmatmul.mubr.msk.f32.gmra.mxu0 %vm134_vm1, %v8527_v11 }
  0x8b   :  { %2357 = vmatprep.mubr.f32.mxu1 %v11811_v1  ;;  %2524 = vmatprep.mubr.f32.mxu0 %v11811_v1 }
  0x8e   :  { %7950 = vmatmul.mubr.msk.f32.vlgmr.msra.gmra.mxu1 %vm134_vm1, %v8504_v5  ;;  %7956 = vmatmul.mubr.msk.f32.vlgmr.msra.gmra.mxu0 %vm134_vm1, %v8504_v5 }
  0x8f   :  { %2363 = vmatprep.mubr.f32.mxu1 %v11811_v1  ;;  %2530 = vmatprep.mubr.f32.mxu0 %v11811_v1 }
  0x90   :  { %7961 = vmatpush1.msk.msra.mxu1 %vm147_vm0, %v2447_v43  ;;  %7967 = vmatpush1.msk.msra.mxu0 %vm147_vm0, %v2702_v44 }
  0x91   :  { %7972 = vmatprep.subr.msk.mxu1 %vm147_vm0, %v2707_v49  ;;  %7978 = vmatprep.subr.msk.mxu0 %vm147_vm0, %v2962_v50 }
  0x92   :  { %7951 = vmatmul.mubr.msk.f32.gmra.mxu1 %vm134_vm1, %v8533_v12  ;;  %7957 = vmatmul.mubr.msk.f32.gmra.mxu0 %vm134_vm1, %v8533_v12 }
  0x93   :  { %2369 = vmatprep.mubr.f32.mxu1 %v11811_v1  ;;  %2536 = vmatprep.mubr.f32.mxu0 %v11811_v1 }
  0x96   :  { %7952 = vmatmul.mubr.msk.f32.gmra.mxu1 %vm134_vm1, %v8499_v4  ;;  %7958 = vmatmul.mubr.msk.f32.gmra.mxu0 %vm134_vm1, %v8499_v4 }
  0x97   :  { %2375 = vmatprep.mubr.f32.mxu1 %v11811_v1  ;;  %2542 = vmatprep.mubr.f32.mxu0 %v11811_v1 }
  0x9a   :  { %7953 = vmatmul.mubr.msk.f32.gmra.mxu1 %vm134_vm1, %v8527_v11  ;;  %7959 = vmatmul.mubr.msk.f32.gmra.mxu0 %vm134_vm1, %v8527_v11 }
  0x9b   :  { %2613 = vmatprep.mubr.f32.mxu1 %v11811_v1  ;;  %2780 = vmatprep.mubr.f32.mxu0 %v11811_v1 }
  0x9e   :  { %7962 = vmatmul.mubr.msk.f32.vlgmr.msra.gmra.mxu1 %vm134_vm1, %v8504_v5  ;;  %7968 = vmatmul.mubr.msk.f32.vlgmr.msra.gmra.mxu0 %vm134_vm1, %v8504_v5 }
  0x9f   :  { %2619 = vmatprep.mubr.f32.mxu1 %v11811_v1  ;;  %2786 = vmatprep.mubr.f32.mxu0 %v11811_v1 }
  0xa0   :  { %7973 = vmatpush1.msk.msra.mxu1 %vm147_vm0, %v2703_v47  ;;  %7979 = vmatpush1.msk.msra.mxu0 %vm147_vm0, %v2958_v48 }
  0xa1   :  { %7984 = vmatprep.subr.msk.mxu1 %vm147_vm0, %v2963_v52  ;;  %8270 = vmatprep.subr.msk.mxu0 %vm147_vm0, %v3214_v53 }
  0xa2   :  { %7963 = vmatmul.mubr.msk.f32.gmra.mxu1 %vm134_vm1, %v8533_v12  ;;  %7969 = vmatmul.mubr.msk.f32.gmra.mxu0 %vm134_vm1, %v8533_v12 }
  0xa3   :  { %2625 = vmatprep.mubr.f32.mxu1 %v11811_v1  ;;  %2792 = vmatprep.mubr.f32.mxu0 %v11811_v1 }
  0xa6   :  { %7964 = vmatmul.mubr.msk.f32.gmra.mxu1 %vm134_vm1, %v8499_v4  ;;  %7970 = vmatmul.mubr.msk.f32.gmra.mxu0 %vm134_vm1, %v8499_v4 }
  0xa7   :  { %2631 = vmatprep.mubr.f32.mxu1 %v11811_v1  ;;  %2798 = vmatprep.mubr.f32.mxu0 %v11811_v1 }
  0xaa   :  { %7965 = vmatmul.mubr.msk.f32.gmra.mxu1 %vm134_vm1, %v8527_v11  ;;  %7971 = vmatmul.mubr.msk.f32.gmra.mxu0 %vm134_vm1, %v8527_v11 }
  0xab   :  { %2869 = vmatprep.mubr.f32.mxu1 %v11811_v1  ;;  %3036 = vmatprep.mubr.f32.mxu0 %v11811_v1 }
  0xae   :  { %7974 = vmatmul.mubr.msk.f32.vlgmr.msra.gmra.mxu1 %vm134_vm1, %v8504_v5  ;;  %7980 = vmatmul.mubr.msk.f32.vlgmr.msra.gmra.mxu0 %vm134_vm1, %v8504_v5 }
  0xaf   :  { %2875 = vmatprep.mubr.f32.mxu1 %v11811_v1  ;;  %3042 = vmatprep.mubr.f32.mxu0 %v11811_v1 }
  0xb0   :  { %7985 = vmatpush1.msk.msra.mxu1 %vm147_vm0, %v2959_v51  ;;  %8271 = vmatpush3.msk.msra.mxu0 %vm147_vm0, %v3214_v53 }
  0xb1   :  { %7995 = vmatprep.subr.msk.mxu1 %vm147_vm0, %v3359_v33  ;;  %8001 = vmatprep.subr.msk.mxu0 %vm147_vm0, %v3360_v34 }
  0xb2   :  { %7975 = vmatmul.mubr.msk.f32.gmra.mxu1 %vm134_vm1, %v8533_v12  ;;  %7981 = vmatmul.mubr.msk.f32.gmra.mxu0 %vm134_vm1, %v8533_v12 }
  0xb3   :  { %2881 = vmatprep.mubr.f32.mxu1 %v11811_v1  ;;  %3048 = vmatprep.mubr.f32.mxu0 %v11811_v1 }
  0xb6   :  { %7976 = vmatmul.mubr.msk.f32.gmra.mxu1 %vm134_vm1, %v8499_v4  ;;  %7982 = vmatmul.mubr.msk.f32.gmra.mxu0 %vm134_vm1, %v8499_v4 }
  0xb7   :  { %2887 = vmatprep.mubr.f32.mxu1 %v11811_v1  ;;  %3054 = vmatprep.mubr.f32.mxu0 %v11811_v1 }
  0xba   :  { %7977 = vmatmul.mubr.msk.f32.gmra.mxu1 %vm134_vm1, %v8527_v11  ;;  %7983 = vmatmul.mubr.msk.f32.gmra.mxu0 %vm134_vm1, %v8527_v11 }
  0xbb   :  { %3125 = vmatprep.mubr.f32.mxu1 %v11811_v1  ;;  %8272 = vmatprep.mubr.msk.f32.mxu0 %vm134_vm1, %v8504_v5 }
  0xbe   :  { %7986 = vmatmul.mubr.msk.f32.vlgmr.msra.gmra.mxu1 %vm134_vm1, %v8504_v5  ;;  %8273 = vmatmul.mubr.msk.f32.vlgmr.msra.gmra.mxu0 %vm134_vm1, %v8533_v12 }
  0xbf   :  { %3131 = vmatprep.mubr.f32.mxu1 %v11811_v1  ;;  %8275 = vmatprep.mubr.msk.f32.mxu0 %vm134_vm1, %v8499_v4 }
  0xc0   :  { %7996 = vmatpush1.msk.msra.mxu1 %vm147_vm0, %v3355_v27  ;;  %8002 = vmatpush1.msk.msra.mxu0 %vm147_vm0, %v3356_v28 }
  0xc2   :  { %7987 = vmatmul.mubr.msk.f32.gmra.mxu1 %vm134_vm1, %v8533_v12  ;;  %8276 = vmatmul.mubr.msk.f32.gmra.mxu0 %vm134_vm1, %v8527_v11 }
  0xc3   :  { %3137 = vmatprep.mubr.f32.mxu1 %v11811_v1  ;;  %3522 = vmatprep.mubr.f32.mxu0 %v11811_v1 }
  0xc6   :  { %v234_v54 = vpop.f32.mrf.mxu1  ;;  %7988 = vmatmul.mubr.msk.f32.gmra.mxu1 %vm134_vm1, %v8499_v4  ;;  %v222_v55 = vpop.f32.mrf.mxu0  ;;  %8003 = vmatmul.mubr.msk.f32.vlgmr.msra.gmra.mxu0 %vm134_vm1, %v8504_v5 }
  0xc7   :  { %3143 = vmatprep.mubr.f32.mxu1 %v11811_v1  ;;  %v358_v60 = vmul.f32 %v222_v55, %v222_v55  ;;  %v366_v29 = vmul.f32 %v234_v54, %v234_v54  ;;  %3528 = vmatprep.mubr.f32.mxu0 %v11811_v1 }
  0xc8   :  { %v236_v56 = vpop.f32.mrf.mxu1  ;;  %v224_v57 = vpop.f32.mrf.mxu0 }
  0xc9   :  { %v359_v61 = vmul.f32 %v224_v57, %v224_v57  ;;  %v334_v0 = vadd.f32 %v224_v57, %v222_v55  ;;  %v367_v21 = vmul.f32 %v236_v56, %v236_v56  ;;  %v344_v45 = vadd.f32 %v236_v56, %v234_v54 }
  0xca   :  { %v240_v58 = vpop.f32.mrf.mxu1  ;;  %7989 = vmatmul.mubr.msk.f32.gmra.mxu1 %vm134_vm1, %v8527_v11  ;;  %v228_v59 = vpop.f32.mrf.mxu0  ;;  %8004 = vmatmul.mubr.msk.f32.gmra.mxu0 %vm134_vm1, %v8533_v12 }
  0xcb   :  { %3433 = vmatprep.mubr.f32.mxu1 %v11811_v1  ;;  %v374_v10 = vadd.f32 %v359_v61, %v358_v60  ;;  %v362_v15 = vmul.f32 %v228_v59, %v228_v59  ;;  %v384_v36 = vadd.f32 %v367_v21, %v366_v29  ;;  %v370_v49 = vmul.f32 %v240_v58, %v240_v58 }
  0xcc   :  { %v242_v62 = vpop.f32.mrf.mxu1  ;;  %v230_v63 = vpop.f32.mrf.mxu0  ;;  %3534 = vmatprep.mubr.f32.mxu0 %v11811_v1 }
  0xcd   :  { %v339_v16 = vadd.f32 %v230_v63, %v228_v59  ;;  %v363_v17 = vmul.f32 %v230_v63, %v230_v63  ;;  %v349_v42 = vadd.f32 %v242_v62, %v240_v58  ;;  %v371_v46 = vmul.f32 %v242_v62, %v242_v62 }
  0xce   :  { %v311_v2 = vpop.f32.mrf.mxu1  ;;  %v478_v3 = vpop.f32.mrf.mxu0  ;;  %7997 = vmatmul.mubr.msk.f32.vlgmr.msra.gmra.mxu1 %vm134_vm1, %v8504_v5  ;;  %8005 = vmatmul.mubr.msk.f32.gmra.mxu0 %vm134_vm1, %v8499_v4 }
  0xcf   :  { %v335_v6 = vadd.f32 %v334_v0, %v311_v2  ;;  %v360_v7 = vmul.f32 %v311_v2, %v311_v2  ;;  %v379_v32 = vadd.f32 %v363_v17, %v362_v15  ;;  %3439 = vmatprep.mubr.f32.mxu1 %v11811_v1  ;;  %v614_v54 = vmul.f32 %v478_v3, %v478_v3 }
  0xd0   :  { %v313_v8 = vpop.f32.mrf.mxu1  ;;  %v480_v9 = vpop.f32.mrf.mxu0  ;;  %v389_v62 = vadd.f32 %v371_v46, %v370_v49  ;;  %3540 = vmatprep.mubr.f32.mxu0 %v11811_v1 }
  0xd1   :  { %v336_v13 = vadd.f32 %v335_v6, %v313_v8  ;;  %v361_v14 = vmul.f32 %v313_v8, %v313_v8  ;;  %v375_v20 = vadd.f32 %v374_v10, %v360_v7  ;;  %v590_v56 = vadd.f32 %v480_v9, %v478_v3 }
  0xd2   :  { %v317_v18 = vpop.f32.mrf.mxu1  ;;  %v8933_v19 = vpop.f32.mrf.mxu0  ;;  %v615_v60 = vmul.f32 %v480_v9, %v480_v9  ;;  %7998 = vmatmul.mubr.msk.f32.gmra.mxu1 %vm134_vm1, %v8533_v12  ;;  %8006 = vmatmul.mubr.msk.f32.gmra.mxu0 %vm134_vm1, %v8527_v11 }
  0xd3   :  { %337 = vadd.xlane.f32.xlu0 %v336_v13  ;;  %v340_v22 = vadd.f32 %v339_v16, %v317_v18  ;;  %v364_v23 = vmul.f32 %v317_v18, %v317_v18  ;;  %v376_v25 = vadd.f32 %v375_v20, %v361_v14  ;;  %3445 = vmatprep.mubr.f32.mxu1 %v11811_v1 }
  0xd4   :  { %v319_v24 = vpop.f32.mrf.mxu1  ;;  %v8935_v26 = vpop.f32.mrf.mxu0  ;;  %v630_v9 = vadd.f32 %v615_v60, %v614_v54  ;;  %v618_v10 = vmul.f32 %v8933_v19, %v8933_v19  ;;  %3857 = vmatprep.mubr.f32.mxu0 %v11811_v1 }
  0xd5   :  { %377 = vadd.xlane.f32.xlu1 %v376_v25  ;;  %v341_v38 = vadd.f32 %v340_v22, %v319_v24  ;;  %v365_v40 = vmul.f32 %v319_v24, %v319_v24  ;;  %v380_v41 = vadd.f32 %v379_v32, %v364_v23  ;;  %v595_v13 = vadd.f32 %v8935_v26, %v8933_v19 }
  0xd6   :  { %v323_v30 = vpop.f32.mrf.mxu1  ;;  %v8943_v31 = vpop.f32.mrf.mxu0  ;;  %v619_v14 = vmul.f32 %v8935_v26, %v8935_v26  ;;  %7999 = vmatmul.mubr.msk.f32.gmra.mxu1 %vm134_vm1, %v8499_v4 }
  0xd7   :  { %v368_v35 = vmul.f32 %v323_v30, %v323_v30  ;;  %v345_v52 = vadd.f32 %v344_v45, %v323_v30  ;;  %v381_v57 = vadd.f32 %v380_v41, %v365_v40  ;;  %3451 = vmatprep.mubr.f32.mxu1 %v11811_v1  ;;  %v622_v24 = vmul.f32 %v8943_v31, %v8943_v31 }
  0xd8   :  { %v325_v37 = vpop.f32.mrf.mxu1  ;;  %v8945_v39 = vpop.f32.mrf.mxu0  ;;  %v635_v30 = vadd.f32 %v619_v14, %v618_v10 }
  0xd9   :  { %v369_v43 = vmul.f32 %v325_v37, %v325_v37  ;;  %v385_v44 = vadd.f32 %v384_v36, %v368_v35  ;;  %342 = vadd.xlane.f32.xlu1 %v341_v38  ;;  %v346_v6 = vadd.f32 %v345_v52, %v325_v37  ;;  %v600_v25 = vadd.f32 %v8945_v39, %v8943_v31 }
  0xda   :  { %v329_v47 = vpop.f32.mrf.mxu1  ;;  %v8950_v48 = vpop.f32.mrf.mxu0  ;;  %v623_v26 = vmul.f32 %v8945_v39, %v8945_v39  ;;  %8000 = vmatmul.mubr.msk.f32.gmra.mxu1 %vm134_vm1, %v8527_v11 }
  0xdb   :  { %v350_v50 = vadd.f32 %v349_v42, %v329_v47  ;;  %v386_v51 = vadd.f32 %v385_v44, %v369_v43  ;;  %v372_v53 = vmul.f32 %v329_v47, %v329_v47  ;;  %v626_v27 = vmul.f32 %v8950_v48, %v8950_v48  ;;  %3744 = vmatprep.mubr.f32.mxu1 %v11811_v1 }
  0xdc   :  { %v331_v55 = vpop.f32.mrf.mxu1  ;;  %v8955_v59 = vpop.f32.mrf.mxu0  ;;  %v640_v39 = vadd.f32 %v623_v26, %v622_v24 }
  0xdd   :  { %387 = vadd.xlane.f32.xlu0 %v386_v51  ;;  %382 = vadd.xlane.f32.xlu1 %v381_v57  ;;  %v351_v2 = vadd.f32 %v350_v50, %v331_v55  ;;  %v373_v3 = vmul.f32 %v331_v55, %v331_v55  ;;  %v390_v8 = vadd.f32 %v389_v62, %v372_v53 }
  0xde   :  { %v567_v58 = vpop.f32.mrf.mxu1  ;;  %v8960_v61 = vpop.f32.mrf.mxu0  ;;  %v627_v28 = vmul.f32 %v8955_v59, %v8955_v59  ;;  %v605_v47 = vadd.f32 %v8955_v59, %v8950_v48 }
  0xdf   :  { %v591_v63 = vadd.f32 %v590_v56, %v567_v58  ;;  %v616_v0 = vmul.f32 %v567_v58, %v567_v58  ;;  %v391_v23 = vadd.f32 %v390_v8, %v373_v3  ;;  %v870_v51 = vmul.f32 %v8960_v61, %v8960_v61 }
  0xe0   :  { %v569_v5 = vpop.f32.mrf.mxu1  ;;  %v8965_v7 = vpop.f32.mrf.mxu0  ;;  %v645_v42 = vadd.f32 %v627_v28, %v626_v27 }
  0xe1   :  { %352 = vadd.xlane.f32.xlu0 %v351_v2  ;;  %347 = vadd.xlane.f32.xlu1 %v346_v6  ;;  %v592_v12 = vadd.f32 %v591_v63, %v569_v5  ;;  %v617_v17 = vmul.f32 %v569_v5, %v569_v5  ;;  %v631_v18 = vadd.f32 %v630_v9, %v616_v0 }
  0xe2   :  { %v573_v15 = vpop.f32.mrf.mxu1  ;;  %v8976_v16 = vpop.f32.mrf.mxu0  ;;  %v871_v52 = vmul.f32 %v8965_v7, %v8965_v7  ;;  %v846_v57 = vadd.f32 %v8965_v7, %v8960_v61 }
  0xe3   :  { %v596_v20 = vadd.f32 %v595_v13, %v573_v15  ;;  %v620_v21 = vmul.f32 %v573_v15, %v573_v15  ;;  %v632_v34 = vadd.f32 %v631_v18, %v617_v17 }
  0xe4   :  { %v575_v22 = vpop.f32.mrf.mxu1  ;;  %v8981_v19 = vpop.f32.mrf.mxu0  ;;  %v886_v2 = vadd.f32 %v871_v52, %v870_v51 }
  0xe5   :  { %593 = vadd.xlane.f32.xlu0 %v592_v12  ;;  %392 = vadd.xlane.f32.xlu1 %v391_v23  ;;  %v597_v35 = vadd.f32 %v596_v20, %v575_v22  ;;  %v621_v37 = vmul.f32 %v575_v22, %v575_v22  ;;  %v636_v38 = vadd.f32 %v635_v30, %v620_v21 }
  0xe6   :  { %v579_v4 = vpop.f32.mrf.mxu1  ;;  %v746_v29 = vpop.f32.mrf.mxu0  ;;  %v851_v7 = vadd.f32 %v8981_v19, %v8976_v16  ;;  %v874_v12 = vmul.f32 %v8976_v16, %v8976_v16  ;;  %v875_v17 = vmul.f32 %v8981_v19, %v8981_v19 }
  0xe7   :  { %v601_v32 = vadd.f32 %v600_v25, %v579_v4  ;;  %v624_v33 = vmul.f32 %v579_v4, %v579_v4  ;;  %v637_v11 = vadd.f32 %v636_v38, %v621_v37  ;;  %v878_v9 = vmul.f32 %v746_v29, %v746_v29 }
  0xe8   :  { %v581_v31 = vpop.f32.mrf.mxu1  ;;  %v748_v36 = vpop.f32.mrf.mxu0 }
  0xe9   :  { %633 = vadd.xlane.f32.xlu0 %v632_v34  ;;  %598 = vadd.xlane.f32.xlu1 %v597_v35  ;;  %v602_v44 = vadd.f32 %v601_v32, %v581_v31  ;;  %v625_v45 = vmul.f32 %v581_v31, %v581_v31  ;;  %v641_v46 = vadd.f32 %v640_v39, %v624_v33 }
  0xea   :  { %v585_v40 = vpop.f32.mrf.mxu1  ;;  %v9002_v41 = vpop.f32.mrf.mxu0  ;;  %v879_v10 = vmul.f32 %v748_v36, %v748_v36  ;;  %v856_v18 = vadd.f32 %v748_v36, %v746_v29  ;;  %v891_v32 = vadd.f32 %v875_v17, %v874_v12 }
  0xeb   :  { %v628_v43 = vmul.f32 %v585_v40, %v585_v40  ;;  %v606_v48 = vadd.f32 %v605_v47, %v585_v40  ;;  %v642_v60 = vadd.f32 %v641_v46, %v625_v45  ;;  %v882_v36 = vmul.f32 %v9002_v41, %v9002_v41 }
  0xec   :  { %v587_v49 = vpop.f32.mrf.mxu1  ;;  %v754_v50 = vpop.f32.mrf.mxu0  ;;  %v896_v4 = vadd.f32 %v879_v10, %v878_v9 }
  0xed   :  { %603 = vadd.xlane.f32.xlu0 %v602_v44  ;;  %v629_v53 = vmul.f32 %v587_v49, %v587_v49  ;;  %v646_v55 = vadd.f32 %v645_v42, %v628_v43  ;;  %638 = vadd.xlane.f32.xlu1 %v637_v11  ;;  %v607_v3 = vadd.f32 %v606_v48, %v587_v49 }
  0xee   :  { %v823_v54 = vpop.f32.mrf.mxu1  ;;  %v9013_v56 = vpop.f32.mrf.mxu0  ;;  %v861_v39 = vadd.f32 %v754_v50, %v9002_v41  ;;  %v883_v40 = vmul.f32 %v754_v50, %v754_v50 }
  0xef   :  { %v872_v59 = vmul.f32 %v823_v54, %v823_v54  ;;  %v647_v58 = vadd.f32 %v646_v55, %v629_v53  ;;  %v847_v62 = vadd.f32 %v846_v57, %v823_v54  ;;  %v1126_v51 = vmul.f32 %v9013_v56, %v9013_v56 }
  0xf0   :  { %v825_v63 = vpop.f32.mrf.mxu1  ;;  %v992_v0 = vpop.f32.mrf.mxu0  ;;  %v901_v57 = vadd.f32 %v883_v40, %v882_v36 }
  0xf1   :  { %643 = vadd.xlane.f32.xlu0 %v642_v60  ;;  %648 = vadd.xlane.f32.xlu1 %v647_v58  ;;  %v873_v8 = vmul.f32 %v825_v63, %v825_v63  ;;  %v887_v61 = vadd.f32 %v886_v2, %v872_v59  ;;  %v848_v14 = vadd.f32 %v847_v62, %v825_v63 }
  0xf2   :  { %v829_v5 = vpop.f32.mrf.mxu1  ;;  %v9015_v6 = vpop.f32.mrf.mxu0  ;;  %v1102_v42 = vadd.f32 %v992_v0, %v9013_v56  ;;  %v1127_v52 = vmul.f32 %v992_v0, %v992_v0 }
  0xf3   :  { %v852_v20 = vadd.f32 %v851_v7, %v829_v5  ;;  %v876_v23 = vmul.f32 %v829_v5, %v829_v5  ;;  %v888_v26 = vadd.f32 %v887_v61, %v873_v8  ;;  %v1130_v0 = vmul.f32 %v9015_v6, %v9015_v6 }
  0xf4   :  { %v831_v13 = vpop.f32.mrf.mxu1  ;;  %v998_v15 = vpop.f32.mrf.mxu0  ;;  %v1142_v56 = vadd.f32 %v1127_v52, %v1126_v51 }
  0xf5   :  { %608 = vadd.xlane.f32.xlu0 %v607_v3  ;;  %849 = vadd.xlane.f32.xlu1 %v848_v14  ;;  %v853_v34 = vadd.f32 %v852_v20, %v831_v13  ;;  %v877_v31 = vmul.f32 %v831_v13, %v831_v13  ;;  %v892_v35 = vadd.f32 %v891_v32, %v876_v23 }
  0xf6   :  { %v835_v21 = vpop.f32.mrf.mxu1  ;;  %v9023_v22 = vpop.f32.mrf.mxu0  ;;  %v1107_v41 = vadd.f32 %v998_v15, %v9015_v6  ;;  %v1131_v3 = vmul.f32 %v998_v15, %v998_v15 }
  0xf7   :  { %v857_v24 = vadd.f32 %v856_v18, %v835_v21  ;;  %v880_v25 = vmul.f32 %v835_v21, %v835_v21  ;;  %v893_v11 = vadd.f32 %v892_v35, %v877_v31 }
  0xf8   :  { %v837_v27 = vpop.f32.mrf.mxu1  ;;  %v9025_v28 = vpop.f32.mrf.mxu0  ;;  %v1147_v23 = vadd.f32 %v1131_v3, %v1130_v0 }
  0xf9   :  { %889 = vadd.xlane.f32.xlu0 %v888_v26  ;;  %v858_v16 = vadd.f32 %v857_v24, %v837_v27  ;;  %v881_v30 = vmul.f32 %v837_v27, %v837_v27  ;;  %v897_v33 = vadd.f32 %v896_v4, %v880_v25 }
  0xfa   :  { %v841_v19 = vpop.f32.mrf.mxu1  ;;  %v1008_v29 = vpop.f32.mrf.mxu0 }
  0xfb   :  { %859 = vadd.xlane.f32.xlu1 %v858_v16  ;;  %v898_v43 = vadd.f32 %v897_v33, %v881_v30  ;;  %v862_v46 = vadd.f32 %v861_v39, %v841_v19  ;;  %v884_v47 = vmul.f32 %v841_v19, %v841_v19  ;;  %v1138_v12 = vmul.f32 %v1008_v29, %v1008_v29 }
  0xfc   :  { %v843_v37 = vpop.f32.mrf.mxu1  ;;  %v1010_v38 = vpop.f32.mrf.mxu0  ;;  %v1134_v16 = vmul.f32 %v9023_v22, %v9023_v22  ;;  %v1135_v30 = vmul.f32 %v9025_v28, %v9025_v28  ;;  %v1112_v33 = vadd.f32 %v9025_v28, %v9023_v22 }
  0xfd   :  { %854 = vadd.xlane.f32.xlu0 %v853_v34  ;;  %v863_v58 = vadd.f32 %v862_v46, %v843_v37  ;;  %v885_v62 = vmul.f32 %v843_v37, %v843_v37  ;;  %v902_v63 = vadd.f32 %v901_v57, %v884_v47  ;;  %v1139_v17 = vmul.f32 %v1010_v38, %v1010_v38 }
  0xfe   :  { %v1079_v44 = vpop.f32.mrf.mxu1  ;;  %v9031_v45 = vpop.f32.mrf.mxu0  ;;  %v1117_v21 = vadd.f32 %v1010_v38, %v1008_v29  ;;  %v1152_v46 = vadd.f32 %v1135_v30, %v1134_v16 }
  0xff   :  { %v1103_v49 = vadd.f32 %v1102_v42, %v1079_v44  ;;  %899 = vadd.xlane.f32.xlu1 %v898_v43  ;;  %v1128_v54 = vmul.f32 %v1079_v44, %v1079_v44  ;;  %v903_v14 = vadd.f32 %v902_v63, %v885_v62  ;;  %v1157_v29 = vadd.f32 %v1139_v17, %v1138_v12 }
 0x100   :  { %v1081_v53 = vpop.f32.mrf.mxu1  ;;  %v1248_v55 = vpop.f32.mrf.mxu0  ;;  %v1382_v22 = vmul.f32 %v9031_v45, %v9031_v45 }
 0x101   :  { %894 = vadd.xlane.f32.xlu0 %v893_v11  ;;  %v1104_v50 = vadd.f32 %v1103_v49, %v1081_v53  ;;  %v1129_v9 = vmul.f32 %v1081_v53, %v1081_v53  ;;  %v1143_v10 = vadd.f32 %v1142_v56, %v1128_v54  ;;  %v1358_v38 = vadd.f32 %v1248_v55, %v9031_v45 }
 0x102   :  { %v1085_v48 = vpop.f32.mrf.mxu1  ;;  %v9036_v59 = vpop.f32.mrf.mxu0  ;;  %v1383_v28 = vmul.f32 %v1248_v55, %v1248_v55 }
 0x103   :  { %v1108_v60 = vadd.f32 %v1107_v41, %v1085_v48  ;;  %1105 = vadd.xlane.f32.xlu1 %v1104_v50  ;;  %v1132_v13 = vmul.f32 %v1085_v48, %v1085_v48  ;;  %v1144_v15 = vadd.f32 %v1143_v10, %v1129_v9  ;;  %v1386_v54 = vmul.f32 %v9036_v59, %v9036_v59 }
 0x104   :  { %v1087_v2 = vpop.f32.mrf.mxu1  ;;  %v1254_v5 = vpop.f32.mrf.mxu0  ;;  %v1398_v62 = vadd.f32 %v1383_v28, %v1382_v22 }
 0x105   :  { %864 = vadd.xlane.f32.xlu0 %v863_v58  ;;  %v1109_v8 = vadd.f32 %v1108_v60, %v1087_v2  ;;  %v1133_v27 = vmul.f32 %v1087_v2, %v1087_v2  ;;  %v1148_v4 = vadd.f32 %v1147_v23, %v1132_v13  ;;  %v1363_v11 = vadd.f32 %v1254_v5, %v9036_v59 }
 0x106   :  { %v1091_v61 = vpop.f32.mrf.mxu1  ;;  %v9040_v7 = vpop.f32.mrf.mxu0  ;;  %v1387_v45 = vmul.f32 %v1254_v5, %v1254_v5 }
 0x107   :  { %1110 = vadd.xlane.f32.xlu1 %v1109_v8  ;;  %v1113_v39 = vadd.f32 %v1112_v33, %v1091_v61  ;;  %v1136_v40 = vmul.f32 %v1091_v61, %v1091_v61  ;;  %v1149_v42 = vadd.f32 %v1148_v4, %v1133_v27  ;;  %v1390_v59 = vmul.f32 %v9040_v7, %v9040_v7 }
 0x108   :  { %v1093_v18 = vpop.f32.mrf.mxu1  ;;  %v1260_v20 = vpop.f32.mrf.mxu0  ;;  %v1403_v12 = vadd.f32 %v1387_v45, %v1386_v54 }
 0x109   :  { %904 = vadd.xlane.f32.xlu0 %v903_v14  ;;  %v1114_v41 = vadd.f32 %v1113_v39, %v1093_v18  ;;  %v1137_v50 = vmul.f32 %v1093_v18, %v1093_v18  ;;  %v1153_v57 = vadd.f32 %v1152_v46, %v1136_v40  ;;  %v1368_v63 = vadd.f32 %v1260_v20, %v9040_v7 }
 0x10a   :  { %v1097_v24 = vpop.f32.mrf.mxu1  ;;  %v9042_v6 = vpop.f32.mrf.mxu0  ;;  %v1391_v5 = vmul.f32 %v1260_v20, %v1260_v20 }
 0x10b   :  { %v1118_v25 = vadd.f32 %v1117_v21, %v1097_v24  ;;  %v1140_v26 = vmul.f32 %v1097_v24, %v1097_v24  ;;  %v1154_v3 = vadd.f32 %v1153_v57, %v1137_v50 }
 0x10c   :  { %v1099_v32 = vpop.f32.mrf.mxu1  ;;  %v9048_v19 = vpop.f32.mrf.mxu0  ;;  %v1408_v27 = vadd.f32 %v1391_v5, %v1390_v59 }
 0x10d   :  { %1145 = vadd.xlane.f32.xlu0 %v1144_v15  ;;  %v1119_v34 = vadd.f32 %v1118_v25, %v1099_v32  ;;  %v1141_v31 = vmul.f32 %v1099_v32, %v1099_v32  ;;  %v1158_v37 = vadd.f32 %v1157_v29, %v1140_v26 }
 0x10e   :  { %v1335_v35 = vpop.f32.mrf.mxu1  ;;  %v9052_v36 = vpop.f32.mrf.mxu0 }
 0x10f   :  { %1120 = vadd.xlane.f32.xlu1 %v1119_v34  ;;  %v1359_v47 = vadd.f32 %v1358_v38, %v1335_v35  ;;  %v1159_v49 = vadd.f32 %v1158_v37, %v1141_v31  ;;  %v1384_v53 = vmul.f32 %v1335_v35, %v1335_v35  ;;  %v1373_v34 = vadd.f32 %v9048_v19, %v9042_v6 }
 0x110   :  { %v1337_v43 = vpop.f32.mrf.mxu1  ;;  %v9055_v44 = vpop.f32.mrf.mxu0  ;;  %v1394_v37 = vmul.f32 %v9042_v6, %v9042_v6  ;;  %v1395_v38 = vmul.f32 %v9048_v19, %v9048_v19 }
 0x111   :  { %1150 = vadd.xlane.f32.xlu0 %v1149_v42  ;;  %v1360_v58 = vadd.f32 %v1359_v47, %v1337_v43  ;;  %v1385_v8 = vmul.f32 %v1337_v43, %v1337_v43  ;;  %v1399_v61 = vadd.f32 %v1398_v62, %v1384_v53  ;;  %v1614_v7 = vadd.f32 %v9055_v44, %v9052_v36 }
 0x112   :  { %v1341_v51 = vpop.f32.mrf.mxu1  ;;  %v9060_v52 = vpop.f32.mrf.mxu0  ;;  %v1639_v19 = vmul.f32 %v9055_v44, %v9055_v44 }
 0x113   :  { %1160 = vadd.xlane.f32.xlu1 %v1159_v49  ;;  %v1364_v55 = vadd.f32 %v1363_v11, %v1341_v51  ;;  %v1388_v0 = vmul.f32 %v1341_v51, %v1341_v51  ;;  %v1400_v23 = vadd.f32 %v1399_v61, %v1385_v8  ;;  %v1638_v49 = vmul.f32 %v9052_v36, %v9052_v36 }
 0x114   :  { %v1343_v48 = vpop.f32.mrf.mxu1  ;;  %v9064_v60 = vpop.f32.mrf.mxu0 }
 0x115   :  { %1115 = vadd.xlane.f32.xlu0 %v1114_v41  ;;  %v1365_v14 = vadd.f32 %v1364_v55, %v1343_v48  ;;  %v1389_v24 = vmul.f32 %v1343_v48, %v1343_v48  ;;  %v1404_v15 = vadd.f32 %v1403_v12, %v1388_v0  ;;  %v1619_v39 = vadd.f32 %v9064_v60, %v9060_v52 }
 0x116   :  { %v1347_v2 = vpop.f32.mrf.mxu1  ;;  %v9067_v56 = vpop.f32.mrf.mxu0  ;;  %v1413_v41 = vadd.f32 %v1395_v38, %v1394_v37  ;;  %v1643_v44 = vmul.f32 %v9064_v60, %v9064_v60 }
 0x117   :  { %1361 = vadd.xlane.f32.xlu1 %v1360_v58  ;;  %v1369_v13 = vadd.f32 %v1368_v63, %v1347_v2  ;;  %v1392_v21 = vmul.f32 %v1347_v2, %v1347_v2  ;;  %v1405_v32 = vadd.f32 %v1404_v15, %v1389_v24  ;;  %v1642_v58 = vmul.f32 %v9060_v52, %v9060_v52 }
 0x118   :  { %v1349_v9 = vpop.f32.mrf.mxu1  ;;  %v9071_v10 = vpop.f32.mrf.mxu0 }
 0x119   :  { %1155 = vadd.xlane.f32.xlu0 %v1154_v3  ;;  %v1370_v20 = vadd.f32 %v1369_v13, %v1349_v9  ;;  %v1393_v29 = vmul.f32 %v1349_v9, %v1349_v9  ;;  %v1409_v33 = vadd.f32 %v1408_v27, %v1392_v21  ;;  %v1624_v51 = vadd.f32 %v9071_v10, %v9067_v56 }
 0x11a   :  { %v1353_v17 = vpop.f32.mrf.mxu1  ;;  %v9073_v18 = vpop.f32.mrf.mxu0  ;;  %v1654_v3 = vadd.f32 %v1639_v19, %v1638_v49  ;;  %v1659_v12 = vadd.f32 %v1643_v44, %v1642_v58  ;;  %v1647_v21 = vmul.f32 %v9071_v10, %v9071_v10 }
 0x11b   :  { %1366 = vadd.xlane.f32.xlu1 %v1365_v14  ;;  %v1374_v42 = vadd.f32 %v1373_v34, %v1353_v17  ;;  %v1396_v22 = vmul.f32 %v1353_v17, %v1353_v17  ;;  %v1410_v47 = vadd.f32 %v1409_v33, %v1393_v29  ;;  %v1646_v17 = vmul.f32 %v9067_v56, %v9067_v56 }
 0x11c   :  { %v1355_v25 = vpop.f32.mrf.mxu1  ;;  %v9075_v26 = vpop.f32.mrf.mxu0  ;;  %v1650_v56 = vmul.f32 %v9073_v18, %v9073_v18 }
 0x11d   :  { %1401 = vadd.xlane.f32.xlu0 %v1400_v23  ;;  %v1375_v54 = vadd.f32 %v1374_v42, %v1355_v25  ;;  %v1397_v36 = vmul.f32 %v1355_v25, %v1355_v25  ;;  %v1414_v55 = vadd.f32 %v1413_v41, %v1396_v22  ;;  %v1629_v2 = vadd.f32 %v9075_v26, %v9073_v18 }
 0x11e   :  { %v1591_v4 = vpop.f32.mrf.mxu1  ;;  %v9079_v16 = vpop.f32.mrf.mxu0  ;;  %v1651_v10 = vmul.f32 %v9075_v26, %v9075_v26 }
 0x11f   :  { %v1615_v30 = vadd.f32 %v1614_v7, %v1591_v4  ;;  %1371 = vadd.xlane.f32.xlu1 %v1370_v20  ;;  %v1640_v48 = vmul.f32 %v1591_v4, %v1591_v4  ;;  %v1415_v5 = vadd.f32 %v1414_v55, %v1397_v36  ;;  %v1894_v22 = vmul.f32 %v9079_v16, %v9079_v16 }
 0x120   :  { %v1593_v31 = vpop.f32.mrf.mxu1  ;;  %v9083_v35 = vpop.f32.mrf.mxu0  ;;  %v1669_v19 = vadd.f32 %v1651_v10, %v1650_v56 }
 0x121   :  { %1406 = vadd.xlane.f32.xlu0 %v1405_v32  ;;  %v1616_v40 = vadd.f32 %v1615_v30, %v1593_v31  ;;  %v1641_v52 = vmul.f32 %v1593_v31, %v1593_v31  ;;  %v1655_v13 = vadd.f32 %v1654_v3, %v1640_v48  ;;  %v1870_v23 = vadd.f32 %v9083_v35, %v9079_v16 }
 0x122   :  { %v1597_v43 = vpop.f32.mrf.mxu1  ;;  %v9091_v46 = vpop.f32.mrf.mxu0  ;;  %v1664_v31 = vadd.f32 %v1647_v21, %v1646_v17  ;;  %v1895_v26 = vmul.f32 %v9083_v35, %v9083_v35 }
 0x123   :  { %v1620_v28 = vadd.f32 %v1619_v39, %v1597_v43  ;;  %1617 = vadd.xlane.f32.xlu1 %v1616_v40  ;;  %v1644_v8 = vmul.f32 %v1597_v43, %v1597_v43  ;;  %v1656_v30 = vadd.f32 %v1655_v13, %v1641_v52  ;;  %v1898_v55 = vmul.f32 %v9091_v46, %v9091_v46 }
 0x124   :  { %v1599_v6 = vpop.f32.mrf.mxu1  ;;  %v9095_v11 = vpop.f32.mrf.mxu0  ;;  %v1910_v36 = vadd.f32 %v1895_v26, %v1894_v22 }
 0x125   :  { %1411 = vadd.xlane.f32.xlu0 %v1410_v47  ;;  %v1621_v53 = vadd.f32 %v1620_v28, %v1599_v6  ;;  %v1645_v7 = vmul.f32 %v1599_v6, %v1599_v6  ;;  %v1660_v20 = vadd.f32 %v1659_v12, %v1644_v8  ;;  %v1875_v33 = vadd.f32 %v9095_v11, %v9091_v46 }
 0x126   :  { %v1603_v50 = vpop.f32.mrf.mxu1  ;;  %v9101_v57 = vpop.f32.mrf.mxu0  ;;  %v1899_v58 = vmul.f32 %v9095_v11, %v9095_v11 }
 0x127   :  { %v1625_v45 = vadd.f32 %v1624_v51, %v1603_v50  ;;  %1622 = vadd.xlane.f32.xlu1 %v1621_v53  ;;  %v1648_v27 = vmul.f32 %v1603_v50, %v1603_v50  ;;  %v1661_v39 = vadd.f32 %v1660_v20, %v1645_v7  ;;  %v1902_v46 = vmul.f32 %v9101_v57, %v9101_v57 }
 0x128   :  { %v1605_v62 = vpop.f32.mrf.mxu1  ;;  %v9107_v63 = vpop.f32.mrf.mxu0  ;;  %v1915_v17 = vadd.f32 %v1899_v58, %v1898_v55 }
 0x129   :  { %1376 = vadd.xlane.f32.xlu0 %v1375_v54  ;;  %v1626_v0 = vadd.f32 %v1625_v45, %v1605_v62  ;;  %v1649_v18 = vmul.f32 %v1605_v62, %v1605_v62  ;;  %v1665_v43 = vadd.f32 %v1664_v31, %v1648_v27  ;;  %v1880_v49 = vadd.f32 %v9107_v63, %v9101_v57 }
 0x12a   :  { %v1609_v61 = vpop.f32.mrf.mxu1  ;;  %v9111_v59 = vpop.f32.mrf.mxu0  ;;  %v1903_v11 = vmul.f32 %v9107_v63, %v9107_v63 }
 0x12b   :  { %v1630_v9 = vadd.f32 %v1629_v2, %v1609_v61  ;;  %1627 = vadd.xlane.f32.xlu1 %v1626_v0  ;;  %v1652_v40 = vmul.f32 %v1609_v61, %v1609_v61  ;;  %v1666_v54 = vadd.f32 %v1665_v43, %v1649_v18  ;;  %v1906_v27 = vmul.f32 %v9111_v59, %v9111_v59 }
 0x12c   :  { %v1611_v14 = vpop.f32.mrf.mxu1  ;;  %v9113_v60 = vpop.f32.mrf.mxu0  ;;  %v1920_v10 = vadd.f32 %v1903_v11, %v1902_v46 }
 0x12d   :  { %1416 = vadd.xlane.f32.xlu0 %v1415_v5  ;;  %v1631_v24 = vadd.f32 %v1630_v9, %v1611_v14  ;;  %v1653_v16 = vmul.f32 %v1611_v14, %v1611_v14  ;;  %v1670_v48 = vadd.f32 %v1669_v19, %v1652_v40  ;;  %v1885_v44 = vadd.f32 %v9113_v60, %v9111_v59 }
 0x12e   :  { %v1847_v15 = vpop.f32.mrf.mxu1  ;;  %v9121_v25 = vpop.f32.mrf.mxu0  ;;  %v1907_v63 = vmul.f32 %v9113_v60, %v9113_v60 }
 0x12f   :  { %v1871_v4 = vadd.f32 %v1870_v23, %v1847_v15  ;;  %1632 = vadd.xlane.f32.xlu1 %v1631_v24  ;;  %v1896_v51 = vmul.f32 %v1847_v15, %v1847_v15  ;;  %v1671_v5 = vadd.f32 %v1670_v48, %v1653_v16  ;;  %v2150_v43 = vmul.f32 %v9121_v25, %v9121_v25 }
 0x130   :  { %v1849_v32 = vpop.f32.mrf.mxu1  ;;  %v9125_v29 = vpop.f32.mrf.mxu0  ;;  %v1925_v18 = vadd.f32 %v1907_v63, %v1906_v27 }
 0x131   :  { %1657 = vadd.xlane.f32.xlu0 %v1656_v30  ;;  %v1872_v34 = vadd.f32 %v1871_v4, %v1849_v32  ;;  %v1897_v3 = vmul.f32 %v1849_v32, %v1849_v32  ;;  %v1911_v8 = vadd.f32 %v1910_v36, %v1896_v51  ;;  %v2126_v14 = vadd.f32 %v9125_v29, %v9121_v25 }
 0x132   :  { %v1853_v37 = vpop.f32.mrf.mxu1  ;;  %v9131_v38 = vpop.f32.mrf.mxu0  ;;  %v2151_v22 = vmul.f32 %v9125_v29, %v9125_v29 }
 0x133   :  { %v1876_v42 = vadd.f32 %v1875_v33, %v1853_v37  ;;  %1873 = vadd.xlane.f32.xlu1 %v1872_v34  ;;  %v1900_v61 = vmul.f32 %v1853_v37, %v1853_v37  ;;  %v1912_v24 = vadd.f32 %v1911_v8, %v1897_v3  ;;  %v2154_v25 = vmul.f32 %v9131_v38, %v9131_v38 }
 0x134   :  { %v1855_v28 = vpop.f32.mrf.mxu1  ;;  %v9137_v47 = vpop.f32.mrf.mxu0  ;;  %v2166_v55 = vadd.f32 %v2151_v22, %v2150_v43 }
 0x135   :  { %1662 = vadd.xlane.f32.xlu0 %v1661_v39  ;;  %v1877_v6 = vadd.f32 %v1876_v42, %v1855_v28  ;;  %v1901_v57 = vmul.f32 %v1855_v28, %v1855_v28  ;;  %v1916_v20 = vadd.f32 %v1915_v17, %v1900_v61  ;;  %v2131_v56 = vadd.f32 %v9137_v47, %v9131_v38 }
 0x136   :  { %v1859_v53 = vpop.f32.mrf.mxu1  ;;  %v9141_v41 = vpop.f32.mrf.mxu0  ;;  %v2155_v29 = vmul.f32 %v9137_v47, %v9137_v47 }
 0x137   :  { %v1881_v50 = vadd.f32 %v1880_v49, %v1859_v53  ;;  %1878 = vadd.xlane.f32.xlu1 %v1877_v6  ;;  %v1904_v15 = vmul.f32 %v1859_v53, %v1859_v53  ;;  %v1917_v39 = vadd.f32 %v1916_v20, %v1901_v57  ;;  %v2158_v61 = vmul.f32 %v9141_v41, %v9141_v41 }
 0x138   :  { %v1861_v45 = vpop.f32.mrf.mxu1  ;;  %v9143_v35 = vpop.f32.mrf.mxu0  ;;  %v2171_v11 = vadd.f32 %v2155_v29, %v2154_v25 }
 0x139   :  { %1667 = vadd.xlane.f32.xlu0 %v1666_v54  ;;  %v1882_v62 = vadd.f32 %v1881_v50, %v1861_v45  ;;  %v1905_v59 = vmul.f32 %v1861_v45, %v1861_v45  ;;  %v1921_v40 = vadd.f32 %v1920_v10, %v1904_v15  ;;  %v2136_v26 = vadd.f32 %v9143_v35, %v9141_v41 }
 0x13a   :  { %v1865_v2 = vpop.f32.mrf.mxu1  ;;  %v9151_v0 = vpop.f32.mrf.mxu0  ;;  %v2159_v47 = vmul.f32 %v9143_v35, %v9143_v35 }
 0x13b   :  { %v1886_v9 = vadd.f32 %v1885_v44, %v1865_v2  ;;  %1883 = vadd.xlane.f32.xlu1 %v1882_v62  ;;  %v1908_v33 = vmul.f32 %v1865_v2, %v1865_v2  ;;  %v1922_v54 = vadd.f32 %v1921_v40, %v1905_v59  ;;  %v2162_v20 = vmul.f32 %v9151_v0, %v9151_v0 }
 0x13c   :  { %v1867_v52 = vpop.f32.mrf.mxu1  ;;  %v9155_v13 = vpop.f32.mrf.mxu0  ;;  %v2176_v57 = vadd.f32 %v2159_v47, %v2158_v61 }
 0x13d   :  { %1672 = vadd.xlane.f32.xlu0 %v1671_v5  ;;  %v1887_v12 = vadd.f32 %v1886_v9, %v1867_v52  ;;  %v1909_v19 = vmul.f32 %v1867_v52, %v1867_v52  ;;  %v1926_v51 = vadd.f32 %v1925_v18, %v1908_v33  ;;  %v2141_v45 = vadd.f32 %v9155_v13, %v9151_v0 }
 0x13e   :  { %v2103_v21 = vpop.f32.mrf.mxu1  ;;  %v9161_v23 = vpop.f32.mrf.mxu0  ;;  %v2163_v27 = vmul.f32 %v9155_v13, %v9155_v13 }
 0x13f   :  { %v2127_v7 = vadd.f32 %v2126_v14, %v2103_v21  ;;  %1888 = vadd.xlane.f32.xlu1 %v1887_v12  ;;  %v2152_v53 = vmul.f32 %v2103_v21, %v2103_v21  ;;  %v1927_v62 = vadd.f32 %v1926_v51, %v1909_v19  ;;  %v2406_v0 = vmul.f32 %v9161_v23, %v9161_v23 }
 0x140   :  { %v2105_v4 = vpop.f32.mrf.mxu1  ;;  %v9167_v30 = vpop.f32.mrf.mxu0  ;;  %v2181_v43 = vadd.f32 %v2163_v27, %v2162_v20 }
 0x141   :  { %1913 = vadd.xlane.f32.xlu0 %v1912_v24  ;;  %v2128_v32 = vadd.f32 %v2127_v7, %v2105_v4  ;;  %v2153_v38 = vmul.f32 %v2105_v4, %v2105_v4  ;;  %v2167_v8 = vadd.f32 %v2166_v55, %v2152_v53  ;;  %v2382_v46 = vadd.f32 %v9167_v30, %v9161_v23 }
 0x142   :  { %v2109_v34 = vpop.f32.mrf.mxu1  ;;  %v9171_v31 = vpop.f32.mrf.mxu0  ;;  %v2407_v13 = vmul.f32 %v9167_v30, %v9167_v30 }
 0x143   :  { %v2132_v37 = vadd.f32 %v2131_v56, %v2109_v34  ;;  %2129 = vadd.xlane.f32.xlu1 %v2128_v32  ;;  %v2156_v2 = vmul.f32 %v2109_v34, %v2109_v34  ;;  %v2168_v24 = vadd.f32 %v2167_v8, %v2153_v38  ;;  %v2410_v53 = vmul.f32 %v9171_v31, %v9171_v31 }
 0x144   :  { %v2111_v42 = vpop.f32.mrf.mxu1  ;;  %v9173_v60 = vpop.f32.mrf.mxu0  ;;  %v2422_v29 = vadd.f32 %v2407_v13, %v2406_v0 }
 0x145   :  { %1918 = vadd.xlane.f32.xlu0 %v1917_v39  ;;  %v2133_v28 = vadd.f32 %v2132_v37, %v2111_v42  ;;  %v2157_v41 = vmul.f32 %v2111_v42, %v2111_v42  ;;  %v2172_v15 = vadd.f32 %v2171_v11, %v2156_v2  ;;  %v2387_v63 = vadd.f32 %v9173_v60, %v9171_v31 }
 0x146   :  { %v2115_v49 = vpop.f32.mrf.mxu1  ;;  %v9181_v6 = vpop.f32.mrf.mxu0  ;;  %v2411_v30 = vmul.f32 %v9173_v60, %v9173_v60 }
 0x147   :  { %v2137_v50 = vadd.f32 %v2136_v26, %v2115_v49  ;;  %2134 = vadd.xlane.f32.xlu1 %v2133_v28  ;;  %v2160_v14 = vmul.f32 %v2115_v49, %v2115_v49  ;;  %v2173_v39 = vadd.f32 %v2172_v15, %v2157_v41  ;;  %v2414_v38 = vmul.f32 %v9181_v6, %v9181_v6 }
 0x148   :  { %v2117_v16 = vpop.f32.mrf.mxu1  ;;  %v9185_v48 = vpop.f32.mrf.mxu0  ;;  %v2427_v60 = vadd.f32 %v2411_v30, %v2410_v53 }
 0x149   :  { %1923 = vadd.xlane.f32.xlu0 %v1922_v54  ;;  %v2138_v36 = vadd.f32 %v2137_v50, %v2117_v16  ;;  %v2161_v10 = vmul.f32 %v2117_v16, %v2117_v16  ;;  %v2177_v33 = vadd.f32 %v2176_v57, %v2160_v14  ;;  %v2392_v42 = vadd.f32 %v9185_v48, %v9181_v6 }
 0x14a   :  { %v2121_v58 = vpop.f32.mrf.mxu1  ;;  %v9191_v44 = vpop.f32.mrf.mxu0  ;;  %v2415_v8 = vmul.f32 %v9185_v48, %v9185_v48 }
 0x14b   :  { %v2142_v3 = vadd.f32 %v2141_v45, %v2121_v58  ;;  %2139 = vadd.xlane.f32.xlu1 %v2138_v36  ;;  %v2164_v34 = vmul.f32 %v2121_v58, %v2121_v58  ;;  %v2178_v28 = vadd.f32 %v2177_v33, %v2161_v10  ;;  %v2418_v48 = vmul.f32 %v9191_v44, %v9191_v44 }
 0x14c   :  { %v2123_v9 = vpop.f32.mrf.mxu1  ;;  %v9197_v5 = vpop.f32.mrf.mxu0  ;;  %v2432_v27 = vadd.f32 %v2415_v8, %v2414_v38 }
 0x14d   :  { %1928 = vadd.xlane.f32.xlu0 %v1927_v62  ;;  %v2143_v52 = vadd.f32 %v2142_v3, %v2123_v9  ;;  %v2165_v23 = vmul.f32 %v2123_v9, %v2123_v9  ;;  %v2182_v51 = vadd.f32 %v2181_v43, %v2164_v34  ;;  %v2397_v25 = vadd.f32 %v9197_v5, %v9191_v44 }
 0x14e   :  { %v2359_v12 = vpop.f32.mrf.mxu1  ;;  %v9201_v17 = vpop.f32.mrf.mxu0  ;;  %v2419_v15 = vmul.f32 %v9197_v5, %v9197_v5 }
 0x14f   :  { %v2383_v21 = vadd.f32 %v2382_v46, %v2359_v12  ;;  %2144 = vadd.xlane.f32.xlu1 %v2143_v52  ;;  %v2408_v49 = vmul.f32 %v2359_v12, %v2359_v12  ;;  %v2183_v62 = vadd.f32 %v2182_v51, %v2165_v23 }
 0x150   :  { %v2361_v7 = vpop.f32.mrf.mxu1  ;;  %v9203_v35 = vpop.f32.mrf.mxu0  ;;  %v2437_v43 = vadd.f32 %v2419_v15, %v2418_v48 }
 0x151   :  { %2169 = vadd.xlane.f32.xlu0 %v2168_v24  ;;  %v2384_v4 = vadd.f32 %v2383_v21, %v2361_v7  ;;  %v2409_v31 = vmul.f32 %v2361_v7, %v2361_v7  ;;  %v2423_v2 = vadd.f32 %v2422_v29, %v2408_v49  ;;  %v2638_v61 = vadd.f32 %v9203_v35, %v9201_v17 }
 0x152   :  { %v2365_v56 = vpop.f32.mrf.mxu1  ;;  %v9211_v32 = vpop.f32.mrf.mxu0  ;;  %v2663_v0 = vmul.f32 %v9203_v35, %v9203_v35 }
 0x153   :  { %v2388_v37 = vadd.f32 %v2387_v63, %v2365_v56  ;;  %2385 = vadd.xlane.f32.xlu1 %v2384_v4  ;;  %v2412_v45 = vmul.f32 %v2365_v56, %v2365_v56  ;;  %v2424_v6 = vadd.f32 %v2423_v2, %v2409_v31 }
 0x154   :  { %v2367_v59 = vpop.f32.mrf.mxu1  ;;  %v9215_v40 = vpop.f32.mrf.mxu0 }
 0x155   :  { %2174 = vadd.xlane.f32.xlu0 %v2173_v39  ;;  %v2389_v18 = vadd.f32 %v2388_v37, %v2367_v59  ;;  %v2413_v52 = vmul.f32 %v2367_v59, %v2367_v59  ;;  %v2428_v11 = vadd.f32 %v2427_v60, %v2412_v45  ;;  %v2643_v7 = vadd.f32 %v9215_v40, %v9211_v32 }
 0x156   :  { %v2371_v22 = vpop.f32.mrf.mxu1  ;;  %v9221_v26 = vpop.f32.mrf.mxu0  ;;  %v2662_v39 = vmul.f32 %v9201_v17, %v9201_v17 }
 0x157   :  { %v2393_v19 = vadd.f32 %v2392_v42, %v2371_v22  ;;  %2390 = vadd.xlane.f32.xlu1 %v2389_v18  ;;  %v2416_v14 = vmul.f32 %v2371_v22, %v2371_v22  ;;  %v2429_v56 = vadd.f32 %v2428_v11, %v2413_v52 }
 0x158   :  { %v2373_v50 = vpop.f32.mrf.mxu1  ;;  %v9227_v54 = vpop.f32.mrf.mxu0 }
 0x159   :  { %2179 = vadd.xlane.f32.xlu0 %v2178_v28  ;;  %v2394_v16 = vadd.f32 %v2393_v19, %v2373_v50  ;;  %v2417_v37 = vmul.f32 %v2373_v50, %v2373_v50  ;;  %v2433_v5 = vadd.f32 %v2432_v27, %v2416_v14  ;;  %v2648_v13 = vadd.f32 %v9227_v54, %v9221_v26 }
 0x15a   :  { %v2377_v36 = vpop.f32.mrf.mxu1  ;;  %v9231_v55 = vpop.f32.mrf.mxu0  ;;  %v2678_v50 = vadd.f32 %v2663_v0, %v2662_v39  ;;  %v2671_v52 = vmul.f32 %v9227_v54, %v9227_v54 }
 0x15b   :  { %v2398_v58 = vadd.f32 %v2397_v25, %v2377_v36  ;;  %2395 = vadd.xlane.f32.xlu1 %v2394_v16  ;;  %v2420_v10 = vmul.f32 %v2377_v36, %v2377_v36  ;;  %v2434_v35 = vadd.f32 %v2433_v5, %v2417_v37  ;;  %v2666_v25 = vmul.f32 %v9211_v32, %v9211_v32 }
 0x15c   :  { %v2379_v3 = vpop.f32.mrf.mxu1  ;;  %v9239_v47 = vpop.f32.mrf.mxu0  ;;  %v2667_v16 = vmul.f32 %v9215_v40, %v9215_v40 }
 0x15d   :  { %2184 = vadd.xlane.f32.xlu0 %v2183_v62  ;;  %v2399_v9 = vadd.f32 %v2398_v58, %v2379_v3  ;;  %v9249_v63 = vpop.xlane.xlu0 %337  ;;  %v2421_v51 = vmul.f32 %v2379_v3, %v2379_v3  ;;  %v2438_v53 = vadd.f32 %v2437_v43, %v2420_v10  ;;  %v2653_v29 = vadd.f32 %v9239_v47, %v9231_v55 }
 0x15e   :  { %v2615_v46 = vpop.f32.mrf.mxu1  ;;  %v9241_v21 = vpop.xlane.xlu1 %377 }
 0x15f   :  { %v2639_v12 = vadd.f32 %v2638_v61, %v2615_v46  ;;  %2400 = vadd.xlane.f32.xlu1 %v2399_v9  ;;  %v2782_v24 = vpop.f32.mrf.mxu0  ;;  %v2664_v22 = vmul.f32 %v2615_v46, %v2615_v46  ;;  %v2439_v61 = vadd.f32 %v2438_v53, %v2421_v51  ;;  %v2670_v9 = vmul.f32 %v9221_v26, %v9221_v26 }
 0x160   :  { %v2617_v41 = vpop.f32.mrf.mxu1  ;;  %v2918_v58 = vmul.f32 %v2782_v24, %v2782_v24 }
 0x161   :  { %2425 = vadd.xlane.f32.xlu0 %v2424_v6  ;;  %v2784_v57 = vpop.f32.mrf.mxu0  ;;  %v2640_v20 = vadd.f32 %v2639_v12, %v2617_v41  ;;  %v2665_v3 = vmul.f32 %v2617_v41, %v2617_v41  ;;  %v2679_v60 = vadd.f32 %v2678_v50, %v2664_v22  ;;  %v2683_v6 = vadd.f32 %v2667_v16, %v2666_v25 }
 0x162   :  { %v2621_v4 = vpop.f32.mrf.mxu1  ;;  %v9251_v34 = vpop.xlane.xlu1 %342  ;;  %v2919_v62 = vmul.f32 %v2784_v57, %v2784_v57  ;;  %v2894_v11 = vadd.f32 %v2784_v57, %v2782_v24  ;;  %v2674_v24 = vmul.f32 %v9231_v55, %v9231_v55  ;;  %v2675_v57 = vmul.f32 %v9239_v47, %v9239_v47 }
 0x163   :  { %v2644_v33 = vadd.f32 %v2643_v7, %v2621_v4  ;;  %2641 = vadd.xlane.f32.xlu1 %v2640_v20  ;;  %v9253_v44 = vpop.f32.mrf.mxu0  ;;  %v2668_v38 = vmul.f32 %v2621_v4, %v2621_v4  ;;  %v2680_v15 = vadd.f32 %v2679_v60, %v2665_v3 }
 0x164   :  { %v2623_v59 = vpop.f32.mrf.mxu1  ;;  %v2934_v20 = vadd.f32 %v2919_v62, %v2918_v58  ;;  %v2693_v53 = vadd.f32 %v2675_v57, %v2674_v24  ;;  %v2922_v50 = vmul.f32 %v9253_v44, %v9253_v44 }
 0x165   :  { %2430 = vadd.xlane.f32.xlu0 %v2429_v56  ;;  %v9261_v42 = vpop.f32.mrf.mxu0  ;;  %v2645_v18 = vadd.f32 %v2644_v33, %v2623_v59  ;;  %v2669_v7 = vmul.f32 %v2623_v59, %v2623_v59  ;;  %v2684_v54 = vadd.f32 %v2683_v6, %v2668_v38  ;;  %v2688_v59 = vadd.f32 %v2671_v52, %v2670_v9 }
 0x166   :  { %v2627_v28 = vpop.f32.mrf.mxu1  ;;  %v9263_v49 = vpop.xlane.xlu0 %387  ;;  %v2923_v25 = vmul.f32 %v9261_v42, %v9261_v42 }
 0x167   :  { %v2649_v19 = vadd.f32 %v2648_v13, %v2627_v28  ;;  %v9265_v23 = vpop.xlane.xlu1 %382  ;;  %2646 = vadd.xlane.f32.xlu1 %v2645_v18  ;;  %v9267_v17 = vpop.f32.mrf.mxu0  ;;  %v2672_v27 = vmul.f32 %v2627_v28, %v2627_v28  ;;  %v2899_v13 = vadd.f32 %v9261_v42, %v9253_v44  ;;  %v2685_v47 = vadd.f32 %v2684_v54, %v2669_v7 }
 0x168   :  { %v2629_v30 = vpop.f32.mrf.mxu1  ;;  %v2926_v42 = vmul.f32 %v9267_v17, %v9267_v17  ;;  %v2939_v6 = vadd.f32 %v2923_v25, %v2922_v50 }
 0x169   :  { %2435 = vadd.xlane.f32.xlu0 %v2434_v35  ;;  %v9275_v45 = vpop.f32.mrf.mxu0  ;;  %v2650_v36 = vadd.f32 %v2649_v19, %v2629_v30  ;;  %v2673_v19 = vmul.f32 %v2629_v30, %v2629_v30  ;;  %v2689_v35 = vadd.f32 %v2688_v59, %v2672_v27 }
 0x16a   :  { %v2633_v31 = vpop.f32.mrf.mxu1  ;;  %v9277_v2 = vpop.xlane.xlu0 %352  ;;  %v2904_v58 = vadd.f32 %v9275_v45, %v9267_v17  ;;  %v2927_v9 = vmul.f32 %v9275_v45, %v9275_v45 }
 0x16b   :  { %v2654_v8 = vadd.f32 %v2653_v29, %v2633_v31  ;;  %v9279_v32 = vpop.xlane.xlu1 %347  ;;  %2651 = vadd.xlane.f32.xlu1 %v2650_v36  ;;  %v9281_v40 = vpop.f32.mrf.mxu0  ;;  %v2676_v22 = vmul.f32 %v2633_v31, %v2633_v31  ;;  %v2690_v44 = vadd.f32 %v2689_v35, %v2673_v19 }
 0x16c   :  { %v2635_v46 = vpop.f32.mrf.mxu1  ;;  %v2930_v19 = vmul.f32 %v9281_v40, %v9281_v40 }
 0x16d   :  { %2440 = vadd.xlane.f32.xlu0 %v2439_v61  ;;  %v9287_v14 = vpop.f32.mrf.mxu0  ;;  %v2655_v12 = vadd.f32 %v2654_v8, %v2635_v46  ;;  %v2677_v38 = vmul.f32 %v2635_v46, %v2635_v46  ;;  %v2694_v8 = vadd.f32 %v2693_v53, %v2676_v22 }
 0x16e   :  { %v2871_v48 = vpop.f32.mrf.mxu1  ;;  %v9289_v41 = vpop.xlane.xlu0 %593  ;;  %v2931_v35 = vmul.f32 %v9287_v14, %v9287_v14 }
 0x16f   :  { %v2895_v4 = vadd.f32 %v2894_v11, %v2871_v48  ;;  %v2920_v56 = vmul.f32 %v2871_v48, %v2871_v48  ;;  %v9291_v26 = vpop.xlane.xlu1 %392  ;;  %2656 = vadd.xlane.f32.xlu1 %v2655_v12  ;;  %v9293_v10 = vpop.f32.mrf.mxu0  ;;  %v2909_v48 = vadd.f32 %v9287_v14, %v9281_v40  ;;  %v2695_v27 = vadd.f32 %v2694_v8, %v2677_v38 }
 0x170   :  { %v2873_v33 = vpop.f32.mrf.mxu1 }
 0x171   :  { %2681 = vadd.xlane.f32.xlu0 %v2680_v15  ;;  %v9299_v37 = vpop.f32.mrf.mxu0  ;;  %v2896_v5 = vadd.f32 %v2895_v4, %v2873_v33  ;;  %v2921_v39 = vmul.f32 %v2873_v33, %v2873_v33  ;;  %v2935_v0 = vadd.f32 %v2934_v20, %v2920_v56  ;;  %v2944_v33 = vadd.f32 %v2927_v9, %v2926_v42 }
 0x172   :  { %v2877_v18 = vpop.f32.mrf.mxu1  ;;  %v9303_v43 = vpop.xlane.xlu0 %633 }
 0x173   :  { %v9305_v28 = vpop.xlane.xlu1 %598  ;;  %2897 = vadd.xlane.f32.xlu1 %v2896_v5  ;;  %v9307_v55 = vpop.f32.mrf.mxu0  ;;  %v2900_v16 = vadd.f32 %v2899_v13, %v2877_v18  ;;  %v2936_v36 = vadd.f32 %v2935_v0, %v2921_v39  ;;  %v2924_v30 = vmul.f32 %v2877_v18, %v2877_v18 }
 0x174   :  { %v2879_v51 = vpop.f32.mrf.mxu1  ;;  %v3178_v40 = vmul.f32 %v9307_v55, %v9307_v55 }
 0x175   :  { %2686 = vadd.xlane.f32.xlu0 %v2685_v47  ;;  %v3046_v29 = vpop.f32.mrf.mxu0  ;;  %v2901_v12 = vadd.f32 %v2900_v16, %v2879_v51  ;;  %v2925_v45 = vmul.f32 %v2879_v51, %v2879_v51  ;;  %v2940_v4 = vadd.f32 %v2939_v6, %v2924_v30  ;;  %v2949_v30 = vadd.f32 %v2931_v35, %v2930_v19 }
 0x176   :  { %v2883_v62 = vpop.f32.mrf.mxu1  ;;  %v9315_v31 = vpop.xlane.xlu0 %603  ;;  %v3155_v38 = vadd.f32 %v3046_v29, %v9307_v55  ;;  %v3179_v8 = vmul.f32 %v3046_v29, %v3046_v29 }
 0x177   :  { %v9317_v3 = vpop.xlane.xlu1 %638  ;;  %2937 = vadd.xlane.f32.xlu1 %v2936_v36  ;;  %v9319_v60 = vpop.f32.mrf.mxu0  ;;  %v2905_v52 = vadd.f32 %v2904_v58, %v2883_v62  ;;  %v2928_v46 = vmul.f32 %v2883_v62, %v2883_v62  ;;  %v2941_v59 = vadd.f32 %v2940_v4, %v2925_v45 }
 0x178   :  { %v2885_v61 = vpop.f32.mrf.mxu1  ;;  %v3195_v29 = vadd.f32 %v3179_v8, %v3178_v40  ;;  %v3182_v45 = vmul.f32 %v9319_v60, %v9319_v60 }
 0x179   :  { %2691 = vadd.xlane.f32.xlu0 %v2690_v44  ;;  %v9325_v11 = vpop.f32.mrf.mxu0  ;;  %v2906_v57 = vadd.f32 %v2905_v52, %v2885_v61  ;;  %v2929_v13 = vmul.f32 %v2885_v61, %v2885_v61  ;;  %v2945_v18 = vadd.f32 %v2944_v33, %v2928_v46 }
 0x17a   :  { %v2889_v15 = vpop.f32.mrf.mxu1  ;;  %v9329_v7 = vpop.xlane.xlu0 %643 }
 0x17b   :  { %v9331_v20 = vpop.xlane.xlu1 %648  ;;  %2902 = vadd.xlane.f32.xlu1 %v2901_v12  ;;  %v9333_v17 = vpop.f32.mrf.mxu0  ;;  %v2910_v54 = vadd.f32 %v2909_v48, %v2889_v15  ;;  %v2932_v16 = vmul.f32 %v2889_v15, %v2889_v15  ;;  %v2946_v36 = vadd.f32 %v2945_v18, %v2929_v13  ;;  %v3150_v12 = vadd.f32 %v9299_v37, %v9293_v10 }
 0x17c   :  { %v2891_v56 = vpop.f32.mrf.mxu1  ;;  %v3160_v18 = vadd.f32 %v9325_v11, %v9319_v60 }
 0x17d   :  { %2696 = vadd.xlane.f32.xlu0 %v2695_v27  ;;  %v9335_v24 = vpop.f32.mrf.mxu0  ;;  %v2911_v53 = vadd.f32 %v2910_v54, %v2891_v56  ;;  %v2933_v42 = vmul.f32 %v2891_v56, %v2891_v56  ;;  %v2950_v61 = vadd.f32 %v2949_v30, %v2932_v16  ;;  %v3183_v56 = vmul.f32 %v9325_v11, %v9325_v11 }
 0x17e   :  { %v9337_v5 = vpop.f32.mrf.mxu1  ;;  %v9339_v39 = vpop.xlane.xlu0 %608  ;;  %v3187_v16 = vmul.f32 %v9335_v24, %v9335_v24  ;;  %v3165_v40 = vadd.f32 %v9335_v24, %v9333_v17 }
 0x17f   :  { %2907 = vadd.xlane.f32.xlu1 %v2906_v57  ;;  %v9341_v0 = vpop.f32.mrf.mxu0  ;;  %v9343_v22 = vpop.xlane.xlu1 %849  ;;  %v3151_v27 = vadd.f32 %v3150_v12, %v9337_v5  ;;  %v2951_v55 = vadd.f32 %v2950_v61, %v2933_v42  ;;  %v3200_v30 = vadd.f32 %v3183_v56, %v3182_v45  ;;  %v3174_v61 = vmul.f32 %v9293_v10, %v9293_v10 }
 0x180   :  { %v9345_v47 = vpop.f32.mrf.mxu1 }
 0x181   :  { %2942 = vadd.xlane.f32.xlu0 %v2941_v59  ;;  %v9351_v51 = vpop.f32.mrf.mxu0  ;;  %v3152_v35 = vadd.f32 %v3151_v27, %v9345_v47 }
 0x182   :  { %v3133_v50 = vpop.f32.mrf.mxu1  ;;  %v9353_v25 = vpop.xlane.xlu0 %889 }
 0x183   :  { %2912 = vadd.xlane.f32.xlu1 %v2911_v53  ;;  %v8277_v44 = vpop.f32.mrf.mxu0  ;;  %v3156_v6 = vadd.f32 %v3155_v38, %v3133_v50  ;;  %v3180_v48 = vmul.f32 %v3133_v50, %v3133_v50  ;;  %v3186_v53 = vmul.f32 %v9333_v17, %v9333_v17 }
 0x184   :  { %v3135_v58 = vpop.f32.mrf.mxu1  ;;  %v9355_v62 = vpop.xlane.xlu1 %859  ;;  %v3318_v11 = vmul.f32 %v8277_v44, %v8277_v44 }
 0x185   :  { %2947 = vadd.xlane.f32.xlu0 %v2946_v36  ;;  %v3294_v15 = vpop.f32.mrf.mxu0  ;;  %v3157_v54 = vadd.f32 %v3156_v6, %v3135_v58  ;;  %v3181_v57 = vmul.f32 %v3135_v58, %v3135_v58  ;;  %v3196_v33 = vadd.f32 %v3195_v29, %v3180_v48  ;;  %v3205_v48 = vadd.f32 %v3187_v16, %v3186_v53 }
 0x186   :  { %v9359_v14 = vpop.xlane.xlu0 %854  ;;  %v3139_v9 = vpop.f32.mrf.mxu1  ;;  %v3316_v16 = vmul.f32 %v9341_v0, %v9341_v0 }
 0x187   :  { %3309 = vadd.xlane.f32.xlu1 %v8277_v44  ;;  %v3184_v19 = vmul.f32 %v3139_v9, %v3139_v9  ;;  %v3161_v36 = vadd.f32 %v3160_v18, %v3139_v9  ;;  %v3197_v58 = vadd.f32 %v3196_v33, %v3181_v57  ;;  %v3175_v9 = vmul.f32 %v9299_v37, %v9299_v37 }
 0x188   :  { %v9362_v52 = vpop.xlane.xlu1 %899  ;;  %v3141_v4 = vpop.f32.mrf.mxu1  ;;  %v3176_v44 = vmul.f32 %v9337_v5, %v9337_v5  ;;  %v3317_v5 = vmul.f32 %v3294_v15, %v3294_v15 }
 0x189   :  { %3305 = vadd.xlane.f32.xlu0 %v9341_v0  ;;  %v3185_v8 = vmul.f32 %v3141_v4, %v3141_v4  ;;  %v3201_v42 = vadd.f32 %v3200_v30, %v3184_v19  ;;  %v3162_v17 = vadd.f32 %v3161_v36, %v3141_v4  ;;  %v3190_v56 = vadd.f32 %v3175_v9, %v3174_v61 }
 0x18a   :  { %v9367_v46 = vpop.xlane.xlu0 %894  ;;  %v3145_v50 = vpop.f32.mrf.mxu1  ;;  %v3177_v4 = vmul.f32 %v9345_v47, %v9345_v47 }
 0x18b   :  { %3307 = vadd.xlane.f32.xlu1 %v3294_v15  ;;  %v3188_v60 = vmul.f32 %v3145_v50, %v3145_v50  ;;  %v3166_v27 = vadd.f32 %v3165_v40, %v3145_v50  ;;  %v3202_v45 = vadd.f32 %v3201_v42, %v3185_v8  ;;  %v3191_v37 = vadd.f32 %v3190_v56, %v3176_v44 }
 0x18c   :  { %v9374_v59 = vpop.xlane.xlu1 %1105  ;;  %v3147_v12 = vpop.f32.mrf.mxu1  ;;  %v3315_v15 = vmul.f32 %v9351_v51, %v9351_v51 }
 0x18d   :  { %2952 = vadd.xlane.f32.xlu0 %v2951_v55  ;;  %v3206_v55 = vadd.f32 %v3205_v48, %v3188_v60  ;;  %v3189_v29 = vmul.f32 %v3147_v12, %v3147_v12 }
 0x18e   :  { %v9376_v13 = vpop.xlane.xlu0 %864 }
 0x18f   :  { %3158 = vadd.xlane.f32.xlu1 %v3157_v54  ;;  %v3167_v54 = vadd.f32 %v3166_v27, %v3147_v12  ;;  %v3207_v33 = vadd.f32 %v3206_v55, %v3189_v29  ;;  %v8417_v12 = vmov 0  }
 0x190   :  { %v9391_v6 = vpop.xlane.xlu1 %1110  ;;  %8311 = vset.pattern.permute.xlu1 %v8417_v12  ;;  %8310 = vset.pattern.permute.xlu0 %v8417_v12 }
 0x191   :  { %3153 = vadd.xlane.f32.xlu0 %v3152_v35  ;;  %v3192_v35 = vadd.f32 %v3191_v37, %v3177_v4 }
 0x192   :  { %v9387_v38 = vpop.xlane.xlu0 %904 }
 0x193   :  { %3198 = vadd.xlane.f32.xlu1 %v3197_v58 }
 0x195   :  { %3325 = vadd.xlane.f32.xlu0 %v3318_v11 }
 0x196   :  { %v9395_v24 = vpop.xlane.xlu0 %1145 }
 0x197   :  { %3163 = vadd.xlane.f32.xlu1 %v3162_v17 }
 0x198   :  { %v9399_v10 = vpop.xlane.xlu1 %1120 }
 0x199   :  { %3203 = vadd.xlane.f32.xlu0 %v3202_v45 }
 0x19a   :  { %v9401_v57 = vpop.xlane.xlu0 %1150 }
 0x19b   :  { %3168 = vadd.xlane.f32.xlu1 %v3167_v54 }
 0x19c   :  { %v9405_v18 = vpop.xlane.xlu1 %1160 }
 0x19d   :  { %3208 = vadd.xlane.f32.xlu0 %v3207_v33 }
 0x19e   :  { %v9407_v19 = vpop.xlane.xlu0 %1115 }
 0x19f   :  { %3323 = vadd.xlane.f32.xlu1 %v3317_v5 }
 0x1a0   :  { %v9409_v53 = vpop.xlane.xlu1 %1361 }
 0x1a1   :  { %3193 = vadd.xlane.f32.xlu0 %v3192_v35 }
 0x1a2   :  { %v9411_v50 = vpop.xlane.xlu0 %1155 }
 0x1a3   :  { %3303 = vadd.xlane.f32.xlu1 %v9351_v51 }
 0x1a4   :  { %v9416_v47 = vpop.xlane.xlu1 %1366 }
 0x1a5   :  { %3321 = vadd.xlane.f32.xlu0 %v3316_v16 }
 0x1a6   :  { %v9420_v36 = vpop.xlane.xlu0 %1401 }
 0x1a7   :  { %11857 = vst [vmem:[#allocation2_spill] sm:$0xff] %v9420_v36  ;;  %3319 = vadd.xlane.f32.xlu1 %v3315_v15 }
 0x1a8   :  { %v9422_v58 = vpop.xlane.xlu1 %1371 }
 0x1aa   :  { %v9424_v30 = vpop.xlane.xlu0 %1406 }
 0x1ac   :  { %v9426_v40 = vpop.xlane.xlu1 %1617 }
 0x1ad   :  { %11858 = vst [vmem:[#allocation3_spill] sm:$0xff] %v9426_v40 }
 0x1ae   :  { %v9428_v60 = vpop.xlane.xlu0 %1411 }
 0x1b0   :  { %v9430_v0 = vpop.xlane.xlu1 %1622 }
 0x1b2   :  { %v9432_v11 = vpop.xlane.xlu0 %1376 }
 0x1b4   :  { %v9434_v8 = vpop.xlane.xlu1 %1627 }
 0x1b6   :  { %v9436_v42 = vpop.xlane.xlu0 %1416 }
 0x1b8   :  { %v9438_v51 = vpop.xlane.xlu1 %1632 }
 0x1ba   :  { %v9440_v61 = vpop.xlane.xlu0 %1657 }
 0x1bb   :  { %11859 = vst [vmem:[#allocation4_spill] sm:$0xff] %v9440_v61 }
 0x1bc   :  { %v9442_v9 = vpop.xlane.xlu1 %1873 }
 0x1bd   :  { %11860 = vst [vmem:[#allocation5_spill] sm:$0xff] %v9442_v9 }
 0x1be   :  { %v9444_v48 = vpop.xlane.xlu0 %1662 }
 0x1bf   :  { %11861 = vst [vmem:[#allocation6_spill] sm:$0xff] %v9444_v48 }
 0x1c0   :  { %v9446_v27 = vpop.xlane.xlu1 %1878 }
 0x1c2   :  { %v9448_v17 = vpop.xlane.xlu0 %1667 }
 0x1c4   :  { %v1884_v44 = vpop.xlane.xlu1 %1883 }
 0x1c6   :  { %v9450_v55 = vpop.xlane.xlu0 %1672 }
 0x1c8   :  { %v9452_v29 = vpop.xlane.xlu1 %1888 }
 0x1ca   :  { %v9454_v45 = vpop.xlane.xlu0 %1913 }
 0x1cb   :  { %11862 = vst [vmem:[#allocation7_spill] sm:$0xff] %v9454_v45 }
 0x1cc   :  { %v9456_v56 = vpop.xlane.xlu1 %2129 }
 0x1cd   :  { %11863 = vst [vmem:[#allocation8_spill] sm:$0xff] %v9456_v56 }
 0x1ce   :  { %v9458_v54 = vpop.xlane.xlu0 %1918 }
 0x1cf   :  { %11864 = vst [vmem:[#allocation9_spill] sm:$0xff] %v9458_v54 }
 0x1d0   :  { %v9460_v37 = vpop.xlane.xlu1 %2134 }
 0x1d2   :  { %v9462_v4 = vpop.xlane.xlu0 %1923 }
 0x1d4   :  { %v2140_v33 = vpop.xlane.xlu1 %2139 }
 0x1d6   :  { %v9464_v5 = vpop.xlane.xlu0 %1928 }
 0x1d7   :  { %11865 = vst [vmem:[#allocation10_spill] sm:$0xff] %v9464_v5 }
 0x1d8   :  { %v9466_v35 = vpop.xlane.xlu1 %2144 }
 0x1da   :  { %v9468_v16 = vpop.xlane.xlu0 %2169 }
 0x1db   :  { %11866 = vst [vmem:[#allocation11_spill] sm:$0xff] %v9468_v16 }
 0x1dc   :  { %v9470_v15 = vpop.xlane.xlu1 %2385 }
 0x1dd   :  { %11867 = vst [vmem:[#allocation12_spill] sm:$0xff] %v9470_v15 }
 0x1de   :  { %v9472_v12 = vpop.xlane.xlu0 %2174 }
 0x1df   :  { %11868 = vst [vmem:[#allocation13_spill] sm:$0xff] %v9472_v12 }
 0x1e0   :  { %v9474_v1 = vpop.xlane.xlu1 %2390 }
 0x1e1   :  { %11869 = vst [vmem:[#allocation14_spill] sm:$0xff] %v9474_v1 }
 0x1e2   :  { %v9476_v45 = vpop.xlane.xlu0 %2179 }
 0x1e3   :  { %11870 = vst [vmem:[#allocation15_spill] sm:$0xff] %v9476_v45 }
 0x1e4   :  { %v2396_v56 = vpop.xlane.xlu1 %2395 }
 0x1e6   :  { %v9478_v54 = vpop.xlane.xlu0 %2184 }
 0x1e7   :  { %11871 = vst [vmem:[#allocation16_spill] sm:$0xff] %v9478_v54 }
 0x1e8   :  { %v9480_v61 = vpop.xlane.xlu1 %2400 }
 0x1e9   :  { %11872 = vst [vmem:[#allocation17_spill] sm:$0xff] %v9480_v61 }
 0x1ea   :  { %v9482_v9 = vpop.xlane.xlu0 %2425 }
 0x1eb   :  { %11873 = vst [vmem:[#allocation18_spill] sm:$0xff] %v9482_v9 }
 0x1ec   :  { %v9484_v48 = vpop.xlane.xlu1 %2641 }
 0x1ed   :  { %11874 = vst [vmem:[#allocation19_spill] sm:$0xff] %v9484_v48 }
 0x1ee   :  { %v9486_v36 = vpop.xlane.xlu0 %2430 }
 0x1ef   :  { %11875 = vst [vmem:[#allocation20_spill] sm:$0xff] %v9486_v36 }
 0x1f0   :  { %v9488_v16 = vpop.xlane.xlu1 %2646 }
 0x1f1   :  { %11876 = vst [vmem:[#allocation21_spill] sm:$0xff] %v9488_v16 }
 0x1f2   :  { %v9490_v15 = vpop.xlane.xlu0 %2435 }
 0x1f3   :  { %11877 = vst [vmem:[#allocation22_spill] sm:$0xff] %v9490_v15 }
 0x1f4   :  { %v9492_v12 = vpop.xlane.xlu1 %2651 }
 0x1f6   :  { %v9494_v40 = vpop.xlane.xlu0 %2440 }
 0x1f7   :  { %11878 = vst [vmem:[#allocation23_spill] sm:$0xff] %v9494_v40 }
 0x1f8   :  { %v9496_v45 = vpop.xlane.xlu1 %2656 }
 0x1f9   :  { %11879 = vst [vmem:[#allocation24_spill] sm:$0xff] %v9496_v45 }
 0x1fa   :  { %v9498_v1 = vpop.xlane.xlu0 %2681 }
 0x1fb   :  { %11880 = vst [vmem:[#allocation25_spill] sm:$0xff] %v9498_v1  ;;  %v612_v1 = vadd.f32 %v9315_v31, %v9279_v32  ;;  %v652_v32 = vadd.f32 %v9329_v7, %v9263_v49 }
 0x1fc   :  { %v9500_v54 = vpop.xlane.xlu1 %2897 }
 0x1fd   :  { %11881 = vst [vmem:[#allocation26_spill] sm:$0xff] %v9500_v54  ;;  %v868_v54 = vadd.f32 %v9355_v62, %v612_v1 }
 0x1fe   :  { %v9502_v61 = vpop.xlane.xlu0 %2686 }
 0x1ff   :  { %11882 = vst [vmem:[#allocation27_spill] sm:$0xff] %v9502_v61 }
 0x200   :  { %v9504_v9 = vpop.xlane.xlu1 %2937 }
 0x201   :  { %11883 = vst [vmem:[#allocation28_spill] sm:$0xff] %v9504_v9  ;;  %v611_v9 = vadd.f32 %v9305_v28, %v9251_v34  ;;  %v653_v34 = vadd.f32 %v9331_v20, %v9291_v26 }
 0x202   :  { %v9506_v48 = vpop.xlane.xlu0 %2691 }
 0x203   :  { %11884 = vst [vmem:[#allocation29_spill] sm:$0xff] %v9506_v48  ;;  %v1124_v48 = vadd.f32 %v9407_v19, %v868_v54  ;;  %v909_v19 = vadd.f32 %v9387_v38, %v653_v34  ;;  %v11895_v34 = vld [vmem:[#allocation16_spill] sm:$0xff] }
 0x204   :  { %v9508_v36 = vpop.xlane.xlu1 %2902 }
 0x205   :  { %v1380_v1 = vadd.f32 %v9422_v58, %v1124_v48 }
 0x206   :  { %v9510_v16 = vpop.xlane.xlu0 %2696 }
 0x207   :  { %11885 = vst [vmem:[#allocation30_spill] sm:$0xff] %v9510_v16  ;;  %v613_v16 = vadd.f32 %v9339_v39, %v9277_v2  ;;  %v908_v2 = vadd.f32 %v9362_v52, %v652_v32  ;;  %v651_v52 = vadd.f32 %v9317_v3, %v9265_v23 }
 0x208   :  { %v2908_v15 = vpop.xlane.xlu1 %2907 }
 0x209   :  { %v869_v31 = vadd.f32 %v9376_v13, %v613_v16  ;;  %v610_v13 = vadd.f32 %v9289_v41, %v9249_v63  ;;  %v1164_v26 = vadd.f32 %v9411_v50, %v908_v2  ;;  %v650_v41 = vadd.f32 %v9303_v43, %v9241_v21 }
 0x20a   :  { %v9512_v5 = vpop.xlane.xlu0 %2942  ;;  %v907_v50 = vadd.f32 %v9367_v46, %v651_v52 }
 0x20b   :  { %11886 = vst [vmem:[#allocation31_spill] sm:$0xff] %v9512_v5  ;;  %v867_v5 = vadd.f32 %v9359_v14, %v611_v9  ;;  %v1125_v39 = vadd.f32 %v9399_v10, %v869_v31  ;;  %v1636_v14 = vadd.f32 %v9434_v8, %v1380_v1  ;;  %v1165_v10 = vadd.f32 %v9405_v18, %v909_v19  ;;  %v11893_v31 = vld [vmem:[#allocation2_spill] sm:$0xff] }
 0x20c   :  { %v9514_v40 = vpop.xlane.xlu1 %2912  ;;  %v1420_v8 = vadd.f32 %v9428_v60, %v1164_v26  ;;  %v1163_v48 = vadd.f32 %v9401_v57, %v907_v50  ;;  %v11894_v1 = vld [vmem:[#allocation6_spill] sm:$0xff]  ;;  %v11904_v50 = vld [vmem:[#allocation29_spill] sm:$0xff] }
 0x20d   :  { %11887 = vst [vmem:[#allocation32_spill] sm:$0xff] %v9514_v40  ;;  %v1123_v28 = vadd.f32 %v9391_v6, %v867_v5  ;;  %v1381_v20 = vadd.f32 %v9432_v11, %v1125_v39  ;;  %v1892_v6 = vadd.f32 %v1884_v44, %v1636_v14  ;;  %v1421_v11 = vadd.f32 %v9436_v42, %v1165_v10  ;;  %v11891_v5 = vld [vmem:[#allocation15_spill] sm:$0xff]  ;;  %v11897_v39 = vld [vmem:[#allocation5_spill] sm:$0xff]  ;;  %v11898_v19 = vld [vmem:[#allocation22_spill] sm:$0xff] }
 0x20e   :  { %v9518_v45 = vpop.xlane.xlu0 %2947  ;;  %v11901_v10 = vld [vmem:[#allocation9_spill] sm:$0xff] }
 0x20f   :  { %v1379_v49 = vadd.f32 %v9416_v47, %v1123_v28  ;;  %v866_v47 = vadd.f32 %v9343_v22, %v610_v13  ;;  %v1637_v9 = vadd.f32 %v9438_v51, %v1381_v20  ;;  %v2148_v63 = vadd.f32 %v2140_v33, %v1892_v6  ;;  %v11896_v28 = vld [vmem:[#allocation21_spill] sm:$0xff]  ;;  %v11899_v13 = vld [vmem:[#allocation24_spill] sm:$0xff] }
 0x210   :  { %v9523_v61 = vpop.xlane.xlu1 %3309  ;;  %v1676_v22 = vadd.f32 %v9448_v17, %v1420_v8  ;;  %v906_v51 = vadd.f32 %v9353_v25, %v650_v41  ;;  %v1677_v21 = vadd.f32 %v9450_v55, %v1421_v11  ;;  %v1419_v25 = vadd.f32 %v9424_v30, %v1163_v48  ;;  %v11900_v6 = vld [vmem:[#allocation4_spill] sm:$0xff] }
 0x211   :  { %v1635_v58 = vadd.f32 %v9430_v0, %v1379_v49  ;;  %v1122_v18 = vadd.f32 %v9374_v59, %v866_v47  ;;  %v1893_v60 = vadd.f32 %v9452_v29, %v1637_v9  ;;  %v2404_v0 = vadd.f32 %v2396_v56, %v2148_v63  ;;  %v11888_v29 = vld [vmem:[#allocation10_spill] sm:$0xff]  ;;  %v11903_v63 = vld [vmem:[#allocation8_spill] sm:$0xff] }
 0x212   :  { %v9529_v40 = vpop.xlane.xlu0 %3305  ;;  %v1162_v44 = vadd.f32 %v9395_v24, %v906_v51  ;;  %v1933_v57 = vadd.f32 %v11888_v29, %v1677_v21  ;;  %v11889_v56 = vld [vmem:[#allocation14_spill] sm:$0xff]  ;;  %v11907_v51 = vld [vmem:[#allocation13_spill] sm:$0xff] }
 0x213   :  { %v1891_v23 = vadd.f32 %v9446_v27, %v1635_v58  ;;  %v1378_v42 = vadd.f32 %v9409_v53, %v1122_v18  ;;  %v1932_v27 = vadd.f32 %v9462_v4, %v1676_v22  ;;  %v2149_v59 = vadd.f32 %v9466_v35, %v1893_v60  ;;  %v11892_v53 = vld [vmem:[#allocation17_spill] sm:$0xff]  ;;  %v11902_v58 = vld [vmem:[#allocation23_spill] sm:$0xff]  ;;  %v11908_v21 = vld [vmem:[#allocation30_spill] sm:$0xff] }
 0x214   :  { %v9538_v62 = vpop.xlane.xlu1 %3307  ;;  %v2660_v17 = vadd.f32 %v9492_v12, %v2404_v0  ;;  %v1418_v35 = vadd.f32 %v11893_v31, %v1162_v44  ;;  %v1675_v12 = vadd.f32 %v11894_v1, %v1419_v25  ;;  %v2189_v24 = vadd.f32 %v11895_v34, %v1933_v57  ;;  %v11906_v60 = vld [vmem:[#allocation7_spill] sm:$0xff]  ;;  %v11911_v57 = vld [vmem:[#allocation20_spill] sm:$0xff] }
 0x215   :  { %v2147_v43 = vadd.f32 %v9460_v37, %v1891_v23  ;;  %v11890_v37 = vld [vmem:[#allocation3_spill] sm:$0xff]  ;;  %v2188_v16 = vadd.f32 %v11891_v5, %v1932_v27  ;;  %v2405_v32 = vadd.f32 %v11892_v53, %v2149_v59  ;;  %v11905_v23 = vld [vmem:[#allocation32_spill] sm:$0xff]  ;;  %v11913_v53 = vld [vmem:[#allocation18_spill] sm:$0xff] }
 0x216   :  { %v9545_v7 = vpop.xlane.xlu0 %2952  ;;  %v1634_v33 = vadd.f32 %v11890_v37, %v1378_v42  ;;  %v2916_v4 = vadd.f32 %v2908_v15, %v2660_v17  ;;  %v1674_v52 = vadd.f32 %v11900_v6, %v1418_v35  ;;  %v1931_v15 = vadd.f32 %v11901_v10, %v1675_v12  ;;  %v11909_v59 = vld [vmem:[#allocation12_spill] sm:$0xff]  ;;  %v11910_v25 = vld [vmem:[#allocation11_spill] sm:$0xff]  ;;  %v11915_v12 = vld [vmem:[#allocation26_spill] sm:$0xff] }
 0x217   :  { %v2403_v55 = vadd.f32 %v11889_v56, %v2147_v43  ;;  %v2444_v49 = vadd.f32 %v11898_v19, %v2188_v16  ;;  %v2661_v26 = vadd.f32 %v11899_v13, %v2405_v32  ;;  %v2445_v47 = vadd.f32 %v11902_v58, %v2189_v24  ;;  %v11912_v37 = vld [vmem:[#allocation19_spill] sm:$0xff] }
 0x218   :  { %v3159_v38 = vpop.xlane.xlu1 %3158  ;;  %v1890_v14 = vadd.f32 %v11897_v39, %v1634_v33  ;;  %v1930_v0 = vadd.f32 %v11906_v60, %v1674_v52  ;;  %v2187_v48 = vadd.f32 %v11907_v51, %v1931_v15  ;;  %v11918_v52 = vld [vmem:[#allocation28_spill] sm:$0xff] }
 0x219   :  { %v2659_v30 = vadd.f32 %v11896_v28, %v2403_v55  ;;  %v2700_v11 = vadd.f32 %v11904_v50, %v2444_v49  ;;  %v2917_v18 = vadd.f32 %v11905_v23, %v2661_v26  ;;  %v2701_v43 = vadd.f32 %v11908_v21, %v2445_v47  ;;  %v11916_v28 = vld [vmem:[#allocation25_spill] sm:$0xff] }
 0x21a   :  { %v9563_v3 = vpop.xlane.xlu0 %3153  ;;  %v2146_v41 = vadd.f32 %v11903_v63, %v1890_v14  ;;  %v2186_v29 = vadd.f32 %v11910_v25, %v1930_v0  ;;  %v2443_v56 = vadd.f32 %v11911_v57, %v2187_v48 }
 0x21b   :  { %v2915_v8 = vadd.f32 %v9508_v36, %v2659_v30  ;;  %v2956_v36 = vadd.f32 %v9518_v45, %v2700_v11  ;;  %v2957_v55 = vadd.f32 %v9545_v7, %v2701_v43  ;;  %v74_v43 = vld [vmem:[%s11800_s7 + $0x10] sm:$0xff] }
 0x21c   :  { %v9572_v46 = vpop.xlane.xlu1 %3198  ;;  %v2402_v17 = vadd.f32 %v11909_v59, %v2146_v41  ;;  %v2442_v32 = vadd.f32 %v11913_v53, %v2186_v29  ;;  %v73_v29 = vld [vmem:[%s11800_s7 + $0x8] sm:$0xff]  ;;  %v9661_v53 = vpop.f32.mrf.mxu0 }
 0x21d   :  { %v3171_v42 = vadd.f32 %v3159_v38, %v2915_v8 }
 0x21e   :  { %v3326_v54 = vpop.xlane.xlu0 %3325  ;;  %v2658_v33 = vadd.f32 %v11912_v37, %v2402_v17  ;;  %v2698_v30 = vadd.f32 %v11916_v28, %v2442_v32 }
 0x21f   :  { %v3312_v45 = vadd.f32 %v9529_v40, %v3171_v42  ;;  %v75_v42 = vld [vmem:[%s11800_s7 + $0x18] sm:$0xff] }
 0x220   :  { %v3164_v2 = vpop.xlane.xlu1 %3163  ;;  %v2914_v34 = vadd.f32 %v11915_v12, %v2658_v33  ;;  %v2954_v10 = vadd.f32 %v11918_v52, %v2698_v30  ;;  %v77_v33 = vld [vmem:[%s11801_s8 + $0x8] sm:$0xff] }
 0x221   :  { %v3172_v20 = vadd.f32 %v3164_v2, %v2916_v4  ;;  %v11914_v4 = vld [vmem:[#allocation27_spill] sm:$0xff]  ;;  %v9625_v26 = vmul.f32 0.00015943877, %v3312_v45 }
 0x222   :  { %v3204_v9 = vpop.xlane.xlu0 %3203  ;;  %v2699_v31 = vadd.f32 %v11914_v4, %v2443_v56  ;;  %v11917_v2 = vld [vmem:[#allocation31_spill] sm:$0xff]  ;;  %v78_v56 = vld [vmem:[%s11801_s8 + $0x10] sm:$0xff]  ;;  %v9665_v4 = vpop.f32.mrf.mxu0 }
 0x223   :  { %v3313_v22 = vadd.f32 %v9538_v62, %v3172_v20  ;;  %v3212_v16 = vadd.f32 %v3204_v9, %v2956_v36  ;;  %v3340_v50 = vmul.f32 %v9625_v26, %v9625_v26 }
 0x224   :  { %v3169_v27 = vpop.xlane.xlu1 %3168  ;;  %v2955_v39 = vadd.f32 %v11917_v2, %v2699_v31  ;;  %v9669_v45 = vpop.f32.mrf.mxu0 }
 0x225   :  { %v3173_v44 = vadd.f32 %v3169_v27, %v2917_v18  ;;  %v9609_v5 = vmul.f32 0.00015943877, %v3313_v22 }
 0x226   :  { %v3209_v62 = vpop.xlane.xlu0 %3208  ;;  %v3211_v15 = vadd.f32 %v9572_v46, %v2955_v39 }
 0x227   :  { %v3314_v38 = vadd.f32 %v9523_v61, %v3173_v44  ;;  %v3213_v35 = vadd.f32 %v3209_v62, %v2957_v55  ;;  %v3170_v61 = vadd.f32 %v9563_v3, %v2914_v34  ;;  %v3341_v40 = vmul.f32 %v9609_v5, %v9609_v5  ;;  %v79_v44 = vld [vmem:[%s11801_s8 + $0x18] sm:$0xff]  ;;  %v72_v62 = vld [vmem:[%s11800_s7] sm:$0xff] }
 0x228   :  { %v3324_v1 = vpop.xlane.xlu1 %3323 }
 0x229   :  { %v9616_v24 = vmul.f32 0.00015943877, %v3314_v38  ;;  %v3329_v7 = vadd.f32 %v3324_v1, %v3212_v16  ;;  %v3330_v14 = vadd.f32 %v3326_v54, %v3213_v35  ;;  %v76_v16 = vld [vmem:[%s11801_s8] sm:$0xff]  ;;  %v9659_v38 = vpop.f32.mrf.mxu1  ;;  %v3532_v1 = vpop.f32.mrf.mxu0 }
 0x22a   :  { %v3194_v19 = vpop.xlane.xlu0 %3193 }
 0x22b   :  { %v3342_v49 = vmul.f32 %v9616_v24, %v9616_v24  ;;  %v3337_v13 = vmul.f32 0.00015943877, %v3329_v7  ;;  %v3338_v20 = vmul.f32 0.00015943877, %v3330_v14  ;;  %v3210_v9 = vadd.f32 %v3194_v19, %v2954_v10  ;;  %v9663_v32 = vpop.f32.mrf.mxu1  ;;  %v3536_v34 = vpop.f32.mrf.mxu0 }
 0x22c   :  { %v3304_v6 = vpop.xlane.xlu1 %3303 }
 0x22d   :  { %v3345_v58 = vsub.f32 %v3337_v13, %v3341_v40  ;;  %v3311_v54 = vadd.f32 %v3304_v6, %v3170_v61  ;;  %v3346_v47 = vsub.f32 %v3338_v20, %v3342_v49  ;;  %v9667_v31 = vpop.f32.mrf.mxu1  ;;  %v3538_v28 = vpop.f32.mrf.mxu0 }
 0x22e   :  { %v3322_v8 = vpop.xlane.xlu0 %3321 }
 0x22f   :  { %v3349_v3 = vadd.f32 1e-05, %v3345_v58  ;;  %v3328_v63 = vadd.f32 %v3322_v8, %v3211_v15  ;;  %v3350_v41 = vadd.f32 1e-05, %v3346_v47  ;;  %v9631_v23 = vmul.f32 0.00015943877, %v3311_v54  ;;  %v3443_v35 = vpop.f32.mrf.mxu1  ;;  %v3542_v2 = vpop.f32.mrf.mxu0 }
 0x230   :  { %v3320_v11 = vpop.xlane.xlu1 %3319  ;;  %v3561_v49 = vsub.f32 %v3542_v2, %v9616_v24 }
 0x231   :  { %8344 = vrsqrt.f32 %v3349_v3  ;;  %v3336_v18 = vmul.f32 0.00015943877, %v3328_v63  ;;  %v3327_v22 = vadd.f32 %v3320_v11, %v3210_v9  ;;  %v3339_v51 = vmul.f32 %v9631_v23, %v9631_v23  ;;  %v3447_v12 = vpop.f32.mrf.mxu1  ;;  %v3544_v14 = vpop.f32.mrf.mxu0 }
 0x232   :  { %8346 = vrsqrt.f32 %v3350_v41  ;;  %v3562_v13 = vsub.f32 %v3544_v14, %v9616_v24  ;;  %v3555_v11 = vsub.f32 %v3447_v12, %v9609_v5 }
 0x233   :  { %v3344_v60 = vsub.f32 %v3336_v18, %v3340_v50  ;;  %v3335_v46 = vmul.f32 0.00015943877, %v3327_v22  ;;  %v3449_v7 = vpop.f32.mrf.mxu1  ;;  %v3557_v22 = vsub.f32 %v3536_v34, %v9609_v5 }
 0x235   :  { %v3348_v0 = vadd.f32 1e-05, %v3344_v60  ;;  %v3343_v48 = vsub.f32 %v3335_v46, %v3339_v51  ;;  %v3453_v30 = vpop.f32.mrf.mxu1  ;;  %v3556_v60 = vsub.f32 %v3449_v7, %v9609_v5  ;;  %v3558_v46 = vsub.f32 %v3538_v28, %v9609_v5 }
 0x236   :  { %v3559_v61 = vsub.f32 %v3453_v30, %v9616_v24 }
 0x237   :  { %8348 = vrsqrt.f32 %v3348_v0  ;;  %v3347_v21 = vadd.f32 1e-05, %v3343_v48  ;;  %v3455_v39 = vpop.f32.mrf.mxu1 }
 0x238   :  { %v3560_v40 = vsub.f32 %v3455_v39, %v9616_v24 }
 0x239   :  { %8350 = vrsqrt.f32 %v3347_v21 }
 0x23e   :  { %v8345_v27 = vpop.eup %8344 }
 0x23f   :  { %v8347_v59 = vpop.eup %8346  ;;  %v3565_v17 = vmul.f32 %v8345_v27, %v74_v43 }
 0x240   :  { %v3566_v36 = vmul.f32 %v8347_v59, %v75_v42 }
 0x241   :  { %3579 = vperm.xlu1 %8311, %v3565_v17  }
 0x242   :  { %3584 = vperm.xlu0 %8310, %v3566_v36  }
 0x244   :  { %v8349_v25 = vpop.eup %8348 }
 0x245   :  { %3620 = vperm.xlu1 %8311, %v79_v44   ;;  %v3564_v57 = vmul.f32 %v8349_v25, %v73_v29 }
 0x246   :  { %v8351_v55 = vpop.eup %8350 }
 0x247   :  { %v3563_v37 = vmul.f32 %v8351_v55, %v72_v62  ;;  %v3553_v55 = vsub.f32 %v9669_v45, %v9625_v26  ;;  %v3552_v62 = vsub.f32 %v3443_v35, %v9625_v26  ;;  %v3548_v45 = vsub.f32 %v9663_v32, %v9631_v23 }
 0x248   :  { %v3550_v35 = vsub.f32 %v9665_v4, %v9631_v23  ;;  %v3549_v4 = vsub.f32 %v9661_v53, %v9631_v23 }
 0x249   :  { %3574 = vperm.xlu1 %8311, %v3564_v57   ;;  %v3551_v57 = vsub.f32 %v9667_v31, %v9625_v26 }
 0x24d   :  { %3615 = vperm.xlu1 %8311, %v78_v56  }
 0x251   :  { %3569 = vperm.xlu1 %8311, %v3563_v37   ;;  %v3554_v37 = vsub.f32 %v3532_v1, %v9625_v26  ;;  %v3547_v1 = vsub.f32 %v9659_v38, %v9631_v23 }
 0x255   :  { %3610 = vperm.xlu1 %8311, %v77_v33  }
 0x259   :  { %3605 = vperm.xlu1 %8311, %v76_v16  }
 0x2bc   :  { %v9671_v19 = vpop.permute.xlu1 %3579 }
 0x2bd   :  { %v9677_v20 = vpop.permute.xlu0 %3584  ;;  %v3596_v0 = vmul.f32 %v9671_v19, %v3556_v60  ;;  %v3598_v51 = vmul.f32 %v9671_v19, %v3558_v46  ;;  %v3595_v48 = vmul.f32 %v9671_v19, %v3555_v11  ;;  %v3597_v21 = vmul.f32 %v9671_v19, %v3557_v22  ;;  %v9761_v60 = vld [vmem:[%s11802_s5 + $0x8] sm:$0xff]  ;;  %v9776_v46 = vld [vmem:[%s11802_s5 + $0x10] sm:$0xff] }
 0x2be   :  { %v3600_v6 = vmul.f32 %v9677_v20, %v3560_v40  ;;  %v3602_v52 = vmul.f32 %v9677_v20, %v3562_v13  ;;  %v3599_v10 = vmul.f32 %v9677_v20, %v3559_v61  ;;  %v3601_v15 = vmul.f32 %v9677_v20, %v3561_v49 }
 0x2bf   :  { %v11919_v22 = vmov 0.0  }
 0x2c0   :  { %v9683_v58 = vpop.permute.xlu1 %3620 }
 0x2c1   :  { %v3636_v54 = vadd.f32 %v9683_v58, %v3600_v6  ;;  %v3638_v47 = vadd.f32 %v9683_v58, %v3602_v52  ;;  %v3635_v8 = vadd.f32 %v9683_v58, %v3599_v10  ;;  %v3637_v3 = vadd.f32 %v9683_v58, %v3601_v15 }
 0x2c3   :  { %v3652_v9 = vmax.f32 %v3636_v54, 0.0  ;;  %v3654_v63 = vmax.f32 %v3638_v47, 0.0  ;;  %v3651_v41 = vmax.f32 %v3635_v8, 0.0  ;;  %v3653_v50 = vmax.f32 %v3637_v3, 0.0  ;;  %v4034_v54 = vld [vmem:[%s11799_s1 + $0x10] sm:$0x77] }
 0x2c4   :  { %v9690_v18 = vpop.permute.xlu1 %3574  ;;  %v4035_v47 = vld [vmem:[%s11799_s1 + $0x18] sm:$0x77] }
 0x2c5   :  { %3704 = vmatprep.subr.mxu1 %v3652_v9  ;;  %3817 = vmatprep.subr.mxu0 %v3654_v63  ;;  %v3592_v33 = vmul.f32 %v9690_v18, %v3552_v62  ;;  %v3594_v16 = vmul.f32 %v9690_v18, %v3554_v37  ;;  %v3591_v12 = vmul.f32 %v9690_v18, %v3551_v57 }
 0x2c6   :  { %3705 = vmatpush1.msra.mxu1 %v3651_v41  ;;  %3818 = vmatpush1.msra.mxu0 %v3653_v50  ;;  %v3593_v31 = vmul.f32 %v9690_v18, %v3553_v55  ;;  %v9750_v41 = vld [vmem:[%s11802_s5] sm:$0xff]  ;;  %v4038_v50 = vcombine.high %v4034_v54, %v4034_v54  ;;  %v4039_v11 = vcombine.high %v4035_v47, %v4035_v47 }
 0x2c8   :  { %v9699_v43 = vpop.permute.xlu1 %3615 }
 0x2c9   :  { %v3632_v42 = vadd.f32 %v9699_v43, %v3596_v0  ;;  %v3634_v27 = vadd.f32 %v9699_v43, %v3598_v51  ;;  %v3631_v59 = vadd.f32 %v9699_v43, %v3595_v48  ;;  %v3633_v17 = vadd.f32 %v9699_v43, %v3597_v21  ;;  %v9787_v0 = vld [vmem:[%s11802_s5 + $0x18] sm:$0xff]  ;;  %v9798_v51 = vld [vmem:[%s11802_s5 + $0x20] sm:$0xff]  ;;  %v9809_v48 = vld [vmem:[%s11802_s5 + $0x28] sm:$0xff] }
 0x2ca   :  { %v9820_v21 = vld [vmem:[%s11802_s5 + $0x30] sm:$0xff] }
 0x2cb   :  { %v3648_v36 = vmax.f32 %v3632_v42, 0.0  ;;  %v3650_v44 = vmax.f32 %v3634_v27, 0.0  ;;  %v3647_v25 = vmax.f32 %v3631_v59, 0.0  ;;  %v3649_v29 = vmax.f32 %v3633_v17, 0.0  ;;  %v9831_v42 = vld [vmem:[%s11802_s5 + $0x38] sm:$0xff]  ;;  %v9842_v27 = vld [vmem:[%s11798_s4] sm:$0xff] }
 0x2cc   :  { %v9707_v56 = vpop.permute.xlu1 %3569  ;;  %v9853_v59 = vld [vmem:[%s11798_s4 + $0x8] sm:$0xff]  ;;  %v9864_v17 = vld [vmem:[%s11798_s4 + $0x10] sm:$0xff] }
 0x2cd   :  { %3706 = vmatprep.subr.mxu1 %v3648_v36  ;;  %3819 = vmatprep.subr.mxu0 %v3650_v44  ;;  %v3588_v39 = vmul.f32 %v9707_v56, %v3548_v45  ;;  %v3590_v14 = vmul.f32 %v9707_v56, %v3550_v35  ;;  %v3587_v32 = vmul.f32 %v9707_v56, %v3547_v1  ;;  %v9875_v36 = vld [vmem:[%s11798_s4 + $0x18] sm:$0xff] }
 0x2ce   :  { %3707 = vmatpush1.msra.mxu1 %v3647_v25  ;;  %3820 = vmatpush1.msra.mxu0 %v3649_v29  ;;  %v3589_v6 = vmul.f32 %v9707_v56, %v3549_v4 }
 0x2d0   :  { %v9717_v34 = vpop.permute.xlu1 %3610 }
 0x2d1   :  { %v3628_v7 = vadd.f32 %v9717_v34, %v3592_v33  ;;  %v3630_v28 = vadd.f32 %v9717_v34, %v3594_v16  ;;  %v3627_v30 = vadd.f32 %v9717_v34, %v3591_v12  ;;  %v3629_v2 = vadd.f32 %v9717_v34, %v3593_v31 }
 0x2d3   :  { %v3644_v61 = vmax.f32 %v3628_v7, 0.0  ;;  %v3646_v49 = vmax.f32 %v3630_v28, 0.0  ;;  %v3643_v38 = vmax.f32 %v3627_v30, 0.0  ;;  %v3645_v40 = vmax.f32 %v3629_v2, 0.0 }
 0x2d4   :  { %v9734_v13 = vpop.permute.xlu1 %3605 }
 0x2d5   :  { %3708 = vmatprep.subr.mxu1 %v3644_v61  ;;  %3821 = vmatprep.subr.mxu0 %v3646_v49  ;;  %v3624_v52 = vadd.f32 %v9734_v13, %v3588_v39  ;;  %v3626_v10 = vadd.f32 %v9734_v13, %v3590_v14  ;;  %v3623_v15 = vadd.f32 %v9734_v13, %v3587_v32 }
 0x2d6   :  { %3709 = vmatpush1.msra.mxu1 %v3643_v38  ;;  %3822 = vmatpush1.msra.mxu0 %v3645_v40  ;;  %v3625_v53 = vadd.f32 %v9734_v13, %v3589_v6 }
 0x2d7   :  { %v3640_v8 = vmax.f32 %v3624_v52, 0.0  ;;  %v3642_v3 = vmax.f32 %v3626_v10, 0.0  ;;  %v3639_v9 = vmax.f32 %v3623_v15, 0.0 }
 0x2d8   :  { %v3641_v63 = vmax.f32 %v3625_v53, 0.0 }
 0x2d9   :  { %3710 = vmatprep.subr.mxu1 %v3640_v8  ;;  %3823 = vmatprep.subr.mxu0 %v3642_v3 }
 0x2da   :  { %3711 = vmatpush1.msra.mxu1 %v3639_v9  ;;  %3824 = vmatpush1.msra.mxu0 %v3641_v63 }
 0x2db   :  { %8007 = vmatmul.mubr.msk.f32.vlgmr.msra.gmra.mxu1 %vm3655_vm2, %v9750_v41  ;;  %8015 = vmatmul.mubr.msk.f32.vlgmr.msra.gmra.mxu0 %vm3655_vm2, %v9750_v41 }
 0x2dc   :  { %3750 = vmatprep.mubr.f32.mxu1 %v11919_v22  ;;  %3863 = vmatprep.mubr.f32.mxu0 %v11919_v22 }
 0x2dd   :  { %8023 = vmatprep.subr.msk.mxu1 %vm147_vm0, %v4038_v50  ;;  %8029 = vmatprep.subr.msk.mxu0 %vm147_vm0, %v4039_v11 }
 0x2de   :  { %8024 = vmatpush1.msk.msra.mxu1 %vm147_vm0, %v4034_v54  ;;  %8030 = vmatpush1.msk.msra.mxu0 %vm147_vm0, %v4035_v47 }
 0x2df   :  { %8008 = vmatmul.mubr.msk.f32.gmra.mxu1 %vm3655_vm2, %v9761_v60  ;;  %8016 = vmatmul.mubr.msk.f32.gmra.mxu0 %vm3655_vm2, %v9761_v60 }
 0x2e0   :  { %3756 = vmatprep.mubr.f32.mxu1 %v11919_v22  ;;  %3869 = vmatprep.mubr.f32.mxu0 %v11919_v22 }
 0x2e3   :  { %8009 = vmatmul.mubr.msk.f32.gmra.mxu1 %vm3655_vm2, %v9776_v46  ;;  %8017 = vmatmul.mubr.msk.f32.gmra.mxu0 %vm3655_vm2, %v9776_v46 }
 0x2e4   :  { %3762 = vmatprep.mubr.f32.mxu1 %v11919_v22  ;;  %3875 = vmatprep.mubr.f32.mxu0 %v11919_v22 }
 0x2e7   :  { %8010 = vmatmul.mubr.msk.f32.gmra.mxu1 %vm3655_vm2, %v9787_v0  ;;  %8018 = vmatmul.mubr.msk.f32.gmra.mxu0 %vm3655_vm2, %v9787_v0 }
 0x2e8   :  { %3768 = vmatprep.mubr.f32.mxu1 %v11919_v22  ;;  %3881 = vmatprep.mubr.f32.mxu0 %v11919_v22 }
 0x2eb   :  { %8011 = vmatmul.mubr.msk.f32.gmra.mxu1 %vm3655_vm2, %v9798_v51  ;;  %8019 = vmatmul.mubr.msk.f32.gmra.mxu0 %vm3655_vm2, %v9798_v51 }
 0x2ec   :  { %3774 = vmatprep.mubr.f32.mxu1 %v11919_v22  ;;  %3887 = vmatprep.mubr.f32.mxu0 %v11919_v22 }
 0x2ef   :  { %8012 = vmatmul.mubr.msk.f32.gmra.mxu1 %vm3655_vm2, %v9809_v48  ;;  %8020 = vmatmul.mubr.msk.f32.gmra.mxu0 %vm3655_vm2, %v9809_v48 }
 0x2f0   :  { %3780 = vmatprep.mubr.f32.mxu1 %v11919_v22  ;;  %3893 = vmatprep.mubr.f32.mxu0 %v11919_v22 }
 0x2f3   :  { %8013 = vmatmul.mubr.msk.f32.gmra.mxu1 %vm3655_vm2, %v9820_v21  ;;  %8021 = vmatmul.mubr.msk.f32.gmra.mxu0 %vm3655_vm2, %v9820_v21 }
 0x2f4   :  { %3786 = vmatprep.mubr.f32.mxu1 %v11919_v22  ;;  %3899 = vmatprep.mubr.f32.mxu0 %v11919_v22 }
 0x2f7   :  { %8014 = vmatmul.mubr.msk.f32.gmra.mxu1 %vm3655_vm2, %v9831_v42  ;;  %8022 = vmatmul.mubr.msk.f32.gmra.mxu0 %vm3655_vm2, %v9831_v42 }
 0x2f8   :  { %4112 = vmatprep.mubr.f32.mxu1 %v11919_v22  ;;  %4201 = vmatprep.mubr.f32.mxu0 %v11919_v22 }
 0x2fb   :  { %8025 = vmatmul.mubr.msk.f32.vlgmr.msra.gmra.mxu1 %vm134_vm1, %v9842_v27  ;;  %8031 = vmatmul.mubr.msk.f32.vlgmr.msra.gmra.mxu0 %vm134_vm1, %v9842_v27 }
 0x2fc   :  { %4118 = vmatprep.mubr.f32.mxu1 %v11919_v22  ;;  %4207 = vmatprep.mubr.f32.mxu0 %v11919_v22 }
 0x2ff   :  { %8026 = vmatmul.mubr.msk.f32.gmra.mxu1 %vm134_vm1, %v9853_v59  ;;  %8032 = vmatmul.mubr.msk.f32.gmra.mxu0 %vm134_vm1, %v9853_v59 }
 0x300   :  { %4124 = vmatprep.mubr.f32.mxu1 %v11919_v22  ;;  %4213 = vmatprep.mubr.f32.mxu0 %v11919_v22 }
 0x303   :  { %8027 = vmatmul.mubr.msk.f32.gmra.mxu1 %vm134_vm1, %v9864_v17  ;;  %8033 = vmatmul.mubr.msk.f32.gmra.mxu0 %vm134_vm1, %v9864_v17 }
 0x304   :  { %4130 = vmatprep.mubr.f32.mxu1 %v11919_v22  ;;  %4219 = vmatprep.mubr.f32.mxu0 %v11919_v22 }
 0x307   :  { %8028 = vmatmul.mubr.msk.f32.gmra.mxu1 %vm134_vm1, %v9875_v36  ;;  %8034 = vmatmul.mubr.msk.f32.gmra.mxu0 %vm134_vm1, %v9875_v36 }
 0x308   :  { %4354 = vmatprep.mubr.f32.mxu1 %v11919_v22  ;;  %4467 = vmatprep.mubr.f32.mxu0 %v11919_v22 }
 0x39b   :  { %v3746_v44 = vpop.f32.mrf.mxu1  ;;  %v3859_v25 = vpop.f32.mrf.mxu0 }
 0x39c   :  { %v3954_v55 = vmul.f32 %v3746_v44, %v3746_v44  ;;  %v3956_v33 = vmul.f32 %v3859_v25, %v3859_v25 }
 0x39d   :  { %v3748_v29 = vpop.f32.mrf.mxu1  ;;  %v3861_v57 = vpop.f32.mrf.mxu0 }
 0x39e   :  { %v3906_v62 = vadd.f32 %v3748_v29, %v3746_v44  ;;  %v3955_v37 = vmul.f32 %v3748_v29, %v3748_v29  ;;  %v3957_v35 = vmul.f32 %v3861_v57, %v3861_v57 }
 0x39f   :  { %v3752_v16 = vpop.f32.mrf.mxu1  ;;  %v3865_v12 = vpop.f32.mrf.mxu0 }
 0x3a0   :  { %v3986_v31 = vadd.f32 %v3955_v37, %v3954_v55  ;;  %v3907_v45 = vadd.f32 %v3906_v62, %v3859_v25  ;;  %v3958_v30 = vmul.f32 %v3752_v16, %v3752_v16  ;;  %v3960_v14 = vmul.f32 %v3865_v12, %v3865_v12 }
 0x3a1   :  { %v3754_v1 = vpop.f32.mrf.mxu1  ;;  %v3867_v7 = vpop.f32.mrf.mxu0 }
 0x3a2   :  { %v3908_v28 = vadd.f32 %v3907_v45, %v3861_v57  ;;  %v3911_v2 = vadd.f32 %v3754_v1, %v3752_v16  ;;  %v3959_v39 = vmul.f32 %v3754_v1, %v3754_v1  ;;  %v3987_v61 = vadd.f32 %v3986_v31, %v3956_v33 }
 0x3a3   :  { %v3758_v32 = vpop.f32.mrf.mxu1  ;;  %v3871_v4 = vpop.f32.mrf.mxu0  ;;  %v3961_v40 = vmul.f32 %v3867_v7, %v3867_v7 }
 0x3a4   :  { %v3991_v49 = vadd.f32 %v3959_v39, %v3958_v30  ;;  %3909 = vadd.xlane.f32.xlu0 %v3908_v28  ;;  %v3912_v38 = vadd.f32 %v3911_v2, %v3865_v12  ;;  %v3962_v10 = vmul.f32 %v3758_v32, %v3758_v32  ;;  %v3988_v54 = vadd.f32 %v3987_v61, %v3957_v35 }
 0x3a5   :  { %v3760_v6 = vpop.f32.mrf.mxu1  ;;  %v3873_v52 = vpop.f32.mrf.mxu0  ;;  %v3964_v47 = vmul.f32 %v3871_v4, %v3871_v4 }
 0x3a6   :  { %v3916_v15 = vadd.f32 %v3760_v6, %v3758_v32  ;;  %v3963_v53 = vmul.f32 %v3760_v6, %v3760_v6  ;;  %v3992_v9 = vadd.f32 %v3991_v49, %v3960_v14  ;;  %v3965_v11 = vmul.f32 %v3873_v52, %v3873_v52 }
 0x3a7   :  { %v3764_v8 = vpop.f32.mrf.mxu1  ;;  %v3877_v3 = vpop.f32.mrf.mxu0  ;;  %v3913_v57 = vadd.f32 %v3912_v38, %v3867_v7 }
 0x3a8   :  { %v3996_v63 = vadd.f32 %v3963_v53, %v3962_v10  ;;  %3989 = vadd.xlane.f32.xlu0 %v3988_v54  ;;  %v3917_v50 = vadd.f32 %v3916_v15, %v3871_v4  ;;  %v3993_v29 = vadd.f32 %v3992_v9, %v3961_v40  ;;  %v3966_v55 = vmul.f32 %v3764_v8, %v3764_v8 }
 0x3a9   :  { %v3766_v44 = vpop.f32.mrf.mxu1  ;;  %v3879_v25 = vpop.f32.mrf.mxu0  ;;  %v3968_v33 = vmul.f32 %v3877_v3, %v3877_v3 }
 0x3aa   :  { %v3921_v62 = vadd.f32 %v3766_v44, %v3764_v8  ;;  %v3967_v37 = vmul.f32 %v3766_v44, %v3766_v44  ;;  %3994 = vadd.xlane.f32.xlu1 %v3993_v29  ;;  %v3997_v31 = vadd.f32 %v3996_v63, %v3964_v47  ;;  %v3918_v35 = vadd.f32 %v3917_v50, %v3873_v52 }
 0x3ab   :  { %v3770_v16 = vpop.f32.mrf.mxu1  ;;  %v3883_v12 = vpop.f32.mrf.mxu0  ;;  %v3969_v1 = vmul.f32 %v3879_v25, %v3879_v25 }
 0x3ac   :  { %v4001_v45 = vadd.f32 %v3967_v37, %v3966_v55  ;;  %3914 = vadd.xlane.f32.xlu0 %v3913_v57  ;;  %v3998_v2 = vadd.f32 %v3997_v31, %v3965_v11  ;;  %v3922_v39 = vadd.f32 %v3921_v62, %v3877_v3  ;;  %v3970_v14 = vmul.f32 %v3770_v16, %v3770_v16 }
 0x3ad   :  { %v3772_v28 = vpop.f32.mrf.mxu1  ;;  %v3885_v30 = vpop.f32.mrf.mxu0  ;;  %v3972_v7 = vmul.f32 %v3883_v12, %v3883_v12 }
 0x3ae   :  { %v3926_v32 = vadd.f32 %v3772_v28, %v3770_v16  ;;  %v3971_v4 = vmul.f32 %v3772_v28, %v3772_v28  ;;  %3999 = vadd.xlane.f32.xlu1 %v3998_v2  ;;  %v4002_v38 = vadd.f32 %v4001_v45, %v3968_v33  ;;  %v3973_v6 = vmul.f32 %v3885_v30, %v3885_v30 }
 0x3af   :  { %v3776_v61 = vpop.f32.mrf.mxu1  ;;  %v3889_v49 = vpop.f32.mrf.mxu0  ;;  %v3923_v52 = vadd.f32 %v3922_v39, %v3879_v25 }
 0x3b0   :  { %v4006_v40 = vadd.f32 %v3971_v4, %v3970_v14  ;;  %3919 = vadd.xlane.f32.xlu0 %v3918_v35  ;;  %v4003_v53 = vadd.f32 %v4002_v38, %v3969_v1  ;;  %v3927_v54 = vadd.f32 %v3926_v32, %v3883_v12  ;;  %v3974_v9 = vmul.f32 %v3776_v61, %v3776_v61 }
 0x3b1   :  { %v3778_v10 = vpop.f32.mrf.mxu1  ;;  %v3891_v15 = vpop.f32.mrf.mxu0  ;;  %v3976_v11 = vmul.f32 %v3889_v49, %v3889_v49 }
 0x3b2   :  { %v3931_v47 = vadd.f32 %v3778_v10, %v3776_v61  ;;  %v3975_v8 = vmul.f32 %v3778_v10, %v3778_v10  ;;  %4004 = vadd.xlane.f32.xlu1 %v4003_v53  ;;  %v4007_v50 = vadd.f32 %v4006_v40, %v3972_v7  ;;  %v3928_v37 = vadd.f32 %v3927_v54, %v3885_v30 }
 0x3b3   :  { %v3782_v3 = vpop.f32.mrf.mxu1  ;;  %v3895_v63 = vpop.f32.mrf.mxu0  ;;  %v3977_v2 = vmul.f32 %v3891_v15, %v3891_v15 }
 0x3b4   :  { %3924 = vadd.xlane.f32.xlu0 %v3923_v52  ;;  %v4011_v44 = vadd.f32 %v3975_v8, %v3974_v9  ;;  %v3932_v29 = vadd.f32 %v3931_v47, %v3889_v49  ;;  %v4008_v62 = vadd.f32 %v4007_v50, %v3973_v6  ;;  %v3978_v33 = vmul.f32 %v3782_v3, %v3782_v3 }
 0x3b5   :  { %v3784_v57 = vpop.f32.mrf.mxu1  ;;  %v3897_v55 = vpop.f32.mrf.mxu0  ;;  %v3980_v25 = vmul.f32 %v3895_v63, %v3895_v63 }
 0x3b6   :  { %v3936_v16 = vadd.f32 %v3784_v57, %v3782_v3  ;;  %v3979_v31 = vmul.f32 %v3784_v57, %v3784_v57  ;;  %4009 = vadd.xlane.f32.xlu1 %v4008_v62  ;;  %v3933_v28 = vadd.f32 %v3932_v29, %v3891_v15  ;;  %v4012_v32 = vadd.f32 %v4011_v44, %v3976_v11 }
 0x3b7   :  { %v3788_v12 = vpop.f32.mrf.mxu1  ;;  %v3901_v45 = vpop.f32.mrf.mxu0  ;;  %v3981_v7 = vmul.f32 %v3897_v55, %v3897_v55 }
 0x3b8   :  { %v4016_v35 = vadd.f32 %v3979_v31, %v3978_v33  ;;  %v3937_v1 = vadd.f32 %v3936_v16, %v3895_v63  ;;  %3929 = vadd.xlane.f32.xlu0 %v3928_v37  ;;  %v3982_v30 = vmul.f32 %v3788_v12, %v3788_v12  ;;  %v3984_v10 = vmul.f32 %v3901_v45, %v3901_v45 }
 0x3b9   :  { %v3790_v39 = vpop.f32.mrf.mxu1  ;;  %v3903_v14 = vpop.f32.mrf.mxu0  ;;  %v4013_v15 = vadd.f32 %v4012_v32, %v3977_v2 }
 0x3ba   :  { %v3938_v4 = vadd.f32 %v3937_v1, %v3897_v55  ;;  %v3941_v61 = vadd.f32 %v3790_v39, %v3788_v12  ;;  %v3983_v49 = vmul.f32 %v3790_v39, %v3790_v39  ;;  %3934 = vadd.xlane.f32.xlu1 %v3933_v28  ;;  %v4017_v6 = vadd.f32 %v4016_v35, %v3980_v25 }
 0x3bb   :  { %v4114_v38 = vpop.f32.mrf.mxu1  ;;  %v9883_v40 = vpop.f32.mrf.mxu0  ;;  %v3985_v50 = vmul.f32 %v3903_v14, %v3903_v14 }
 0x3bc   :  { %3939 = vadd.xlane.f32.xlu0 %v3938_v4  ;;  %v4021_v53 = vadd.f32 %v3983_v49, %v3982_v30  ;;  %v3942_v52 = vadd.f32 %v3941_v61, %v3901_v45  ;;  %v4018_v8 = vadd.f32 %v4017_v6, %v3981_v7  ;;  %v4226_v57 = vsub.f32 %v4114_v38, %v9631_v23 }
 0x3bd   :  { %v4116_v54 = vpop.f32.mrf.mxu1  ;;  %v4205_v47 = vpop.f32.mrf.mxu0  ;;  %v4228_v12 = vsub.f32 %v9883_v40, %v9631_v23 }
 0x3be   :  { %4014 = vadd.xlane.f32.xlu1 %v4013_v15  ;;  %v3943_v63 = vadd.f32 %v3942_v52, %v3903_v14  ;;  %v4022_v29 = vadd.f32 %v4021_v53, %v3984_v10  ;;  %v4242_v25 = vmul.f32 %v4226_v57, %v9707_v56  ;;  %v4227_v2 = vsub.f32 %v4116_v54, %v9631_v23 }
 0x3bf   :  { %v4120_v9 = vpop.f32.mrf.mxu1  ;;  %v4209_v3 = vpop.f32.mrf.mxu0  ;;  %v4229_v4 = vsub.f32 %v4205_v47, %v9631_v23 }
 0x3c0   :  { %4019 = vadd.xlane.f32.xlu0 %v4018_v8  ;;  %v4023_v16 = vadd.f32 %v4022_v29, %v3985_v50  ;;  %v4230_v7 = vsub.f32 %v4120_v9, %v9625_v26  ;;  %v4232_v40 = vsub.f32 %v4209_v3, %v9625_v26  ;;  %v4243_v8 = vmul.f32 %v4227_v2, %v9707_v56 }
 0x3c1   :  { %v4122_v11 = vpop.f32.mrf.mxu1  ;;  %v4211_v44 = vpop.f32.mrf.mxu0 }
 0x3c2   :  { %3944 = vadd.xlane.f32.xlu1 %v3943_v63  ;;  %v4231_v39 = vsub.f32 %v4122_v11, %v9625_v26  ;;  %v4233_v61 = vsub.f32 %v4211_v44, %v9625_v26  ;;  %v4246_v50 = vmul.f32 %v4230_v7, %v9690_v18  ;;  %v4248_v57 = vmul.f32 %v4232_v40, %v9690_v18 }
 0x3c3   :  { %v4126_v55 = vpop.f32.mrf.mxu1  ;;  %v4215_v62 = vpop.f32.mrf.mxu0 }
 0x3c4   :  { %v4234_v45 = vsub.f32 %v4126_v55, %v9609_v5  ;;  %v4236_v14 = vsub.f32 %v4215_v62, %v9609_v5  ;;  %v4247_v9 = vmul.f32 %v4231_v39, %v9690_v18  ;;  %v4249_v11 = vmul.f32 %v4233_v61, %v9690_v18 }
 0x3c5   :  { %v4128_v37 = vpop.f32.mrf.mxu1  ;;  %v4217_v33 = vpop.f32.mrf.mxu0  ;;  %v4262_v39 = vadd.f32 %v4246_v50, %v9717_v34 }
 0x3c6   :  { %v4235_v31 = vsub.f32 %v4128_v37, %v9609_v5  ;;  %v4237_v35 = vsub.f32 %v4217_v33, %v9609_v5  ;;  %4024 = vadd.xlane.f32.xlu1 %v4023_v16  ;;  %v4250_v52 = vmul.f32 %v4234_v45, %v9671_v19  ;;  %v4252_v3 = vmul.f32 %v4236_v14, %v9671_v19 }
 0x3c7   :  { %v4132_v1 = vpop.f32.mrf.mxu1  ;;  %v4221_v28 = vpop.f32.mrf.mxu0  ;;  %v4245_v33 = vmul.f32 %v4229_v4, %v9707_v56  ;;  %v4263_v2 = vadd.f32 %v4247_v9, %v9717_v34  ;;  %v4265_v7 = vadd.f32 %v4249_v11, %v9717_v34  ;;  %v4264_v4 = vadd.f32 %v4248_v57, %v9717_v34  ;;  %v4645_v9 = vld [vmem:[%s11799_s1 + $0x28] sm:$0x77] }
 0x3c8   :  { %v4238_v32 = vsub.f32 %v4132_v1, %v9616_v24  ;;  %v4240_v49 = vsub.f32 %v4221_v28, %v9616_v24  ;;  %v4251_v6 = vmul.f32 %v4235_v31, %v9671_v19  ;;  %v4253_v54 = vmul.f32 %v4237_v35, %v9671_v19 }
 0x3c9   :  { %v4134_v30 = vpop.f32.mrf.mxu1  ;;  %v4223_v38 = vpop.f32.mrf.mxu0  ;;  %v4266_v16 = vadd.f32 %v4250_v52, %v9699_v43  ;;  %v4244_v35 = vmul.f32 %v4228_v12, %v9707_v56  ;;  %v4268_v1 = vadd.f32 %v4252_v3, %v9699_v43  ;;  %v4258_v12 = vadd.f32 %v4242_v25, %v9734_v13  ;;  %v4644_v25 = vld [vmem:[%s11799_s1 + $0x20] sm:$0x77] }
 0x3ca   :  { %v4254_v10 = vmul.f32 %v4238_v32, %v9677_v20  ;;  %v4239_v53 = vsub.f32 %v4134_v30, %v9616_v24  ;;  %v4256_v47 = vmul.f32 %v4240_v49, %v9677_v20  ;;  %v4241_v15 = vsub.f32 %v4223_v38, %v9616_v24 }
 0x3cb   :  { %v4267_v37 = vadd.f32 %v4251_v6, %v9699_v43  ;;  %v4269_v45 = vadd.f32 %v4253_v54, %v9699_v43  ;;  %v4259_v30 = vadd.f32 %v4243_v8, %v9734_v13  ;;  %v4282_v38 = vmax.f32 %v4266_v16, 0.0 }
 0x3cc   :  { %v4255_v63 = vmul.f32 %v4239_v53, %v9677_v20  ;;  %v4270_v44 = vadd.f32 %v4254_v10, %v9683_v58  ;;  %v4257_v29 = vmul.f32 %v4241_v15, %v9677_v20  ;;  %v4272_v55 = vadd.f32 %v4256_v47, %v9683_v58 }
 0x3cd   :  { %v4283_v49 = vmax.f32 %v4267_v37, 0.0  ;;  %v4285_v40 = vmax.f32 %v4269_v45, 0.0  ;;  %v4261_v6 = vadd.f32 %v4245_v33, %v9734_v13  ;;  %v4260_v10 = vadd.f32 %v4244_v35, %v9734_v13 }
 0x3ce   :  { %v4271_v62 = vadd.f32 %v4255_v63, %v9683_v58  ;;  %v4273_v31 = vadd.f32 %v4257_v29, %v9683_v58  ;;  %v4286_v14 = vmax.f32 %v4270_v44, 0.0  ;;  %v4288_v61 = vmax.f32 %v4272_v55, 0.0 }
 0x3cf   :  { %v4284_v53 = vmax.f32 %v4268_v1, 0.0  ;;  %v4279_v52 = vmax.f32 %v4263_v2, 0.0  ;;  %v4278_v54 = vmax.f32 %v4262_v39, 0.0  ;;  %v4281_v47 = vmax.f32 %v4265_v7, 0.0 }
 0x3d0   :  { %v4287_v28 = vmax.f32 %v4271_v62, 0.0  ;;  %v4289_v32 = vmax.f32 %v4273_v31, 0.0  ;;  %v4280_v15 = vmax.f32 %v4264_v4, 0.0  ;;  %v4275_v8 = vmax.f32 %v4259_v30, 0.0 }
 0x3d1   :  { %v4274_v3 = vmax.f32 %v4258_v12, 0.0  ;;  %v4277_v63 = vmax.f32 %v4261_v6, 0.0  ;;  %v4276_v50 = vmax.f32 %v4260_v10, 0.0  ;;  %v4648_v11 = vcombine.high %v4644_v25, %v4644_v25 }
 0x3d2   :  { %4314 = vmatprep.subr.mxu1 %v4287_v28  ;;  %4427 = vmatprep.subr.mxu0 %v4289_v32  ;;  %v4649_v44 = vcombine.high %v4645_v9, %v4645_v9 }
 0x3d3   :  { %4315 = vmatpush1.msra.mxu1 %v4286_v14  ;;  %4428 = vmatpush1.msra.mxu0 %v4288_v61 }
 0x3d4   :  { %4316 = vmatprep.subr.mxu1 %v4283_v49  ;;  %4429 = vmatprep.subr.mxu0 %v4285_v40 }
 0x3d5   :  { %4317 = vmatpush1.msra.mxu1 %v4282_v38  ;;  %4430 = vmatpush1.msra.mxu0 %v4284_v53 }
 0x3d6   :  { %4318 = vmatprep.subr.mxu1 %v4279_v52  ;;  %4431 = vmatprep.subr.mxu0 %v4281_v47 }
 0x3d7   :  { %4319 = vmatpush1.msra.mxu1 %v4278_v54  ;;  %4432 = vmatpush1.msra.mxu0 %v4280_v15 }
 0x3d8   :  { %4320 = vmatprep.subr.mxu1 %v4275_v8  ;;  %4433 = vmatprep.subr.mxu0 %v4277_v63 }
 0x3d9   :  { %4321 = vmatpush1.msra.mxu1 %v4274_v3  ;;  %4434 = vmatpush1.msra.mxu0 %v4276_v50 }
 0x3da   :  { %8035 = vmatmul.mubr.msk.f32.vlgmr.msra.gmra.mxu1 %vm3655_vm2, %v9750_v41  ;;  %8043 = vmatmul.mubr.msk.f32.vlgmr.msra.gmra.mxu0 %vm3655_vm2, %v9750_v41 }
 0x3db   :  { %4360 = vmatprep.mubr.f32.mxu1 %v11919_v22  ;;  %4473 = vmatprep.mubr.f32.mxu0 %v11919_v22 }
 0x3dc   :  { %8051 = vmatprep.subr.msk.mxu1 %vm147_vm0, %v4648_v11  ;;  %8057 = vmatprep.subr.msk.mxu0 %vm147_vm0, %v4649_v44 }
 0x3dd   :  { %8052 = vmatpush1.msk.msra.mxu1 %vm147_vm0, %v4644_v25  ;;  %8058 = vmatpush1.msk.msra.mxu0 %vm147_vm0, %v4645_v9 }
 0x3de   :  { %8036 = vmatmul.mubr.msk.f32.gmra.mxu1 %vm3655_vm2, %v9761_v60  ;;  %8044 = vmatmul.mubr.msk.f32.gmra.mxu0 %vm3655_vm2, %v9761_v60 }
 0x3df   :  { %4366 = vmatprep.mubr.f32.mxu1 %v11919_v22  ;;  %4479 = vmatprep.mubr.f32.mxu0 %v11919_v22 }
 0x3e2   :  { %8037 = vmatmul.mubr.msk.f32.gmra.mxu1 %vm3655_vm2, %v9776_v46  ;;  %8045 = vmatmul.mubr.msk.f32.gmra.mxu0 %vm3655_vm2, %v9776_v46 }
 0x3e3   :  { %4372 = vmatprep.mubr.f32.mxu1 %v11919_v22  ;;  %4485 = vmatprep.mubr.f32.mxu0 %v11919_v22 }
 0x3e6   :  { %8038 = vmatmul.mubr.msk.f32.gmra.mxu1 %vm3655_vm2, %v9787_v0  ;;  %8046 = vmatmul.mubr.msk.f32.gmra.mxu0 %vm3655_vm2, %v9787_v0 }
 0x3e7   :  { %4378 = vmatprep.mubr.f32.mxu1 %v11919_v22  ;;  %4491 = vmatprep.mubr.f32.mxu0 %v11919_v22 }
 0x3ea   :  { %8039 = vmatmul.mubr.msk.f32.gmra.mxu1 %vm3655_vm2, %v9798_v51  ;;  %8047 = vmatmul.mubr.msk.f32.gmra.mxu0 %vm3655_vm2, %v9798_v51 }
 0x3eb   :  { %4384 = vmatprep.mubr.f32.mxu1 %v11919_v22  ;;  %4497 = vmatprep.mubr.f32.mxu0 %v11919_v22 }
 0x3ee   :  { %8040 = vmatmul.mubr.msk.f32.gmra.mxu1 %vm3655_vm2, %v9809_v48  ;;  %8048 = vmatmul.mubr.msk.f32.gmra.mxu0 %vm3655_vm2, %v9809_v48 }
 0x3ef   :  { %4390 = vmatprep.mubr.f32.mxu1 %v11919_v22  ;;  %4503 = vmatprep.mubr.f32.mxu0 %v11919_v22 }
 0x3f2   :  { %8041 = vmatmul.mubr.msk.f32.gmra.mxu1 %vm3655_vm2, %v9820_v21  ;;  %8049 = vmatmul.mubr.msk.f32.gmra.mxu0 %vm3655_vm2, %v9820_v21 }
 0x3f3   :  { %4396 = vmatprep.mubr.f32.mxu1 %v11919_v22  ;;  %4509 = vmatprep.mubr.f32.mxu0 %v11919_v22 }
 0x3f6   :  { %8042 = vmatmul.mubr.msk.f32.gmra.mxu1 %vm3655_vm2, %v9831_v42  ;;  %8050 = vmatmul.mubr.msk.f32.gmra.mxu0 %vm3655_vm2, %v9831_v42 }
 0x3f7   :  { %4722 = vmatprep.mubr.f32.mxu1 %v11919_v22  ;;  %4811 = vmatprep.mubr.f32.mxu0 %v11919_v22 }
 0x3fa   :  { %8053 = vmatmul.mubr.msk.f32.vlgmr.msra.gmra.mxu1 %vm134_vm1, %v9842_v27  ;;  %8059 = vmatmul.mubr.msk.f32.vlgmr.msra.gmra.mxu0 %vm134_vm1, %v9842_v27 }
 0x3fb   :  { %4728 = vmatprep.mubr.f32.mxu1 %v11919_v22  ;;  %4817 = vmatprep.mubr.f32.mxu0 %v11919_v22 }
 0x3fe   :  { %8054 = vmatmul.mubr.msk.f32.gmra.mxu1 %vm134_vm1, %v9853_v59  ;;  %8060 = vmatmul.mubr.msk.f32.gmra.mxu0 %vm134_vm1, %v9853_v59 }
 0x3ff   :  { %4734 = vmatprep.mubr.f32.mxu1 %v11919_v22  ;;  %4823 = vmatprep.mubr.f32.mxu0 %v11919_v22 }
 0x402   :  { %8055 = vmatmul.mubr.msk.f32.gmra.mxu1 %vm134_vm1, %v9864_v17  ;;  %8061 = vmatmul.mubr.msk.f32.gmra.mxu0 %vm134_vm1, %v9864_v17 }
 0x403   :  { %4740 = vmatprep.mubr.f32.mxu1 %v11919_v22  ;;  %4829 = vmatprep.mubr.f32.mxu0 %v11919_v22 }
 0x406   :  { %8056 = vmatmul.mubr.msk.f32.gmra.mxu1 %vm134_vm1, %v9875_v36  ;;  %8062 = vmatmul.mubr.msk.f32.gmra.mxu0 %vm134_vm1, %v9875_v36 }
 0x407   :  { %4964 = vmatprep.mubr.f32.mxu1 %v11919_v22  ;;  %5077 = vmatprep.mubr.f32.mxu0 %v11919_v22 }
 0x49a   :  { %v4356_v41 = vpop.f32.mrf.mxu1  ;;  %v4469_v60 = vpop.f32.mrf.mxu0 }
 0x49b   :  { %v4564_v0 = vmul.f32 %v4356_v41, %v4356_v41  ;;  %v4566_v51 = vmul.f32 %v4469_v60, %v4469_v60 }
 0x49c   :  { %v4358_v46 = vpop.f32.mrf.mxu1  ;;  %v4471_v42 = vpop.f32.mrf.mxu0 }
 0x49d   :  { %v4516_v48 = vadd.f32 %v4358_v46, %v4356_v41  ;;  %v4565_v21 = vmul.f32 %v4358_v46, %v4358_v46  ;;  %v4567_v29 = vmul.f32 %v4471_v42, %v4471_v42 }
 0x49e   :  { %v4362_v27 = vpop.f32.mrf.mxu1  ;;  %v4475_v57 = vpop.f32.mrf.mxu0 }
 0x49f   :  { %v4596_v59 = vadd.f32 %v4565_v21, %v4564_v0  ;;  %v4517_v17 = vadd.f32 %v4516_v48, %v4469_v60  ;;  %v4568_v55 = vmul.f32 %v4362_v27, %v4362_v27  ;;  %v4570_v62 = vmul.f32 %v4475_v57, %v4475_v57 }
 0x4a0   :  { %v4364_v36 = vpop.f32.mrf.mxu1  ;;  %v4477_v31 = vpop.f32.mrf.mxu0 }
 0x4a1   :  { %v4518_v37 = vadd.f32 %v4517_v17, %v4471_v42  ;;  %v4521_v33 = vadd.f32 %v4364_v36, %v4362_v27  ;;  %v4569_v16 = vmul.f32 %v4364_v36, %v4364_v36  ;;  %v4597_v45 = vadd.f32 %v4596_v59, %v4566_v51 }
 0x4a2   :  { %v4368_v35 = vpop.f32.mrf.mxu1  ;;  %v4571_v2 = vmul.f32 %v4477_v31, %v4477_v31  ;;  %v4481_v39 = vpop.f32.mrf.mxu0 }
 0x4a3   :  { %v4601_v1 = vadd.f32 %v4569_v16, %v4568_v55  ;;  %v4522_v28 = vadd.f32 %v4521_v33, %v4475_v57  ;;  %4519 = vadd.xlane.f32.xlu0 %v4518_v37  ;;  %v4598_v14 = vadd.f32 %v4597_v45, %v4567_v29  ;;  %v4572_v32 = vmul.f32 %v4368_v35, %v4368_v35 }
 0x4a4   :  { %v4574_v7 = vmul.f32 %v4481_v39, %v4481_v39  ;;  %v4370_v4 = vpop.f32.mrf.mxu1  ;;  %v4483_v12 = vpop.f32.mrf.mxu0 }
 0x4a5   :  { %v4523_v61 = vadd.f32 %v4522_v28, %v4477_v31  ;;  %v4526_v49 = vadd.f32 %v4370_v4, %v4368_v35  ;;  %v4573_v30 = vmul.f32 %v4370_v4, %v4370_v4  ;;  %4599 = vadd.xlane.f32.xlu1 %v4598_v14  ;;  %v4602_v38 = vadd.f32 %v4601_v1, %v4570_v62 }
 0x4a6   :  { %v4374_v40 = vpop.f32.mrf.mxu1  ;;  %v4575_v53 = vmul.f32 %v4483_v12, %v4483_v12  ;;  %v4487_v52 = vpop.f32.mrf.mxu0 }
 0x4a7   :  { %v4606_v6 = vadd.f32 %v4573_v30, %v4572_v32  ;;  %v4527_v10 = vadd.f32 %v4526_v49, %v4481_v39  ;;  %4524 = vadd.xlane.f32.xlu0 %v4523_v61  ;;  %v4603_v54 = vadd.f32 %v4602_v38, %v4571_v2  ;;  %v4576_v47 = vmul.f32 %v4374_v40, %v4374_v40 }
 0x4a8   :  { %v4578_v25 = vmul.f32 %v4487_v52, %v4487_v52  ;;  %v4376_v15 = vpop.f32.mrf.mxu1  ;;  %v4489_v63 = vpop.f32.mrf.mxu0 }
 0x4a9   :  { %v4528_v8 = vadd.f32 %v4527_v10, %v4483_v12  ;;  %v4531_v9 = vadd.f32 %v4376_v15, %v4374_v40  ;;  %v4577_v3 = vmul.f32 %v4376_v15, %v4376_v15  ;;  %4604 = vadd.xlane.f32.xlu1 %v4603_v54  ;;  %v4607_v50 = vadd.f32 %v4606_v6, %v4574_v7 }
 0x4aa   :  { %v4380_v11 = vpop.f32.mrf.mxu1  ;;  %v4579_v60 = vmul.f32 %v4489_v63, %v4489_v63  ;;  %v4493_v46 = vpop.f32.mrf.mxu0 }
 0x4ab   :  { %v4611_v44 = vadd.f32 %v4577_v3, %v4576_v47  ;;  %v4532_v41 = vadd.f32 %v4531_v9, %v4487_v52  ;;  %4529 = vadd.xlane.f32.xlu0 %v4528_v8  ;;  %v4608_v0 = vadd.f32 %v4607_v50, %v4575_v53  ;;  %v4580_v51 = vmul.f32 %v4380_v11, %v4380_v11 }
 0x4ac   :  { %v4582_v48 = vmul.f32 %v4493_v46, %v4493_v46  ;;  %v4382_v21 = vpop.f32.mrf.mxu1  ;;  %v4495_v17 = vpop.f32.mrf.mxu0 }
 0x4ad   :  { %v4533_v42 = vadd.f32 %v4532_v41, %v4489_v63  ;;  %v4536_v27 = vadd.f32 %v4382_v21, %v4380_v11  ;;  %v4581_v59 = vmul.f32 %v4382_v21, %v4382_v21  ;;  %4609 = vadd.xlane.f32.xlu1 %v4608_v0  ;;  %v4612_v29 = vadd.f32 %v4611_v44, %v4578_v25 }
 0x4ae   :  { %v4386_v57 = vpop.f32.mrf.mxu1  ;;  %v4583_v36 = vmul.f32 %v4495_v17, %v4495_v17  ;;  %v4499_v37 = vpop.f32.mrf.mxu0 }
 0x4af   :  { %v4616_v55 = vadd.f32 %v4581_v59, %v4580_v51  ;;  %v4537_v62 = vadd.f32 %v4536_v27, %v4493_v46  ;;  %4534 = vadd.xlane.f32.xlu0 %v4533_v42  ;;  %v4613_v33 = vadd.f32 %v4612_v29, %v4579_v60  ;;  %v4584_v16 = vmul.f32 %v4386_v57, %v4386_v57 }
 0x4b0   :  { %v4388_v31 = vpop.f32.mrf.mxu1  ;;  %v4501_v28 = vpop.f32.mrf.mxu0  ;;  %v4586_v14 = vmul.f32 %v4499_v37, %v4499_v37 }
 0x4b1   :  { %v4538_v45 = vadd.f32 %v4537_v62, %v4495_v17  ;;  %v4541_v35 = vadd.f32 %v4388_v31, %v4386_v57  ;;  %v4585_v1 = vmul.f32 %v4388_v31, %v4388_v31  ;;  %4614 = vadd.xlane.f32.xlu1 %v4613_v33  ;;  %v4617_v2 = vadd.f32 %v4616_v55, %v4582_v48 }
 0x4b2   :  { %v4392_v39 = vpop.f32.mrf.mxu1  ;;  %v4505_v4 = vpop.f32.mrf.mxu0  ;;  %v4587_v10 = vmul.f32 %v4501_v28, %v4501_v28 }
 0x4b3   :  { %v4621_v32 = vadd.f32 %v4585_v1, %v4584_v16  ;;  %v4542_v7 = vadd.f32 %v4541_v35, %v4499_v37  ;;  %4539 = vadd.xlane.f32.xlu0 %v4538_v45  ;;  %v4618_v61 = vadd.f32 %v4617_v2, %v4583_v36  ;;  %v4588_v30 = vmul.f32 %v4392_v39, %v4392_v39 }
 0x4b4   :  { %v4394_v49 = vpop.f32.mrf.mxu1  ;;  %v4590_v12 = vmul.f32 %v4505_v4, %v4505_v4  ;;  %v4507_v6 = vpop.f32.mrf.mxu0 }
 0x4b5   :  { %v4546_v38 = vadd.f32 %v4394_v49, %v4392_v39  ;;  %v4589_v40 = vmul.f32 %v4394_v49, %v4394_v49  ;;  %4619 = vadd.xlane.f32.xlu1 %v4618_v61  ;;  %v4543_v52 = vadd.f32 %v4542_v7, %v4501_v28  ;;  %v4622_v15 = vadd.f32 %v4621_v32, %v4586_v14 }
 0x4b6   :  { %v4398_v53 = vpop.f32.mrf.mxu1  ;;  %v4511_v25 = vpop.f32.mrf.mxu0  ;;  %v4591_v8 = vmul.f32 %v4507_v6, %v4507_v6 }
 0x4b7   :  { %v4626_v54 = vadd.f32 %v4589_v40, %v4588_v30  ;;  %v4547_v47 = vadd.f32 %v4546_v38, %v4505_v4  ;;  %v4592_v9 = vmul.f32 %v4398_v53, %v4398_v53  ;;  %v4594_v3 = vmul.f32 %v4511_v25, %v4511_v25 }
 0x4b8   :  { %v4400_v63 = vpop.f32.mrf.mxu1  ;;  %v4513_v41 = vpop.f32.mrf.mxu0  ;;  %v4623_v21 = vadd.f32 %v4622_v15, %v4587_v10 }
 0x4b9   :  { %v4548_v50 = vadd.f32 %v4547_v47, %v4507_v6  ;;  %v4551_v11 = vadd.f32 %v4400_v63, %v4398_v53  ;;  %v4593_v44 = vmul.f32 %v4400_v63, %v4400_v63  ;;  %4544 = vadd.xlane.f32.xlu1 %v4543_v52  ;;  %v4627_v60 = vadd.f32 %v4626_v54, %v4590_v12 }
 0x4ba   :  { %v4724_v46 = vpop.f32.mrf.mxu1  ;;  %v4595_v51 = vmul.f32 %v4513_v41, %v4513_v41  ;;  %v10016_v48 = vpop.f32.mrf.mxu0 }
 0x4bb   :  { %v4631_v0 = vadd.f32 %v4593_v44, %v4592_v9  ;;  %4549 = vadd.xlane.f32.xlu0 %v4548_v50  ;;  %v4552_v27 = vadd.f32 %v4551_v11, %v4511_v25  ;;  %v4628_v17 = vadd.f32 %v4627_v60, %v4591_v8  ;;  %v4836_v16 = vsub.f32 %v4724_v46, %v9631_v23 }
 0x4bc   :  { %v4726_v42 = vpop.f32.mrf.mxu1  ;;  %v4815_v59 = vpop.f32.mrf.mxu0  ;;  %v4838_v39 = vsub.f32 %v10016_v48, %v9631_v23 }
 0x4bd   :  { %4624 = vadd.xlane.f32.xlu1 %v4623_v21  ;;  %v4632_v29 = vadd.f32 %v4631_v0, %v4594_v3  ;;  %v4553_v37 = vadd.f32 %v4552_v27, %v4513_v41  ;;  %v4852_v2 = vmul.f32 %v4836_v16, %v9707_v56  ;;  %v4837_v4 = vsub.f32 %v4726_v42, %v9631_v23 }
 0x4be   :  { %v4730_v57 = vpop.f32.mrf.mxu1  ;;  %v4819_v55 = vpop.f32.mrf.mxu0  ;;  %v4839_v38 = vsub.f32 %v4815_v59, %v9631_v23 }
 0x4bf   :  { %4629 = vadd.xlane.f32.xlu0 %v4628_v17  ;;  %v4633_v62 = vadd.f32 %v4632_v29, %v4595_v51  ;;  %v4840_v40 = vsub.f32 %v4730_v57, %v9625_v26  ;;  %v4842_v52 = vsub.f32 %v4819_v55, %v9625_v26  ;;  %v4853_v50 = vmul.f32 %v4837_v4, %v9707_v56 }
 0x4c0   :  { %v4732_v36 = vpop.f32.mrf.mxu1  ;;  %v4821_v33 = vpop.f32.mrf.mxu0  ;;  %v4855_v59 = vmul.f32 %v4839_v38, %v9707_v56  ;;  %v4854_v55 = vmul.f32 %v4838_v39, %v9707_v56  ;;  %v4868_v39 = vadd.f32 %v4852_v2, %v9734_v13 }
 0x4c1   :  { %4634 = vadd.xlane.f32.xlu1 %v4633_v62  ;;  %v4841_v61 = vsub.f32 %v4732_v36, %v9625_v26  ;;  %v4843_v6 = vsub.f32 %v4821_v33, %v9625_v26  ;;  %v4856_v60 = vmul.f32 %v4840_v40, %v9690_v18  ;;  %v4858_v48 = vmul.f32 %v4842_v52, %v9690_v18 }
 0x4c2   :  { %v4736_v31 = vpop.f32.mrf.mxu1  ;;  %v4825_v45 = vpop.f32.mrf.mxu0  ;;  %v4871_v4 = vadd.f32 %v4855_v59, %v9734_v13 }
 0x4c3   :  { %4554 = vadd.xlane.f32.xlu0 %v4553_v37  ;;  %v4844_v14 = vsub.f32 %v4736_v31, %v9609_v5  ;;  %v4846_v49 = vsub.f32 %v4825_v45, %v9609_v5  ;;  %v4857_v11 = vmul.f32 %v4841_v61, %v9690_v18  ;;  %v4859_v46 = vmul.f32 %v4843_v6, %v9690_v18 }
 0x4c4   :  { %v4738_v35 = vpop.f32.mrf.mxu1  ;;  %v4827_v28 = vpop.f32.mrf.mxu0  ;;  %v4872_v33 = vadd.f32 %v4856_v60, %v9717_v34  ;;  %v4870_v61 = vadd.f32 %v4854_v55, %v9734_v13  ;;  %v4884_v6 = vmax.f32 %v4868_v39, 0.0  ;;  %v10181_v60 = vld [vmem:[%s11798_s4 + $0x10] sm:$0xff] }
 0x4c5   :  { %v4845_v1 = vsub.f32 %v4738_v35, %v9609_v5  ;;  %v4847_v32 = vsub.f32 %v4827_v28, %v9609_v5  ;;  %v4860_v8 = vmul.f32 %v4844_v14, %v9671_v19  ;;  %v4862_v44 = vmul.f32 %v4846_v49, %v9671_v19 }
 0x4c6   :  { %v4742_v7 = vpop.f32.mrf.mxu1  ;;  %v4831_v12 = vpop.f32.mrf.mxu0  ;;  %v4873_v37 = vadd.f32 %v4857_v11, %v9717_v34  ;;  %v4875_v45 = vadd.f32 %v4859_v46, %v9717_v34  ;;  %v4874_v35 = vadd.f32 %v4858_v48, %v9717_v34  ;;  %v4869_v14 = vadd.f32 %v4853_v50, %v9734_v13  ;;  %v10145_v50 = vld [vmem:[%s11802_s5 + $0x30] sm:$0xff]  ;;  %v10156_v11 = vld [vmem:[%s11802_s5 + $0x38] sm:$0xff] }
 0x4c7   :  { %v4848_v30 = vsub.f32 %v4742_v7, %v9616_v24  ;;  %v4850_v10 = vsub.f32 %v4831_v12, %v9616_v24  ;;  %v4861_v54 = vmul.f32 %v4845_v1, %v9671_v19  ;;  %v4863_v9 = vmul.f32 %v4847_v32, %v9671_v19  ;;  %v10189_v46 = vld [vmem:[%s11798_s4 + $0x18] sm:$0xff] }
 0x4c8   :  { %v4744_v53 = vpop.f32.mrf.mxu1  ;;  %v4833_v15 = vpop.f32.mrf.mxu0  ;;  %v4876_v17 = vadd.f32 %v4860_v8, %v9699_v43  ;;  %v4878_v62 = vadd.f32 %v4862_v44, %v9699_v43  ;;  %v4888_v12 = vmax.f32 %v4872_v33, 0.0  ;;  %v4891_v38 = vmax.f32 %v4875_v45, 0.0  ;;  %v10101_v8 = vld [vmem:[%s11802_s5 + $0x10] sm:$0xff]  ;;  %v10163_v44 = vld [vmem:[%s11798_s4] sm:$0xff] }
 0x4c9   :  { %v4864_v47 = vmul.f32 %v4848_v30, %v9677_v20  ;;  %v4849_v25 = vsub.f32 %v4744_v53, %v9616_v24  ;;  %v4866_v3 = vmul.f32 %v4850_v10, %v9677_v20  ;;  %v4851_v63 = vsub.f32 %v4833_v15, %v9616_v24  ;;  %v5584_v53 = vld [vmem:[%s11803_s2] sm:$0x77]  ;;  %v10089_v15 = vld [vmem:[%s11802_s5 + $0x8] sm:$0xff] }
 0x4ca   :  { %v4877_v27 = vadd.f32 %v4861_v54, %v9699_v43  ;;  %v4879_v57 = vadd.f32 %v4863_v9, %v9699_v43  ;;  %v4892_v32 = vmax.f32 %v4876_v17, 0.0  ;;  %v4894_v49 = vmax.f32 %v4878_v62, 0.0  ;;  %v5254_v54 = vld [vmem:[%s11799_s1 + $0x30] sm:$0x7]  ;;  %v10112_v9 = vld [vmem:[%s11802_s5 + $0x18] sm:$0xff] }
 0x4cb   :  { %v4865_v41 = vmul.f32 %v4849_v25, %v9677_v20  ;;  %v4880_v0 = vadd.f32 %v4864_v47, %v9683_v58  ;;  %v4867_v51 = vmul.f32 %v4851_v63, %v9677_v20  ;;  %v4882_v21 = vadd.f32 %v4866_v3, %v9683_v58  ;;  %v10076_v47 = vld [vmem:[%s11802_s5] sm:$0xff]  ;;  %v10134_v63 = vld [vmem:[%s11802_s5 + $0x28] sm:$0xff] }
 0x4cc   :  { %v4893_v28 = vmax.f32 %v4877_v27, 0.0  ;;  %v4895_v7 = vmax.f32 %v4879_v57, 0.0  ;;  %v4889_v30 = vmax.f32 %v4873_v37, 0.0  ;;  %v4890_v40 = vmax.f32 %v4874_v35, 0.0  ;;  %v10123_v3 = vld [vmem:[%s11802_s5 + $0x20] sm:$0xff] }
 0x4cd   :  { %v4881_v42 = vadd.f32 %v4865_v41, %v9683_v58  ;;  %v4883_v29 = vadd.f32 %v4867_v51, %v9683_v58  ;;  %v4896_v16 = vmax.f32 %v4880_v0, 0.0  ;;  %v4898_v1 = vmax.f32 %v4882_v21, 0.0  ;;  %v10174_v41 = vld [vmem:[%s11798_s4 + $0x8] sm:$0xff] }
 0x4ce   :  { %v4885_v2 = vmax.f32 %v4869_v14, 0.0  ;;  %v4887_v10 = vmax.f32 %v4871_v4, 0.0  ;;  %v4886_v52 = vmax.f32 %v4870_v61, 0.0  ;;  %v5588_v25 = vcombine.high %v5584_v53, %v5584_v53 }
 0x4cf   :  { %v4897_v36 = vmax.f32 %v4881_v42, 0.0  ;;  %v4899_v31 = vmax.f32 %v4883_v29, 0.0 }
 0x4d1   :  { %4924 = vmatprep.subr.mxu1 %v4897_v36  ;;  %5037 = vmatprep.subr.mxu0 %v4899_v31 }
 0x4d2   :  { %4925 = vmatpush1.msra.mxu1 %v4896_v16  ;;  %5038 = vmatpush1.msra.mxu0 %v4898_v1 }
 0x4d3   :  { %4926 = vmatprep.subr.mxu1 %v4893_v28  ;;  %5039 = vmatprep.subr.mxu0 %v4895_v7 }
 0x4d4   :  { %4927 = vmatpush1.msra.mxu1 %v4892_v32  ;;  %5040 = vmatpush1.msra.mxu0 %v4894_v49 }
 0x4d5   :  { %4928 = vmatprep.subr.mxu1 %v4889_v30  ;;  %5041 = vmatprep.subr.mxu0 %v4891_v38 }
 0x4d6   :  { %4929 = vmatpush1.msra.mxu1 %v4888_v12  ;;  %5042 = vmatpush1.msra.mxu0 %v4890_v40 }
 0x4d7   :  { %4930 = vmatprep.subr.mxu1 %v4885_v2  ;;  %5043 = vmatprep.subr.mxu0 %v4887_v10 }
 0x4d8   :  { %4931 = vmatpush1.msra.mxu1 %v4884_v6  ;;  %5044 = vmatpush1.msra.mxu0 %v4886_v52 }
 0x4d9   :  { %8063 = vmatmul.mubr.msk.f32.vlgmr.msra.gmra.mxu1 %vm3655_vm2, %v10076_v47  ;;  %8071 = vmatmul.mubr.msk.f32.vlgmr.msra.gmra.mxu0 %vm3655_vm2, %v10076_v47 }
 0x4da   :  { %4970 = vmatprep.mubr.f32.mxu1 %v11919_v22  ;;  %5083 = vmatprep.mubr.f32.mxu0 %v11919_v22 }
 0x4db   :  { %8278 = vmatprep.subr.msk.mxu1 %vm147_vm0, %v5254_v54 }
 0x4dc   :  { %8279 = vmatpush3.msk.msra.mxu1 %vm147_vm0, %v5254_v54 }
 0x4dd   :  { %8064 = vmatmul.mubr.msk.f32.gmra.mxu1 %vm3655_vm2, %v10089_v15  ;;  %8092 = vmatprep.subr.msk.mxu1 %vm147_vm0, %v5588_v25 }
 0x4de   :  { %4976 = vmatprep.mubr.f32.mxu1 %v11919_v22  ;;  %8072 = vmatmul.mubr.msk.f32.gmra.mxu0 %vm3655_vm2, %v10089_v15 }
 0x4df   :  { %5089 = vmatprep.mubr.f32.mxu0 %v11919_v22 }
 0x4e1   :  { %8065 = vmatmul.mubr.msk.f32.gmra.mxu1 %vm3655_vm2, %v10101_v8 }
 0x4e2   :  { %4982 = vmatprep.mubr.f32.mxu1 %v11919_v22  ;;  %8073 = vmatmul.mubr.msk.f32.gmra.mxu0 %vm3655_vm2, %v10101_v8 }
 0x4e3   :  { %5095 = vmatprep.mubr.f32.mxu0 %v11919_v22 }
 0x4e5   :  { %8066 = vmatmul.mubr.msk.f32.gmra.mxu1 %vm3655_vm2, %v10112_v9 }
 0x4e6   :  { %4988 = vmatprep.mubr.f32.mxu1 %v11919_v22  ;;  %8074 = vmatmul.mubr.msk.f32.gmra.mxu0 %vm3655_vm2, %v10112_v9 }
 0x4e7   :  { %5101 = vmatprep.mubr.f32.mxu0 %v11919_v22 }
 0x4e9   :  { %8067 = vmatmul.mubr.msk.f32.gmra.mxu1 %vm3655_vm2, %v10123_v3 }
 0x4ea   :  { %4994 = vmatprep.mubr.f32.mxu1 %v11919_v22  ;;  %8075 = vmatmul.mubr.msk.f32.gmra.mxu0 %vm3655_vm2, %v10123_v3 }
 0x4eb   :  { %5107 = vmatprep.mubr.f32.mxu0 %v11919_v22 }
 0x4ed   :  { %8068 = vmatmul.mubr.msk.f32.gmra.mxu1 %vm3655_vm2, %v10134_v63 }
 0x4ee   :  { %5000 = vmatprep.mubr.f32.mxu1 %v11919_v22  ;;  %8076 = vmatmul.mubr.msk.f32.gmra.mxu0 %vm3655_vm2, %v10134_v63 }
 0x4ef   :  { %5113 = vmatprep.mubr.f32.mxu0 %v11919_v22 }
 0x4f1   :  { %8069 = vmatmul.mubr.msk.f32.gmra.mxu1 %vm3655_vm2, %v10145_v50 }
 0x4f2   :  { %5006 = vmatprep.mubr.f32.mxu1 %v11919_v22  ;;  %8077 = vmatmul.mubr.msk.f32.gmra.mxu0 %vm3655_vm2, %v10145_v50 }
 0x4f3   :  { %5119 = vmatprep.mubr.f32.mxu0 %v11919_v22 }
 0x4f5   :  { %8070 = vmatmul.mubr.msk.f32.gmra.mxu1 %vm3655_vm2, %v10156_v11 }
 0x4f6   :  { %8280 = vmatprep.mubr.msk.f32.mxu1 %vm134_vm1, %v10163_v44  ;;  %8078 = vmatmul.mubr.msk.f32.gmra.mxu0 %vm3655_vm2, %v10156_v11 }
 0x4f7   :  { %8294 = vmatprep.mubr.msk.f32.mxu0 %vm3655_vm2, %v10076_v47 }
 0x4f9   :  { %8281 = vmatmul.mubr.msk.f32.vlgmr.msra.gmra.mxu1 %vm134_vm1, %v10174_v41 }
 0x4fa   :  { %8283 = vmatprep.mubr.msk.f32.mxu1 %vm134_vm1, %v10181_v60  ;;  %8093 = vmatpush1.msk.msra.mxu1 %vm147_vm0, %v5584_v53 }
 0x4fd   :  { %8284 = vmatmul.mubr.msk.f32.gmra.mxu1 %vm134_vm1, %v10189_v46 }
 0x4fe   :  { %5662 = vmatprep.mubr.f32.mxu1 %v11919_v22 }
 0x501   :  { %8094 = vmatmul.mubr.msk.f32.vlgmr.msra.gmra.mxu1 %vm134_vm1, %v10163_v44 }
 0x502   :  { %5668 = vmatprep.mubr.f32.mxu1 %v11919_v22 }
 0x505   :  { %8095 = vmatmul.mubr.msk.f32.gmra.mxu1 %vm134_vm1, %v10174_v41 }
 0x506   :  { %5674 = vmatprep.mubr.f32.mxu1 %v11919_v22 }
 0x509   :  { %8096 = vmatmul.mubr.msk.f32.gmra.mxu1 %vm134_vm1, %v10181_v60 }
 0x50a   :  { %5680 = vmatprep.mubr.f32.mxu1 %v11919_v22 }
 0x50d   :  { %8097 = vmatmul.mubr.msk.f32.gmra.mxu1 %vm134_vm1, %v10189_v46 }
 0x50e   :  { %5904 = vmatprep.mubr.f32.mxu1 %v11919_v22 }
 0x599   :  { %v4966_v0 = vpop.f32.mrf.mxu1  ;;  %v5079_v51 = vpop.f32.mrf.mxu0 }
 0x59a   :  { %v5174_v21 = vmul.f32 %v4966_v0, %v4966_v0  ;;  %v5176_v59 = vmul.f32 %v5079_v51, %v5079_v51 }
 0x59b   :  { %v4968_v48 = vpop.f32.mrf.mxu1  ;;  %v5081_v17 = vpop.f32.mrf.mxu0 }
 0x59c   :  { %v5126_v42 = vadd.f32 %v4968_v48, %v4966_v0  ;;  %v5175_v27 = vmul.f32 %v4968_v48, %v4968_v48  ;;  %v5177_v62 = vmul.f32 %v5081_v17, %v5081_v17 }
 0x59d   :  { %v4972_v29 = vpop.f32.mrf.mxu1 }
 0x59e   :  { %v5206_v57 = vadd.f32 %v5175_v27, %v5174_v21  ;;  %v5127_v55 = vadd.f32 %v5126_v42, %v5079_v51  ;;  %v5085_v36 = vpop.f32.mrf.mxu0  ;;  %v5178_v37 = vmul.f32 %v4972_v29, %v4972_v29 }
 0x59f   :  { %v4974_v33 = vpop.f32.mrf.mxu1  ;;  %v5180_v16 = vmul.f32 %v5085_v36, %v5085_v36 }
 0x5a0   :  { %v5207_v31 = vadd.f32 %v5206_v57, %v5176_v59  ;;  %v5131_v45 = vadd.f32 %v4974_v33, %v4972_v29  ;;  %v5179_v35 = vmul.f32 %v4974_v33, %v4974_v33  ;;  %v5128_v1 = vadd.f32 %v5127_v55, %v5081_v17  ;;  %v5087_v28 = vpop.f32.mrf.mxu0 }
 0x5a1   :  { %v4978_v14 = vpop.f32.mrf.mxu1  ;;  %v5181_v4 = vmul.f32 %v5087_v28, %v5087_v28 }
 0x5a2   :  { %v5211_v39 = vadd.f32 %v5179_v35, %v5178_v37  ;;  %v10206_v32 = vadd.f32 %v5207_v31, %v5177_v62  ;;  %v5132_v7 = vadd.f32 %v5131_v45, %v5085_v36  ;;  %5129 = vadd.xlane.f32.xlu0 %v5128_v1  ;;  %v5091_v61 = vpop.f32.mrf.mxu0  ;;  %v5182_v49 = vmul.f32 %v4978_v14, %v4978_v14 }
 0x5a3   :  { %v4980_v30 = vpop.f32.mrf.mxu1  ;;  %v5184_v12 = vmul.f32 %v5091_v61, %v5091_v61 }
 0x5a4   :  { %v5212_v38 = vadd.f32 %v5211_v39, %v5180_v16  ;;  %v5136_v40 = vadd.f32 %v4980_v30, %v4978_v14  ;;  %v5183_v2 = vmul.f32 %v4980_v30, %v4980_v30  ;;  %v5133_v6 = vadd.f32 %v5132_v7, %v5087_v28  ;;  %v5093_v10 = vpop.f32.mrf.mxu0 }
 0x5a5   :  { %v4984_v53 = vpop.f32.mrf.mxu1  ;;  %v5185_v0 = vmul.f32 %v5093_v10, %v5093_v10 }
 0x5a6   :  { %v5216_v52 = vadd.f32 %v5183_v2, %v5182_v49  ;;  %v5213_v54 = vadd.f32 %v5212_v38, %v5181_v4  ;;  %v5137_v25 = vadd.f32 %v5136_v40, %v5091_v61  ;;  %5134 = vadd.xlane.f32.xlu0 %v5133_v6  ;;  %v5097_v51 = vpop.f32.mrf.mxu0  ;;  %v5186_v48 = vmul.f32 %v4984_v53, %v4984_v53 }
 0x5a7   :  { %v4986_v21 = vpop.f32.mrf.mxu1  ;;  %v5188_v42 = vmul.f32 %v5097_v51, %v5097_v51 }
 0x5a8   :  { %v5217_v27 = vadd.f32 %v5216_v52, %v5184_v12  ;;  %v5141_v59 = vadd.f32 %v4986_v21, %v4984_v53  ;;  %v5187_v17 = vmul.f32 %v4986_v21, %v4986_v21  ;;  %v5138_v29 = vadd.f32 %v5137_v25, %v5093_v10  ;;  %5214 = vadd.xlane.f32.xlu1 %v5213_v54  ;;  %v5099_v57 = vpop.f32.mrf.mxu0 }
 0x5a9   :  { %v4990_v55 = vpop.f32.mrf.mxu1  ;;  %v5189_v33 = vmul.f32 %v5099_v57, %v5099_v57 }
 0x5aa   :  { %v5221_v62 = vadd.f32 %v5187_v17, %v5186_v48  ;;  %v5218_v36 = vadd.f32 %v5217_v27, %v5185_v0  ;;  %v5142_v37 = vadd.f32 %v5141_v59, %v5097_v51  ;;  %5139 = vadd.xlane.f32.xlu0 %v5138_v29  ;;  %v5103_v16 = vpop.f32.mrf.mxu0  ;;  %v5190_v31 = vmul.f32 %v4990_v55, %v4990_v55 }
 0x5ab   :  { %v4992_v45 = vpop.f32.mrf.mxu1  ;;  %v5192_v35 = vmul.f32 %v5103_v16, %v5103_v16 }
 0x5ac   :  { %v5222_v1 = vadd.f32 %v5221_v62, %v5188_v42  ;;  %v5146_v28 = vadd.f32 %v4992_v45, %v4990_v55  ;;  %v5191_v14 = vmul.f32 %v4992_v45, %v4992_v45  ;;  %v5143_v39 = vadd.f32 %v5142_v37, %v5099_v57  ;;  %5219 = vadd.xlane.f32.xlu1 %v5218_v36  ;;  %v5105_v7 = vpop.f32.mrf.mxu0 }
 0x5ad   :  { %v4996_v4 = vpop.f32.mrf.mxu1  ;;  %v5193_v12 = vmul.f32 %v5105_v7, %v5105_v7 }
 0x5ae   :  { %v5226_v61 = vadd.f32 %v5191_v14, %v5190_v31  ;;  %v5223_v49 = vadd.f32 %v5222_v1, %v5189_v33  ;;  %v5147_v30 = vadd.f32 %v5146_v28, %v5103_v16  ;;  %5144 = vadd.xlane.f32.xlu0 %v5143_v39  ;;  %v5109_v38 = vpop.f32.mrf.mxu0  ;;  %v5194_v40 = vmul.f32 %v4996_v4, %v4996_v4 }
 0x5af   :  { %v4998_v2 = vpop.f32.mrf.mxu1  ;;  %v5196_v6 = vmul.f32 %v5109_v38, %v5109_v38 }
 0x5b0   :  { %v5227_v10 = vadd.f32 %v5226_v61, %v5192_v35  ;;  %v5151_v53 = vadd.f32 %v4998_v2, %v4996_v4  ;;  %v5195_v52 = vmul.f32 %v4998_v2, %v4998_v2  ;;  %v5148_v54 = vadd.f32 %v5147_v30, %v5105_v7  ;;  %5224 = vadd.xlane.f32.xlu1 %v5223_v49  ;;  %v5111_v25 = vpop.f32.mrf.mxu0 }
 0x5b1   :  { %v5002_v0 = vpop.f32.mrf.mxu1  ;;  %v5197_v42 = vmul.f32 %v5111_v25, %v5111_v25 }
 0x5b2   :  { %v5231_v51 = vadd.f32 %v5195_v52, %v5194_v40  ;;  %v5228_v48 = vadd.f32 %v5227_v10, %v5193_v12  ;;  %v5152_v21 = vadd.f32 %v5151_v53, %v5109_v38  ;;  %5149 = vadd.xlane.f32.xlu0 %v5148_v54  ;;  %v5115_v27 = vpop.f32.mrf.mxu0  ;;  %v5198_v59 = vmul.f32 %v5002_v0, %v5002_v0 }
 0x5b3   :  { %v5004_v17 = vpop.f32.mrf.mxu1  ;;  %v5200_v45 = vmul.f32 %v5115_v27, %v5115_v27 }
 0x5b4   :  { %v5232_v29 = vadd.f32 %v5231_v51, %v5196_v6  ;;  %v5156_v57 = vadd.f32 %v5004_v17, %v5002_v0  ;;  %v5199_v55 = vmul.f32 %v5004_v17, %v5004_v17  ;;  %v5153_v62 = vadd.f32 %v5152_v21, %v5111_v25  ;;  %5229 = vadd.xlane.f32.xlu1 %v5228_v48  ;;  %v5117_v36 = vpop.f32.mrf.mxu0 }
 0x5b5   :  { %v5008_v37 = vpop.f32.mrf.mxu1  ;;  %v5201_v4 = vmul.f32 %v5117_v36, %v5117_v36 }
 0x5b6   :  { %v5236_v33 = vadd.f32 %v5199_v55, %v5198_v59  ;;  %v5233_v16 = vadd.f32 %v5232_v29, %v5197_v42  ;;  %v5157_v31 = vadd.f32 %v5156_v57, %v5115_v27  ;;  %5154 = vadd.xlane.f32.xlu0 %v5153_v62  ;;  %v5121_v35 = vpop.f32.mrf.mxu0  ;;  %v5202_v28 = vmul.f32 %v5008_v37, %v5008_v37 }
 0x5b7   :  { %v5010_v1 = vpop.f32.mrf.mxu1  ;;  %v5204_v7 = vmul.f32 %v5121_v35, %v5121_v35 }
 0x5b8   :  { %v5161_v14 = vadd.f32 %v5010_v1, %v5008_v37  ;;  %v5203_v39 = vmul.f32 %v5010_v1, %v5010_v1  ;;  %5234 = vadd.xlane.f32.xlu1 %v5233_v16  ;;  %v5123_v49 = vpop.f32.mrf.mxu0  ;;  %v5237_v30 = vadd.f32 %v5236_v33, %v5200_v45  ;;  %v5158_v38 = vadd.f32 %v5157_v31, %v5117_v36  ;;  %v5585_v1 = vld [vmem:[%s11803_s2 + $0x8] sm:$0x77] }
 0x5b9   :  { %v8282_v61 = vpop.f32.mrf.mxu1  ;;  %v5205_v52 = vmul.f32 %v5123_v49, %v5123_v49 }
 0x5ba   :  { %v5241_v12 = vadd.f32 %v5203_v39, %v5202_v28  ;;  %v5162_v40 = vadd.f32 %v5161_v14, %v5121_v35  ;;  %v5344_v10 = vsub.f32 %v8282_v61, %v9625_v26  ;;  %v5238_v25 = vadd.f32 %v5237_v30, %v5201_v4 }
 0x5bb   :  { %v5324_v2 = vpop.f32.mrf.mxu1 }
 0x5bc   :  { %v5242_v6 = vadd.f32 %v5241_v12, %v5204_v7  ;;  %v5163_v53 = vadd.f32 %v5162_v40, %v5123_v49  ;;  %5159 = vadd.xlane.f32.xlu1 %v5158_v38  ;;  %v5343_v0 = vsub.f32 %v5324_v2, %v9631_v23  ;;  %v5348_v21 = vmul.f32 %v5344_v10, %v9690_v18 }
 0x5bd   :  { %v8285_v54 = vpop.f32.mrf.mxu1  ;;  %v5589_v7 = vcombine.high %v5585_v1, %v5585_v1 }
 0x5be   :  { %v5346_v51 = vsub.f32 %v8285_v54, %v9616_v24  ;;  %5164 = vadd.xlane.f32.xlu0 %v5163_v53  ;;  %v5243_v42 = vadd.f32 %v5242_v6, %v5205_v52  ;;  %v5347_v29 = vmul.f32 %v5343_v0, %v9707_v56  ;;  %v5352_v33 = vadd.f32 %v5348_v21, %v9717_v34 }
 0x5bf   :  { %v5334_v48 = vpop.f32.mrf.mxu1 }
 0x5c0   :  { %v5350_v27 = vmul.f32 %v5346_v51, %v9677_v20  ;;  %v5345_v59 = vsub.f32 %v5334_v48, %v9609_v5  ;;  %5239 = vadd.xlane.f32.xlu1 %v5238_v25  ;;  %v5351_v45 = vadd.f32 %v5347_v29, %v9734_v13  ;;  %v5356_v28 = vmax.f32 %v5352_v33, 0.0 }
 0x5c1   :  { %v5664_v17 = vpop.f32.mrf.mxu1 }
 0x5c2   :  { %v5349_v57 = vmul.f32 %v5345_v59, %v9671_v19  ;;  %5244 = vadd.xlane.f32.xlu0 %v5243_v42  ;;  %v5354_v55 = vadd.f32 %v5350_v27, %v9683_v58  ;;  %v5355_v39 = vmax.f32 %v5351_v45, 0.0  ;;  %v5776_v54 = vsub.f32 %v5664_v17, %v9631_v23 }
 0x5c3   :  { %v5666_v62 = vpop.f32.mrf.mxu1 }
 0x5c4   :  { %v5358_v36 = vmax.f32 %v5354_v55, 0.0  ;;  %v5353_v37 = vadd.f32 %v5349_v57, %v9699_v43  ;;  %v5777_v6 = vsub.f32 %v5666_v62, %v9631_v23  ;;  %v5792_v17 = vmul.f32 %v5776_v54, %v9707_v56 }
 0x5c5   :  { %v5670_v16 = vpop.f32.mrf.mxu1 }
 0x5c6   :  { %8286 = vmatprep.subr.mxu0 %v5358_v36  ;;  %v5357_v31 = vmax.f32 %v5353_v37, 0.0  ;;  %v5780_v40 = vsub.f32 %v5670_v16, %v9625_v26  ;;  %v5793_v42 = vmul.f32 %v5777_v6, %v9707_v56  ;;  %v5808_v16 = vadd.f32 %v5792_v17, %v9734_v13 }
 0x5c7   :  { %8287 = vmatpush3.msra.mxu0 %v5358_v36  ;;  %v5672_v35 = vpop.f32.mrf.mxu1 }
 0x5c8   :  { %8288 = vmatprep.subr.mxu0 %v5357_v31  ;;  %v5781_v12 = vsub.f32 %v5672_v35, %v9625_v26  ;;  %v5796_v48 = vmul.f32 %v5780_v40, %v9690_v18  ;;  %v5809_v33 = vadd.f32 %v5793_v42, %v9734_v13 }
 0x5c9   :  { %8289 = vmatpush3.msra.mxu0 %v5357_v31  ;;  %v5676_v14 = vpop.f32.mrf.mxu1 }
 0x5ca   :  { %8290 = vmatprep.subr.mxu0 %v5356_v28  ;;  %v5784_v49 = vsub.f32 %v5676_v14, %v9609_v5  ;;  %v5797_v0 = vmul.f32 %v5781_v12, %v9690_v18  ;;  %v5812_v62 = vadd.f32 %v5796_v48, %v9717_v34 }
 0x5cb   :  { %8291 = vmatpush3.msra.mxu0 %v5356_v28  ;;  %v5678_v4 = vpop.f32.mrf.mxu1  ;;  %v5824_v28 = vmax.f32 %v5808_v16, 0.0 }
 0x5cc   :  { %v5785_v61 = vsub.f32 %v5678_v4, %v9609_v5  ;;  %8292 = vmatprep.subr.mxu0 %v5355_v39  ;;  %v5800_v25 = vmul.f32 %v5784_v49, %v9671_v19  ;;  %v5813_v55 = vadd.f32 %v5797_v0, %v9717_v34  ;;  %v5828_v35 = vmax.f32 %v5812_v62, 0.0 }
 0x5cd   :  { %8293 = vmatpush3.msra.mxu0 %v5355_v39  ;;  %v5682_v30 = vpop.f32.mrf.mxu1 }
 0x5ce   :  { %v5788_v38 = vsub.f32 %v5682_v30, %v9616_v24  ;;  %8295 = vmatmul.mubr.msk.f32.vlgmr.msra.gmra.mxu0 %vm3655_vm2, %v10089_v15  ;;  %8098 = vmatprep.subr.msk.mxu0 %vm147_vm0, %v5589_v7  ;;  %v5801_v10 = vmul.f32 %v5785_v61, %v9671_v19  ;;  %v5816_v29 = vadd.f32 %v5800_v25, %v9699_v43  ;;  %v5829_v45 = vmax.f32 %v5813_v55, 0.0  ;;  %v10304_v61 = vpop.xlane.xlu0 %3909 }
 0x5cf   :  { %v5684_v2 = vpop.f32.mrf.mxu1  ;;  %8297 = vmatprep.mubr.msk.f32.mxu0 %vm3655_vm2, %v10101_v8  ;;  %8099 = vmatpush1.msk.msra.mxu0 %vm147_vm0, %v5585_v1  ;;  %v5825_v1 = vmax.f32 %v5809_v33, 0.0 }
 0x5d0   :  { %v5804_v53 = vmul.f32 %v5788_v38, %v9677_v20  ;;  %v5789_v52 = vsub.f32 %v5684_v2, %v9616_v24  ;;  %v5817_v59 = vadd.f32 %v5801_v10, %v9699_v43  ;;  %v5832_v31 = vmax.f32 %v5816_v29, 0.0  ;;  %v10308_v2 = vpop.xlane.xlu1 %3994 }
 0x5d2   :  { %v5805_v51 = vmul.f32 %v5789_v52, %v9677_v20  ;;  %8298 = vmatmul.mubr.msk.f32.gmra.mxu0 %vm3655_vm2, %v10112_v9  ;;  %v5820_v21 = vadd.f32 %v5804_v53, %v9683_v58  ;;  %v5833_v37 = vmax.f32 %v5817_v59, 0.0  ;;  %v10312_v52 = vpop.xlane.xlu0 %3989 }
 0x5d3   :  { %8300 = vmatprep.mubr.msk.f32.mxu0 %vm3655_vm2, %v10123_v3 }
 0x5d4   :  { %v5821_v27 = vadd.f32 %v5805_v51, %v9683_v58  ;;  %v5836_v36 = vmax.f32 %v5820_v21, 0.0  ;;  %v10315_v48 = vpop.xlane.xlu1 %3999 }
 0x5d6   :  { %8301 = vmatmul.mubr.msk.f32.gmra.mxu0 %vm3655_vm2, %v10134_v63  ;;  %v5837_v57 = vmax.f32 %v5821_v27, 0.0  ;;  %v10318_v59 = vpop.xlane.xlu0 %3914 }
 0x5d7   :  { %8303 = vmatprep.mubr.msk.f32.mxu0 %vm3655_vm2, %v10145_v50 }
 0x5d8   :  { %5864 = vmatprep.subr.mxu1 %v5837_v57 }
 0x5d9   :  { %5865 = vmatpush1.msra.mxu1 %v5836_v36  ;;  %v10322_v36 = vpop.xlane.xlu1 %4004 }
 0x5da   :  { %8304 = vmatmul.mubr.msk.f32.gmra.mxu0 %vm3655_vm2, %v10156_v11  ;;  %5866 = vmatprep.subr.mxu1 %v5833_v37 }
 0x5db   :  { %5867 = vmatpush1.msra.mxu1 %v5832_v31  ;;  %5751 = vmatprep.mubr.f32.mxu0 %v11919_v22  ;;  %v10325_v31 = vpop.xlane.xlu0 %3919 }
 0x5dc   :  { %5868 = vmatprep.subr.mxu1 %v5829_v45 }
 0x5dd   :  { %5869 = vmatpush1.msra.mxu1 %v5828_v35 }
 0x5de   :  { %8100 = vmatmul.mubr.msk.f32.vlgmr.msra.gmra.mxu0 %vm134_vm1, %v10163_v44  ;;  %5870 = vmatprep.subr.mxu1 %v5825_v1 }
 0x5df   :  { %5871 = vmatpush1.msra.mxu1 %v5824_v28  ;;  %5757 = vmatprep.mubr.f32.mxu0 %v11919_v22 }
 0x5e0   :  { %8104 = vmatmul.mubr.msk.f32.vlgmr.msra.gmra.mxu1 %vm3655_vm2, %v10076_v47 }
 0x5e1   :  { %5910 = vmatprep.mubr.f32.mxu1 %v11919_v22 }
 0x5e2   :  { %8101 = vmatmul.mubr.msk.f32.gmra.mxu0 %vm134_vm1, %v10174_v41 }
 0x5e3   :  { %5763 = vmatprep.mubr.f32.mxu0 %v11919_v22 }
 0x5e4   :  { %8105 = vmatmul.mubr.msk.f32.gmra.mxu1 %vm3655_vm2, %v10089_v15 }
 0x5e5   :  { %5916 = vmatprep.mubr.f32.mxu1 %v11919_v22 }
 0x5e6   :  { %8102 = vmatmul.mubr.msk.f32.gmra.mxu0 %vm134_vm1, %v10181_v60 }
 0x5e7   :  { %5769 = vmatprep.mubr.f32.mxu0 %v11919_v22 }
 0x5e8   :  { %8106 = vmatmul.mubr.msk.f32.gmra.mxu1 %vm3655_vm2, %v10101_v8 }
 0x5e9   :  { %5922 = vmatprep.mubr.f32.mxu1 %v11919_v22 }
 0x5ea   :  { %8103 = vmatmul.mubr.msk.f32.gmra.mxu0 %vm134_vm1, %v10189_v46 }
 0x5eb   :  { %6017 = vmatprep.mubr.f32.mxu0 %v11919_v22 }
 0x5ec   :  { %8107 = vmatmul.mubr.msk.f32.gmra.mxu1 %vm3655_vm2, %v10112_v9 }
 0x5ed   :  { %5928 = vmatprep.mubr.f32.mxu1 %v11919_v22 }
 0x5f0   :  { %8108 = vmatmul.mubr.msk.f32.gmra.mxu1 %vm3655_vm2, %v10123_v3 }
 0x5f1   :  { %5934 = vmatprep.mubr.f32.mxu1 %v11919_v22 }
 0x5f4   :  { %8109 = vmatmul.mubr.msk.f32.gmra.mxu1 %vm3655_vm2, %v10134_v63 }
 0x5f5   :  { %5940 = vmatprep.mubr.f32.mxu1 %v11919_v22 }
 0x5f8   :  { %8110 = vmatmul.mubr.msk.f32.gmra.mxu1 %vm3655_vm2, %v10145_v50 }
 0x5f9   :  { %5946 = vmatprep.mubr.f32.mxu1 %v11919_v22 }
 0x5fc   :  { %8111 = vmatmul.mubr.msk.f32.gmra.mxu1 %vm3655_vm2, %v10156_v11 }
 0x5fd   :  { %6395 = vmatprep.mubr.f32.mxu1 %v11919_v22 }
 0x68e   :  { %v8296_v44 = vpop.f32.mrf.mxu0 }
 0x68f   :  { %v5467_v37 = vsel %vm3655_vm2, %v8296_v44, 0.0 }
 0x690   :  { %v10300_v41 = vpop.f32.mrf.mxu0 }
 0x692   :  { %v8299_v60 = vpop.f32.mrf.mxu0 }
 0x693   :  { %v5499_v46 = vmul.f32 %v8299_v60, %v8299_v60  ;;  %v5473_v14 = vsel %vm3655_vm2, %v8299_v60, 0.0  ;;  %v5497_v60 = vmul.f32 %v8296_v44, %v8296_v44 }
 0x694   :  { %v5435_v39 = vpop.f32.mrf.mxu0  ;;  %5474 = vadd.xlane.f32.xlu0 %v5473_v14 }
 0x695   :  { %v5513_v7 = vsel %vm3655_vm2, %v5499_v46, 0.0  ;;  %v5470_v30 = vsel %vm3655_vm2, %v5435_v39, 0.0  ;;  %v5498_v33 = vmul.f32 %v5435_v39, %v5435_v39 }
 0x696   :  { %v8302_v4 = vpop.f32.mrf.mxu0  ;;  %5514 = vadd.xlane.f32.xlu1 %v5513_v7 }
 0x697   :  { %v5501_v49 = vmul.f32 %v8302_v4, %v8302_v4  ;;  %v5479_v6 = vsel %vm3655_vm2, %v8302_v4, 0.0  ;;  %v5510_v4 = vsel %vm3655_vm2, %v5498_v33, 0.0 }
 0x698   :  { %v5445_v12 = vpop.f32.mrf.mxu0  ;;  %5471 = vadd.xlane.f32.xlu0 %v5470_v30 }
 0x699   :  { %v5519_v38 = vsel %vm3655_vm2, %v5501_v49, 0.0  ;;  %v5500_v54 = vmul.f32 %v5445_v12, %v5445_v12  ;;  %v5476_v0 = vsel %vm3655_vm2, %v5445_v12, 0.0  ;;  %v10335_v49 = vpop.xlane.xlu1 %4009 }
 0x69a   :  { %v8305_v40 = vpop.f32.mrf.mxu0  ;;  %5520 = vadd.xlane.f32.xlu1 %v5519_v38 }
 0x69b   :  { %v5485_v10 = vsel %vm3655_vm2, %v8305_v40, 0.0  ;;  %v5503_v21 = vmul.f32 %v8305_v40, %v8305_v40  ;;  %v5516_v42 = vsel %vm3655_vm2, %v5500_v54, 0.0 }
 0x69c   :  { %v5455_v53 = vpop.f32.mrf.mxu0  ;;  %5480 = vadd.xlane.f32.xlu0 %v5479_v6 }
 0x69d   :  { %v5482_v17 = vsel %vm3655_vm2, %v5455_v53, 0.0  ;;  %v5502_v57 = vmul.f32 %v5455_v53, %v5455_v53  ;;  %v5525_v55 = vsel %vm3655_vm2, %v5503_v21, 0.0  ;;  %v5496_v53 = vmul.f32 %v10300_v41, %v10300_v41  ;;  %v10359_v21 = vpop.xlane.xlu1 %3934 }
 0x69e   :  { %v5753_v25 = vpop.f32.mrf.mxu0  ;;  %5486 = vadd.xlane.f32.xlu1 %v5485_v10  ;;  %v5507_v10 = vsel %vm3655_vm2, %v5497_v60, 0.0 }
 0x69f   :  { %v5522_v35 = vsel %vm3655_vm2, %v5502_v57, 0.0  ;;  %v5778_v38 = vsub.f32 %v5753_v25, %v9631_v23 }
 0x6a0   :  { %v5755_v51 = vpop.f32.mrf.mxu0  ;;  %5477 = vadd.xlane.f32.xlu0 %v5476_v0 }
 0x6a1   :  { %v5779_v30 = vsub.f32 %v5755_v51, %v9631_v23 }
 0x6a2   :  { %v5759_v27 = vpop.f32.mrf.mxu0  ;;  %5517 = vadd.xlane.f32.xlu1 %v5516_v42 }
 0x6a3   :  { %v5782_v7 = vsub.f32 %v5759_v27, %v9625_v26  ;;  %v5795_v23 = vmul.f32 %v5779_v30, %v9707_v56 }
 0x6a4   :  { %v5761_v29 = vpop.f32.mrf.mxu0  ;;  %5483 = vadd.xlane.f32.xlu0 %v5482_v17 }
 0x6a5   :  { %v5783_v46 = vsub.f32 %v5761_v29, %v9625_v26  ;;  %v10343_v26 = vpop.xlane.xlu0 %3924  ;;  %v5798_v54 = vmul.f32 %v5782_v7, %v9690_v18  ;;  %v5811_v57 = vadd.f32 %v5795_v23, %v9734_v13 }
 0x6a6   :  { %v5765_v62 = vpop.f32.mrf.mxu0  ;;  %5526 = vadd.xlane.f32.xlu1 %v5525_v55 }
 0x6a7   :  { %v5786_v1 = vsub.f32 %v5765_v62, %v9609_v5  ;;  %v5814_v27 = vadd.f32 %v5798_v54, %v9717_v34 }
 0x6a8   :  { %v5767_v16 = vpop.f32.mrf.mxu0  ;;  %5468 = vadd.xlane.f32.xlu0 %v5467_v37  ;;  %v10368_v37 = vpop.xlane.xlu1 %4014 }
 0x6a9   :  { %v5787_v45 = vsub.f32 %v5767_v16, %v9609_v5  ;;  %v5802_v40 = vmul.f32 %v5786_v1, %v9671_v19  ;;  %v10363_v29 = vpop.xlane.xlu0 %3929  ;;  %v5830_v62 = vmax.f32 %v5814_v27, 0.0 }
 0x6aa   :  { %v5771_v28 = vpop.f32.mrf.mxu0  ;;  %5523 = vadd.xlane.f32.xlu1 %v5522_v35  ;;  %v95_v35 = vld [vmem:[%s11804_s10 + $0x38] sm:$0xff] }
 0x6ab   :  { %v5790_v14 = vsub.f32 %v5771_v28, %v9616_v24  ;;  %v5803_v5 = vmul.f32 %v5787_v45, %v9671_v19  ;;  %v5464_v19 = vsel %vm3655_vm2, %v10300_v41, 0.0  ;;  %v5818_v51 = vadd.f32 %v5802_v40, %v9699_v43 }
 0x6ac   :  { %v5773_v39 = vpop.f32.mrf.mxu0  ;;  %5209 = vadd.xlane.f32.xlu0 %v10206_v32  ;;  %v5799_v32 = vmul.f32 %v5783_v46, %v9690_v18 }
 0x6ad   :  { %v5806_v12 = vmul.f32 %v5790_v14, %v9677_v20  ;;  %v5791_v44 = vsub.f32 %v5773_v39, %v9616_v24  ;;  %v5819_v0 = vadd.f32 %v5803_v5, %v9699_v43  ;;  %v5834_v43 = vmax.f32 %v5818_v51, 0.0  ;;  %v10370_v16 = vpop.xlane.xlu0 %3939 }
 0x6ae   :  { %5511 = vadd.xlane.f32.xlu1 %v5510_v4  ;;  %v5815_v42 = vadd.f32 %v5799_v32, %v9717_v34  ;;  %v5827_v34 = vmax.f32 %v5811_v57, 0.0 }
 0x6af   :  { %v5807_v6 = vmul.f32 %v5791_v44, %v9677_v20  ;;  %v5822_v24 = vadd.f32 %v5806_v12, %v9683_v58  ;;  %v5794_v20 = vmul.f32 %v5778_v38, %v9707_v56  ;;  %v5835_v41 = vmax.f32 %v5819_v0, 0.0 }
 0x6b0   :  { %5508 = vadd.xlane.f32.xlu0 %v5507_v10  ;;  %v5831_v55 = vmax.f32 %v5815_v42, 0.0 }
 0x6b1   :  { %v5823_v25 = vadd.f32 %v5807_v6, %v9683_v58  ;;  %v5838_v17 = vmax.f32 %v5822_v24, 0.0  ;;  %v5504_v58 = vsel %vm3655_vm2, %v5496_v53, 0.0  ;;  %v5810_v56 = vadd.f32 %v5794_v20, %v9734_v13  ;;  %v10375_v13 = vpop.xlane.xlu1 %3944  ;;  %v10377_v45 = vpop.xlane.xlu0 %4019 }
 0x6b2   :  { %5465 = vadd.xlane.f32.xlu1 %v5464_v19 }
 0x6b3   :  { %v5839_v18 = vmax.f32 %v5823_v25, 0.0  ;;  %v5826_v33 = vmax.f32 %v5810_v56, 0.0 }
 0x6b5   :  { %5977 = vmatprep.subr.mxu0 %v5839_v18  ;;  %v10385_v1 = vpop.xlane.xlu1 %4024  ;;  %v10387_v28 = vpop.xlane.xlu0 %4519 }
 0x6b6   :  { %5978 = vmatpush1.msra.mxu0 %v5838_v17  ;;  %5505 = vadd.xlane.f32.xlu1 %v5504_v58 }
 0x6b7   :  { %5979 = vmatprep.subr.mxu0 %v5835_v41 }
 0x6b8   :  { %5980 = vmatpush1.msra.mxu0 %v5834_v43 }
 0x6b9   :  { %5981 = vmatprep.subr.mxu0 %v5831_v55  ;;  %v10400_v60 = vpop.xlane.xlu0 %4524 }
 0x6ba   :  { %5982 = vmatpush1.msra.mxu0 %v5830_v62 }
 0x6bb   :  { %5983 = vmatprep.subr.mxu0 %v5827_v34 }
 0x6bc   :  { %5984 = vmatpush1.msra.mxu0 %v5826_v33 }
 0x6bd   :  { %8112 = vmatmul.mubr.msk.f32.vlgmr.msra.gmra.mxu0 %vm3655_vm2, %v10076_v47  ;;  %v94_v47 = vld [vmem:[%s11804_s10 + $0x30] sm:$0xff]  ;;  %v10413_v14 = vpop.xlane.xlu0 %4529 }
 0x6be   :  { %6023 = vmatprep.mubr.f32.mxu0 %v11919_v22 }
 0x6c1   :  { %8113 = vmatmul.mubr.msk.f32.gmra.mxu0 %vm3655_vm2, %v10089_v15  ;;  %v10395_v15 = vpop.xlane.xlu1 %4599 }
 0x6c2   :  { %6029 = vmatprep.mubr.f32.mxu0 %v11919_v22 }
 0x6c5   :  { %8114 = vmatmul.mubr.msk.f32.gmra.mxu0 %vm3655_vm2, %v10101_v8  ;;  %v93_v8 = vld [vmem:[%s11804_s10 + $0x28] sm:$0xff]  ;;  %v10408_v46 = vpop.xlane.xlu1 %4604 }
 0x6c6   :  { %6035 = vmatprep.mubr.f32.mxu0 %v11919_v22 }
 0x6c7   :  { %6215 = vperm.xlu1 %8311, %v95_v35  }
 0x6c9   :  { %8115 = vmatmul.mubr.msk.f32.gmra.mxu0 %vm3655_vm2, %v10112_v9  ;;  %v92_v9 = vld [vmem:[%s11804_s10 + $0x20] sm:$0xff]  ;;  %v10418_v7 = vpop.xlane.xlu1 %4609 }
 0x6ca   :  { %6041 = vmatprep.mubr.f32.mxu0 %v11919_v22 }
 0x6cb   :  { %6210 = vperm.xlu1 %8311, %v94_v47  }
 0x6cd   :  { %8116 = vmatmul.mubr.msk.f32.gmra.mxu0 %vm3655_vm2, %v10123_v3  ;;  %v4535_v3 = vpop.xlane.xlu0 %4534  ;;  %v4615_v39 = vpop.xlane.xlu1 %4614 }
 0x6ce   :  { %6047 = vmatprep.mubr.f32.mxu0 %v11919_v22  ;;  %v4559_v18 = vadd.f32 %v4535_v3, %v10343_v26  ;;  %v4639_v27 = vadd.f32 %v4615_v39, %v10322_v36 }
 0x6cf   :  { %6205 = vperm.xlu1 %8311, %v93_v8  }
 0x6d1   :  { %8117 = vmatmul.mubr.msk.f32.gmra.mxu0 %vm3655_vm2, %v10134_v63  ;;  %v4540_v4 = vpop.xlane.xlu0 %4539  ;;  %v4620_v30 = vpop.xlane.xlu1 %4619 }
 0x6d2   :  { %6053 = vmatprep.mubr.f32.mxu0 %v11919_v22  ;;  %v4560_v3 = vadd.f32 %v4540_v4, %v10363_v29 }
 0x6d3   :  { %6200 = vperm.xlu1 %8311, %v92_v9  }
 0x6d5   :  { %8118 = vmatmul.mubr.msk.f32.gmra.mxu0 %vm3655_vm2, %v10145_v50  ;;  %v4550_v63 = vpop.xlane.xlu0 %4549  ;;  %v4545_v5 = vpop.xlane.xlu1 %4544 }
 0x6d6   :  { %6059 = vmatprep.mubr.f32.mxu0 %v11919_v22  ;;  %v4561_v34 = vadd.f32 %v4545_v5, %v10359_v21 }
 0x6d9   :  { %8119 = vmatmul.mubr.msk.f32.gmra.mxu0 %vm3655_vm2, %v10156_v11  ;;  %v10426_v12 = vpop.xlane.xlu0 %4629  ;;  %v4625_v44 = vpop.xlane.xlu1 %4624 }
 0x6da   :  { %6556 = vmatprep.mubr.f32.mxu0 %v11919_v22  ;;  %v4641_v33 = vadd.f32 %v4625_v44, %v10368_v37  ;;  %v4640_v44 = vadd.f32 %v4620_v30, %v10335_v49  ;;  %v4558_v49 = vadd.f32 %v10413_v14, %v10325_v31  ;;  %v4642_v31 = vadd.f32 %v10426_v12, %v10377_v45  ;;  %v83_v12 = vld [vmem:[%s11805_s9 + $0x18] sm:$0xff] }
 0x6dd   :  { %v4555_v38 = vpop.xlane.xlu0 %4554  ;;  %v4635_v50 = vpop.xlane.xlu1 %4634 }
 0x6e1   :  { %v10428_v40 = vpop.xlane.xlu0 %5129  ;;  %v10432_v6 = vpop.xlane.xlu1 %5214 }
 0x6e5   :  { %v10430_v32 = vpop.xlane.xlu0 %5134  ;;  %v10436_v11 = vpop.xlane.xlu1 %5219 }
 0x6e9   :  { %v10434_v10 = vpop.xlane.xlu0 %5139  ;;  %v5225_v54 = vpop.xlane.xlu1 %5224 }
 0x6ea   :  { %v5249_v41 = vadd.f32 %v5225_v54, %v4639_v27 }
 0x6ed   :  { %v5145_v53 = vpop.xlane.xlu0 %5144  ;;  %v5230_v23 = vpop.xlane.xlu1 %5229 }
 0x6ee   :  { %v5169_v17 = vadd.f32 %v5145_v53, %v4559_v18  ;;  %v4563_v53 = vadd.f32 %v4555_v38, %v10375_v13  ;;  %v4643_v38 = vadd.f32 %v4635_v50, %v10385_v1  ;;  %v4557_v1 = vadd.f32 %v10400_v60, %v10318_v59 }
 0x6ef   :  { %v5168_v50 = vadd.f32 %v10434_v10, %v4558_v49  ;;  %v4638_v10 = vadd.f32 %v10418_v7, %v10315_v48 }
 0x6f1   :  { %v5150_v24 = vpop.xlane.xlu0 %5149  ;;  %v5235_v25 = vpop.xlane.xlu1 %5234 }
 0x6f2   :  { %v5251_v36 = vadd.f32 %v5235_v25, %v4641_v33  ;;  %v5170_v21 = vadd.f32 %v5150_v24, %v4560_v3 }
 0x6f5   :  { %v5155_v19 = vpop.xlane.xlu0 %5154  ;;  %v5160_v20 = vpop.xlane.xlu1 %5159 }
 0x6f6   :  { %v5171_v8 = vadd.f32 %v5155_v19, %v4561_v34  ;;  %v4562_v19 = vadd.f32 %v4550_v63, %v10370_v16 }
 0x6f8   :  { %v5172_v24 = vadd.f32 %v5160_v20, %v4562_v19 }
 0x6f9   :  { %v5165_v0 = vpop.xlane.xlu0 %5164  ;;  %v5240_v42 = vpop.xlane.xlu1 %5239 }
 0x6fa   :  { %v5173_v5 = vadd.f32 %v5165_v0, %v4563_v53 }
 0x6fd   :  { %v5245_v51 = vpop.xlane.xlu0 %5244 }
 0x6fe   :  { %v5253_v30 = vadd.f32 %v5245_v51, %v4643_v38  ;;  %v5167_v51 = vadd.f32 %v10430_v32, %v4557_v1 }
 0x71d   :  { %v5475_v58 = vpop.xlane.xlu0 %5474 }
 0x71e   :  { %v5491_v57 = vadd.f32 %v5475_v58, %v5169_v17 }
 0x71f   :  { %v5515_v56 = vpop.xlane.xlu1 %5514 }
 0x720   :  { %v10440_v43 = vmul.f32 0.0006377551, %v5491_v57  ;;  %v5531_v55 = vadd.f32 %v5515_v56, %v5249_v41  ;;  %v5250_v41 = vadd.f32 %v5230_v23, %v4640_v44 }
 0x721   :  { %v5472_v62 = vpop.xlane.xlu0 %5471 }
 0x722   :  { %v5555_v35 = vmul.f32 %v10440_v43, %v10440_v43  ;;  %v5547_v26 = vmul.f32 0.0006377551, %v5531_v55 }
 0x723   :  { %v5521_v47 = vpop.xlane.xlu1 %5520 }
 0x724   :  { %v5563_v9 = vsub.f32 %v5547_v26, %v5555_v35  ;;  %v5533_v18 = vadd.f32 %v5521_v47, %v5251_v36  ;;  %v5490_v26 = vadd.f32 %v5472_v62, %v5168_v50  ;;  %v5252_v36 = vadd.f32 %v5240_v42, %v4642_v31  ;;  %v87_v31 = vld [vmem:[%s11805_s9 + $0x38] sm:$0xff] }
 0x725   :  { %v5481_v39 = vpop.xlane.xlu0 %5480  ;;  %v4637_v42 = vadd.f32 %v10408_v46, %v10308_v2 }
 0x726   :  { %v5571_v54 = vadd.f32 1e-05, %v5563_v9  ;;  %v5493_v27 = vadd.f32 %v5481_v39, %v5171_v8  ;;  %v5549_v58 = vmul.f32 0.0006377551, %v5533_v18  ;;  %v10481_v18 = vmul.f32 0.0006377551, %v5490_v26 }
 0x727   :  { %v5487_v17 = vpop.xlane.xlu1 %5486  ;;  %v5247_v2 = vadd.f32 %v10432_v6, %v4637_v42 }
 0x728   :  { %8352 = vrsqrt.f32 %v5571_v54  ;;  %v10448_v37 = vmul.f32 0.0006377551, %v5493_v27  ;;  %v5495_v4 = vadd.f32 %v5487_v17, %v5173_v5  ;;  %v5248_v54 = vadd.f32 %v10436_v11, %v4638_v10 }
 0x729   :  { %v5478_v25 = vpop.xlane.xlu0 %5477  ;;  %v4556_v5 = vadd.f32 %v10387_v28, %v10304_v61  ;;  %v4636_v61 = vadd.f32 %v10395_v15, %v10312_v52 }
 0x72a   :  { %v5557_v29 = vmul.f32 %v10448_v37, %v10448_v37  ;;  %v5492_v13 = vadd.f32 %v5478_v25, %v5170_v21  ;;  %v10459_v34 = vmul.f32 0.0006377551, %v5495_v4  ;;  %v5554_v4 = vmul.f32 %v10481_v18, %v10481_v18 }
 0x72b   :  { %v5518_v57 = vpop.xlane.xlu1 %5517  ;;  %v5166_v25 = vadd.f32 %v10428_v40, %v4556_v5 }
 0x72c   :  { %v5565_v0 = vsub.f32 %v5549_v58, %v5557_v29  ;;  %v10455_v56 = vmul.f32 0.0006377551, %v5492_v13  ;;  %v5532_v16 = vadd.f32 %v5518_v57, %v5250_v41  ;;  %v5559_v59 = vmul.f32 %v10459_v34, %v10459_v34  ;;  %v85_v41 = vld [vmem:[%s11805_s9 + $0x28] sm:$0xff] }
 0x72d   :  { %v5484_v63 = vpop.xlane.xlu0 %5483 }
 0x72e   :  { %v5573_v55 = vadd.f32 1e-05, %v5565_v0  ;;  %v5556_v33 = vmul.f32 %v10455_v56, %v10455_v56  ;;  %v5494_v35 = vadd.f32 %v5484_v63, %v5172_v24  ;;  %v5548_v23 = vmul.f32 0.0006377551, %v5532_v16 }
 0x72f   :  { %v5527_v20 = vpop.xlane.xlu1 %5526 }
 0x730   :  { %8354 = vrsqrt.f32 %v5573_v55  ;;  %v5535_v14 = vadd.f32 %v5527_v20, %v5253_v30  ;;  %v5564_v47 = vsub.f32 %v5548_v23, %v5556_v33  ;;  %v10469_v9 = vmul.f32 0.0006377551, %v5494_v35  ;;  %v84_v35 = vld [vmem:[%s11805_s9 + $0x20] sm:$0xff] }
 0x731   :  { %v5469_v8 = vpop.xlane.xlu0 %5468 }
 0x732   :  { %v5551_v60 = vmul.f32 0.0006377551, %v5535_v14  ;;  %v5572_v3 = vadd.f32 1e-05, %v5564_v47  ;;  %v5489_v39 = vadd.f32 %v5469_v8, %v5167_v51  ;;  %v5558_v7 = vmul.f32 %v10469_v9, %v10469_v9  ;;  %v86_v8 = vld [vmem:[%s11805_s9 + $0x30] sm:$0xff] }
 0x733   :  { %v5524_v45 = vpop.xlane.xlu1 %5523 }
 0x734   :  { %v5567_v32 = vsub.f32 %v5551_v60, %v5559_v59  ;;  %v5534_v62 = vadd.f32 %v5524_v45, %v5252_v36  ;;  %8356 = vrsqrt.f32 %v5572_v3  ;;  %v10487_v44 = vmul.f32 0.0006377551, %v5489_v39  ;;  %v82_v60 = vld [vmem:[%s11805_s9 + $0x10] sm:$0xff]  ;;  %v91_v3 = vld [vmem:[%s11804_s10 + $0x18] sm:$0xff] }
 0x735   :  { %v8353_v53 = vpop.eup %8352  ;;  %v5210_v27 = vpop.xlane.xlu0 %5209 }
 0x736   :  { %v5575_v48 = vadd.f32 1e-05, %v5567_v32  ;;  %v5550_v17 = vmul.f32 0.0006377551, %v5534_v62  ;;  %v6101_v21 = vmul.f32 %v8353_v53, %v83_v12  ;;  %v5553_v28 = vmul.f32 %v10487_v44, %v10487_v44  ;;  %v81_v12 = vld [vmem:[%s11805_s9 + $0x8] sm:$0xff]  ;;  %v90_v32 = vld [vmem:[%s11804_s10 + $0x10] sm:$0xff] }
 0x737   :  { %v5512_v19 = vpop.xlane.xlu1 %5511  ;;  %v5246_v49 = vadd.f32 %v5210_v27, %v4636_v61  ;;  %v80_v53 = vld [vmem:[%s11805_s9] sm:$0xff] }
 0x738   :  { %8358 = vrsqrt.f32 %v5575_v48  ;;  %v5566_v46 = vsub.f32 %v5550_v17, %v5558_v7  ;;  %v5530_v11 = vadd.f32 %v5512_v19, %v5248_v54  ;;  %6123 = vperm.xlu0 %8310, %v6101_v21   ;;  %v89_v54 = vld [vmem:[%s11804_s10 + $0x8] sm:$0xff]  ;;  %v88_v48 = vld [vmem:[%s11804_s10] sm:$0xff]  ;;  %v10534_v7 = vpop.f32.mrf.mxu1 }
 0x739   :  { %v5509_v58 = vpop.xlane.xlu0 %5508 }
 0x73a   :  { %v5574_v29 = vadd.f32 1e-05, %v5566_v46  ;;  %v5546_v13 = vmul.f32 0.0006377551, %v5530_v11  ;;  %v5529_v38 = vadd.f32 %v5509_v58, %v5247_v2  ;;  %v10536_v17 = vpop.f32.mrf.mxu1 }
 0x73b   :  { %v5466_v6 = vpop.xlane.xlu1 %5465 }
 0x73c   :  { %8360 = vrsqrt.f32 %v5574_v29  ;;  %v5562_v40 = vsub.f32 %v5546_v13, %v5554_v4  ;;  %v5545_v57 = vmul.f32 0.0006377551, %v5529_v38  ;;  %v5488_v24 = vadd.f32 %v5466_v6, %v5166_v25  ;;  %v10540_v5 = vpop.f32.mrf.mxu1 }
 0x73d   :  { %v8355_v0 = vpop.eup %8354 }
 0x73e   :  { %v5570_v30 = vadd.f32 1e-05, %v5562_v40  ;;  %v5561_v16 = vsub.f32 %v5545_v57, %v5553_v28  ;;  %v10500_v63 = vmul.f32 0.0006377551, %v5488_v24  ;;  %v6103_v55 = vmul.f32 %v8355_v0, %v85_v41  ;;  %v10544_v2 = vpop.f32.mrf.mxu1 }
 0x73f   :  { %v5506_v52 = vpop.xlane.xlu1 %5505 }
 0x740   :  { %8362 = vrsqrt.f32 %v5570_v30  ;;  %v5569_v15 = vadd.f32 1e-05, %v5561_v16  ;;  %v5528_v33 = vadd.f32 %v5506_v52, %v5246_v49  ;;  %6133 = vperm.xlu0 %8310, %v6103_v55   ;;  %v5552_v50 = vmul.f32 %v10500_v63, %v10500_v63  ;;  %v10548_v11 = vpop.f32.mrf.mxu1 }
 0x741   :  { %v8357_v1 = vpop.eup %8356 }
 0x742   :  { %8364 = vrsqrt.f32 %v5569_v15  ;;  %v5544_v23 = vmul.f32 0.0006377551, %v5528_v33  ;;  %v6102_v20 = vmul.f32 %v8357_v1, %v84_v35  ;;  %v10552_v58 = vpop.f32.mrf.mxu1 }
 0x743   :  { %v10576_v52 = vpop.permute.xlu1 %6215 }
 0x744   :  { %v5560_v14 = vsub.f32 %v5544_v23, %v5552_v50  ;;  %6128 = vperm.xlu0 %8310, %v6102_v20   ;;  %v10556_v4 = vpop.f32.mrf.mxu1 }
 0x745   :  { %v8359_v51 = vpop.eup %8358  ;;  %v6078_v20 = vsub.f32 %v10556_v4, %v10440_v43 }
 0x746   :  { %v5568_v26 = vadd.f32 1e-05, %v5560_v14  ;;  %v6105_v47 = vmul.f32 %v8359_v51, %v87_v31  ;;  %v10560_v38 = vpop.f32.mrf.mxu1  ;;  %v6074_v14 = vsub.f32 %v10548_v11, %v10481_v18 }
 0x747   :  { %v10580_v35 = vpop.permute.xlu1 %6210  ;;  %v6079_v31 = vsub.f32 %v10560_v38, %v10440_v43 }
 0x748   :  { %8366 = vrsqrt.f32 %v5568_v26  ;;  %6143 = vperm.xlu0 %8310, %v6105_v47   ;;  %v10564_v28 = vpop.f32.mrf.mxu1 }
 0x749   :  { %v8361_v36 = vpop.eup %8360 }
 0x74a   :  { %v6104_v59 = vmul.f32 %v8361_v36, %v86_v8  ;;  %v5932_v41 = vpop.f32.mrf.mxu1  ;;  %v6075_v36 = vsub.f32 %v10552_v58, %v10481_v18 }
 0x74c   :  { %6138 = vperm.xlu1 %8311, %v6104_v59   ;;  %v5936_v57 = vpop.f32.mrf.mxu1 }
 0x74d   :  { %v8363_v10 = vpop.eup %8362  ;;  %v6086_v26 = vsub.f32 %v5936_v57, %v10448_v37 }
 0x74e   :  { %v6100_v39 = vmul.f32 %v8363_v10, %v82_v60  ;;  %v5938_v0 = vpop.f32.mrf.mxu1  ;;  %v6082_v10 = vsub.f32 %v10564_v28, %v10455_v56 }
 0x74f   :  { %v8365_v45 = vpop.eup %8364  ;;  %v6087_v47 = vsub.f32 %v5938_v0, %v10448_v37 }
 0x750   :  { %6195 = vperm.xlu1 %8311, %v91_v3   ;;  %6118 = vperm.xlu0 %8310, %v6100_v39   ;;  %v6099_v62 = vmul.f32 %v8365_v45, %v81_v12  ;;  %v10572_v30 = vpop.f32.mrf.mxu1  ;;  %v6083_v3 = vsub.f32 %v5932_v41, %v10455_v56  ;;  %v6206_v45 = vpop.permute.xlu1 %6205 }
 0x751   :  { %v6090_v39 = vsub.f32 %v10572_v30, %v10469_v9 }
 0x752   :  { %v10574_v55 = vpop.f32.mrf.mxu1 }
 0x753   :  { %v6091_v12 = vsub.f32 %v10574_v55, %v10469_v9 }
 0x754   :  { %6190 = vperm.xlu1 %8311, %v90_v32   ;;  %6113 = vperm.xlu0 %8310, %v6099_v62   ;;  %v5948_v33 = vpop.f32.mrf.mxu1  ;;  %v6070_v32 = vsub.f32 %v10540_v5, %v10487_v44  ;;  %v6071_v62 = vsub.f32 %v10544_v2, %v10487_v44 }
 0x755   :  { %v8367_v42 = vpop.eup %8366  ;;  %v6094_v51 = vsub.f32 %v5948_v33, %v10459_v34 }
 0x756   :  { %v6098_v27 = vmul.f32 %v8367_v42, %v80_v53  ;;  %v5950_v23 = vpop.f32.mrf.mxu1 }
 0x757   :  { %v6095_v59 = vsub.f32 %v5950_v23, %v10459_v34 }
 0x758   :  { %6185 = vperm.xlu1 %8311, %v89_v54   ;;  %6108 = vperm.xlu0 %8310, %v6098_v27  }
 0x75c   :  { %6180 = vperm.xlu0 %8310, %v88_v48  }
 0x77d   :  { %v10538_v21 = vpop.f32.mrf.mxu0 }
 0x77f   :  { %v10542_v19 = vpop.f32.mrf.mxu0 }
 0x781   :  { %v10546_v46 = vpop.f32.mrf.mxu0 }
 0x782   :  { %v6072_v38 = vsub.f32 %v10546_v46, %v10487_v44  ;;  %v11922_v46 = vsub.f32 %v10538_v21, %v10500_v63 }
 0x783   :  { %v10550_v25 = vpop.f32.mrf.mxu0 }
 0x785   :  { %v10554_v29 = vpop.f32.mrf.mxu0 }
 0x786   :  { %v6076_v41 = vsub.f32 %v10554_v29, %v10481_v18 }
 0x787   :  { %v10558_v13 = vpop.f32.mrf.mxu0 }
 0x788   :  { %v6077_v55 = vsub.f32 %v10558_v13, %v10481_v18 }
 0x789   :  { %v10562_v61 = vpop.f32.mrf.mxu0 }
 0x78a   :  { %v6080_v33 = vsub.f32 %v10562_v61, %v10440_v43 }
 0x78b   :  { %v10566_v6 = vpop.f32.mrf.mxu0 }
 0x78c   :  { %v6081_v23 = vsub.f32 %v10566_v6, %v10440_v43 }
 0x78d   :  { %v10568_v40 = vpop.f32.mrf.mxu0 }
 0x78e   :  { %v6084_v4 = vsub.f32 %v10568_v40, %v10455_v56 }
 0x78f   :  { %v10570_v24 = vpop.f32.mrf.mxu0 }
 0x790   :  { %v6085_v48 = vsub.f32 %v10570_v24, %v10455_v56 }
 0x791   :  { %v6049_v49 = vpop.f32.mrf.mxu0 }
 0x792   :  { %v6088_v54 = vsub.f32 %v6049_v49, %v10448_v37 }
 0x793   :  { %v6051_v16 = vpop.f32.mrf.mxu0 }
 0x794   :  { %v6089_v27 = vsub.f32 %v6051_v16, %v10448_v37 }
 0x795   :  { %v10578_v15 = vpop.f32.mrf.mxu0 }
 0x797   :  { %v10584_v50 = vpop.f32.mrf.mxu0 }
 0x799   :  { %v6061_v60 = vpop.f32.mrf.mxu0 }
 0x79b   :  { %v6063_v57 = vpop.f32.mrf.mxu0 }
 0x79c   :  { %v6097_v61 = vsub.f32 %v6063_v57, %v10459_v34 }
 0x7b3   :  { %v10582_v1 = vpop.permute.xlu0 %6123 }
 0x7b4   :  { %v6158_v43 = vmul.f32 %v10582_v1, %v6078_v20  ;;  %v10643_v6 = vmul.f32 %v10582_v1, %v6079_v31 }
 0x7bb   :  { %v6134_v8 = vpop.permute.xlu0 %6133 }
 0x7bc   :  { %v6166_v0 = vmul.f32 %v6134_v8, %v6086_v26  ;;  %v6167_v49 = vmul.f32 %v6134_v8, %v6087_v47  ;;  %v6168_v30 = vmul.f32 %v6134_v8, %v6088_v54  ;;  %v6169_v37 = vmul.f32 %v6134_v8, %v6089_v27  ;;  %v6201_v54 = vpop.permute.xlu1 %6200 }
 0x7bd   :  { %v6092_v26 = vsub.f32 %v10578_v15, %v10469_v9  ;;  %v6093_v47 = vsub.f32 %v10584_v50, %v10469_v9  ;;  %v6096_v27 = vsub.f32 %v6061_v60, %v10459_v34 }
 0x7be   :  { %v10645_v40 = vadd.f32 %v6206_v45, %v6166_v0  ;;  %v10647_v56 = vadd.f32 %v6206_v45, %v6168_v30  ;;  %v10649_v15 = vadd.f32 %v6206_v45, %v6167_v49  ;;  %v10651_v42 = vadd.f32 %v6206_v45, %v6169_v37 }
 0x7bf   :  { %v6129_v16 = vpop.permute.xlu0 %6128 }
 0x7c0   :  { %v6163_v8 = vmul.f32 %v6129_v16, %v6083_v3  ;;  %v6162_v53 = vmul.f32 %v6129_v16, %v6082_v10  ;;  %v6164_v34 = vmul.f32 %v6129_v16, %v6084_v4  ;;  %v6165_v57 = vmul.f32 %v6129_v16, %v6085_v48 }
 0x7c2   :  { %v10653_v20 = vadd.f32 %v6201_v54, %v6163_v8 }
 0x7c3   :  { %v6144_v24 = vpop.permute.xlu0 %6143 }
 0x7c4   :  { %v6174_v9 = vmul.f32 %v6144_v24, %v6094_v51  ;;  %v6175_v50 = vmul.f32 %v6144_v24, %v6095_v59  ;;  %v6176_v3 = vmul.f32 %v6144_v24, %v6096_v27  ;;  %v6177_v60 = vmul.f32 %v6144_v24, %v6097_v61 }
 0x7c6   :  { %v6246_v31 = vadd.f32 %v10576_v52, %v6174_v9  ;;  %v6248_v0 = vadd.f32 %v10576_v52, %v6176_v3  ;;  %v6247_v28 = vadd.f32 %v10576_v52, %v6175_v50  ;;  %v6249_v49 = vadd.f32 %v10576_v52, %v6177_v60 }
 0x7c7   :  { %v6139_v30 = vpop.permute.xlu1 %6138  ;;  %v6160_v9 = vmul.f32 %v10582_v1, %v6080_v33  ;;  %v6161_v52 = vmul.f32 %v10582_v1, %v6081_v23  ;;  %v6270_v50 = vmax.f32 %v10645_v40, 0.0  ;;  %v6272_v3 = vmax.f32 %v10647_v56, 0.0 }
 0x7c8   :  { %v6170_v45 = vmul.f32 %v6139_v30, %v6090_v39  ;;  %v6171_v37 = vmul.f32 %v6139_v30, %v6091_v12  ;;  %v6172_v51 = vmul.f32 %v6139_v30, %v6092_v26  ;;  %v6173_v59 = vmul.f32 %v6139_v30, %v6093_v47 }
 0x7c9   :  { %v6279_v27 = vmax.f32 %v6247_v28, 0.0  ;;  %v6281_v61 = vmax.f32 %v6249_v49, 0.0  ;;  %v6278_v10 = vmax.f32 %v6246_v31, 0.0  ;;  %v6280_v4 = vmax.f32 %v6248_v0, 0.0 }
 0x7ca   :  { %v6242_v48 = vadd.f32 %v10580_v35, %v6170_v45  ;;  %v6244_v16 = vadd.f32 %v10580_v35, %v6172_v51  ;;  %v6243_v8 = vadd.f32 %v10580_v35, %v6171_v37  ;;  %v6245_v24 = vadd.f32 %v10580_v35, %v6173_v59 }
 0x7cb   :  { %6347 = vmatprep.subr.mxu1 %v6279_v27  ;;  %6508 = vmatprep.subr.mxu0 %v6281_v61  ;;  %v6119_v39 = vpop.permute.xlu0 %6118  ;;  %v6196_v12 = vpop.permute.xlu1 %6195  ;;  %v6237_v28 = vadd.f32 %v6201_v54, %v6165_v57  ;;  %v6271_v26 = vmax.f32 %v10649_v15, 0.0  ;;  %v6273_v47 = vmax.f32 %v10651_v42, 0.0  ;;  %v6234_v60 = vadd.f32 %v6201_v54, %v6162_v53 }
 0x7cc   :  { %6348 = vmatpush1.msra.mxu1 %v6278_v10  ;;  %v6236_v35 = vadd.f32 %v6201_v54, %v6164_v34  ;;  %6509 = vmatpush1.msra.mxu0 %v6280_v4  ;;  %v6275_v33 = vmax.f32 %v6243_v8, 0.0  ;;  %v6277_v31 = vmax.f32 %v6245_v24, 0.0  ;;  %v6230_v1 = vadd.f32 %v6196_v12, %v6158_v43 }
 0x7cd   :  { %v6274_v23 = vmax.f32 %v6242_v48, 0.0  ;;  %v6276_v0 = vmax.f32 %v6244_v16, 0.0  ;;  %v6267_v30 = vmax.f32 %v10653_v20, 0.0  ;;  %v6154_v15 = vmul.f32 %v6119_v39, %v6074_v14 }
 0x7ce   :  { %v6156_v42 = vmul.f32 %v6119_v39, %v6076_v41  ;;  %v6232_v40 = vadd.f32 %v6196_v12, %v6160_v9  ;;  %6349 = vmatprep.subr.mxu1 %v6275_v33  ;;  %6510 = vmatprep.subr.mxu0 %v6277_v31  ;;  %v6269_v56 = vmax.f32 %v6237_v28, 0.0  ;;  %v6155_v43 = vmul.f32 %v6119_v39, %v6075_v36  ;;  %v57_v33 = vld [vmem:[%s11806_s6 + $0x8] sm:$0xff]  ;;  %v58_v31 = vld [vmem:[%s11806_s6 + $0x10] sm:$0xff] }
 0x7cf   :  { %v6114_v53 = vpop.permute.xlu0 %6113  ;;  %v6191_v54 = vpop.permute.xlu1 %6190  ;;  %v6157_v34 = vmul.f32 %v6119_v39, %v6077_v55  ;;  %6350 = vmatpush1.msra.mxu1 %v6274_v23  ;;  %v6231_v11 = vadd.f32 %v6196_v12, %v10643_v6  ;;  %v6233_v14 = vadd.f32 %v6196_v12, %v6161_v52  ;;  %6511 = vmatpush1.msra.mxu0 %v6276_v0  ;;  %v6266_v57 = vmax.f32 %v6234_v60, 0.0  ;;  %v60_v23 = vld [vmem:[%s11806_s6 + $0x20] sm:$0xff]  ;;  %v61_v0 = vld [vmem:[%s11806_s6 + $0x28] sm:$0xff] }
 0x7d0   :  { %v6226_v29 = vadd.f32 %v6191_v54, %v6154_v15  ;;  %v6228_v41 = vadd.f32 %v6191_v54, %v6156_v42  ;;  %6351 = vmatprep.subr.mxu1 %v6271_v26  ;;  %v6268_v20 = vmax.f32 %v6236_v35, 0.0  ;;  %v6262_v49 = vmax.f32 %v6230_v1, 0.0  ;;  %6512 = vmatprep.subr.mxu0 %v6273_v47  ;;  %v56_v35 = vld [vmem:[%s11806_s6] sm:$0xff]  ;;  %v59_v1 = vld [vmem:[%s11806_s6 + $0x18] sm:$0xff] }
 0x7d1   :  { %v6150_v58 = vmul.f32 %v6114_v53, %v6070_v32  ;;  %6352 = vmatpush1.msra.mxu1 %v6270_v50  ;;  %v6227_v36 = vadd.f32 %v6191_v54, %v6155_v43  ;;  %v6229_v18 = vadd.f32 %v6191_v54, %v6157_v34  ;;  %v6264_v13 = vmax.f32 %v6232_v40, 0.0  ;;  %6513 = vmatpush1.msra.mxu0 %v6272_v3  ;;  %v63_v15 = vld [vmem:[%s11806_s6 + $0x38] sm:$0xff]  ;;  %v64_v42 = vld [vmem:[%s11806_s6 + $0x40] sm:$0xff]  ;;  %v65_v40 = vld [vmem:[%s11806_s6 + $0x48] sm:$0xff] }
 0x7d2   :  { %v6151_v55 = vmul.f32 %v6114_v53, %v6071_v62  ;;  %v6152_v6 = vmul.f32 %v6114_v53, %v6072_v38  ;;  %v11920_v45 = vsub.f32 %v10550_v25, %v10487_v44  ;;  %6353 = vmatprep.subr.mxu1 %v6267_v30  ;;  %v6258_v51 = vmax.f32 %v6226_v29, 0.0  ;;  %6514 = vmatprep.subr.mxu0 %v6269_v56  ;;  %v62_v30 = vld [vmem:[%s11806_s6 + $0x30] sm:$0xff]  ;;  %v67_v54 = vld [vmem:[%s11806_s6 + $0x58] sm:$0xff]  ;;  %v68_v56 = vld [vmem:[%s11806_s6 + $0x60] sm:$0xff] }
 0x7d3   :  { %v6109_v5 = vpop.permute.xlu0 %6108  ;;  %v6186_v32 = vpop.permute.xlu1 %6185  ;;  %v11921_v59 = vsub.f32 %v10534_v7, %v10500_v63  ;;  %v6263_v2 = vmax.f32 %v6231_v11, 0.0  ;;  %v6265_v62 = vmax.f32 %v6233_v14, 0.0  ;;  %v6260_v61 = vmax.f32 %v6228_v41, 0.0  ;;  %6354 = vmatpush1.msra.mxu1 %v6266_v57  ;;  %6515 = vmatpush1.msra.mxu0 %v6268_v20  ;;  %v69_v43 = vld [vmem:[%s11806_s6 + $0x68] sm:$0xff]  ;;  %v70_v34 = vld [vmem:[%s11806_s6 + $0x70] sm:$0xff]  ;;  %v71_v11 = vld [vmem:[%s11806_s6 + $0x78] sm:$0xff] }
 0x7d4   :  { %v6153_v37 = vmul.f32 %v6114_v53, %v11920_v45  ;;  %v6148_v38 = vmul.f32 %v6109_v5, %v11922_v46  ;;  %v6222_v44 = vadd.f32 %v6186_v32, %v6150_v58  ;;  %v6224_v25 = vadd.f32 %v6186_v32, %v6152_v6  ;;  %v66_v53 = vld [vmem:[%s11806_s6 + $0x50] sm:$0xff] }
 0x7d5   :  { %v6146_v27 = vmul.f32 %v6109_v5, %v11921_v59  ;;  %6355 = vmatprep.subr.mxu1 %v6263_v2  ;;  %6516 = vmatprep.subr.mxu0 %v6265_v62  ;;  %v6259_v10 = vmax.f32 %v6227_v36, 0.0  ;;  %v6261_v4 = vmax.f32 %v6229_v18, 0.0  ;;  %v6223_v48 = vadd.f32 %v6186_v32, %v6151_v55 }
 0x7d6   :  { %v6225_v16 = vadd.f32 %v6186_v32, %v6153_v37  ;;  %v11923_v7 = vsub.f32 %v10536_v17, %v10500_v63  ;;  %v11924_v24 = vsub.f32 %v10542_v19, %v10500_v63  ;;  %v6254_v21 = vmax.f32 %v6222_v44, 0.0  ;;  %6356 = vmatpush1.msra.mxu1 %v6262_v49  ;;  %6517 = vmatpush1.msra.mxu0 %v6264_v13 }
 0x7d7   :  { %v6256_v52 = vmax.f32 %v6224_v25, 0.0  ;;  %v6181_v39 = vpop.permute.xlu0 %6180  ;;  %6357 = vmatprep.subr.mxu1 %v6259_v10  ;;  %6518 = vmatprep.subr.mxu0 %v6261_v4  ;;  %v6255_v26 = vmax.f32 %v6223_v48, 0.0 }
 0x7d8   :  { %v6147_v8 = vmul.f32 %v6109_v5, %v11923_v7  ;;  %v6149_v9 = vmul.f32 %v6109_v5, %v11924_v24  ;;  %v6218_v12 = vadd.f32 %v6181_v39, %v6146_v27  ;;  %v6220_v28 = vadd.f32 %v6181_v39, %v6148_v38  ;;  %6358 = vmatpush1.msra.mxu1 %v6258_v51 }
 0x7d9   :  { %v6257_v47 = vmax.f32 %v6225_v16, 0.0  ;;  %6519 = vmatpush1.msra.mxu0 %v6260_v61  ;;  %6359 = vmatprep.subr.mxu1 %v6255_v26 }
 0x7da   :  { %v6219_v50 = vadd.f32 %v6181_v39, %v6147_v8  ;;  %v6221_v17 = vadd.f32 %v6181_v39, %v6149_v9  ;;  %v6250_v3 = vmax.f32 %v6218_v12, 0.0  ;;  %v6252_v60 = vmax.f32 %v6220_v28, 0.0  ;;  %6360 = vmatpush1.msra.mxu1 %v6254_v21 }
 0x7db   :  { %6520 = vmatprep.subr.mxu0 %v6257_v47 }
 0x7dc   :  { %6521 = vmatpush1.msra.mxu0 %v6256_v52  ;;  %v6251_v63 = vmax.f32 %v6219_v50, 0.0  ;;  %v6253_v19 = vmax.f32 %v6221_v17, 0.0 }
 0x7de   :  { %6361 = vmatprep.subr.mxu1 %v6251_v63  ;;  %6522 = vmatprep.subr.mxu0 %v6253_v19 }
 0x7df   :  { %6362 = vmatpush1.msra.mxu1 %v6250_v3  ;;  %6523 = vmatpush1.msra.mxu0 %v6252_v60 }
 0x7e0   :  { %8120 = vmatmul.mubr.msk.f32.vlgmr.msra.gmra.mxu1 %vm6282_vm3, %v56_v35  ;;  %8136 = vmatmul.mubr.msk.f32.vlgmr.msra.gmra.mxu0 %vm6282_vm3, %v56_v35 }
 0x7e1   :  { %6401 = vmatprep.mubr.f32.mxu1 %v11919_v22  ;;  %6562 = vmatprep.mubr.f32.mxu0 %v11919_v22 }
 0x7e2   :  { %7680 = vmatprep.subr.mxu0 %v11919_v22 }
 0x7e4   :  { %8121 = vmatmul.mubr.msk.f32.gmra.mxu1 %vm6282_vm3, %v57_v33  ;;  %8137 = vmatmul.mubr.msk.f32.gmra.mxu0 %vm6282_vm3, %v57_v33 }
 0x7e5   :  { %6407 = vmatprep.mubr.f32.mxu1 %v11919_v22  ;;  %6568 = vmatprep.mubr.f32.mxu0 %v11919_v22 }
 0x7e8   :  { %8122 = vmatmul.mubr.msk.f32.gmra.mxu1 %vm6282_vm3, %v58_v31  ;;  %8138 = vmatmul.mubr.msk.f32.gmra.mxu0 %vm6282_vm3, %v58_v31 }
 0x7e9   :  { %6413 = vmatprep.mubr.f32.mxu1 %v11919_v22  ;;  %6574 = vmatprep.mubr.f32.mxu0 %v11919_v22 }
 0x7ec   :  { %8123 = vmatmul.mubr.msk.f32.gmra.mxu1 %vm6282_vm3, %v59_v1  ;;  %8139 = vmatmul.mubr.msk.f32.gmra.mxu0 %vm6282_vm3, %v59_v1 }
 0x7ed   :  { %6419 = vmatprep.mubr.f32.mxu1 %v11919_v22  ;;  %6580 = vmatprep.mubr.f32.mxu0 %v11919_v22 }
 0x7f0   :  { %8124 = vmatmul.mubr.msk.f32.gmra.mxu1 %vm6282_vm3, %v60_v23  ;;  %8140 = vmatmul.mubr.msk.f32.gmra.mxu0 %vm6282_vm3, %v60_v23 }
 0x7f1   :  { %6425 = vmatprep.mubr.f32.mxu1 %v11919_v22  ;;  %6586 = vmatprep.mubr.f32.mxu0 %v11919_v22 }
 0x7f4   :  { %8125 = vmatmul.mubr.msk.f32.gmra.mxu1 %vm6282_vm3, %v61_v0  ;;  %8141 = vmatmul.mubr.msk.f32.gmra.mxu0 %vm6282_vm3, %v61_v0 }
 0x7f5   :  { %6431 = vmatprep.mubr.f32.mxu1 %v11919_v22  ;;  %6592 = vmatprep.mubr.f32.mxu0 %v11919_v22 }
 0x7f8   :  { %8126 = vmatmul.mubr.msk.f32.gmra.mxu1 %vm6282_vm3, %v62_v30  ;;  %8142 = vmatmul.mubr.msk.f32.gmra.mxu0 %vm6282_vm3, %v62_v30 }
 0x7f9   :  { %6437 = vmatprep.mubr.f32.mxu1 %v11919_v22  ;;  %6598 = vmatprep.mubr.f32.mxu0 %v11919_v22 }
 0x7fc   :  { %8127 = vmatmul.mubr.msk.f32.gmra.mxu1 %vm6282_vm3, %v63_v15  ;;  %8143 = vmatmul.mubr.msk.f32.gmra.mxu0 %vm6282_vm3, %v63_v15 }
 0x7fd   :  { %6443 = vmatprep.mubr.f32.mxu1 %v11919_v22  ;;  %6604 = vmatprep.mubr.f32.mxu0 %v11919_v22 }
 0x800   :  { %8128 = vmatmul.mubr.msk.f32.gmra.mxu1 %vm6282_vm3, %v64_v42  ;;  %8144 = vmatmul.mubr.msk.f32.gmra.mxu0 %vm6282_vm3, %v64_v42 }
 0x801   :  { %6449 = vmatprep.mubr.f32.mxu1 %v11919_v22  ;;  %6610 = vmatprep.mubr.f32.mxu0 %v11919_v22 }
 0x804   :  { %8129 = vmatmul.mubr.msk.f32.gmra.mxu1 %vm6282_vm3, %v65_v40  ;;  %8145 = vmatmul.mubr.msk.f32.gmra.mxu0 %vm6282_vm3, %v65_v40 }
 0x805   :  { %6455 = vmatprep.mubr.f32.mxu1 %v11919_v22  ;;  %6616 = vmatprep.mubr.f32.mxu0 %v11919_v22 }
 0x808   :  { %8130 = vmatmul.mubr.msk.f32.gmra.mxu1 %vm6282_vm3, %v66_v53  ;;  %8146 = vmatmul.mubr.msk.f32.gmra.mxu0 %vm6282_vm3, %v66_v53 }
 0x809   :  { %6461 = vmatprep.mubr.f32.mxu1 %v11919_v22  ;;  %6622 = vmatprep.mubr.f32.mxu0 %v11919_v22 }
 0x80c   :  { %8131 = vmatmul.mubr.msk.f32.gmra.mxu1 %vm6282_vm3, %v67_v54  ;;  %8147 = vmatmul.mubr.msk.f32.gmra.mxu0 %vm6282_vm3, %v67_v54 }
 0x80d   :  { %6467 = vmatprep.mubr.f32.mxu1 %v11919_v22  ;;  %6628 = vmatprep.mubr.f32.mxu0 %v11919_v22 }
 0x810   :  { %8132 = vmatmul.mubr.msk.f32.gmra.mxu1 %vm6282_vm3, %v68_v56  ;;  %8148 = vmatmul.mubr.msk.f32.gmra.mxu0 %vm6282_vm3, %v68_v56 }
 0x811   :  { %6473 = vmatprep.mubr.f32.mxu1 %v11919_v22  ;;  %6634 = vmatprep.mubr.f32.mxu0 %v11919_v22 }
 0x814   :  { %8133 = vmatmul.mubr.msk.f32.gmra.mxu1 %vm6282_vm3, %v69_v43  ;;  %8149 = vmatmul.mubr.msk.f32.gmra.mxu0 %vm6282_vm3, %v69_v43 }
 0x815   :  { %6479 = vmatprep.mubr.f32.mxu1 %v11919_v22  ;;  %6640 = vmatprep.mubr.f32.mxu0 %v11919_v22 }
 0x818   :  { %8134 = vmatmul.mubr.msk.f32.gmra.mxu1 %vm6282_vm3, %v70_v34  ;;  %8150 = vmatmul.mubr.msk.f32.gmra.mxu0 %vm6282_vm3, %v70_v34 }
 0x819   :  { %6485 = vmatprep.mubr.f32.mxu1 %v11919_v22  ;;  %6646 = vmatprep.mubr.f32.mxu0 %v11919_v22 }
 0x81c   :  { %8135 = vmatmul.mubr.msk.f32.gmra.mxu1 %vm6282_vm3, %v71_v11  ;;  %8151 = vmatmul.mubr.msk.f32.gmra.mxu0 %vm6282_vm3, %v71_v11 }
 0x8a0   :  { %v10818_v14 = vpop.f32.mrf.mxu1  ;;  %v10820_v29 = vpop.f32.mrf.mxu0 }
 0x8a1   :  { %v6750_v20 = vmul.f32 %v10818_v14, %v10818_v14  ;;  %v6752_v36 = vmul.f32 %v10820_v29, %v10820_v29 }
 0x8a2   :  { %v10822_v41 = vpop.f32.mrf.mxu1  ;;  %v10824_v57 = vpop.f32.mrf.mxu0 }
 0x8a3   :  { %v6653_v49 = vadd.f32 %v10822_v41, %v10818_v14  ;;  %v6751_v58 = vmul.f32 %v10822_v41, %v10822_v41  ;;  %v6753_v37 = vmul.f32 %v10824_v57, %v10824_v57  ;;  %v6656_v5 = vsel %vm6655_vm4, %v10824_v57, 0.0 }
 0x8a4   :  { %v10834_v18 = vpop.f32.mrf.mxu1  ;;  %v10836_v13 = vpop.f32.mrf.mxu0 }
 0x8a5   :  { %v6814_v55 = vadd.f32 %v6751_v58, %v6750_v20  ;;  %v6654_v6 = vadd.f32 %v6653_v49, %v10820_v29  ;;  %v6754_v45 = vmul.f32 %v10834_v18, %v10834_v18  ;;  %v6756_v62 = vmul.f32 %v10836_v13, %v10836_v13 }
 0x8a6   :  { %v10845_v32 = vpop.f32.mrf.mxu1  ;;  %v10847_v51 = vpop.f32.mrf.mxu0  ;;  %v6816_v4 = vsel %vm6655_vm4, %v6753_v37, 0.0 }
 0x8a7   :  { %v6815_v59 = vadd.f32 %v6814_v55, %v6752_v36  ;;  %v6660_v27 = vadd.f32 %v10845_v32, %v10834_v18  ;;  %v6755_v2 = vmul.f32 %v10845_v32, %v10845_v32  ;;  %v6757_v46 = vmul.f32 %v10847_v51, %v10847_v51 }
 0x8a8   :  { %v10855_v61 = vpop.f32.mrf.mxu1  ;;  %v6657_v38 = vadd.f32 %v6656_v5, %v6654_v6  ;;  %v10859_v44 = vpop.f32.mrf.mxu0  ;;  %v6662_v16 = vsel %vm6655_vm4, %v10847_v51, 0.0 }
 0x8a9   :  { %v6820_v25 = vadd.f32 %v6755_v2, %v6754_v45  ;;  %v6758_v10 = vmul.f32 %v10855_v61, %v10855_v61  ;;  %v6661_v48 = vadd.f32 %v6660_v27, %v10836_v13  ;;  %v6760_v8 = vmul.f32 %v10859_v44, %v10859_v44 }
 0x8aa   :  { %6658 = vadd.xlane.f32.xlu1 %v6657_v38  ;;  %v10867_v7 = vpop.f32.mrf.mxu1  ;;  %v6817_v24 = vadd.f32 %v6816_v4, %v6815_v59  ;;  %v10871_v9 = vpop.f32.mrf.mxu0  ;;  %v6822_v12 = vsel %vm6655_vm4, %v6757_v46, 0.0 }
 0x8ab   :  { %v6821_v21 = vadd.f32 %v6820_v25, %v6756_v62  ;;  %v6666_v52 = vadd.f32 %v10867_v7, %v10855_v61  ;;  %v6759_v39 = vmul.f32 %v10867_v7, %v10867_v7  ;;  %v6761_v26 = vmul.f32 %v10871_v9, %v10871_v9 }
 0x8ac   :  { %6818 = vadd.xlane.f32.xlu0 %v6817_v24  ;;  %v10878_v28 = vpop.f32.mrf.mxu1  ;;  %v10882_v47 = vpop.f32.mrf.mxu0  ;;  %v6668_v3 = vsel %vm6655_vm4, %v10871_v9, 0.0  ;;  %v6663_v33 = vadd.f32 %v6662_v16, %v6661_v48 }
 0x8ad   :  { %v6826_v50 = vadd.f32 %v6759_v39, %v6758_v10  ;;  %v6762_v17 = vmul.f32 %v10878_v28, %v10878_v28  ;;  %v6667_v60 = vadd.f32 %v6666_v52, %v10859_v44  ;;  %v6764_v19 = vmul.f32 %v10882_v47, %v10882_v47 }
 0x8ae   :  { %v10889_v63 = vpop.f32.mrf.mxu1  ;;  %v6823_v35 = vadd.f32 %v6822_v12, %v6821_v21  ;;  %v10893_v31 = vpop.f32.mrf.mxu0  ;;  %v6828_v30 = vsel %vm6655_vm4, %v6761_v26, 0.0 }
 0x8af   :  { %v6827_v1 = vadd.f32 %v6826_v50, %v6760_v8  ;;  %v6672_v23 = vadd.f32 %v10889_v63, %v10878_v28  ;;  %v6763_v0 = vmul.f32 %v10889_v63, %v10889_v63  ;;  %v6765_v42 = vmul.f32 %v10893_v31, %v10893_v31 }
 0x8b0   :  { %6824 = vadd.xlane.f32.xlu1 %v6823_v35  ;;  %6664 = vadd.xlane.f32.xlu0 %v6663_v33  ;;  %v10900_v15 = vpop.f32.mrf.mxu1  ;;  %v10904_v40 = vpop.f32.mrf.mxu0  ;;  %v6674_v56 = vsel %vm6655_vm4, %v10893_v31, 0.0  ;;  %v6669_v49 = vadd.f32 %v6668_v3, %v6667_v60 }
 0x8b1   :  { %v6832_v53 = vadd.f32 %v6763_v0, %v6762_v17  ;;  %v6766_v54 = vmul.f32 %v10900_v15, %v10900_v15  ;;  %v6673_v43 = vadd.f32 %v6672_v23, %v10882_v47  ;;  %v6768_v11 = vmul.f32 %v10904_v40, %v10904_v40 }
 0x8b2   :  { %v10911_v34 = vpop.f32.mrf.mxu1  ;;  %v6829_v20 = vadd.f32 %v6828_v30, %v6827_v1  ;;  %v10915_v58 = vpop.f32.mrf.mxu0  ;;  %v6834_v45 = vsel %vm6655_vm4, %v6765_v42, 0.0 }
 0x8b3   :  { %v6833_v36 = vadd.f32 %v6832_v53, %v6764_v19  ;;  %v6678_v55 = vadd.f32 %v10911_v34, %v10900_v15  ;;  %v6767_v6 = vmul.f32 %v10911_v34, %v10911_v34  ;;  %v6769_v5 = vmul.f32 %v10915_v58, %v10915_v58 }
 0x8b4   :  { %6830 = vadd.xlane.f32.xlu1 %v6829_v20  ;;  %6670 = vadd.xlane.f32.xlu0 %v6669_v49  ;;  %v10922_v37 = vpop.f32.mrf.mxu1  ;;  %v10926_v59 = vpop.f32.mrf.mxu0  ;;  %v6680_v62 = vsel %vm6655_vm4, %v10915_v58, 0.0  ;;  %v6675_v4 = vadd.f32 %v6674_v56, %v6673_v43 }
 0x8b5   :  { %v6838_v27 = vadd.f32 %v6767_v6, %v6766_v54  ;;  %v6770_v2 = vmul.f32 %v10922_v37, %v10922_v37  ;;  %v6679_v46 = vadd.f32 %v6678_v55, %v10904_v40  ;;  %v6772_v25 = vmul.f32 %v10926_v59, %v10926_v59 }
 0x8b6   :  { %v10933_v38 = vpop.f32.mrf.mxu1  ;;  %v6835_v10 = vadd.f32 %v6834_v45, %v6833_v36  ;;  %v10937_v48 = vpop.f32.mrf.mxu0  ;;  %v6840_v21 = vsel %vm6655_vm4, %v6769_v5, 0.0 }
 0x8b7   :  { %v6839_v16 = vadd.f32 %v6838_v27, %v6768_v11  ;;  %v6684_v8 = vadd.f32 %v10933_v38, %v10922_v37  ;;  %v6771_v24 = vmul.f32 %v10933_v38, %v10933_v38  ;;  %v6773_v39 = vmul.f32 %v10937_v48, %v10937_v48 }
 0x8b8   :  { %6836 = vadd.xlane.f32.xlu1 %v6835_v10  ;;  %6676 = vadd.xlane.f32.xlu0 %v6675_v4  ;;  %v10944_v52 = vpop.f32.mrf.mxu1  ;;  %v10948_v12 = vpop.f32.mrf.mxu0  ;;  %v6686_v17 = vsel %vm6655_vm4, %v10937_v48, 0.0  ;;  %v6681_v33 = vadd.f32 %v6680_v62, %v6679_v46 }
 0x8b9   :  { %v6844_v26 = vadd.f32 %v6771_v24, %v6770_v2  ;;  %v6774_v50 = vmul.f32 %v10944_v52, %v10944_v52  ;;  %v6685_v3 = vadd.f32 %v6684_v8, %v10926_v59  ;;  %v6776_v19 = vmul.f32 %v10948_v12, %v10948_v12 }
 0x8ba   :  { %v10955_v60 = vpop.f32.mrf.mxu1  ;;  %v6841_v35 = vadd.f32 %v6840_v21, %v6839_v16  ;;  %v10959_v1 = vpop.f32.mrf.mxu0  ;;  %v6846_v42 = vsel %vm6655_vm4, %v6773_v39, 0.0 }
 0x8bb   :  { %v6845_v23 = vadd.f32 %v6844_v26, %v6772_v25  ;;  %v6690_v0 = vadd.f32 %v10955_v60, %v10944_v52  ;;  %v6775_v30 = vmul.f32 %v10955_v60, %v10955_v60  ;;  %v6777_v54 = vmul.f32 %v10959_v1, %v10959_v1 }
 0x8bc   :  { %6842 = vadd.xlane.f32.xlu1 %v6841_v35  ;;  %6682 = vadd.xlane.f32.xlu0 %v6681_v33  ;;  %v10966_v53 = vpop.f32.mrf.mxu1  ;;  %v10970_v56 = vpop.f32.mrf.mxu0  ;;  %v6692_v20 = vsel %vm6655_vm4, %v10959_v1, 0.0  ;;  %v6687_v45 = vadd.f32 %v6686_v17, %v6685_v3 }
 0x8bd   :  { %v6850_v43 = vadd.f32 %v6775_v30, %v6774_v50  ;;  %v6778_v11 = vmul.f32 %v10966_v53, %v10966_v53  ;;  %v6691_v49 = vadd.f32 %v6690_v0, %v10948_v12  ;;  %v6780_v55 = vmul.f32 %v10970_v56, %v10970_v56 }
 0x8be   :  { %v10977_v36 = vpop.f32.mrf.mxu1  ;;  %v6847_v6 = vadd.f32 %v6846_v42, %v6845_v23  ;;  %v10981_v5 = vpop.f32.mrf.mxu0  ;;  %v6852_v46 = vsel %vm6655_vm4, %v6777_v54, 0.0 }
 0x8bf   :  { %v6851_v27 = vadd.f32 %v6850_v43, %v6776_v19  ;;  %v6696_v2 = vadd.f32 %v10977_v36, %v10966_v53  ;;  %v6779_v62 = vmul.f32 %v10977_v36, %v10977_v36  ;;  %v6781_v10 = vmul.f32 %v10981_v5, %v10981_v5 }
 0x8c0   :  { %6848 = vadd.xlane.f32.xlu1 %v6847_v6  ;;  %6688 = vadd.xlane.f32.xlu0 %v6687_v45  ;;  %v10988_v25 = vpop.f32.mrf.mxu1  ;;  %v10992_v4 = vpop.f32.mrf.mxu0  ;;  %v6698_v24 = vsel %vm6655_vm4, %v10981_v5, 0.0  ;;  %v6693_v17 = vadd.f32 %v6692_v20, %v6691_v49 }
 0x8c1   :  { %v6856_v16 = vadd.f32 %v6779_v62, %v6778_v11  ;;  %v6782_v8 = vmul.f32 %v10988_v25, %v10988_v25  ;;  %v6697_v21 = vadd.f32 %v6696_v2, %v10970_v56  ;;  %v6784_v26 = vmul.f32 %v10992_v4, %v10992_v4 }
 0x8c2   :  { %v10999_v39 = vpop.f32.mrf.mxu1  ;;  %v6853_v50 = vadd.f32 %v6852_v46, %v6851_v27  ;;  %v11003_v3 = vpop.f32.mrf.mxu0  ;;  %v6858_v23 = vsel %vm6655_vm4, %v6781_v10, 0.0 }
 0x8c3   :  { %v6857_v19 = vadd.f32 %v6856_v16, %v6780_v55  ;;  %v6702_v35 = vadd.f32 %v10999_v39, %v10988_v25  ;;  %v6783_v33 = vmul.f32 %v10999_v39, %v10999_v39  ;;  %v6785_v30 = vmul.f32 %v11003_v3, %v11003_v3 }
 0x8c4   :  { %6854 = vadd.xlane.f32.xlu1 %v6853_v50  ;;  %6694 = vadd.xlane.f32.xlu0 %v6693_v17  ;;  %v11010_v0 = vpop.f32.mrf.mxu1  ;;  %v11014_v42 = vpop.f32.mrf.mxu0  ;;  %v6704_v11 = vsel %vm6655_vm4, %v11003_v3, 0.0  ;;  %v6699_v45 = vadd.f32 %v6698_v24, %v6697_v21 }
 0x8c5   :  { %11925 = vst [vmem:[#allocation10_spill] sm:$0xff] %v11014_v42  ;;  %v6862_v54 = vadd.f32 %v6783_v33, %v6782_v8  ;;  %v6786_v43 = vmul.f32 %v11010_v0, %v11010_v0  ;;  %v6703_v20 = vadd.f32 %v6702_v35, %v10992_v4  ;;  %v6788_v55 = vmul.f32 %v11014_v42, %v11014_v42 }
 0x8c6   :  { %v11021_v49 = vpop.f32.mrf.mxu1  ;;  %v6859_v6 = vadd.f32 %v6858_v23, %v6857_v19  ;;  %v11025_v27 = vpop.f32.mrf.mxu0  ;;  %v6864_v10 = vsel %vm6655_vm4, %v6785_v30, 0.0 }
 0x8c7   :  { %11926 = vst [vmem:[#allocation14_spill] sm:$0xff] %v11021_v49  ;;  %11927 = vst [vmem:[#allocation3_spill] sm:$0xff] %v11025_v27  ;;  %v6863_v2 = vadd.f32 %v6862_v54, %v6784_v26  ;;  %v6708_v62 = vadd.f32 %v11021_v49, %v11010_v0  ;;  %v6787_v46 = vmul.f32 %v11021_v49, %v11021_v49  ;;  %v6710_v26 = vsel %vm6655_vm4, %v11025_v27, 0.0 }
 0x8c8   :  { %6860 = vadd.xlane.f32.xlu1 %v6859_v6  ;;  %6700 = vadd.xlane.f32.xlu0 %v6699_v45  ;;  %v11032_v16 = vpop.f32.mrf.mxu1  ;;  %v6789_v8 = vmul.f32 %v11025_v27, %v11025_v27  ;;  %v11036_v50 = vpop.f32.mrf.mxu0  ;;  %v6705_v23 = vadd.f32 %v6704_v11, %v6703_v20 }
 0x8c9   :  { %11928 = vst [vmem:[#allocation15_spill] sm:$0xff] %v11032_v16  ;;  %11929 = vst [vmem:[#allocation17_spill] sm:$0xff] %v11036_v50  ;;  %v6868_v24 = vadd.f32 %v6787_v46, %v6786_v43  ;;  %v6790_v21 = vmul.f32 %v11032_v16, %v11032_v16  ;;  %v6709_v17 = vadd.f32 %v6708_v62, %v11014_v42 }
 0x8ca   :  { %v11043_v19 = vpop.f32.mrf.mxu1  ;;  %v6792_v35 = vmul.f32 %v11036_v50, %v11036_v50  ;;  %v6865_v33 = vadd.f32 %v6864_v10, %v6863_v2  ;;  %v11047_v30 = vpop.f32.mrf.mxu0  ;;  %v6870_v45 = vsel %vm6655_vm4, %v6789_v8, 0.0 }
 0x8cb   :  { %11930 = vst [vmem:[#allocation2_spill] sm:$0xff] %v11043_v19  ;;  %11931 = vst [vmem:[#allocation6_spill] sm:$0xff] %v11047_v30  ;;  %v6869_v54 = vadd.f32 %v6868_v24, %v6788_v55  ;;  %v6714_v43 = vadd.f32 %v11043_v19, %v11032_v16  ;;  %v6791_v6 = vmul.f32 %v11043_v19, %v11043_v19  ;;  %v6716_v55 = vsel %vm6655_vm4, %v11047_v30, 0.0 }
 0x8cc   :  { %6866 = vadd.xlane.f32.xlu1 %v6865_v33  ;;  %6706 = vadd.xlane.f32.xlu0 %v6705_v23  ;;  %v11054_v62 = vpop.f32.mrf.mxu1  ;;  %v6793_v46 = vmul.f32 %v11047_v30, %v11047_v30  ;;  %v11058_v2 = vpop.f32.mrf.mxu0  ;;  %v6711_v23 = vadd.f32 %v6710_v26, %v6709_v17 }
 0x8cd   :  { %11932 = vst [vmem:[#allocation16_spill] sm:$0xff] %v11054_v62  ;;  %11933 = vst [vmem:[#allocation21_spill] sm:$0xff] %v11058_v2  ;;  %v6874_v11 = vadd.f32 %v6791_v6, %v6790_v21  ;;  %v6794_v20 = vmul.f32 %v11054_v62, %v11054_v62  ;;  %v6715_v10 = vadd.f32 %v6714_v43, %v11036_v50 }
 0x8ce   :  { %v11065_v24 = vpop.f32.mrf.mxu1  ;;  %v6796_v8 = vmul.f32 %v11058_v2, %v11058_v2  ;;  %v6871_v33 = vadd.f32 %v6870_v45, %v6869_v54  ;;  %v11069_v19 = vpop.f32.mrf.mxu0  ;;  %v6876_v30 = vsel %vm6655_vm4, %v6793_v46, 0.0 }
 0x8cf   :  { %11934 = vst [vmem:[#allocation5_spill] sm:$0xff] %v11065_v24  ;;  %11935 = vst [vmem:[#allocation22_spill] sm:$0xff] %v11069_v19  ;;  %v6875_v16 = vadd.f32 %v6874_v11, %v6792_v35  ;;  %v6720_v21 = vadd.f32 %v11065_v24, %v11054_v62  ;;  %v6795_v6 = vmul.f32 %v11065_v24, %v11065_v24  ;;  %v6722_v35 = vsel %vm6655_vm4, %v11069_v19, 0.0 }
 0x8d0   :  { %6872 = vadd.xlane.f32.xlu1 %v6871_v33  ;;  %6712 = vadd.xlane.f32.xlu0 %v6711_v23  ;;  %v11076_v43 = vpop.f32.mrf.mxu1  ;;  %v6797_v50 = vmul.f32 %v11069_v19, %v11069_v19  ;;  %v11080_v54 = vpop.f32.mrf.mxu0  ;;  %v6717_v23 = vadd.f32 %v6716_v55, %v6715_v10 }
 0x8d1   :  { %11936 = vst [vmem:[#allocation24_spill] sm:$0xff] %v11076_v43  ;;  %11937 = vst [vmem:[#allocation4_spill] sm:$0xff] %v11080_v54  ;;  %v6880_v26 = vadd.f32 %v6795_v6, %v6794_v20  ;;  %v6798_v17 = vmul.f32 %v11076_v43, %v11076_v43  ;;  %v6721_v45 = vadd.f32 %v6720_v21, %v11058_v2 }
 0x8d2   :  { %v11087_v11 = vpop.f32.mrf.mxu1  ;;  %v6800_v46 = vmul.f32 %v11080_v54, %v11080_v54  ;;  %v6877_v33 = vadd.f32 %v6876_v30, %v6875_v16  ;;  %v11091_v24 = vpop.f32.mrf.mxu0  ;;  %v6882_v19 = vsel %vm6655_vm4, %v6797_v50, 0.0 }
 0x8d3   :  { %11938 = vst [vmem:[#allocation9_spill] sm:$0xff] %v11087_v11  ;;  %11939 = vst [vmem:[#allocation23_spill] sm:$0xff] %v11091_v24  ;;  %v6881_v62 = vadd.f32 %v6880_v26, %v6796_v8  ;;  %v6726_v20 = vadd.f32 %v11087_v11, %v11076_v43  ;;  %v6799_v6 = vmul.f32 %v11087_v11, %v11087_v11  ;;  %v6728_v10 = vsel %vm6655_vm4, %v11091_v24, 0.0 }
 0x8d4   :  { %6878 = vadd.xlane.f32.xlu1 %v6877_v33  ;;  %6718 = vadd.xlane.f32.xlu0 %v6717_v23  ;;  %v11098_v21 = vpop.f32.mrf.mxu1  ;;  %v6801_v2 = vmul.f32 %v11091_v24, %v11091_v24  ;;  %v11102_v16 = vpop.f32.mrf.mxu0  ;;  %v6723_v23 = vadd.f32 %v6722_v35, %v6721_v45 }
 0x8d5   :  { %11940 = vst [vmem:[#allocation8_spill] sm:$0xff] %v11098_v21  ;;  %11941 = vst [vmem:[#allocation29_spill] sm:$0xff] %v11102_v16  ;;  %v6886_v30 = vadd.f32 %v6799_v6, %v6798_v17  ;;  %v6802_v55 = vmul.f32 %v11098_v21, %v11098_v21  ;;  %v6727_v8 = vadd.f32 %v6726_v20, %v11080_v54 }
 0x8d6   :  { %v11109_v26 = vpop.f32.mrf.mxu1  ;;  %v6804_v50 = vmul.f32 %v11102_v16, %v11102_v16  ;;  %v6883_v33 = vadd.f32 %v6882_v19, %v6881_v62  ;;  %v11113_v11 = vpop.f32.mrf.mxu0  ;;  %v6888_v24 = vsel %vm6655_vm4, %v6801_v2, 0.0 }
 0x8d7   :  { %11942 = vst [vmem:[#allocation32_spill] sm:$0xff] %v11109_v26  ;;  %11943 = vst [vmem:[#allocation7_spill] sm:$0xff] %v11113_v11  ;;  %v6887_v43 = vadd.f32 %v6886_v30, %v6800_v46  ;;  %v6732_v17 = vadd.f32 %v11109_v26, %v11098_v21  ;;  %v6803_v6 = vmul.f32 %v11109_v26, %v11109_v26  ;;  %v6734_v45 = vsel %vm6655_vm4, %v11113_v11, 0.0 }
 0x8d8   :  { %6884 = vadd.xlane.f32.xlu1 %v6883_v33  ;;  %6724 = vadd.xlane.f32.xlu0 %v6723_v23  ;;  %v11120_v20 = vpop.f32.mrf.mxu1  ;;  %v6805_v54 = vmul.f32 %v11113_v11, %v11113_v11  ;;  %v11124_v19 = vpop.f32.mrf.mxu0  ;;  %v6729_v23 = vadd.f32 %v6728_v10, %v6727_v8 }
 0x8d9   :  { %11944 = vst [vmem:[#allocation13_spill] sm:$0xff] %v11120_v20  ;;  %11945 = vst [vmem:[#allocation30_spill] sm:$0xff] %v11124_v19  ;;  %v6892_v62 = vadd.f32 %v6803_v6, %v6802_v55  ;;  %v6806_v35 = vmul.f32 %v11120_v20, %v11120_v20  ;;  %v6733_v46 = vadd.f32 %v6732_v17, %v11102_v16 }
 0x8da   :  { %v11131_v30 = vpop.f32.mrf.mxu1  ;;  %v6808_v2 = vmul.f32 %v11124_v19, %v11124_v19  ;;  %v6889_v33 = vadd.f32 %v6888_v24, %v6887_v43  ;;  %v11135_v26 = vpop.f32.mrf.mxu0  ;;  %v6894_v11 = vsel %vm6655_vm4, %v6805_v54, 0.0 }
 0x8db   :  { %11946 = vst [vmem:[#allocation12_spill] sm:$0xff] %v11131_v30  ;;  %11947 = vst [vmem:[#allocation11_spill] sm:$0xff] %v11135_v26  ;;  %v6893_v21 = vadd.f32 %v6892_v62, %v6804_v50  ;;  %v6738_v55 = vadd.f32 %v11131_v30, %v11120_v20  ;;  %v6807_v6 = vmul.f32 %v11131_v30, %v11131_v30  ;;  %v6740_v8 = vsel %vm6655_vm4, %v11135_v26, 0.0 }
 0x8dc   :  { %6890 = vadd.xlane.f32.xlu1 %v6889_v33  ;;  %6730 = vadd.xlane.f32.xlu0 %v6729_v23  ;;  %v11142_v17 = vpop.f32.mrf.mxu1  ;;  %v6809_v16 = vmul.f32 %v11135_v26, %v11135_v26  ;;  %v11146_v24 = vpop.f32.mrf.mxu0  ;;  %v6735_v33 = vadd.f32 %v6734_v45, %v6733_v46 }
 0x8dd   :  { %11948 = vst [vmem:[#allocation20_spill] sm:$0xff] %v11142_v17  ;;  %11949 = vst [vmem:[#allocation19_spill] sm:$0xff] %v11146_v24  ;;  %v6898_v43 = vadd.f32 %v6807_v6, %v6806_v35  ;;  %v6810_v10 = vmul.f32 %v11142_v17, %v11142_v17  ;;  %v6739_v50 = vadd.f32 %v6738_v55, %v11124_v19 }
 0x8de   :  { %v11153_v62 = vpop.f32.mrf.mxu1  ;;  %v6895_v54 = vadd.f32 %v6894_v11, %v6893_v21  ;;  %v11155_v23 = vpop.f32.mrf.mxu0  ;;  %v6900_v30 = vsel %vm6655_vm4, %v6809_v16, 0.0  ;;  %v6812_v26 = vmul.f32 %v11146_v24, %v11146_v24 }
 0x8df   :  { %11950 = vst [vmem:[#allocation18_spill] sm:$0xff] %v11153_v62  ;;  %11951 = vst [vmem:[#allocation27_spill] sm:$0xff] %v11155_v23  ;;  %v6899_v20 = vadd.f32 %v6898_v43, %v6808_v2  ;;  %v6744_v35 = vadd.f32 %v11153_v62, %v11142_v17  ;;  %v6811_v6 = vmul.f32 %v11153_v62, %v11153_v62  ;;  %v6746_v43 = vsel %vm6655_vm4, %v11155_v23, 0.0 }
 0x8e0   :  { %6896 = vadd.xlane.f32.xlu1 %v6895_v54  ;;  %6736 = vadd.xlane.f32.xlu0 %v6735_v33  ;;  %v6813_v11 = vmul.f32 %v11155_v23, %v11155_v23  ;;  %v6741_v16 = vadd.f32 %v6740_v8, %v6739_v50  ;;  %v7485_v8 = vld [vmem:[%s11808_s3 + $0x178] sm:$0xff]  ;;  %v7484_v50 = vld [vmem:[%s11808_s3 + $0x170] sm:$0xff]  ;;  %v7451_v54 = vld [vmem:[%s11808_s3 + $0x68] sm:$0xff] }
 0x8e1   :  { %v6904_v21 = vadd.f32 %v6811_v6, %v6810_v10  ;;  %v6901_v45 = vadd.f32 %v6900_v30, %v6899_v20  ;;  %v6745_v46 = vadd.f32 %v6744_v35, %v11146_v24  ;;  %v112_v10 = vld [vmem:[%s11807_s12] sm:$0xff]  ;;  %v7469_v20 = vld [vmem:[%s11808_s3 + $0xf8] sm:$0xff]  ;;  %v7468_v30 = vld [vmem:[%s11808_s3 + $0xf0] sm:$0xff]  ;;  %7681 = vmatpush1.msra.mxu0 %v7485_v8 }
 0x8e2   :  { %v6906_v2 = vsel %vm6655_vm4, %v6813_v11, 0.0  ;;  %8190 = vmatprep.subr.mxu1 %v7469_v20  ;;  %7682 = vmatprep.subr.mxu0 %v11919_v22  ;;  %v7483_v33 = vld [vmem:[%s11808_s3 + $0x168] sm:$0xff]  ;;  %v7466_v35 = vld [vmem:[%s11808_s3 + $0xe0] sm:$0xff]  ;;  %v7461_v8 = vld [vmem:[%s11808_s3 + $0xb8] sm:$0xff] }
 0x8e3   :  { %v6905_v55 = vadd.f32 %v6904_v21, %v6812_v26  ;;  %v6747_v17 = vadd.f32 %v6746_v43, %v6745_v46  ;;  %v7453_v26 = vld [vmem:[%s11808_s3 + $0x78] sm:$0xff]  ;;  %7683 = vmatpush1.msra.mxu0 %v7484_v50  ;;  %v7482_v6 = vld [vmem:[%s11808_s3 + $0x160] sm:$0xff]  ;;  %v7463_v43 = vld [vmem:[%s11808_s3 + $0xc8] sm:$0xff] }
 0x8e4   :  { %6902 = vadd.xlane.f32.xlu1 %v6901_v45  ;;  %6742 = vadd.xlane.f32.xlu0 %v6741_v16  ;;  %v7450_v11 = vld [vmem:[%s11808_s3 + $0x60] sm:$0xff]  ;;  %v7465_v21 = vld [vmem:[%s11808_s3 + $0xd8] sm:$0xff]  ;;  %v7464_v16 = vld [vmem:[%s11808_s3 + $0xd0] sm:$0xff] }
 0x8e5   :  { %v6907_v62 = vadd.f32 %v6906_v2, %v6905_v55  ;;  %8191 = vmatpush3.msra.mxu1 %v7453_v26  ;;  %7684 = vmatprep.subr.mxu0 %v11919_v22  ;;  %v7481_v45 = vld [vmem:[%s11808_s3 + $0x158] sm:$0xff]  ;;  %v7480_v2 = vld [vmem:[%s11808_s3 + $0x150] sm:$0xff]  ;;  %v7447_v20 = vld [vmem:[%s11808_s3 + $0x48] sm:$0xff] }
 0x8e6   :  { %8192 = vmatprep.subr.mxu1 %v7468_v30  ;;  %7685 = vmatpush1.msra.mxu0 %v7483_v33  ;;  %v7449_v46 = vld [vmem:[%s11808_s3 + $0x58] sm:$0xff]  ;;  %v7448_v55 = vld [vmem:[%s11808_s3 + $0x50] sm:$0xff]  ;;  %v7462_v26 = vld [vmem:[%s11808_s3 + $0xc0] sm:$0xff] }
 0x8e7   :  { %7686 = vmatprep.subr.mxu0 %v11919_v22  ;;  %v7478_v30 = vld [vmem:[%s11808_s3 + $0x140] sm:$0xff]  ;;  %v7477_v50 = vld [vmem:[%s11808_s3 + $0x138] sm:$0xff]  ;;  %v7476_v33 = vld [vmem:[%s11808_s3 + $0x130] sm:$0xff] }
 0x8e8   :  { %6908 = vadd.xlane.f32.xlu1 %v6907_v62  ;;  %6748 = vadd.xlane.f32.xlu0 %v6747_v17  ;;  %v7452_v17 = vld [vmem:[%s11808_s3 + $0x70] sm:$0xff]  ;;  %v7467_v62 = vld [vmem:[%s11808_s3 + $0xe8] sm:$0xff] }
 0x8e9   :  { %8193 = vmatpush3.msra.mxu1 %v7452_v17  ;;  %7687 = vmatpush1.msra.mxu0 %v7482_v6  ;;  %v7446_v17 = vld [vmem:[%s11808_s3 + $0x40] sm:$0xff]  ;;  %v7459_v6 = vld [vmem:[%s11808_s3 + $0xa8] sm:$0xff]  ;;  %v98_v23 = vld [vmem:[%s11809_s11 + $0x10] sm:$0xff] }
 0x8ea   :  { %8194 = vmatprep.subr.mxu1 %v7467_v62  ;;  %7688 = vmatprep.subr.mxu0 %v11919_v22  ;;  %v7445_v62 = vld [vmem:[%s11808_s3 + $0x38] sm:$0xff] }
 0x8eb   :  { %8195 = vmatpush3.msra.mxu1 %v7451_v54  ;;  %7689 = vmatpush1.msra.mxu0 %v7481_v45  ;;  %v7460_v54 = vld [vmem:[%s11808_s3 + $0xb0] sm:$0xff]  ;;  %v7458_v45 = vld [vmem:[%s11808_s3 + $0xa0] sm:$0xff] }
 0x8ec   :  { %8196 = vmatprep.subr.mxu1 %v7466_v35  ;;  %7690 = vmatprep.subr.mxu0 %v11919_v22  ;;  %v7444_v35 = vld [vmem:[%s11808_s3 + $0x30] sm:$0xff] }
 0x8ed   :  { %8197 = vmatpush3.msra.mxu1 %v7450_v11  ;;  %7691 = vmatpush1.msra.mxu0 %v7480_v2  ;;  %v7475_v11 = vld [vmem:[%s11808_s3 + $0x128] sm:$0xff]  ;;  %v7457_v2 = vld [vmem:[%s11808_s3 + $0x98] sm:$0xff] }
 0x8ee   :  { %8198 = vmatprep.subr.mxu1 %v7465_v21  ;;  %7692 = vmatprep.subr.mxu0 %v11919_v22  ;;  %v7443_v21 = vld [vmem:[%s11808_s3 + $0x28] sm:$0xff] }
 0x8ef   :  { %8199 = vmatpush3.msra.mxu1 %v7449_v46  ;;  %v7474_v46 = vld [vmem:[%s11808_s3 + $0x120] sm:$0xff] }
 0x8f0   :  { %8200 = vmatprep.subr.mxu1 %v7464_v16  ;;  %v7442_v16 = vld [vmem:[%s11808_s3 + $0x20] sm:$0xff] }
 0x8f1   :  { %8201 = vmatpush3.msra.mxu1 %v7448_v55  ;;  %v7473_v55 = vld [vmem:[%s11808_s3 + $0x118] sm:$0xff] }
 0x8f2   :  { %8202 = vmatprep.subr.mxu1 %v7463_v43 }
 0x8f3   :  { %8203 = vmatpush3.msra.mxu1 %v7447_v20 }
 0x8f4   :  { %8204 = vmatprep.subr.mxu1 %v7462_v26 }
 0x8f5   :  { %8205 = vmatpush3.msra.mxu1 %v7446_v17 }
 0x8f6   :  { %8206 = vmatprep.subr.mxu1 %v7461_v8 }
 0x8f7   :  { %8207 = vmatpush3.msra.mxu1 %v7445_v62 }
 0x8f8   :  { %8208 = vmatprep.subr.mxu1 %v7460_v54 }
 0x8f9   :  { %7232 = vperm.xlu1 %8311, %v112_v10   ;;  %v7479_v10 = vld [vmem:[%s11808_s3 + $0x148] sm:$0xff]  ;;  %8209 = vmatpush3.msra.mxu1 %v7444_v35 }
 0x8fa   :  { %7693 = vmatpush1.msra.mxu0 %v7479_v10  ;;  %8210 = vmatprep.subr.mxu1 %v7459_v6 }
 0x8fb   :  { %7694 = vmatprep.subr.mxu0 %v11919_v22  ;;  %8211 = vmatpush3.msra.mxu1 %v7443_v21 }
 0x8fc   :  { %7695 = vmatpush1.msra.mxu0 %v7478_v30  ;;  %8212 = vmatprep.subr.mxu1 %v7458_v45 }
 0x8fd   :  { %7696 = vmatprep.subr.mxu0 %v11919_v22  ;;  %8213 = vmatpush3.msra.mxu1 %v7442_v16 }
 0x8fe   :  { %7697 = vmatpush1.msra.mxu0 %v7477_v50  ;;  %8214 = vmatprep.subr.mxu1 %v7457_v2 }
 0x8ff   :  { %7698 = vmatprep.subr.mxu0 %v11919_v22 }
 0x900   :  { %7699 = vmatpush1.msra.mxu0 %v7476_v33 }
 0x901   :  { %7700 = vmatprep.subr.mxu0 %v11919_v22 }
 0x902   :  { %7701 = vmatpush1.msra.mxu0 %v7475_v11 }
 0x903   :  { %7702 = vmatprep.subr.mxu0 %v11919_v22 }
 0x904   :  { %7703 = vmatpush1.msra.mxu0 %v7474_v46 }
 0x905   :  { %7704 = vmatprep.subr.mxu0 %v11919_v22 }
 0x906   :  { %7705 = vmatpush1.msra.mxu0 %v7473_v55 }
 0x907   :  { %7706 = vmatprep.subr.mxu0 %v11919_v22 }
 0x933   :  { %v6659_v43 = vpop.xlane.xlu1 %6658 }
 0x934   :  { %v11300_v10 = vmul.f32 0.0025510204, %v6659_v43 }
 0x935   :  { %v6819_v20 = vpop.xlane.xlu0 %6818 }
 0x936   :  { %v6926_v26 = vmul.f32 0.0025510204, %v6819_v20  ;;  %v6942_v30 = vmul.f32 %v11300_v10, %v11300_v10 }
 0x938   :  { %v6958_v17 = vsub.f32 %v6926_v26, %v6942_v30 }
 0x939   :  { %v6825_v8 = vpop.xlane.xlu1 %6824  ;;  %v6665_v50 = vpop.xlane.xlu0 %6664 }
 0x93a   :  { %v6974_v62 = vadd.f32 1e-05, %v6958_v17  ;;  %v11304_v54 = vmul.f32 0.0025510204, %v6665_v50  ;;  %v6927_v33 = vmul.f32 0.0025510204, %v6825_v8 }
 0x93c   :  { %8368 = vrsqrt.f32 %v6974_v62  ;;  %v6943_v35 = vmul.f32 %v11304_v54, %v11304_v54 }
 0x93d   :  { %v6831_v6 = vpop.xlane.xlu1 %6830  ;;  %v6671_v11 = vpop.xlane.xlu0 %6670 }
 0x93e   :  { %v6959_v21 = vsub.f32 %v6927_v33, %v6943_v35  ;;  %v11308_v45 = vmul.f32 0.0025510204, %v6671_v11  ;;  %v6928_v16 = vmul.f32 0.0025510204, %v6831_v6  ;;  %v96_v6 = vld [vmem:[%s11809_s11] sm:$0xff] }
 0x940   :  { %v6975_v46 = vadd.f32 1e-05, %v6959_v21  ;;  %v6944_v2 = vmul.f32 %v11308_v45, %v11308_v45 }
 0x941   :  { %v6837_v55 = vpop.xlane.xlu1 %6836  ;;  %v6677_v43 = vpop.xlane.xlu0 %6676 }
 0x942   :  { %8370 = vrsqrt.f32 %v6975_v46  ;;  %v6960_v20 = vsub.f32 %v6928_v16, %v6944_v2  ;;  %v11312_v26 = vmul.f32 0.0025510204, %v6677_v43  ;;  %v6929_v17 = vmul.f32 0.0025510204, %v6837_v55  ;;  %v7441_v16 = vld [vmem:[%s11808_s3 + $0x18] sm:$0xff]  ;;  %v7472_v2 = vld [vmem:[%s11808_s3 + $0x110] sm:$0xff] }
 0x943   :  { %8215 = vmatpush3.msra.mxu1 %v7441_v16  ;;  %7707 = vmatpush1.msra.mxu0 %v7472_v2  ;;  %v7439_v2 = vld [vmem:[%s11808_s3 + $0x8] sm:$0xff] }
 0x944   :  { %v6976_v30 = vadd.f32 1e-05, %v6960_v20  ;;  %v6945_v8 = vmul.f32 %v11312_v26, %v11312_v26  ;;  %7708 = vmatprep.subr.mxu0 %v11919_v22 }
 0x945   :  { %v6843_v50 = vpop.xlane.xlu1 %6842  ;;  %v6683_v62 = vpop.xlane.xlu0 %6682 }
 0x946   :  { %8372 = vrsqrt.f32 %v6976_v30  ;;  %v6961_v33 = vsub.f32 %v6929_v17, %v6945_v8  ;;  %v11316_v35 = vmul.f32 0.0025510204, %v6683_v62  ;;  %v6930_v21 = vmul.f32 0.0025510204, %v6843_v50  ;;  %v7456_v30 = vld [vmem:[%s11808_s3 + $0x90] sm:$0xff]  ;;  %v7471_v62 = vld [vmem:[%s11808_s3 + $0x108] sm:$0xff] }
 0x947   :  { %8216 = vmatprep.subr.mxu1 %v7456_v30  ;;  %v7440_v50 = vld [vmem:[%s11808_s3 + $0x10] sm:$0xff]  ;;  %7709 = vmatpush1.msra.mxu0 %v7471_v62  ;;  %v7454_v30 = vld [vmem:[%s11808_s3 + $0x80] sm:$0xff]  ;;  %v113_v62 = vld [vmem:[%s11807_s12 + $0x8] sm:$0xff] }
 0x948   :  { %v6977_v11 = vadd.f32 1e-05, %v6961_v33  ;;  %v6946_v46 = vmul.f32 %v11316_v35, %v11316_v35  ;;  %8217 = vmatpush3.msra.mxu1 %v7440_v50  ;;  %7710 = vmatprep.subr.mxu0 %v11919_v22 }
 0x949   :  { %v8369_v55 = vpop.eup %8368  ;;  %v6849_v43 = vpop.xlane.xlu1 %6848 }
 0x94a   :  { %v6689_v20 = vpop.xlane.xlu0 %6688  ;;  %8374 = vrsqrt.f32 %v6977_v11  ;;  %v6962_v17 = vsub.f32 %v6930_v21, %v6946_v46  ;;  %v7070_v33 = vmul.f32 %v8369_v55, %v96_v6  ;;  %v7455_v11 = vld [vmem:[%s11808_s3 + $0x88] sm:$0xff]  ;;  %v6931_v46 = vmul.f32 0.0025510204, %v6849_v43  ;;  %v7470_v6 = vld [vmem:[%s11808_s3 + $0x100] sm:$0xff] }
 0x94b   :  { %v11332_v8 = vmul.f32 0.0025510204, %v6689_v20  ;;  %8218 = vmatprep.subr.mxu1 %v7455_v11  ;;  %v97_v43 = vld [vmem:[%s11809_s11 + $0x8] sm:$0xff]  ;;  %7711 = vmatpush1.msra.mxu0 %v7470_v6  ;;  %v7486_v11 = vld [vmem:[%s11808_s3 + $0x180] sm:$0xff] }
 0x94c   :  { %v6978_v21 = vadd.f32 1e-05, %v6962_v17  ;;  %7088 = vperm.xlu0 %8310, %v7070_v33   ;;  %8219 = vmatpush3.msra.mxu1 %v7439_v2  ;;  %v7438_v33 = vld [vmem:[%s11808_s3] sm:$0xff] }
 0x94d   :  { %v6947_v16 = vmul.f32 %v11332_v8, %v11332_v8  ;;  %v6855_v55 = vpop.xlane.xlu1 %6854  ;;  %8220 = vmatprep.subr.mxu1 %v7454_v30  ;;  %7742 = vmatprep.subr.mxu0 %v11919_v22  ;;  %v114_v22 = vld [vmem:[%s11807_s12 + $0x10] sm:$0xff] }
 0x94e   :  { %v6695_v20 = vpop.xlane.xlu0 %6694  ;;  %8376 = vrsqrt.f32 %v6978_v21  ;;  %8221 = vmatpush3.msra.mxu1 %v7438_v33  ;;  %7743 = vmatpush2.msra.mxu0 %v7486_v11 }
 0x94f   :  { %v6963_v17 = vsub.f32 %v6931_v46, %v6947_v16  ;;  %v11359_v50 = vmul.f32 0.0025510204, %v6695_v20  ;;  %v8371_v2 = vpop.eup %8370  ;;  %v6932_v46 = vmul.f32 0.0025510204, %v6855_v55 }
 0x950   :  { %v7071_v20 = vmul.f32 %v8371_v2, %v97_v43  ;;  %7237 = vperm.xlu0 %8310, %v113_v62  }
 0x951   :  { %v6979_v21 = vadd.f32 1e-05, %v6963_v17  ;;  %v6948_v16 = vmul.f32 %v11359_v50, %v11359_v50  ;;  %v6861_v6 = vpop.xlane.xlu1 %6860 }
 0x952   :  { %v6701_v30 = vpop.xlane.xlu0 %6700  ;;  %7093 = vperm.xlu1 %8311, %v7071_v20   ;;  %v6933_v43 = vmul.f32 0.0025510204, %v6861_v6 }
 0x953   :  { %8378 = vrsqrt.f32 %v6979_v21  ;;  %v6964_v24 = vsub.f32 %v6932_v46, %v6948_v16  ;;  %v11376_v19 = vmul.f32 0.0025510204, %v6701_v30  ;;  %v8373_v55 = vpop.eup %8372  ;;  %v99_v21 = vld [vmem:[%s11809_s11 + $0x18] sm:$0xff] }
 0x954   :  { %v7072_v33 = vmul.f32 %v8373_v55, %v98_v23  ;;  %7242 = vperm.xlu0 %8310, %v114_v22  }
 0x955   :  { %v6980_v17 = vadd.f32 1e-05, %v6964_v24  ;;  %v6949_v62 = vmul.f32 %v11376_v19, %v11376_v19  ;;  %v6867_v11 = vpop.xlane.xlu1 %6866  ;;  %v115_v24 = vld [vmem:[%s11807_s12 + $0x18] sm:$0xff] }
 0x956   :  { %v6707_v2 = vpop.xlane.xlu0 %6706  ;;  %7098 = vperm.xlu1 %8311, %v7072_v33   ;;  %v6934_v30 = vmul.f32 0.0025510204, %v6867_v11  ;;  %v116_v33 = vld [vmem:[%s11807_s12 + $0x20] sm:$0xff] }
 0x957   :  { %8380 = vrsqrt.f32 %v6980_v17  ;;  %v6965_v46 = vsub.f32 %v6933_v43, %v6949_v62  ;;  %v11386_v16 = vmul.f32 0.0025510204, %v6707_v2  ;;  %v8375_v20 = vpop.eup %8374  ;;  %v100_v17 = vld [vmem:[%s11809_s11 + $0x20] sm:$0xff] }
 0x958   :  { %v7073_v22 = vmul.f32 %v8375_v20, %v99_v21  ;;  %7247 = vperm.xlu0 %8310, %v115_v24  }
 0x959   :  { %v6981_v6 = vadd.f32 1e-05, %v6965_v46  ;;  %v6950_v23 = vmul.f32 %v11386_v16, %v11386_v16  ;;  %v6873_v55 = vpop.xlane.xlu1 %6872 }
 0x95a   :  { %v6713_v27 = vpop.xlane.xlu0 %6712  ;;  %7103 = vperm.xlu1 %8311, %v7073_v22   ;;  %v6935_v46 = vmul.f32 0.0025510204, %v6873_v55 }
 0x95b   :  { %8382 = vrsqrt.f32 %v6981_v6  ;;  %v6966_v43 = vsub.f32 %v6934_v30, %v6950_v23  ;;  %v11396_v62 = vmul.f32 0.0025510204, %v6713_v27  ;;  %v8377_v11 = vpop.eup %8376  ;;  %v101_v27 = vld [vmem:[%s11809_s11 + $0x28] sm:$0xff] }
 0x95c   :  { %v7074_v24 = vmul.f32 %v8377_v11, %v100_v17  ;;  %7252 = vperm.xlu0 %8310, %v116_v33   ;;  %v117_v23 = vld [vmem:[%s11807_s12 + $0x28] sm:$0xff] }
 0x95d   :  { %v6982_v2 = vadd.f32 1e-05, %v6966_v43  ;;  %v6951_v21 = vmul.f32 %v11396_v62, %v11396_v62  ;;  %v6879_v20 = vpop.xlane.xlu1 %6878 }
 0x95e   :  { %v6719_v42 = vpop.xlane.xlu0 %6718  ;;  %7108 = vperm.xlu1 %8311, %v7074_v24   ;;  %v6936_v43 = vmul.f32 0.0025510204, %v6879_v20 }
 0x95f   :  { %8384 = vrsqrt.f32 %v6982_v2  ;;  %v6967_v6 = vsub.f32 %v6935_v46, %v6951_v21  ;;  %v11406_v30 = vmul.f32 0.0025510204, %v6719_v42  ;;  %v102_v42 = vld [vmem:[%s11809_s11 + $0x30] sm:$0xff] }
 0x960   :  { %v8379_v22 = vpop.eup %8378  ;;  %7257 = vperm.xlu0 %8310, %v117_v23   ;;  %v118_v21 = vld [vmem:[%s11807_s12 + $0x30] sm:$0xff] }
 0x961   :  { %11952 = vst [vmem:[#allocation26_spill] sm:$0xff] %v11406_v30  ;;  %v6983_v55 = vadd.f32 1e-05, %v6967_v6  ;;  %v6952_v17 = vmul.f32 %v11406_v30, %v11406_v30  ;;  %v7075_v33 = vmul.f32 %v8379_v22, %v101_v27  ;;  %v6885_v11 = vpop.xlane.xlu1 %6884 }
 0x962   :  { %v6725_v49 = vpop.xlane.xlu0 %6724  ;;  %v6937_v6 = vmul.f32 0.0025510204, %v6885_v11 }
 0x963   :  { %8386 = vrsqrt.f32 %v6983_v55  ;;  %v6968_v2 = vsub.f32 %v6936_v43, %v6952_v17  ;;  %v11416_v46 = vmul.f32 0.0025510204, %v6725_v49  ;;  %7113 = vperm.xlu1 %8311, %v7075_v33   ;;  %v103_v49 = vld [vmem:[%s11809_s11 + $0x38] sm:$0xff] }
 0x964   :  { %v8381_v24 = vpop.eup %8380  ;;  %7262 = vperm.xlu0 %8310, %v118_v21   ;;  %v119_v17 = vld [vmem:[%s11807_s12 + $0x38] sm:$0xff] }
 0x965   :  { %11953 = vst [vmem:[#allocation25_spill] sm:$0xff] %v11416_v46  ;;  %v6984_v20 = vadd.f32 1e-05, %v6968_v2  ;;  %v6953_v27 = vmul.f32 %v11416_v46, %v11416_v46  ;;  %v7076_v23 = vmul.f32 %v8381_v24, %v102_v42  ;;  %v6891_v22 = vpop.xlane.xlu1 %6890 }
 0x966   :  { %v6731_v30 = vpop.xlane.xlu0 %6730  ;;  %v6938_v2 = vmul.f32 0.0025510204, %v6891_v22 }
 0x967   :  { %8388 = vrsqrt.f32 %v6984_v20  ;;  %v6969_v55 = vsub.f32 %v6937_v6, %v6953_v27  ;;  %v11426_v43 = vmul.f32 0.0025510204, %v6731_v30  ;;  %7118 = vperm.xlu1 %8311, %v7076_v23   ;;  %v104_v30 = vld [vmem:[%s11809_s11 + $0x40] sm:$0xff] }
 0x968   :  { %v8383_v33 = vpop.eup %8382  ;;  %7267 = vperm.xlu0 %8310, %v119_v17   ;;  %v120_v27 = vld [vmem:[%s11807_s12 + $0x40] sm:$0xff] }
 0x969   :  { %11954 = vst [vmem:[#allocation31_spill] sm:$0xff] %v11426_v43  ;;  %v6985_v11 = vadd.f32 1e-05, %v6969_v55  ;;  %v6954_v42 = vmul.f32 %v11426_v43, %v11426_v43  ;;  %v7077_v21 = vmul.f32 %v8383_v33, %v103_v49  ;;  %v6897_v24 = vpop.xlane.xlu1 %6896 }
 0x96a   :  { %v6737_v46 = vpop.xlane.xlu0 %6736  ;;  %v6939_v55 = vmul.f32 0.0025510204, %v6897_v24 }
 0x96b   :  { %8390 = vrsqrt.f32 %v6985_v11  ;;  %v6970_v20 = vsub.f32 %v6938_v2, %v6954_v42  ;;  %v11436_v6 = vmul.f32 0.0025510204, %v6737_v46  ;;  %7123 = vperm.xlu1 %8311, %v7077_v21   ;;  %v105_v46 = vld [vmem:[%s11809_s11 + $0x48] sm:$0xff] }
 0x96c   :  { %v8385_v23 = vpop.eup %8384  ;;  %7272 = vperm.xlu0 %8310, %v120_v27   ;;  %v121_v42 = vld [vmem:[%s11807_s12 + $0x48] sm:$0xff] }
 0x96d   :  { %11955 = vst [vmem:[#allocation28_spill] sm:$0xff] %v11436_v6  ;;  %v6986_v22 = vadd.f32 1e-05, %v6970_v20  ;;  %v6955_v49 = vmul.f32 %v11436_v6, %v11436_v6  ;;  %v7078_v17 = vmul.f32 %v8385_v23, %v104_v30  ;;  %v6903_v33 = vpop.xlane.xlu1 %6902 }
 0x96e   :  { %v6743_v43 = vpop.xlane.xlu0 %6742  ;;  %v6940_v20 = vmul.f32 0.0025510204, %v6903_v33 }
 0x96f   :  { %8392 = vrsqrt.f32 %v6986_v22  ;;  %v6971_v11 = vsub.f32 %v6939_v55, %v6955_v49  ;;  %v11446_v2 = vmul.f32 0.0025510204, %v6743_v43  ;;  %7128 = vperm.xlu1 %8311, %v7078_v17   ;;  %v106_v43 = vld [vmem:[%s11809_s11 + $0x50] sm:$0xff] }
 0x970   :  { %v8387_v21 = vpop.eup %8386  ;;  %7277 = vperm.xlu0 %8310, %v121_v42   ;;  %v122_v49 = vld [vmem:[%s11807_s12 + $0x50] sm:$0xff] }
 0x971   :  { %v6987_v24 = vadd.f32 1e-05, %v6971_v11  ;;  %v6956_v30 = vmul.f32 %v11446_v2, %v11446_v2  ;;  %v7079_v27 = vmul.f32 %v8387_v21, %v105_v46  ;;  %v6909_v23 = vpop.xlane.xlu1 %6908  ;;  %v107_v21 = vld [vmem:[%s11809_s11 + $0x58] sm:$0xff] }
 0x972   :  { %v6749_v6 = vpop.xlane.xlu0 %6748  ;;  %v6941_v11 = vmul.f32 0.0025510204, %v6909_v23  ;;  %v108_v23 = vld [vmem:[%s11809_s11 + $0x60] sm:$0xff] }
 0x973   :  { %8394 = vrsqrt.f32 %v6987_v24  ;;  %v6972_v22 = vsub.f32 %v6940_v20, %v6956_v30  ;;  %v11456_v55 = vmul.f32 0.0025510204, %v6749_v6  ;;  %7133 = vperm.xlu1 %8311, %v7079_v27   ;;  %v123_v24 = vld [vmem:[%s11807_s12 + $0x58] sm:$0xff] }
 0x974   :  { %v8389_v17 = vpop.eup %8388  ;;  %7282 = vperm.xlu0 %8310, %v122_v49  }
 0x975   :  { %v6988_v33 = vadd.f32 1e-05, %v6972_v22  ;;  %v6957_v46 = vmul.f32 %v11456_v55, %v11456_v55  ;;  %v7080_v42 = vmul.f32 %v8389_v17, %v106_v43  ;;  %v124_v43 = vld [vmem:[%s11807_s12 + $0x60] sm:$0xff]  ;;  %v109_v17 = vld [vmem:[%s11809_s11 + $0x68] sm:$0xff] }
 0x977   :  { %8396 = vrsqrt.f32 %v6988_v33  ;;  %v6973_v6 = vsub.f32 %v6941_v11, %v6957_v46  ;;  %7138 = vperm.xlu1 %8311, %v7080_v42   ;;  %v125_v33 = vld [vmem:[%s11807_s12 + $0x68] sm:$0xff]  ;;  %v110_v42 = vld [vmem:[%s11809_s11 + $0x70] sm:$0xff] }
 0x978   :  { %v8391_v20 = vpop.eup %8390  ;;  %7287 = vperm.xlu0 %8310, %v123_v24  }
 0x979   :  { %v6989_v30 = vadd.f32 1e-05, %v6973_v6  ;;  %v7081_v27 = vmul.f32 %v8391_v20, %v107_v21  ;;  %v126_v21 = vld [vmem:[%s11807_s12 + $0x70] sm:$0xff]  ;;  %v111_v20 = vld [vmem:[%s11809_s11 + $0x78] sm:$0xff] }
 0x97b   :  { %8398 = vrsqrt.f32 %v6989_v30  ;;  %7143 = vperm.xlu1 %8311, %v7081_v27   ;;  %v127_v30 = vld [vmem:[%s11807_s12 + $0x78] sm:$0xff] }
 0x97c   :  { %v8393_v22 = vpop.eup %8392  ;;  %7292 = vperm.xlu0 %8310, %v124_v43   ;;  %v7006_v43 = vsub.f32 %v10818_v14, %v11300_v10  ;;  %v7013_v14 = vsub.f32 %v10847_v51, %v11304_v54  ;;  %v7233_v51 = vpop.permute.xlu1 %7232 }
 0x97d   :  { %v7082_v49 = vmul.f32 %v8393_v22, %v108_v23  ;;  %v7007_v22 = vsub.f32 %v10822_v41, %v11300_v10  ;;  %v7014_v41 = vsub.f32 %v10855_v61, %v11308_v45 }
 0x97f   :  { %7148 = vperm.xlu1 %8311, %v7082_v49   ;;  %v7008_v49 = vsub.f32 %v10820_v29, %v11300_v10  ;;  %v7015_v29 = vsub.f32 %v10867_v7, %v11308_v45  ;;  %v7020_v7 = vsub.f32 %v10882_v47, %v11312_v26 }
 0x980   :  { %v8395_v11 = vpop.eup %8394  ;;  %7297 = vperm.xlu0 %8310, %v125_v33   ;;  %v7010_v33 = vsub.f32 %v10834_v18, %v11304_v54  ;;  %v7017_v18 = vsub.f32 %v10871_v9, %v11308_v45  ;;  %v7022_v9 = vsub.f32 %v10900_v15, %v11316_v35 }
 0x981   :  { %v7083_v46 = vmul.f32 %v8395_v11, %v109_v17  ;;  %v7009_v17 = vsub.f32 %v10824_v57, %v11300_v10  ;;  %v7011_v11 = vsub.f32 %v10845_v32, %v11304_v54  ;;  %v7016_v57 = vsub.f32 %v10859_v44, %v11308_v45 }
 0x982   :  { %v7018_v32 = vsub.f32 %v10878_v28, %v11312_v26  ;;  %v7021_v44 = vsub.f32 %v10893_v31, %v11312_v26  ;;  %v7023_v45 = vsub.f32 %v10911_v34, %v11316_v35 }
 0x983   :  { %7153 = vperm.xlu1 %8311, %v7083_v46   ;;  %v7012_v46 = vsub.f32 %v10836_v13, %v11304_v54  ;;  %v7019_v13 = vsub.f32 %v10889_v63, %v11312_v26  ;;  %v7037_v63 = vsub.f32 %v10981_v5, %v11376_v19  ;;  %v7038_v26 = vsub.f32 %v10988_v25, %v11386_v16  ;;  %v11973_v5 = vld [vmem:[#allocation25_spill] sm:$0xff] }
 0x984   :  { %v8397_v6 = vpop.eup %8396  ;;  %7302 = vperm.xlu0 %8310, %v126_v21  }
 0x985   :  { %v7084_v24 = vmul.f32 %v8397_v6, %v110_v42 }
 0x987   :  { %7158 = vperm.xlu1 %8311, %v7084_v24  }
 0x988   :  { %v8399_v27 = vpop.eup %8398  ;;  %7307 = vperm.xlu0 %8310, %v127_v30  }
 0x989   :  { %v7085_v23 = vmul.f32 %v8399_v27, %v111_v20 }
 0x98b   :  { %7163 = vperm.xlu1 %8311, %v7085_v23  }
 0x9c7   :  { %v7089_v42 = vpop.permute.xlu0 %7088 }
 0x9c8   :  { %v7166_v10 = vmul.f32 %v7089_v42, %v7006_v43  ;;  %v7167_v54 = vmul.f32 %v7089_v42, %v7007_v22  ;;  %v7168_v61 = vmul.f32 %v7089_v42, %v7008_v49  ;;  %v7169_v21 = vmul.f32 %v7089_v42, %v7009_v17 }
 0x9ca   :  { %v7310_v6 = vadd.f32 %v7233_v51, %v7166_v10  ;;  %v7312_v24 = vadd.f32 %v7233_v51, %v7168_v61  ;;  %v7313_v20 = vadd.f32 %v7233_v51, %v7169_v21  ;;  %v7311_v30 = vadd.f32 %v7233_v51, %v7167_v54 }
 0x9cb   :  { %v7238_v27 = vpop.permute.xlu0 %7237 }
 0x9cc   :  { %v7374_v22 = vmax.f32 %v7310_v6, 0.0  ;;  %v7376_v49 = vmax.f32 %v7312_v24, 0.0  ;;  %v7375_v42 = vmax.f32 %v7311_v30, 0.0  ;;  %v7377_v10 = vmax.f32 %v7313_v20, 0.0 }
 0x9cd   :  { %v7094_v17 = vpop.permute.xlu1 %7093 }
 0x9ce   :  { %v7170_v61 = vmul.f32 %v7094_v17, %v7010_v33  ;;  %v7171_v51 = vmul.f32 %v7094_v17, %v7011_v11  ;;  %v7172_v54 = vmul.f32 %v7094_v17, %v7012_v46  ;;  %v7173_v21 = vmul.f32 %v7094_v17, %v7013_v14  ;;  %7599 = vmatprep.mubr.f32.mxu1 %v7375_v42 }
 0x9cf   :  { %8152 = vmatprep.mubr.msk.f32.mxu0 %vm6655_vm4, %v7377_v10  ;;  %7600 = vmatmul.mubr.f32.vlgmr.msra.gmra.mxu1 %v7374_v22  ;;  %v7243_v33 = vpop.permute.xlu0 %7242  ;;  %v7031_v14 = vsub.f32 %v10955_v60, %v11359_v50  ;;  %v7034_v17 = vsub.f32 %v10966_v53, %v11376_v19 }
 0x9d0   :  { %v7314_v24 = vadd.f32 %v7238_v27, %v7170_v61  ;;  %v7316_v43 = vadd.f32 %v7238_v27, %v7172_v54  ;;  %v7317_v30 = vadd.f32 %v7238_v27, %v7173_v21  ;;  %7745 = vmatmul.mubr.f32.vlgmr.msra.gmra.mxu0 %v7376_v49  ;;  %v7315_v46 = vadd.f32 %v7238_v27, %v7171_v51 }
 0x9d1   :  { %v7099_v11 = vpop.permute.xlu1 %7098 }
 0x9d2   :  { %v7174_v42 = vmul.f32 %v7099_v11, %v7014_v41  ;;  %v7175_v10 = vmul.f32 %v7099_v11, %v7015_v29  ;;  %v7176_v6 = vmul.f32 %v7099_v11, %v7016_v57  ;;  %v7177_v61 = vmul.f32 %v7099_v11, %v7017_v18 }
 0x9d3   :  { %v7379_v54 = vmax.f32 %v7315_v46, 0.0  ;;  %v7381_v21 = vmax.f32 %v7317_v30, 0.0  ;;  %v7378_v22 = vmax.f32 %v7314_v24, 0.0  ;;  %v7380_v49 = vmax.f32 %v7316_v43, 0.0  ;;  %v7248_v51 = vpop.permute.xlu0 %7247 }
 0x9d4   :  { %v7318_v31 = vadd.f32 %v7243_v33, %v7174_v42  ;;  %v7320_v47 = vadd.f32 %v7243_v33, %v7176_v6  ;;  %v7321_v27 = vadd.f32 %v7243_v33, %v7177_v61  ;;  %v7319_v23 = vadd.f32 %v7243_v33, %v7175_v10 }
 0x9d5   :  { %7604 = vmatprep.mubr.f32.mxu1 %v7379_v54  ;;  %8153 = vmatprep.mubr.msk.f32.mxu0 %vm6655_vm4, %v7381_v21  ;;  %v7104_v20 = vpop.permute.xlu1 %7103  ;;  %v7035_v41 = vsub.f32 %v10977_v36, %v11376_v19  ;;  %v7036_v29 = vsub.f32 %v10970_v56, %v11376_v19  ;;  %v11974_v19 = vld [vmem:[#allocation16_spill] sm:$0xff] }
 0x9d6   :  { %v7178_v57 = vmul.f32 %v7104_v20, %v7018_v32  ;;  %v7179_v18 = vmul.f32 %v7104_v20, %v7019_v13  ;;  %v7180_v43 = vmul.f32 %v7104_v20, %v7020_v7  ;;  %v7181_v6 = vmul.f32 %v7104_v20, %v7021_v44  ;;  %7605 = vmatmul.mubr.f32.gmra.mxu1 %v7378_v22 }
 0x9d7   :  { %7750 = vmatmul.mubr.f32.gmra.mxu0 %v7380_v49  ;;  %v7383_v24 = vmax.f32 %v7319_v23, 0.0  ;;  %v7385_v30 = vmax.f32 %v7321_v27, 0.0  ;;  %v7382_v33 = vmax.f32 %v7318_v31, 0.0  ;;  %v7384_v11 = vmax.f32 %v7320_v47, 0.0  ;;  %v7253_v61 = vpop.permute.xlu0 %7252 }
 0x9d8   :  { %v7322_v46 = vadd.f32 %v7248_v51, %v7178_v57  ;;  %v7324_v42 = vadd.f32 %v7248_v51, %v7180_v43  ;;  %v7325_v10 = vadd.f32 %v7248_v51, %v7181_v6  ;;  %v7323_v54 = vadd.f32 %v7248_v51, %v7179_v18 }
 0x9d9   :  { %7609 = vmatprep.mubr.f32.mxu1 %v7383_v24  ;;  %8154 = vmatprep.mubr.msk.f32.mxu0 %vm6655_vm4, %v7385_v30  ;;  %v7109_v28 = vpop.permute.xlu1 %7108  ;;  %v7039_v32 = vsub.f32 %v10999_v39, %v11386_v16  ;;  %v11956_v44 = vsub.f32 %v10904_v40, %v11316_v35  ;;  %v11957_v47 = vsub.f32 %v10915_v58, %v11316_v35 }
 0x9da   :  { %v7182_v13 = vmul.f32 %v7109_v28, %v7022_v9  ;;  %v7183_v7 = vmul.f32 %v7109_v28, %v7023_v45  ;;  %7610 = vmatmul.mubr.f32.gmra.mxu1 %v7382_v33  ;;  %v7387_v20 = vmax.f32 %v7323_v54, 0.0  ;;  %v7389_v21 = vmax.f32 %v7325_v10, 0.0 }
 0x9db   :  { %v7184_v23 = vmul.f32 %v7109_v28, %v11956_v44  ;;  %v7185_v31 = vmul.f32 %v7109_v28, %v11957_v47  ;;  %7755 = vmatmul.mubr.f32.gmra.mxu0 %v7384_v11  ;;  %v7386_v22 = vmax.f32 %v7322_v46, 0.0  ;;  %v7388_v49 = vmax.f32 %v7324_v42, 0.0  ;;  %v7258_v51 = vpop.permute.xlu0 %7257 }
 0x9dc   :  { %v7326_v15 = vadd.f32 %v7253_v61, %v7182_v13  ;;  %v7327_v34 = vadd.f32 %v7253_v61, %v7183_v7  ;;  %7614 = vmatprep.mubr.f32.mxu1 %v7387_v20  ;;  %8155 = vmatprep.mubr.msk.f32.mxu0 %vm6655_vm4, %v7389_v21  ;;  %v7040_v45 = vsub.f32 %v10992_v4, %v11386_v16  ;;  %v11962_v7 = vld [vmem:[#allocation14_spill] sm:$0xff] }
 0x9dd   :  { %v7328_v9 = vadd.f32 %v7253_v61, %v7184_v23  ;;  %v7329_v27 = vadd.f32 %v7253_v61, %v7185_v31  ;;  %v7041_v58 = vsub.f32 %v11003_v3, %v11386_v16  ;;  %v7042_v35 = vsub.f32 %v11010_v0, %v11396_v62  ;;  %v11964_v23 = vld [vmem:[#allocation3_spill] sm:$0xff]  ;;  %v11977_v3 = vld [vmem:[#allocation22_spill] sm:$0xff] }
 0x9de   :  { %v7114_v40 = vpop.permute.xlu1 %7113  ;;  %v11958_v57 = vsub.f32 %v10922_v37, %v11332_v8  ;;  %v11959_v43 = vsub.f32 %v10933_v38, %v11332_v8  ;;  %v11960_v24 = vsub.f32 %v10926_v59, %v11332_v8  ;;  %v11961_v33 = vsub.f32 %v10937_v48, %v11332_v8  ;;  %7615 = vmatmul.mubr.f32.gmra.mxu1 %v7386_v22  ;;  %v11963_v48 = vld [vmem:[#allocation10_spill] sm:$0xff] }
 0x9df   :  { %7760 = vmatmul.mubr.f32.gmra.mxu0 %v7388_v49  ;;  %v7391_v46 = vmax.f32 %v7327_v34, 0.0  ;;  %v7393_v42 = vmax.f32 %v7329_v27, 0.0  ;;  %v7390_v10 = vmax.f32 %v7326_v15, 0.0  ;;  %v7392_v61 = vmax.f32 %v7328_v9, 0.0  ;;  %v7263_v13 = vpop.permute.xlu0 %7262 }
 0x9e0   :  { %v7186_v18 = vmul.f32 %v7114_v40, %v11958_v57  ;;  %v7187_v6 = vmul.f32 %v7114_v40, %v11959_v43  ;;  %v7188_v30 = vmul.f32 %v7114_v40, %v11960_v24  ;;  %v7189_v11 = vmul.f32 %v7114_v40, %v11961_v33 }
 0x9e1   :  { %7619 = vmatprep.mubr.f32.mxu1 %v7391_v46  ;;  %8156 = vmatprep.mubr.msk.f32.mxu0 %vm6655_vm4, %v7393_v42  ;;  %v7043_v44 = vsub.f32 %v11962_v7, %v11396_v62  ;;  %v7044_v8 = vsub.f32 %v11963_v48, %v11396_v62  ;;  %v7045_v47 = vsub.f32 %v11964_v23, %v11396_v62  ;;  %v11980_v48 = vld [vmem:[#allocation9_spill] sm:$0xff]  ;;  %v11981_v62 = vld [vmem:[#allocation4_spill] sm:$0xff] }
 0x9e2   :  { %v7330_v37 = vadd.f32 %v7258_v51, %v7186_v18  ;;  %v7332_v54 = vadd.f32 %v7258_v51, %v7188_v30  ;;  %v7333_v28 = vadd.f32 %v7258_v51, %v7189_v11  ;;  %v7331_v38 = vadd.f32 %v7258_v51, %v7187_v6  ;;  %v7119_v59 = vpop.permute.xlu1 %7118  ;;  %7620 = vmatmul.mubr.f32.gmra.mxu1 %v7390_v10  ;;  %v11969_v6 = vld [vmem:[#allocation15_spill] sm:$0xff]  ;;  %v11971_v30 = vld [vmem:[#allocation17_spill] sm:$0xff] }
 0x9e3   :  { %v11965_v31 = vsub.f32 %v10944_v52, %v11359_v50  ;;  %v7191_v21 = vmul.f32 %v7119_v59, %v7031_v14  ;;  %v11966_v22 = vsub.f32 %v10948_v12, %v11359_v50  ;;  %v11967_v15 = vsub.f32 %v10959_v1, %v11359_v50  ;;  %7765 = vmatmul.mubr.f32.gmra.mxu0 %v7392_v61  ;;  %v7268_v43 = vpop.permute.xlu0 %7267  ;;  %v11968_v14 = vld [vmem:[#allocation26_spill] sm:$0xff] }
 0x9e4   :  { %v7395_v27 = vmax.f32 %v7331_v38, 0.0  ;;  %v7397_v51 = vmax.f32 %v7333_v28, 0.0  ;;  %v7394_v34 = vmax.f32 %v7330_v37, 0.0  ;;  %v7396_v40 = vmax.f32 %v7332_v54, 0.0  ;;  %v11970_v1 = vld [vmem:[#allocation2_spill] sm:$0xff] }
 0x9e5   :  { %v7190_v20 = vmul.f32 %v7119_v59, %v11965_v31  ;;  %v7192_v49 = vmul.f32 %v7119_v59, %v11966_v22  ;;  %v7193_v9 = vmul.f32 %v7119_v59, %v11967_v15  ;;  %v7335_v60 = vadd.f32 %v7263_v13, %v7191_v21  ;;  %v11975_v59 = vld [vmem:[#allocation5_spill] sm:$0xff] }
 0x9e6   :  { %7624 = vmatprep.mubr.f32.mxu1 %v7395_v27  ;;  %8157 = vmatprep.mubr.msk.f32.mxu0 %vm6655_vm4, %v7397_v51  ;;  %v7124_v12 = vpop.permute.xlu1 %7123  ;;  %v7046_v24 = vsub.f32 %v11969_v6, %v11968_v14  ;;  %v7047_v50 = vsub.f32 %v11970_v1, %v11968_v14  ;;  %v7048_v33 = vsub.f32 %v11971_v30, %v11968_v14  ;;  %v11985_v30 = vld [vmem:[#allocation32_spill] sm:$0xff] }
 0x9e7   :  { %v7334_v52 = vadd.f32 %v7263_v13, %v7190_v20  ;;  %v7336_v57 = vadd.f32 %v7263_v13, %v7192_v49  ;;  %v7337_v18 = vadd.f32 %v7263_v13, %v7193_v9  ;;  %v7194_v11 = vmul.f32 %v7124_v12, %v7034_v17  ;;  %7625 = vmatmul.mubr.f32.gmra.mxu1 %v7394_v34  ;;  %v7273_v38 = vpop.permute.xlu0 %7272 }
 0x9e8   :  { %v7195_v46 = vmul.f32 %v7124_v12, %v7035_v41  ;;  %v7196_v42 = vmul.f32 %v7124_v12, %v7036_v29  ;;  %v7197_v10 = vmul.f32 %v7124_v12, %v7037_v63  ;;  %7770 = vmatmul.mubr.f32.gmra.mxu0 %v7396_v40  ;;  %v7399_v61 = vmax.f32 %v7335_v60, 0.0  ;;  %v11972_v41 = vld [vmem:[#allocation6_spill] sm:$0xff] }
 0x9e9   :  { %v7401_v37 = vmax.f32 %v7337_v18, 0.0  ;;  %v7398_v54 = vmax.f32 %v7334_v52, 0.0  ;;  %v7400_v28 = vmax.f32 %v7336_v57, 0.0  ;;  %v7338_v53 = vadd.f32 %v7268_v43, %v7194_v11  ;;  %v11979_v52 = vld [vmem:[#allocation24_spill] sm:$0xff] }
 0x9ea   :  { %v7340_v17 = vadd.f32 %v7268_v43, %v7196_v42  ;;  %v7341_v13 = vadd.f32 %v7268_v43, %v7197_v10  ;;  %v7339_v36 = vadd.f32 %v7268_v43, %v7195_v46  ;;  %7629 = vmatprep.mubr.f32.mxu1 %v7399_v61  ;;  %v7129_v56 = vpop.permute.xlu1 %7128  ;;  %v7049_v29 = vsub.f32 %v11972_v41, %v11968_v14 }
 0x9eb   :  { %8158 = vmatprep.mubr.msk.f32.mxu0 %vm6655_vm4, %v7401_v37  ;;  %v7050_v63 = vsub.f32 %v11974_v19, %v11973_v5  ;;  %v7051_v31 = vsub.f32 %v11975_v59, %v11973_v5  ;;  %v7198_v20 = vmul.f32 %v7129_v56, %v7038_v26  ;;  %v7199_v21 = vmul.f32 %v7129_v56, %v7039_v32  ;;  %v7278_v40 = vpop.permute.xlu0 %7277  ;;  %v11976_v32 = vld [vmem:[#allocation21_spill] sm:$0xff] }
 0x9ec   :  { %v7200_v22 = vmul.f32 %v7129_v56, %v7040_v45  ;;  %v7201_v49 = vmul.f32 %v7129_v56, %v7041_v58  ;;  %7630 = vmatmul.mubr.f32.gmra.mxu1 %v7398_v54  ;;  %7775 = vmatmul.mubr.f32.gmra.mxu0 %v7400_v28  ;;  %v7403_v15 = vmax.f32 %v7339_v36, 0.0  ;;  %v7405_v9 = vmax.f32 %v7341_v13, 0.0  ;;  %v11978_v58 = vld [vmem:[#allocation31_spill] sm:$0xff]  ;;  %v11988_v59 = vld [vmem:[#allocation13_spill] sm:$0xff] }
 0x9ed   :  { %v7402_v27 = vmax.f32 %v7338_v53, 0.0  ;;  %v7404_v51 = vmax.f32 %v7340_v17, 0.0  ;;  %v7342_v25 = vadd.f32 %v7273_v38, %v7198_v20  ;;  %v7343_v39 = vadd.f32 %v7273_v38, %v7199_v21 }
 0x9ee   :  { %v7344_v26 = vadd.f32 %v7273_v38, %v7200_v22  ;;  %v7345_v34 = vadd.f32 %v7273_v38, %v7201_v49  ;;  %7634 = vmatprep.mubr.f32.mxu1 %v7403_v15  ;;  %8159 = vmatprep.mubr.msk.f32.mxu0 %vm6655_vm4, %v7405_v9  ;;  %v7134_v4 = vpop.permute.xlu1 %7133  ;;  %v7052_v45 = vsub.f32 %v11976_v32, %v11973_v5  ;;  %v11984_v49 = vld [vmem:[#allocation8_spill] sm:$0xff] }
 0x9ef   :  { %v7053_v16 = vsub.f32 %v11977_v3, %v11973_v5  ;;  %v7054_v57 = vsub.f32 %v11979_v52, %v11978_v58  ;;  %v7202_v18 = vmul.f32 %v7134_v4, %v7042_v35  ;;  %v7203_v43 = vmul.f32 %v7134_v4, %v7043_v44  ;;  %v7283_v37 = vpop.permute.xlu0 %7282  ;;  %v11987_v5 = vld [vmem:[#allocation7_spill] sm:$0xff] }
 0x9f0   :  { %v7204_v60 = vmul.f32 %v7134_v4, %v7044_v8  ;;  %v7205_v12 = vmul.f32 %v7134_v4, %v7045_v47  ;;  %7635 = vmatmul.mubr.f32.gmra.mxu1 %v7402_v27  ;;  %7780 = vmatmul.mubr.f32.gmra.mxu0 %v7404_v51  ;;  %v7407_v11 = vmax.f32 %v7343_v39, 0.0  ;;  %v7409_v46 = vmax.f32 %v7345_v34, 0.0  ;;  %v11982_v47 = vld [vmem:[#allocation23_spill] sm:$0xff] }
 0x9f1   :  { %v7406_v42 = vmax.f32 %v7342_v25, 0.0  ;;  %v7408_v10 = vmax.f32 %v7344_v26, 0.0  ;;  %v7346_v0 = vadd.f32 %v7278_v40, %v7202_v18  ;;  %v7347_v7 = vadd.f32 %v7278_v40, %v7203_v43 }
 0x9f2   :  { %v7348_v35 = vadd.f32 %v7278_v40, %v7204_v60  ;;  %v7349_v61 = vadd.f32 %v7278_v40, %v7205_v12  ;;  %7639 = vmatprep.mubr.f32.mxu1 %v7407_v11  ;;  %8160 = vmatprep.mubr.msk.f32.mxu0 %vm6655_vm4, %v7409_v46  ;;  %v7139_v44 = vpop.permute.xlu1 %7138  ;;  %v7055_v8 = vsub.f32 %v11980_v48, %v11978_v58 }
 0x9f3   :  { %v7056_v23 = vsub.f32 %v11981_v62, %v11978_v58  ;;  %v7057_v54 = vsub.f32 %v11982_v47, %v11978_v58  ;;  %v7206_v28 = vmul.f32 %v7139_v44, %v7046_v24  ;;  %v7207_v53 = vmul.f32 %v7139_v44, %v7047_v50  ;;  %v7288_v6 = vpop.permute.xlu0 %7287  ;;  %v11983_v50 = vld [vmem:[#allocation28_spill] sm:$0xff]  ;;  %v11990_v58 = vld [vmem:[#allocation30_spill] sm:$0xff] }
 0x9f4   :  { %v7208_v17 = vmul.f32 %v7139_v44, %v7048_v33  ;;  %v7209_v13 = vmul.f32 %v7139_v44, %v7049_v29  ;;  %7640 = vmatmul.mubr.f32.gmra.mxu1 %v7406_v42  ;;  %7785 = vmatmul.mubr.f32.gmra.mxu0 %v7408_v10  ;;  %v7411_v38 = vmax.f32 %v7347_v7, 0.0  ;;  %v7413_v36 = vmax.f32 %v7349_v61, 0.0  ;;  %v11986_v29 = vld [vmem:[#allocation29_spill] sm:$0xff] }
 0x9f5   :  { %v7410_v56 = vmax.f32 %v7346_v0, 0.0  ;;  %v7412_v41 = vmax.f32 %v7348_v35, 0.0  ;;  %v7350_v20 = vadd.f32 %v7283_v37, %v7206_v28  ;;  %v7351_v24 = vadd.f32 %v7283_v37, %v7207_v53 }
 0x9f6   :  { %v7352_v21 = vadd.f32 %v7283_v37, %v7208_v17  ;;  %v7353_v22 = vadd.f32 %v7283_v37, %v7209_v13  ;;  %7644 = vmatprep.mubr.f32.mxu1 %v7411_v38  ;;  %8161 = vmatprep.mubr.msk.f32.mxu0 %vm6655_vm4, %v7413_v36  ;;  %v7144_v1 = vpop.permute.xlu1 %7143  ;;  %v7058_v14 = vsub.f32 %v11984_v49, %v11983_v50 }
 0x9f7   :  { %v7059_v33 = vsub.f32 %v11985_v30, %v11983_v50  ;;  %v7060_v15 = vsub.f32 %v11986_v29, %v11983_v50  ;;  %v7210_v9 = vmul.f32 %v7144_v1, %v7050_v63  ;;  %v7211_v27 = vmul.f32 %v7144_v1, %v7051_v31  ;;  %v7293_v18 = vpop.permute.xlu0 %7292 }
 0x9f8   :  { %v7212_v51 = vmul.f32 %v7144_v1, %v7052_v45  ;;  %v7213_v25 = vmul.f32 %v7144_v1, %v7053_v16  ;;  %7645 = vmatmul.mubr.f32.gmra.mxu1 %v7410_v56  ;;  %7790 = vmatmul.mubr.f32.gmra.mxu0 %v7412_v41  ;;  %v7415_v26 = vmax.f32 %v7351_v24, 0.0  ;;  %v7417_v34 = vmax.f32 %v7353_v22, 0.0  ;;  %v11989_v45 = vld [vmem:[#allocation12_spill] sm:$0xff]  ;;  %v11993_v24 = vld [vmem:[#allocation18_spill] sm:$0xff] }
 0x9f9   :  { %v7414_v40 = vmax.f32 %v7350_v20, 0.0  ;;  %v7416_v39 = vmax.f32 %v7352_v21, 0.0  ;;  %v7354_v4 = vadd.f32 %v7288_v6, %v7210_v9  ;;  %v7355_v43 = vadd.f32 %v7288_v6, %v7211_v27 }
 0x9fa   :  { %v7356_v32 = vadd.f32 %v7288_v6, %v7212_v51  ;;  %v7357_v3 = vadd.f32 %v7288_v6, %v7213_v25  ;;  %7649 = vmatprep.mubr.f32.mxu1 %v7415_v26  ;;  %8162 = vmatprep.mubr.msk.f32.mxu0 %vm6655_vm4, %v7417_v34  ;;  %v7149_v19 = vpop.permute.xlu1 %7148  ;;  %v7061_v63 = vsub.f32 %v11987_v5, %v11983_v50  ;;  %v11994_v50 = vld [vmem:[#allocation19_spill] sm:$0xff] }
 0x9fb   :  { %v7062_v31 = vsub.f32 %v11988_v59, %v11446_v2  ;;  %v7063_v16 = vsub.f32 %v11989_v45, %v11446_v2  ;;  %v7214_v60 = vmul.f32 %v7149_v19, %v7054_v57  ;;  %v7215_v12 = vmul.f32 %v7149_v19, %v7055_v8  ;;  %v7298_v44 = vpop.permute.xlu0 %7297  ;;  %v11991_v57 = vld [vmem:[#allocation11_spill] sm:$0xff] }
 0x9fc   :  { %v7216_v11 = vmul.f32 %v7149_v19, %v7056_v23  ;;  %v7217_v46 = vmul.f32 %v7149_v19, %v7057_v54  ;;  %7650 = vmatmul.mubr.f32.gmra.mxu1 %v7414_v40  ;;  %7795 = vmatmul.mubr.f32.gmra.mxu0 %v7416_v39  ;;  %v7419_v42 = vmax.f32 %v7355_v43, 0.0  ;;  %v7421_v10 = vmax.f32 %v7357_v3, 0.0  ;;  %v11992_v23 = vld [vmem:[#allocation20_spill] sm:$0xff] }
 0x9fd   :  { %v7418_v0 = vmax.f32 %v7354_v4, 0.0  ;;  %v7420_v35 = vmax.f32 %v7356_v32, 0.0  ;;  %v7358_v61 = vadd.f32 %v7293_v18, %v7214_v60  ;;  %v7359_v48 = vadd.f32 %v7293_v18, %v7215_v12 }
 0x9fe   :  { %v7360_v37 = vadd.f32 %v7293_v18, %v7216_v11  ;;  %v7361_v7 = vadd.f32 %v7293_v18, %v7217_v46  ;;  %7654 = vmatprep.mubr.f32.mxu1 %v7419_v42  ;;  %8163 = vmatprep.mubr.msk.f32.mxu0 %vm6655_vm4, %v7421_v10  ;;  %v7154_v62 = vpop.permute.xlu1 %7153  ;;  %v7064_v52 = vsub.f32 %v11990_v58, %v11446_v2 }
 0x9ff   :  { %v7065_v8 = vsub.f32 %v11991_v57, %v11446_v2  ;;  %v7066_v47 = vsub.f32 %v11992_v23, %v11456_v55  ;;  %v7218_v54 = vmul.f32 %v7154_v62, %v7058_v14  ;;  %v7219_v28 = vmul.f32 %v7154_v62, %v7059_v33  ;;  %v7303_v6 = vpop.permute.xlu0 %7302  ;;  %v11995_v14 = vld [vmem:[#allocation27_spill] sm:$0xff] }
 0xa00   :  { %v7220_v53 = vmul.f32 %v7154_v62, %v7060_v15  ;;  %v7221_v17 = vmul.f32 %v7154_v62, %v7061_v63  ;;  %7655 = vmatmul.mubr.f32.gmra.mxu1 %v7418_v0  ;;  %7800 = vmatmul.mubr.f32.gmra.mxu0 %v7420_v35  ;;  %v7423_v13 = vmax.f32 %v7359_v48, 0.0  ;;  %v7425_v38 = vmax.f32 %v7361_v7, 0.0 }
 0xa01   :  { %v7422_v36 = vmax.f32 %v7358_v61, 0.0  ;;  %v7424_v56 = vmax.f32 %v7360_v37, 0.0  ;;  %v7362_v41 = vadd.f32 %v7298_v44, %v7218_v54  ;;  %v7363_v22 = vadd.f32 %v7298_v44, %v7219_v28 }
 0xa02   :  { %v7364_v20 = vadd.f32 %v7298_v44, %v7220_v53  ;;  %v7365_v21 = vadd.f32 %v7298_v44, %v7221_v17  ;;  %7659 = vmatprep.mubr.f32.mxu1 %v7423_v13  ;;  %8164 = vmatprep.mubr.msk.f32.mxu0 %vm6655_vm4, %v7425_v38  ;;  %v7159_v2 = vpop.permute.xlu1 %7158  ;;  %v7067_v1 = vsub.f32 %v11993_v24, %v11456_v55 }
 0xa03   :  { %v7068_v49 = vsub.f32 %v11994_v50, %v11456_v55  ;;  %v7069_v30 = vsub.f32 %v11995_v14, %v11456_v55  ;;  %v7222_v33 = vmul.f32 %v7159_v2, %v7062_v31  ;;  %v7223_v29 = vmul.f32 %v7159_v2, %v7063_v16  ;;  %v7308_v19 = vpop.permute.xlu0 %7307 }
 0xa04   :  { %v7224_v15 = vmul.f32 %v7159_v2, %v7064_v52  ;;  %v7225_v9 = vmul.f32 %v7159_v2, %v7065_v8  ;;  %7660 = vmatmul.mubr.f32.gmra.mxu1 %v7422_v36  ;;  %7805 = vmatmul.mubr.f32.gmra.mxu0 %v7424_v56  ;;  %v7427_v27 = vmax.f32 %v7363_v22, 0.0  ;;  %v7429_v51 = vmax.f32 %v7365_v21, 0.0 }
 0xa05   :  { %v7426_v25 = vmax.f32 %v7362_v41, 0.0  ;;  %v7428_v26 = vmax.f32 %v7364_v20, 0.0  ;;  %v7366_v34 = vadd.f32 %v7303_v6, %v7222_v33  ;;  %v7367_v4 = vadd.f32 %v7303_v6, %v7223_v29 }
 0xa06   :  { %v7368_v40 = vadd.f32 %v7303_v6, %v7224_v15  ;;  %v7369_v39 = vadd.f32 %v7303_v6, %v7225_v9  ;;  %7664 = vmatprep.mubr.f32.mxu1 %v7427_v27  ;;  %8165 = vmatprep.mubr.msk.f32.mxu0 %vm6655_vm4, %v7429_v51  ;;  %v7164_v32 = vpop.permute.xlu1 %7163 }
 0xa07   :  { %v7226_v3 = vmul.f32 %v7164_v32, %v7066_v47  ;;  %v7227_v55 = vmul.f32 %v7164_v32, %v7067_v1  ;;  %v7228_v18 = vmul.f32 %v7164_v32, %v7068_v49  ;;  %v7229_v43 = vmul.f32 %v7164_v32, %v7069_v30 }
 0xa08   :  { %7665 = vmatmul.mubr.f32.gmra.mxu1 %v7426_v25  ;;  %7810 = vmatmul.mubr.f32.gmra.mxu0 %v7428_v26  ;;  %v7431_v5 = vmax.f32 %v7367_v4, 0.0  ;;  %v7433_v63 = vmax.f32 %v7369_v39, 0.0  ;;  %v7430_v59 = vmax.f32 %v7366_v34, 0.0  ;;  %v7432_v31 = vmax.f32 %v7368_v40, 0.0 }
 0xa09   :  { %v7370_v45 = vadd.f32 %v7308_v19, %v7226_v3  ;;  %v7372_v16 = vadd.f32 %v7308_v19, %v7228_v18  ;;  %v7373_v60 = vadd.f32 %v7308_v19, %v7229_v43  ;;  %v7371_v12 = vadd.f32 %v7308_v19, %v7227_v55 }
 0xa0a   :  { %7669 = vmatprep.mubr.f32.mxu1 %v7431_v5  ;;  %8166 = vmatprep.mubr.msk.f32.mxu0 %vm6655_vm4, %v7433_v63 }
 0xa0b   :  { %v7434_v11 = vmax.f32 %v7370_v45, 0.0  ;;  %v7437_v46 = vmax.f32 %v7373_v60, 0.0  ;;  %v7435_v42 = vmax.f32 %v7371_v12, 0.0  ;;  %v7436_v10 = vmax.f32 %v7372_v16, 0.0 }
 0xa0c   :  { %7670 = vmatmul.mubr.f32.gmra.mxu1 %v7430_v59  ;;  %7815 = vmatmul.mubr.f32.gmra.mxu0 %v7432_v31 }
 0xa0d   :  { %7674 = vmatprep.mubr.f32.mxu1 %v7435_v42  ;;  %8167 = vmatprep.mubr.msk.f32.mxu0 %vm6655_vm4, %v7437_v46 }
 0xa10   :  { %7675 = vmatmul.mubr.f32.gmra.mxu1 %v7434_v11  ;;  %7820 = vmatmul.mubr.f32.gmra.mxu0 %v7436_v10 }
 0xa8f   :  { %v8222_v0 = vpop.f32.mrf.mxu1 }
 0xa90   :  { %v7746_v35 = vpop.f32.mrf.mxu0 }
 0xa91   :  { %v8223_v61 = vpop.f32.mrf.mxu1 }
 0xa92   :  { %v7748_v37 = vpop.f32.mrf.mxu0  ;;  %v8224_v7 = vadd.f32 %v8223_v61, %v8222_v0 }
 0xa94   :  { %v7747_v44 = vadd.f32 %v8224_v7, %v7746_v35 }
 0xa96   :  { %v8225_v48 = vpop.f32.mrf.mxu1  ;;  %7826 = vst.msk [vmem:[%s11810_s13] sm:$0xff] %vm7825_vm5, %v7747_v44 }
 0xa97   :  { %v7751_v62 = vpop.f32.mrf.mxu0 }
 0xa98   :  { %v8226_v58 = vpop.f32.mrf.mxu1 }
 0xa99   :  { %v8227_v52 = vadd.f32 %v8226_v58, %v8225_v48  ;;  %v7753_v57 = vpop.f32.mrf.mxu0 }
 0xa9a   :  { %v8228_v8 = vpop.f32.mrf.mxu1 }
 0xa9b   :  { %v7752_v23 = vadd.f32 %v8227_v52, %v7751_v62  ;;  %v7756_v47 = vpop.f32.mrf.mxu0 }
 0xa9c   :  { %v8229_v54 = vpop.f32.mrf.mxu1 }
 0xa9d   :  { %7827 = vst.msk [vmem:[%s11810_s13 + $0x8] sm:$0xff] %vm7825_vm5, %v7752_v23  ;;  %v8230_v28 = vadd.f32 %v8229_v54, %v8228_v8  ;;  %v7758_v53 = vpop.f32.mrf.mxu0 }
 0xa9e   :  { %v8231_v17 = vpop.f32.mrf.mxu1 }
 0xa9f   :  { %v7757_v13 = vadd.f32 %v8230_v28, %v7756_v47  ;;  %v7761_v38 = vpop.f32.mrf.mxu0 }
 0xaa0   :  { %v8232_v36 = vpop.f32.mrf.mxu1 }
 0xaa1   :  { %7828 = vst.msk [vmem:[%s11810_s13 + $0x10] sm:$0xff] %vm7825_vm5, %v7757_v13  ;;  %v8233_v56 = vadd.f32 %v8232_v36, %v8231_v17  ;;  %v7763_v41 = vpop.f32.mrf.mxu0 }
 0xaa2   :  { %v8234_v20 = vpop.f32.mrf.mxu1 }
 0xaa3   :  { %v7762_v21 = vadd.f32 %v8233_v56, %v7761_v38  ;;  %v7766_v22 = vpop.f32.mrf.mxu0 }
 0xaa4   :  { %v8235_v6 = vpop.f32.mrf.mxu1 }
 0xaa5   :  { %7829 = vst.msk [vmem:[%s11810_s13 + $0x18] sm:$0xff] %vm7825_vm5, %v7762_v21  ;;  %v8236_v2 = vadd.f32 %v8235_v6, %v8234_v20  ;;  %v7768_v24 = vpop.f32.mrf.mxu0 }
 0xaa7   :  { %v8237_v1 = vpop.f32.mrf.mxu1  ;;  %v7767_v50 = vadd.f32 %v8236_v2, %v7766_v22 }
 0xaa8   :  { %v7771_v49 = vpop.f32.mrf.mxu0 }
 0xaa9   :  { %v8238_v14 = vpop.f32.mrf.mxu1  ;;  %7830 = vst.msk [vmem:[%s11810_s13 + $0x20] sm:$0xff] %vm7825_vm5, %v7767_v50 }
 0xaaa   :  { %v8239_v30 = vadd.f32 %v8238_v14, %v8237_v1  ;;  %v7773_v33 = vpop.f32.mrf.mxu0 }
 0xaac   :  { %v8240_v29 = vpop.f32.mrf.mxu1  ;;  %v7772_v15 = vadd.f32 %v8239_v30, %v7771_v49  ;;  %v7776_v9 = vpop.f32.mrf.mxu0 }
 0xaae   :  { %v8241_v27 = vpop.f32.mrf.mxu1  ;;  %7831 = vst.msk [vmem:[%s11810_s13 + $0x28] sm:$0xff] %vm7825_vm5, %v7772_v15  ;;  %v7778_v25 = vpop.f32.mrf.mxu0 }
 0xaaf   :  { %v8242_v51 = vadd.f32 %v8241_v27, %v8240_v29 }
 0xab0   :  { %v8243_v26 = vpop.f32.mrf.mxu1  ;;  %v7781_v40 = vpop.f32.mrf.mxu0 }
 0xab1   :  { %v7777_v34 = vadd.f32 %v8242_v51, %v7776_v9 }
 0xab2   :  { %v8244_v39 = vpop.f32.mrf.mxu1  ;;  %v7783_v32 = vpop.f32.mrf.mxu0 }
 0xab3   :  { %7832 = vst.msk [vmem:[%s11810_s13 + $0x30] sm:$0xff] %vm7825_vm5, %v7777_v34  ;;  %v8245_v4 = vadd.f32 %v8244_v39, %v8243_v26 }
 0xab4   :  { %v8246_v3 = vpop.f32.mrf.mxu1  ;;  %v7786_v18 = vpop.f32.mrf.mxu0 }
 0xab5   :  { %v7782_v55 = vadd.f32 %v8245_v4, %v7781_v40 }
 0xab6   :  { %v8247_v43 = vpop.f32.mrf.mxu1  ;;  %v7788_v5 = vpop.f32.mrf.mxu0 }
 0xab7   :  { %7833 = vst.msk [vmem:[%s11810_s13 + $0x38] sm:$0xff] %vm7825_vm5, %v7782_v55  ;;  %v8248_v19 = vadd.f32 %v8247_v43, %v8246_v3 }
 0xab8   :  { %v8249_v63 = vpop.f32.mrf.mxu1  ;;  %v7791_v31 = vpop.f32.mrf.mxu0 }
 0xab9   :  { %v7787_v59 = vadd.f32 %v8248_v19, %v7786_v18 }
 0xaba   :  { %v8250_v45 = vpop.f32.mrf.mxu1  ;;  %v7793_v60 = vpop.f32.mrf.mxu0 }
 0xabb   :  { %7834 = vst.msk [vmem:[%s11810_s13 + $0x40] sm:$0xff] %vm7825_vm5, %v7787_v59  ;;  %v8251_v16 = vadd.f32 %v8250_v45, %v8249_v63 }
 0xabc   :  { %v8252_v12 = vpop.f32.mrf.mxu1  ;;  %v7796_v46 = vpop.f32.mrf.mxu0 }
 0xabd   :  { %v7792_v11 = vadd.f32 %v8251_v16, %v7791_v31 }
 0xabe   :  { %v8253_v42 = vpop.f32.mrf.mxu1  ;;  %v7798_v0 = vpop.f32.mrf.mxu0 }
 0xabf   :  { %7835 = vst.msk [vmem:[%s11810_s13 + $0x48] sm:$0xff] %vm7825_vm5, %v7792_v11  ;;  %v8254_v10 = vadd.f32 %v8253_v42, %v8252_v12 }
 0xac0   :  { %v8255_v35 = vpop.f32.mrf.mxu1  ;;  %v7801_v37 = vpop.f32.mrf.mxu0 }
 0xac1   :  { %v7797_v61 = vadd.f32 %v8254_v10, %v7796_v46 }
 0xac2   :  { %v8256_v7 = vpop.f32.mrf.mxu1  ;;  %v7803_v48 = vpop.f32.mrf.mxu0 }
 0xac3   :  { %7836 = vst.msk [vmem:[%s11810_s13 + $0x50] sm:$0xff] %vm7825_vm5, %v7797_v61  ;;  %v8257_v44 = vadd.f32 %v8256_v7, %v8255_v35 }
 0xac4   :  { %v8258_v62 = vpop.f32.mrf.mxu1  ;;  %v7806_v52 = vpop.f32.mrf.mxu0 }
 0xac5   :  { %v7802_v58 = vadd.f32 %v8257_v44, %v7801_v37 }
 0xac6   :  { %v8259_v57 = vpop.f32.mrf.mxu1  ;;  %v7808_v23 = vpop.f32.mrf.mxu0 }
 0xac7   :  { %7837 = vst.msk [vmem:[%s11810_s13 + $0x58] sm:$0xff] %vm7825_vm5, %v7802_v58  ;;  %v8260_v8 = vadd.f32 %v8259_v57, %v8258_v62 }
 0xac8   :  { %v8261_v47 = vpop.f32.mrf.mxu1  ;;  %v7811_v28 = vpop.f32.mrf.mxu0 }
 0xac9   :  { %v7807_v54 = vadd.f32 %v8260_v8, %v7806_v52 }
 0xaca   :  { %v8262_v53 = vpop.f32.mrf.mxu1  ;;  %v7813_v13 = vpop.f32.mrf.mxu0 }
 0xacb   :  { %7838 = vst.msk [vmem:[%s11810_s13 + $0x60] sm:$0xff] %vm7825_vm5, %v7807_v54  ;;  %v8263_v17 = vadd.f32 %v8262_v53, %v8261_v47 }
 0xacc   :  { %v8264_v38 = vpop.f32.mrf.mxu1  ;;  %v7816_v56 = vpop.f32.mrf.mxu0 }
 0xacd   :  { %v7812_v36 = vadd.f32 %v8263_v17, %v7811_v28 }
 0xace   :  { %v8265_v41 = vpop.f32.mrf.mxu1  ;;  %v7818_v21 = vpop.f32.mrf.mxu0 }
 0xacf   :  { %7839 = vst.msk [vmem:[%s11810_s13 + $0x68] sm:$0xff] %vm7825_vm5, %v7812_v36  ;;  %v8266_v20 = vadd.f32 %v8265_v41, %v8264_v38 }
 0xad0   :  { %v8267_v22 = vpop.f32.mrf.mxu1  ;;  %v7821_v2 = vpop.f32.mrf.mxu0 }
 0xad1   :  { %v7817_v6 = vadd.f32 %v8266_v20, %v7816_v56 }
 0xad2   :  { %v8268_v24 = vpop.f32.mrf.mxu1  ;;  %v7823_v50 = vpop.f32.mrf.mxu0 }
 0xad3   :  { %7840 = vst.msk [vmem:[%s11810_s13 + $0x70] sm:$0xff] %vm7825_vm5, %v7817_v6  ;;  %v8269_v1 = vadd.f32 %v8268_v24, %v8267_v22 }
 0xad5   :  { %v7822_v49 = vadd.f32 %v8269_v1, %v7821_v2 }
 0xad7   :  { %7841 = vst.msk [vmem:[%s11810_s13 + $0x78] sm:$0xff] %vm7825_vm5, %v7822_v49 }

</bundles_post_ra>
